<compile_context>
chip_gen: v7x
topology: tpu7x:2x2x1
jax: 0.10.0
libtpu: 0.0.40
codegen_flags: <defaults>
</compile_context>

<pallas_src>
import numpy as np
import jax
import jax.numpy as jnp
from jax.experimental import pallas as pl
from jax.experimental.pallas import tpu as pltpu


# ----------------------------------------------------------------------------
# Kernel 1: latent-mean + synthesizer stand-in + tanh + PostSynthesisProcessing
#           + fully folded landmark / VGG tails (single pallas_call)
# ----------------------------------------------------------------------------

def _synth_tail_kernel(lat_ref, wsyn_ref, wcat_ref, bcat_ref, base_ref, tail_ref):
    # TODO(synk): StyleGAN synthesizer unavailable; mean(W+)-latent
    #             linear(512 -> 3*32*32) + tanh stand-in.
    z = jnp.mean(lat_ref[...], axis=1)                            # (N, 512)
    r = jnp.dot(z.astype(jnp.bfloat16), wsyn_ref[...],
                preferred_element_type=jnp.float32)               # (N, 3072)
    # PostSynthesisProcessing: (x + 1) * 127.5 then clamp(y + 0.5, 0, 255)
    base = jnp.clip(127.5 * jnp.tanh(r) + 128.0, 0.0, 255.0)      # (N, 3072) in [0, 255]
    base_ref[...] = base
    # TODO(synk): ImageToLandmarks_batch / vgg_face_dag unavailable; linear
    #             stand-ins, exactly pre-folded (in make_params) with
    #             crop + bilinear(->224), bilinear(->64), 224/64 scale,
    #             adaptive avg-pool(->8) and the VGG mean subtraction.
    tail_ref[...] = (jnp.dot(base.astype(jnp.bfloat16), wcat_ref[...],
                             preferred_element_type=jnp.float32)
                     + bcat_ref[...])                             # (N, 512)


def pallas_synth_tail(latents, w_syn, w_cat, b_cat):
    N, S, K = latents.shape
    M = w_syn.shape[1]
    P = w_cat.shape[1]
    return pl.pallas_call(
        _synth_tail_kernel,
        out_shape=(jax.ShapeDtypeStruct((N, M), jnp.float32),
                   jax.ShapeDtypeStruct((N, P), jnp.float32)),
        grid_spec=pltpu.PrefetchScalarGridSpec(
            num_scalar_prefetch=0,
            grid=(1,),
            in_specs=[pl.BlockSpec((N, S, K), lambda i: (0, 0, 0)),
                      pl.BlockSpec((K, M), lambda i: (0, 0)),
                      pl.BlockSpec((M, P), lambda i: (0, 0)),
                      pl.BlockSpec((1, P), lambda i: (0, 0))],
            out_specs=[pl.BlockSpec((N, M), lambda i: (0, 0)),
                       pl.BlockSpec((N, P), lambda i: (0, 0))],
        ),
        compiler_params=pltpu.CompilerParams(
            dimension_semantics=("arbitrary",),
            vmem_limit_bytes=32 * 1024 * 1024),
    )(latents, w_syn, w_cat, b_cat)


# ----------------------------------------------------------------------------
# Kernel 2: fused 32x nearest-neighbor upsample writer (32x32 base -> 1024x1024)
#   One full (1024, 1024) output slab per grid step (per channel).
# ----------------------------------------------------------------------------

def _upsample_kernel(x_ref, cup_ref, o_ref):
    # Column-wise 32x nearest upsample via a tiny MXU matmul: (32,32)@(32,1024).
    cols = jnp.dot(x_ref[...], cup_ref[...],
                   preferred_element_type=jnp.float32)            # (32, 1024)
    # Row-wise 32x nearest upsample: replicate each base row into 32 output
    # rows with sublane broadcasts + lane-dense stores (no large f32 matmul,
    # keeps the kernel HBM-write-bound even on v5e).
    for k in range(32):
        o_ref[k * 32:(k + 1) * 32, :] = jnp.broadcast_to(
            cols[k:k + 1, :], (32, 1024))


def pallas_upsample32(base3, cup):
    NC, HB, WB = base3.shape                 # (N*C, 32, 32)
    H, W = 1024, 1024
    return pl.pallas_call(
        _upsample_kernel,
        out_shape=jax.ShapeDtypeStruct((NC, H, W), jnp.float32),
        grid_spec=pltpu.PrefetchScalarGridSpec(
            num_scalar_prefetch=0,
            grid=(NC,),
            in_specs=[pl.BlockSpec((None, HB, WB), lambda i: (i, 0, 0)),
                      pl.BlockSpec((WB, W), lambda i: (0, 0))],
            out_specs=pl.BlockSpec((None, H, W), lambda i: (i, 0, 0)),
        ),
        compiler_params=pltpu.CompilerParams(
            dimension_semantics=("parallel",)),
    )(base3, cup)


# ----------------------------------------------------------------------------
# Resize / crop / pool weight matrices (PyTorch F.interpolate bilinear,
# align_corners=False; adaptive_avg_pool2d; nearest upsample)
# ----------------------------------------------------------------------------

def bilinear_matrix(in_size, out_size):
    scale = in_size / out_size
    i = np.arange(out_size)
    src = (i + 0.5) * scale - 0.5
    i0 = np.floor(src).astype(np.int64)
    frac = (src - i0).astype(np.float32)
    i0c = np.clip(i0, 0, in_size - 1)
    i1c = np.clip(i0 + 1, 0, in_size - 1)
    W = np.zeros((out_size, in_size), dtype=np.float32)
    W[np.arange(out_size), i0c] += (1.0 - frac)
    W[np.arange(out_size), i1c] += frac
    return W


def avgpool_matrix(in_size, out_size):
    assert in_size % out_size == 0
    k = in_size // out_size
    W = np.zeros((out_size, in_size), dtype=np.float32)
    for o in range(out_size):
        W[o, o * k:(o + 1) * k] = 1.0 / k
    return W


def nearest_upsample_matrix(out_size, in_size):
    assert out_size % in_size == 0
    W = np.zeros((out_size, in_size), dtype=np.float32)
    W[np.arange(out_size), np.arange(out_size) * in_size // out_size] = 1.0
    return W


# ----------------------------------------------------------------------------
# Parameters (deterministic, synthetic) + exact linear folds
# ----------------------------------------------------------------------------

def make_params():
    kp = jax.random.PRNGKey(42)
    k1, k2, k3 = jax.random.split(kp, 3)
    # TODO(synk): StyleGAN synthesizer unavailable; linear(512 -> 3*32*32)+tanh stand-in.
    W_syn = (jax.random.normal(k1, (512, 3 * 32 * 32), jnp.float32) * 0.05
             ).astype(jnp.bfloat16)
    # TODO(synk): ImageToLandmarks_batch unavailable; linear(3*64*64 -> 136) stand-in.
    W_lm = np.asarray(jax.random.normal(k2, (3 * 64 * 64, 136), jnp.float32)) * 0.01
    # TODO(synk): vgg_face_dag unavailable; avgpool(8x8) + linear(192 -> 256) stand-in.
    W_vgg = np.asarray(jax.random.normal(k3, (3 * 8 * 8, 256), jnp.float32)) * 0.1

    # ---- exact linear folds of crop / resize / pool (computed once, numpy) ----
    U = nearest_upsample_matrix(1024, 32)                 # 32x nearest upsample (1024, 32)
    Rb = bilinear_matrix(696, 224)                        # bilinear 696 -> 224 (224, 696)
    Rcrop = Rb @ U[210:906, :]                            # rows: crop[210:906] of upsample (224, 32)
    Ccrop = (Rb @ U[164:860, :]).T                        # cols: crop[164:860]             (32, 224)
    R64 = bilinear_matrix(224, 64)                        # bilinear 224 -> 64 (64, 224)
    P8 = avgpool_matrix(224, 8)                           # adaptive avg pool 224 -> 8 (8, 224)
    A_lm = (R64 @ Rcrop).astype(np.float32)               # (64, 32)
    B_lm = (Ccrop @ R64.T).astype(np.float32)             # (32, 64)
    A_vgg = (P8 @ Rcrop).astype(np.float32)               # (8, 32)
    B_vgg = (Ccrop @ P8.T).astype(np.float32)             # (32, 8)

    # ---- fold the heads + downstream linear stand-ins onto the flattened base ----
    # img64[n,c] = A_lm @ base[n,c] @ B_lm, landmark GEMV over vec(img64), *224/64:
    #   Wp_lm[c*1024+k*32+l, o] = (224/64) * sum_{h,w} A_lm[h,k] B_lm[l,w] W_lm[c,h,w,o]
    W_lm_r = W_lm.reshape(3, 64, 64, 136)
    Wp_lm = np.einsum('hk,lw,chwo->cklo', A_lm, B_lm, W_lm_r,
                      optimize=True).reshape(3072, 136) * (224.0 / 64.0)
    # pooled[n,c] = A_vgg @ base[n,c] @ B_vgg, then VGG stand-in linear:
    #   Wp_vgg[c*1024+k*32+l, o] = sum_{i,j} A_vgg[i,k] B_vgg[l,j] W_vgg[c,i,j,o]
    W_vgg_r = W_vgg.reshape(3, 8, 8, 256)
    Wp_vgg = np.einsum('ik,lj,cijo->cklo', A_vgg, B_vgg, W_vgg_r,
                       optimize=True).reshape(3072, 256)

    # VGGFaceProcessing: std = 1, mean subtracted at 224x224; mean commutes with
    # the avg pool (rows of all fold matrices sum to 1), so it folds into a bias.
    vgg_mean = np.array([131.0912, 103.8827, 91.4953], np.float32)
    mean_flat = np.repeat(vgg_mean, 8 * 8).astype(np.float32)     # channel-major (192,)
    b_vgg = -(mean_flat @ W_vgg)                                  # (256,)

    # Single fused tail weight: columns [0:136]=landmark (zero-padded to 256),
    # columns [256:512]=VGG features.
    W_cat = np.zeros((3072, 512), np.float32)
    W_cat[:, :136] = Wp_lm
    W_cat[:, 256:] = Wp_vgg
    b_cat = np.zeros((1, 512), np.float32)
    b_cat[0, 256:] = b_vgg

    # Column nearest-upsample matrix for the image writer (32 -> 1024).
    Cup = nearest_upsample_matrix(1024, 32).T                     # (32, 1024)

    return dict(
        W_syn=W_syn,
        W_cat=jnp.asarray(W_cat).astype(jnp.bfloat16),            # 3 MiB weight stream
        b_cat=jnp.asarray(b_cat),
        Cup=jnp.asarray(Cup),
    )


# ----------------------------------------------------------------------------
# Non_ID_reconstructor.forward
# ----------------------------------------------------------------------------

def non_id_reconstructor_forward(latents, params):
    N = latents.shape[0]
    C = 3

    # synthesis_image (latent_type == 'WP') + pose_porcessing_outputImg +
    # crop_image_forVGGFACE2 + landmark regressor (+ *224/64) + VGG encoder,
    # all in one fused kernel producing the post-processed 32x32 base and the
    # concatenated [L_pred | X_pred] tail.
    post_base, tail = pallas_synth_tail(latents, params["W_syn"],
                                        params["W_cat"], params["b_cat"])
    base3 = post_base.reshape(N * C, 32, 32)

    # generated_image = PostSynthesisProcessing(synthesizer(latents))  (N, 3, 1024, 1024)
    generated_image = pallas_upsample32(base3, params["Cup"])
    generated_image = generated_image.reshape(N, C, 1024, 1024)

    L_pred = tail[:, :136]                                        # (N, 136)
    X_pred = tail[:, 256:]                                        # (N, 256)
    return L_pred, X_pred, generated_image


# ----------------------------------------------------------------------------

if __name__ == "__main__":
    key = jax.random.PRNGKey(0)
    latents = jax.random.normal(key, (2, 18, 512), jnp.float32)   # WP latents (N, 18, 512)
    params = make_params()

    fwd = jax.jit(non_id_reconstructor_forward)
    L_pred, X_pred, gen_img = fwd(latents, params)
    jax.block_until_ready((L_pred, X_pred, gen_img))

    assert L_pred.shape == (2, 136)
    assert X_pred.shape == (2, 256)
    assert gen_img.shape == (2, 3, 1024, 1024)
    assert bool(jnp.all(jnp.isfinite(L_pred))) and bool(jnp.all(jnp.isfinite(X_pred)))
    assert float(jnp.min(gen_img)) >= 0.0 and float(jnp.max(gen_img)) <= 255.0

    print("KERNEL_OK")
</pallas_src>

<mosaic_0001>
module attributes {stable_mosaic.version = 11 : i64} {
  func.func @_synth_tail_kernel(%arg0: i32, %arg1: memref<2x18x512xf32, #tpu.memory_space<vmem>>, %arg2: memref<512x3072xbf16, #tpu.memory_space<vmem>>, %arg3: memref<3072x512xbf16, #tpu.memory_space<vmem>>, %arg4: memref<1x512xf32, #tpu.memory_space<vmem>>, %arg5: memref<2x3072xf32, #tpu.memory_space<vmem>>, %arg6: memref<2x512xf32, #tpu.memory_space<vmem>>) attributes {dimension_semantics = [#tpu.dimension_semantics<arbitrary>], iteration_bounds = array<i64: 1>, scalar_prefetch = 0 : i64, scratch_operands = 0 : i64, tpu.core_type = #tpu.core_type<tc>, window_params = [{pipeline_mode = #tpu.pipeline_mode<synchronous>, transform_indices = @transform_0, window_bounds = array<i64: 2, 18, 512>}, {pipeline_mode = #tpu.pipeline_mode<synchronous>, transform_indices = @transform_1, window_bounds = array<i64: 512, 3072>}, {pipeline_mode = #tpu.pipeline_mode<synchronous>, transform_indices = @transform_2, window_bounds = array<i64: 3072, 512>}, {pipeline_mode = #tpu.pipeline_mode<synchronous>, transform_indices = @transform_3, window_bounds = array<i64: 1, 512>}, {pipeline_mode = #tpu.pipeline_mode<synchronous>, transform_indices = @transform_4, window_bounds = array<i64: 2, 3072>}, {pipeline_mode = #tpu.pipeline_mode<synchronous>, transform_indices = @transform_5, window_bounds = array<i64: 2, 512>}]} {
    %c0 = arith.constant 0 : index
    %c0_0 = arith.constant 0 : index
    %c0_1 = arith.constant 0 : index
    %0 = vector.load %arg1[%c0, %c0_0, %c0_1] : memref<2x18x512xf32, #tpu.memory_space<vmem>>, vector<2x18x512xf32>
    %cst = arith.constant dense<0.000000e+00> : vector<2x512xf32>
    %1 = vector.multi_reduction <add>, %0, %cst [1] : vector<2x18x512xf32> to vector<2x512xf32>
    %cst_2 = arith.constant 1.800000e+01 : f32
    %2 = vector.broadcast %cst_2 : f32 to vector<2x512xf32>
    %3 = arith.divf %1, %2 : vector<2x512xf32>
    %4 = arith.truncf %3 : vector<2x512xf32> to vector<2x512xbf16>
    %c0_3 = arith.constant 0 : index
    %c0_4 = arith.constant 0 : index
    %5 = vector.load %arg2[%c0_3, %c0_4] : memref<512x3072xbf16, #tpu.memory_space<vmem>>, vector<512x3072xbf16>
    %cst_5 = arith.constant dense<0.000000e+00> : vector<2x3072xf32>
    %6 = tpu.matmul %4, %5, %cst_5 {dimension_numbers = #tpu.dot_dimension_numbers<[1], [0], [0], [1], [0, 0, 1, 1], [], []>} : vector<2x512xbf16>, vector<512x3072xbf16>, vector<2x3072xf32> -> vector<2x3072xf32>
    %7 = math.tanh %6 : vector<2x3072xf32>
    %cst_6 = arith.constant 1.275000e+02 : f32
    %8 = vector.broadcast %cst_6 : f32 to vector<2x3072xf32>
    %9 = arith.mulf %8, %7 : vector<2x3072xf32>
    %cst_7 = arith.constant 1.280000e+02 : f32
    %10 = vector.broadcast %cst_7 : f32 to vector<2x3072xf32>
    %11 = arith.addf %9, %10 : vector<2x3072xf32>
    %cst_8 = arith.constant 0.000000e+00 : f32
    %cst_9 = arith.constant 2.550000e+02 : f32
    %12 = vector.broadcast %cst_8 : f32 to vector<2x3072xf32>
    %13 = arith.maximumf %12, %11 : vector<2x3072xf32>
    %14 = vector.broadcast %cst_9 : f32 to vector<2x3072xf32>
    %15 = arith.minimumf %14, %13 : vector<2x3072xf32>
    %c0_10 = arith.constant 0 : index
    %c0_11 = arith.constant 0 : index
    %16 = vector.load %arg5[%c0_10, %c0_11] : memref<2x3072xf32, #tpu.memory_space<vmem>>, vector<2x3072xf32>
    tpu.vector_store %arg5[%c0_10, %c0_11], %15 {strides = array<i32>} : memref<2x3072xf32, #tpu.memory_space<vmem>>, vector<2x3072xf32>,
    %17 = arith.truncf %15 : vector<2x3072xf32> to vector<2x3072xbf16>
    %c0_12 = arith.constant 0 : index
    %c0_13 = arith.constant 0 : index
    %18 = vector.load %arg3[%c0_12, %c0_13] : memref<3072x512xbf16, #tpu.memory_space<vmem>>, vector<3072x512xbf16>
    %cst_14 = arith.constant dense<0.000000e+00> : vector<2x512xf32>
    %19 = tpu.matmul %17, %18, %cst_14 {dimension_numbers = #tpu.dot_dimension_numbers<[1], [0], [0], [1], [0, 0, 1, 1], [], []>} : vector<2x3072xbf16>, vector<3072x512xbf16>, vector<2x512xf32> -> vector<2x512xf32>
    %c0_15 = arith.constant 0 : index
    %c0_16 = arith.constant 0 : index
    %20 = vector.load %arg4[%c0_15, %c0_16] : memref<1x512xf32, #tpu.memory_space<vmem>>, vector<1x512xf32>
    %21 = vector.broadcast %20 : vector<1x512xf32> to vector<2x512xf32>
    %22 = arith.addf %19, %21 : vector<2x512xf32>
    %c0_17 = arith.constant 0 : index
    %c0_18 = arith.constant 0 : index
    %23 = vector.load %arg6[%c0_17, %c0_18] : memref<2x512xf32, #tpu.memory_space<vmem>>, vector<2x512xf32>
    tpu.vector_store %arg6[%c0_17, %c0_18], %22 {strides = array<i32>} : memref<2x512xf32, #tpu.memory_space<vmem>>, vector<2x512xf32>,
    return
  }
  func.func @transform_0(%arg0: i32) -> (i32, i32, i32) {
    %c0_i32 = arith.constant 0 : i32
    %c0_i32_0 = arith.constant 0 : i32
    %c0_i32_1 = arith.constant 0 : i32
    %c0_i32_2 = arith.constant 0 : i32
    return %c0_i32, %c0_i32_0, %c0_i32_1 : i32, i32, i32
  }
  func.func @transform_1(%arg0: i32) -> (i32, i32) {
    %c0_i32 = arith.constant 0 : i32
    %c0_i32_0 = arith.constant 0 : i32
    %c0_i32_1 = arith.constant 0 : i32
    return %c0_i32, %c0_i32_0 : i32, i32
  }
  func.func @transform_2(%arg0: i32) -> (i32, i32) {
    %c0_i32 = arith.constant 0 : i32
    %c0_i32_0 = arith.constant 0 : i32
    %c0_i32_1 = arith.constant 0 : i32
    return %c0_i32, %c0_i32_0 : i32, i32
  }
  func.func @transform_3(%arg0: i32) -> (i32, i32) {
    %c0_i32 = arith.constant 0 : i32
    %c0_i32_0 = arith.constant 0 : i32
    %c0_i32_1 = arith.constant 0 : i32
    return %c0_i32, %c0_i32_0 : i32, i32
  }
  func.func @transform_4(%arg0: i32) -> (i32, i32) {
    %c0_i32 = arith.constant 0 : i32
    %c0_i32_0 = arith.constant 0 : i32
    %c0_i32_1 = arith.constant 0 : i32
    return %c0_i32, %c0_i32_0 : i32, i32
  }
  func.func @transform_5(%arg0: i32) -> (i32, i32) {
    %c0_i32 = arith.constant 0 : i32
    %c0_i32_0 = arith.constant 0 : i32
    %c0_i32_1 = arith.constant 0 : i32
    return %c0_i32, %c0_i32_0 : i32, i32
  }
}

module attributes {stable_mosaic.version = 11 : i64} {
  func.func @_upsample_kernel(%arg0: i32, %arg1: memref<1x32x32xf32, #tpu.memory_space<vmem>>, %arg2: memref<32x1024xf32, #tpu.memory_space<vmem>>, %arg3: memref<1x1024x1024xf32, #tpu.memory_space<vmem>>) attributes {dimension_semantics = [#tpu.dimension_semantics<parallel>], iteration_bounds = array<i64: 6>, scalar_prefetch = 0 : i64, scratch_operands = 0 : i64, tpu.core_type = #tpu.core_type<tc>, window_params = [{transform_indices = @transform_0, window_bounds = array<i64: 1, 32, 32>}, {pipeline_mode = #tpu.pipeline_mode<synchronous>, transform_indices = @transform_1, window_bounds = array<i64: 32, 1024>}, {transform_indices = @transform_2, window_bounds = array<i64: 1, 1024, 1024>}]} {
    %c0 = arith.constant 0 : index
    %c0_0 = arith.constant 0 : index
    %c0_1 = arith.constant 0 : index
    %0 = vector.load %arg1[%c0, %c0_0, %c0_1] : memref<1x32x32xf32, #tpu.memory_space<vmem>>, vector<1x32x32xf32>
    %1 = vector.shape_cast %0 : vector<1x32x32xf32> to vector<32x32xf32>
    %c0_2 = arith.constant 0 : index
    %c0_3 = arith.constant 0 : index
    %2 = vector.load %arg2[%c0_2, %c0_3] : memref<32x1024xf32, #tpu.memory_space<vmem>>, vector<32x1024xf32>
    %cst = arith.constant dense<0.000000e+00> : vector<32x1024xf32>
    %3 = tpu.matmul %1, %2, %cst {dimension_numbers = #tpu.dot_dimension_numbers<[1], [0], [0], [1], [0, 0, 1, 1], [], []>} : vector<32x32xf32>, vector<32x1024xf32>, vector<32x1024xf32> -> vector<32x1024xf32>
    %4 = vector.extract_strided_slice %3 {offsets = [0, 0], sizes = [1, 1024], strides = [1, 1]} : vector<32x1024xf32> to vector<1x1024xf32>
    %5 = vector.shape_cast %4 : vector<1x1024xf32> to vector<1x1024xf32>
    %6 = vector.broadcast %5 : vector<1x1024xf32> to vector<32x1024xf32>
    %c0_4 = arith.constant 0 : index
    %c0_5 = arith.constant 0 : index
    %c0_6 = arith.constant 0 : index
    %7 = vector.load %arg3[%c0_4, %c0_5, %c0_6] : memref<1x1024x1024xf32, #tpu.memory_space<vmem>>, vector<1x32x1024xf32>
    %8 = vector.shape_cast %7 : vector<1x32x1024xf32> to vector<32x1024xf32>
    %9 = vector.shape_cast %6 : vector<32x1024xf32> to vector<1x32x1024xf32>
    tpu.vector_store %arg3[%c0_4, %c0_5, %c0_6], %9 {strides = array<i32>} : memref<1x1024x1024xf32, #tpu.memory_space<vmem>>, vector<1x32x1024xf32>,
    %10 = vector.extract_strided_slice %3 {offsets = [1, 0], sizes = [1, 1024], strides = [1, 1]} : vector<32x1024xf32> to vector<1x1024xf32>
    %11 = vector.shape_cast %10 : vector<1x1024xf32> to vector<1x1024xf32>
    %12 = vector.broadcast %11 : vector<1x1024xf32> to vector<32x1024xf32>
    %c0_7 = arith.constant 0 : index
    %c32 = arith.constant 32 : index
    %c0_8 = arith.constant 0 : index
    %13 = vector.load %arg3[%c0_7, %c32, %c0_8] : memref<1x1024x1024xf32, #tpu.memory_space<vmem>>, vector<1x32x1024xf32>
    %14 = vector.shape_cast %13 : vector<1x32x1024xf32> to vector<32x1024xf32>
    %15 = vector.shape_cast %12 : vector<32x1024xf32> to vector<1x32x1024xf32>
    tpu.vector_store %arg3[%c0_7, %c32, %c0_8], %15 {strides = array<i32>} : memref<1x1024x1024xf32, #tpu.memory_space<vmem>>, vector<1x32x1024xf32>,
    %16 = vector.extract_strided_slice %3 {offsets = [2, 0], sizes = [1, 1024], strides = [1, 1]} : vector<32x1024xf32> to vector<1x1024xf32>
    %17 = vector.shape_cast %16 : vector<1x1024xf32> to vector<1x1024xf32>
    %18 = vector.broadcast %17 : vector<1x1024xf32> to vector<32x1024xf32>
    %c0_9 = arith.constant 0 : index
    %c64 = arith.constant 64 : index
    %c0_10 = arith.constant 0 : index
    %19 = vector.load %arg3[%c0_9, %c64, %c0_10] : memref<1x1024x1024xf32, #tpu.memory_space<vmem>>, vector<1x32x1024xf32>
    %20 = vector.shape_cast %19 : vector<1x32x1024xf32> to vector<32x1024xf32>
    %21 = vector.shape_cast %18 : vector<32x1024xf32> to vector<1x32x1024xf32>
    tpu.vector_store %arg3[%c0_9, %c64, %c0_10], %21 {strides = array<i32>} : memref<1x1024x1024xf32, #tpu.memory_space<vmem>>, vector<1x32x1024xf32>,
    %22 = vector.extract_strided_slice %3 {offsets = [3, 0], sizes = [1, 1024], strides = [1, 1]} : vector<32x1024xf32> to vector<1x1024xf32>
    %23 = vector.shape_cast %22 : vector<1x1024xf32> to vector<1x1024xf32>
    %24 = vector.broadcast %23 : vector<1x1024xf32> to vector<32x1024xf32>
    %c0_11 = arith.constant 0 : index
    %c96 = arith.constant 96 : index
    %c0_12 = arith.constant 0 : index
    %25 = vector.load %arg3[%c0_11, %c96, %c0_12] : memref<1x1024x1024xf32, #tpu.memory_space<vmem>>, vector<1x32x1024xf32>
    %26 = vector.shape_cast %25 : vector<1x32x1024xf32> to vector<32x1024xf32>
    %27 = vector.shape_cast %24 : vector<32x1024xf32> to vector<1x32x1024xf32>
    tpu.vector_store %arg3[%c0_11, %c96, %c0_12], %27 {strides = array<i32>} : memref<1x1024x1024xf32, #tpu.memory_space<vmem>>, vector<1x32x1024xf32>,
    %28 = vector.extract_strided_slice %3 {offsets = [4, 0], sizes = [1, 1024], strides = [1, 1]} : vector<32x1024xf32> to vector<1x1024xf32>
    %29 = vector.shape_cast %28 : vector<1x1024xf32> to vector<1x1024xf32>
    %30 = vector.broadcast %29 : vector<1x1024xf32> to vector<32x1024xf32>
    %c0_13 = arith.constant 0 : index
    %c128 = arith.constant 128 : index
    %c0_14 = arith.constant 0 : index
    %31 = vector.load %arg3[%c0_13, %c128, %c0_14] : memref<1x1024x1024xf32, #tpu.memory_space<vmem>>, vector<1x32x1024xf32>
    %32 = vector.shape_cast %31 : vector<1x32x1024xf32> to vector<32x1024xf32>
    %33 = vector.shape_cast %30 : vector<32x1024xf32> to vector<1x32x1024xf32>
    tpu.vector_store %arg3[%c0_13, %c128, %c0_14], %33 {strides = array<i32>} : memref<1x1024x1024xf32, #tpu.memory_space<vmem>>, vector<1x32x1024xf32>,
    %34 = vector.extract_strided_slice %3 {offsets = [5, 0], sizes = [1, 1024], strides = [1, 1]} : vector<32x1024xf32> to vector<1x1024xf32>
    %35 = vector.shape_cast %34 : vector<1x1024xf32> to vector<1x1024xf32>
    %36 = vector.broadcast %35 : vector<1x1024xf32> to vector<32x1024xf32>
    %c0_15 = arith.constant 0 : index
    %c160 = arith.constant 160 : index
    %c0_16 = arith.constant 0 : index
    %37 = vector.load %arg3[%c0_15, %c160, %c0_16] : memref<1x1024x1024xf32, #tpu.memory_space<vmem>>, vector<1x32x1024xf32>
    %38 = vector.shape_cast %37 : vector<1x32x1024xf32> to vector<32x1024xf32>
    %39 = vector.shape_cast %36 : vector<32x1024xf32> to vector<1x32x1024xf32>
    tpu.vector_store %arg3[%c0_15, %c160, %c0_16], %39 {strides = array<i32>} : memref<1x1024x1024xf32, #tpu.memory_space<vmem>>, vector<1x32x1024xf32>,
    %40 = vector.extract_strided_slice %3 {offsets = [6, 0], sizes = [1, 1024], strides = [1, 1]} : vector<32x1024xf32> to vector<1x1024xf32>
    %41 = vector.shape_cast %40 : vector<1x1024xf32> to vector<1x1024xf32>
    %42 = vector.broadcast %41 : vector<1x1024xf32> to vector<32x1024xf32>
    %c0_17 = arith.constant 0 : index
    %c192 = arith.constant 192 : index
    %c0_18 = arith.constant 0 : index
    %43 = vector.load %arg3[%c0_17, %c192, %c0_18] : memref<1x1024x1024xf32, #tpu.memory_space<vmem>>, vector<1x32x1024xf32>
    %44 = vector.shape_cast %43 : vector<1x32x1024xf32> to vector<32x1024xf32>
    %45 = vector.shape_cast %42 : vector<32x1024xf32> to vector<1x32x1024xf32>
    tpu.vector_store %arg3[%c0_17, %c192, %c0_18], %45 {strides = array<i32>} : memref<1x1024x1024xf32, #tpu.memory_space<vmem>>, vector<1x32x1024xf32>,
    %46 = vector.extract_strided_slice %3 {offsets = [7, 0], sizes = [1, 1024], strides = [1, 1]} : vector<32x1024xf32> to vector<1x1024xf32>
    %47 = vector.shape_cast %46 : vector<1x1024xf32> to vector<1x1024xf32>
    %48 = vector.broadcast %47 : vector<1x1024xf32> to vector<32x1024xf32>
    %c0_19 = arith.constant 0 : index
    %c224 = arith.constant 224 : index
    %c0_20 = arith.constant 0 : index
    %49 = vector.load %arg3[%c0_19, %c224, %c0_20] : memref<1x1024x1024xf32, #tpu.memory_space<vmem>>, vector<1x32x1024xf32>
    %50 = vector.shape_cast %49 : vector<1x32x1024xf32> to vector<32x1024xf32>
    %51 = vector.shape_cast %48 : vector<32x1024xf32> to vector<1x32x1024xf32>
    tpu.vector_store %arg3[%c0_19, %c224, %c0_20], %51 {strides = array<i32>} : memref<1x1024x1024xf32, #tpu.memory_space<vmem>>, vector<1x32x1024xf32>,
    %52 = vector.extract_strided_slice %3 {offsets = [8, 0], sizes = [1, 1024], strides = [1, 1]} : vector<32x1024xf32> to vector<1x1024xf32>
    %53 = vector.shape_cast %52 : vector<1x1024xf32> to vector<1x1024xf32>
    %54 = vector.broadcast %53 : vector<1x1024xf32> to vector<32x1024xf32>
    %c0_21 = arith.constant 0 : index
    %c256 = arith.constant 256 : index
    %c0_22 = arith.constant 0 : index
    %55 = vector.load %arg3[%c0_21, %c256, %c0_22] : memref<1x1024x1024xf32, #tpu.memory_space<vmem>>, vector<1x32x1024xf32>
    %56 = vector.shape_cast %55 : vector<1x32x1024xf32> to vector<32x1024xf32>
    %57 = vector.shape_cast %54 : vector<32x1024xf32> to vector<1x32x1024xf32>
    tpu.vector_store %arg3[%c0_21, %c256, %c0_22], %57 {strides = array<i32>} : memref<1x1024x1024xf32, #tpu.memory_space<vmem>>, vector<1x32x1024xf32>,
    %58 = vector.extract_strided_slice %3 {offsets = [9, 0], sizes = [1, 1024], strides = [1, 1]} : vector<32x1024xf32> to vector<1x1024xf32>
    %59 = vector.shape_cast %58 : vector<1x1024xf32> to vector<1x1024xf32>
    %60 = vector.broadcast %59 : vector<1x1024xf32> to vector<32x1024xf32>
    %c0_23 = arith.constant 0 : index
    %c288 = arith.constant 288 : index
    %c0_24 = arith.constant 0 : index
    %61 = vector.load %arg3[%c0_23, %c288, %c0_24] : memref<1x1024x1024xf32, #tpu.memory_space<vmem>>, vector<1x32x1024xf32>
    %62 = vector.shape_cast %61 : vector<1x32x1024xf32> to vector<32x1024xf32>
    %63 = vector.shape_cast %60 : vector<32x1024xf32> to vector<1x32x1024xf32>
    tpu.vector_store %arg3[%c0_23, %c288, %c0_24], %63 {strides = array<i32>} : memref<1x1024x1024xf32, #tpu.memory_space<vmem>>, vector<1x32x1024xf32>,
    %64 = vector.extract_strided_slice %3 {offsets = [10, 0], sizes = [1, 1024], strides = [1, 1]} : vector<32x1024xf32> to vector<1x1024xf32>
    %65 = vector.shape_cast %64 : vector<1x1024xf32> to vector<1x1024xf32>
    %66 = vector.broadcast %65 : vector<1x1024xf32> to vector<32x1024xf32>
    %c0_25 = arith.constant 0 : index
    %c320 = arith.constant 320 : index
    %c0_26 = arith.constant 0 : index
    %67 = vector.load %arg3[%c0_25, %c320, %c0_26] : memref<1x1024x1024xf32, #tpu.memory_space<vmem>>, vector<1x32x1024xf32>
    %68 = vector.shape_cast %67 : vector<1x32x1024xf32> to vector<32x1024xf32>
    %69 = vector.shape_cast %66 : vector<32x1024xf32> to vector<1x32x1024xf32>
    tpu.vector_store %arg3[%c0_25, %c320, %c0_26], %69 {strides = array<i32>} : memref<1x1024x1024xf32, #tpu.memory_space<vmem>>, vector<1x32x1024xf32>,
    %70 = vector.extract_strided_slice %3 {offsets = [11, 0], sizes = [1, 1024], strides = [1, 1]} : vector<32x1024xf32> to vector<1x1024xf32>
    %71 = vector.shape_cast %70 : vector<1x1024xf32> to vector<1x1024xf32>
    %72 = vector.broadcast %71 : vector<1x1024xf32> to vector<32x1024xf32>
    %c0_27 = arith.constant 0 : index
    %c352 = arith.constant 352 : index
    %c0_28 = arith.constant 0 : index
    %73 = vector.load %arg3[%c0_27, %c352, %c0_28] : memref<1x1024x1024xf32, #tpu.memory_space<vmem>>, vector<1x32x1024xf32>
    %74 = vector.shape_cast %73 : vector<1x32x1024xf32> to vector<32x1024xf32>
    %75 = vector.shape_cast %72 : vector<32x1024xf32> to vector<1x32x1024xf32>
    tpu.vector_store %arg3[%c0_27, %c352, %c0_28], %75 {strides = array<i32>} : memref<1x1024x1024xf32, #tpu.memory_space<vmem>>, vector<1x32x1024xf32>,
    %76 = vector.extract_strided_slice %3 {offsets = [12, 0], sizes = [1, 1024], strides = [1, 1]} : vector<32x1024xf32> to vector<1x1024xf32>
    %77 = vector.shape_cast %76 : vector<1x1024xf32> to vector<1x1024xf32>
    %78 = vector.broadcast %77 : vector<1x1024xf32> to vector<32x1024xf32>
    %c0_29 = arith.constant 0 : index
    %c384 = arith.constant 384 : index
    %c0_30 = arith.constant 0 : index
    %79 = vector.load %arg3[%c0_29, %c384, %c0_30] : memref<1x1024x1024xf32, #tpu.memory_space<vmem>>, vector<1x32x1024xf32>
    %80 = vector.shape_cast %79 : vector<1x32x1024xf32> to vector<32x1024xf32>
    %81 = vector.shape_cast %78 : vector<32x1024xf32> to vector<1x32x1024xf32>
    tpu.vector_store %arg3[%c0_29, %c384, %c0_30], %81 {strides = array<i32>} : memref<1x1024x1024xf32, #tpu.memory_space<vmem>>, vector<1x32x1024xf32>,
    %82 = vector.extract_strided_slice %3 {offsets = [13, 0], sizes = [1, 1024], strides = [1, 1]} : vector<32x1024xf32> to vector<1x1024xf32>
    %83 = vector.shape_cast %82 : vector<1x1024xf32> to vector<1x1024xf32>
    %84 = vector.broadcast %83 : vector<1x1024xf32> to vector<32x1024xf32>
    %c0_31 = arith.constant 0 : index
    %c416 = arith.constant 416 : index
    %c0_32 = arith.constant 0 : index
    %85 = vector.load %arg3[%c0_31, %c416, %c0_32] : memref<1x1024x1024xf32, #tpu.memory_space<vmem>>, vector<1x32x1024xf32>
    %86 = vector.shape_cast %85 : vector<1x32x1024xf32> to vector<32x1024xf32>
    %87 = vector.shape_cast %84 : vector<32x1024xf32> to vector<1x32x1024xf32>
    tpu.vector_store %arg3[%c0_31, %c416, %c0_32], %87 {strides = array<i32>} : memref<1x1024x1024xf32, #tpu.memory_space<vmem>>, vector<1x32x1024xf32>,
    %88 = vector.extract_strided_slice %3 {offsets = [14, 0], sizes = [1, 1024], strides = [1, 1]} : vector<32x1024xf32> to vector<1x1024xf32>
    %89 = vector.shape_cast %88 : vector<1x1024xf32> to vector<1x1024xf32>
    %90 = vector.broadcast %89 : vector<1x1024xf32> to vector<32x1024xf32>
    %c0_33 = arith.constant 0 : index
    %c448 = arith.constant 448 : index
    %c0_34 = arith.constant 0 : index
    %91 = vector.load %arg3[%c0_33, %c448, %c0_34] : memref<1x1024x1024xf32, #tpu.memory_space<vmem>>, vector<1x32x1024xf32>
    %92 = vector.shape_cast %91 : vector<1x32x1024xf32> to vector<32x1024xf32>
    %93 = vector.shape_cast %90 : vector<32x1024xf32> to vector<1x32x1024xf32>
    tpu.vector_store %arg3[%c0_33, %c448, %c0_34], %93 {strides = array<i32>} : memref<1x1024x1024xf32, #tpu.memory_space<vmem>>, vector<1x32x1024xf32>,
    %94 = vector.extract_strided_slice %3 {offsets = [15, 0], sizes = [1, 1024], strides = [1, 1]} : vector<32x1024xf32> to vector<1x1024xf32>
    %95 = vector.shape_cast %94 : vector<1x1024xf32> to vector<1x1024xf32>
    %96 = vector.broadcast %95 : vector<1x1024xf32> to vector<32x1024xf32>
    %c0_35 = arith.constant 0 : index
    %c480 = arith.constant 480 : index
    %c0_36 = arith.constant 0 : index
    %97 = vector.load %arg3[%c0_35, %c480, %c0_36] : memref<1x1024x1024xf32, #tpu.memory_space<vmem>>, vector<1x32x1024xf32>
    %98 = vector.shape_cast %97 : vector<1x32x1024xf32> to vector<32x1024xf32>
    %99 = vector.shape_cast %96 : vector<32x1024xf32> to vector<1x32x1024xf32>
    tpu.vector_store %arg3[%c0_35, %c480, %c0_36], %99 {strides = array<i32>} : memref<1x1024x1024xf32, #tpu.memory_space<vmem>>, vector<1x32x1024xf32>,
    %100 = vector.extract_strided_slice %3 {offsets = [16, 0], sizes = [1, 1024], strides = [1, 1]} : vector<32x1024xf32> to vector<1x1024xf32>
    %101 = vector.shape_cast %100 : vector<1x1024xf32> to vector<1x1024xf32>
    %102 = vector.broadcast %101 : vector<1x1024xf32> to vector<32x1024xf32>
    %c0_37 = arith.constant 0 : index
    %c512 = arith.constant 512 : index
    %c0_38 = arith.constant 0 : index
    %103 = vector.load %arg3[%c0_37, %c512, %c0_38] : memref<1x1024x1024xf32, #tpu.memory_space<vmem>>, vector<1x32x1024xf32>
    %104 = vector.shape_cast %103 : vector<1x32x1024xf32> to vector<32x1024xf32>
    %105 = vector.shape_cast %102 : vector<32x1024xf32> to vector<1x32x1024xf32>
    tpu.vector_store %arg3[%c0_37, %c512, %c0_38], %105 {strides = array<i32>} : memref<1x1024x1024xf32, #tpu.memory_space<vmem>>, vector<1x32x1024xf32>,
    %106 = vector.extract_strided_slice %3 {offsets = [17, 0], sizes = [1, 1024], strides = [1, 1]} : vector<32x1024xf32> to vector<1x1024xf32>
    %107 = vector.shape_cast %106 : vector<1x1024xf32> to vector<1x1024xf32>
    %108 = vector.broadcast %107 : vector<1x1024xf32> to vector<32x1024xf32>
    %c0_39 = arith.constant 0 : index
    %c544 = arith.constant 544 : index
    %c0_40 = arith.constant 0 : index
    %109 = vector.load %arg3[%c0_39, %c544, %c0_40] : memref<1x1024x1024xf32, #tpu.memory_space<vmem>>, vector<1x32x1024xf32>
    %110 = vector.shape_cast %109 : vector<1x32x1024xf32> to vector<32x1024xf32>
    %111 = vector.shape_cast %108 : vector<32x1024xf32> to vector<1x32x1024xf32>
    tpu.vector_store %arg3[%c0_39, %c544, %c0_40], %111 {strides = array<i32>} : memref<1x1024x1024xf32, #tpu.memory_space<vmem>>, vector<1x32x1024xf32>,
    %112 = vector.extract_strided_slice %3 {offsets = [18, 0], sizes = [1, 1024], strides = [1, 1]} : vector<32x1024xf32> to vector<1x1024xf32>
    %113 = vector.shape_cast %112 : vector<1x1024xf32> to vector<1x1024xf32>
    %114 = vector.broadcast %113 : vector<1x1024xf32> to vector<32x1024xf32>
    %c0_41 = arith.constant 0 : index
    %c576 = arith.constant 576 : index
    %c0_42 = arith.constant 0 : index
    %115 = vector.load %arg3[%c0_41, %c576, %c0_42] : memref<1x1024x1024xf32, #tpu.memory_space<vmem>>, vector<1x32x1024xf32>
    %116 = vector.shape_cast %115 : vector<1x32x1024xf32> to vector<32x1024xf32>
    %117 = vector.shape_cast %114 : vector<32x1024xf32> to vector<1x32x1024xf32>
    tpu.vector_store %arg3[%c0_41, %c576, %c0_42], %117 {strides = array<i32>} : memref<1x1024x1024xf32, #tpu.memory_space<vmem>>, vector<1x32x1024xf32>,
    %118 = vector.extract_strided_slice %3 {offsets = [19, 0], sizes = [1, 1024], strides = [1, 1]} : vector<32x1024xf32> to vector<1x1024xf32>
    %119 = vector.shape_cast %118 : vector<1x1024xf32> to vector<1x1024xf32>
    %120 = vector.broadcast %119 : vector<1x1024xf32> to vector<32x1024xf32>
    %c0_43 = arith.constant 0 : index
    %c608 = arith.constant 608 : index
    %c0_44 = arith.constant 0 : index
    %121 = vector.load %arg3[%c0_43, %c608, %c0_44] : memref<1x1024x1024xf32, #tpu.memory_space<vmem>>, vector<1x32x1024xf32>
    %122 = vector.shape_cast %121 : vector<1x32x1024xf32> to vector<32x1024xf32>
    %123 = vector.shape_cast %120 : vector<32x1024xf32> to vector<1x32x1024xf32>
    tpu.vector_store %arg3[%c0_43, %c608, %c0_44], %123 {strides = array<i32>} : memref<1x1024x1024xf32, #tpu.memory_space<vmem>>, vector<1x32x1024xf32>,
    %124 = vector.extract_strided_slice %3 {offsets = [20, 0], sizes = [1, 1024], strides = [1, 1]} : vector<32x1024xf32> to vector<1x1024xf32>
    %125 = vector.shape_cast %124 : vector<1x1024xf32> to vector<1x1024xf32>
    %126 = vector.broadcast %125 : vector<1x1024xf32> to vector<32x1024xf32>
    %c0_45 = arith.constant 0 : index
    %c640 = arith.constant 640 : index
    %c0_46 = arith.constant 0 : index
    %127 = vector.load %arg3[%c0_45, %c640, %c0_46] : memref<1x1024x1024xf32, #tpu.memory_space<vmem>>, vector<1x32x1024xf32>
    %128 = vector.shape_cast %127 : vector<1x32x1024xf32> to vector<32x1024xf32>
    %129 = vector.shape_cast %126 : vector<32x1024xf32> to vector<1x32x1024xf32>
    tpu.vector_store %arg3[%c0_45, %c640, %c0_46], %129 {strides = array<i32>} : memref<1x1024x1024xf32, #tpu.memory_space<vmem>>, vector<1x32x1024xf32>,
    %130 = vector.extract_strided_slice %3 {offsets = [21, 0], sizes = [1, 1024], strides = [1, 1]} : vector<32x1024xf32> to vector<1x1024xf32>
    %131 = vector.shape_cast %130 : vector<1x1024xf32> to vector<1x1024xf32>
    %132 = vector.broadcast %131 : vector<1x1024xf32> to vector<32x1024xf32>
    %c0_47 = arith.constant 0 : index
    %c672 = arith.constant 672 : index
    %c0_48 = arith.constant 0 : index
    %133 = vector.load %arg3[%c0_47, %c672, %c0_48] : memref<1x1024x1024xf32, #tpu.memory_space<vmem>>, vector<1x32x1024xf32>
    %134 = vector.shape_cast %133 : vector<1x32x1024xf32> to vector<32x1024xf32>
    %135 = vector.shape_cast %132 : vector<32x1024xf32> to vector<1x32x1024xf32>
    tpu.vector_store %arg3[%c0_47, %c672, %c0_48], %135 {strides = array<i32>} : memref<1x1024x1024xf32, #tpu.memory_space<vmem>>, vector<1x32x1024xf32>,
    %136 = vector.extract_strided_slice %3 {offsets = [22, 0], sizes = [1, 1024], strides = [1, 1]} : vector<32x1024xf32> to vector<1x1024xf32>
    %137 = vector.shape_cast %136 : vector<1x1024xf32> to vector<1x1024xf32>
    %138 = vector.broadcast %137 : vector<1x1024xf32> to vector<32x1024xf32>
    %c0_49 = arith.constant 0 : index
    %c704 = arith.constant 704 : index
    %c0_50 = arith.constant 0 : index
    %139 = vector.load %arg3[%c0_49, %c704, %c0_50] : memref<1x1024x1024xf32, #tpu.memory_space<vmem>>, vector<1x32x1024xf32>
    %140 = vector.shape_cast %139 : vector<1x32x1024xf32> to vector<32x1024xf32>
    %141 = vector.shape_cast %138 : vector<32x1024xf32> to vector<1x32x1024xf32>
    tpu.vector_store %arg3[%c0_49, %c704, %c0_50], %141 {strides = array<i32>} : memref<1x1024x1024xf32, #tpu.memory_space<vmem>>, vector<1x32x1024xf32>,
    %142 = vector.extract_strided_slice %3 {offsets = [23, 0], sizes = [1, 1024], strides = [1, 1]} : vector<32x1024xf32> to vector<1x1024xf32>
    %143 = vector.shape_cast %142 : vector<1x1024xf32> to vector<1x1024xf32>
    %144 = vector.broadcast %143 : vector<1x1024xf32> to vector<32x1024xf32>
    %c0_51 = arith.constant 0 : index
    %c736 = arith.constant 736 : index
    %c0_52 = arith.constant 0 : index
    %145 = vector.load %arg3[%c0_51, %c736, %c0_52] : memref<1x1024x1024xf32, #tpu.memory_space<vmem>>, vector<1x32x1024xf32>
    %146 = vector.shape_cast %145 : vector<1x32x1024xf32> to vector<32x1024xf32>
    %147 = vector.shape_cast %144 : vector<32x1024xf32> to vector<1x32x1024xf32>
    tpu.vector_store %arg3[%c0_51, %c736, %c0_52], %147 {strides = array<i32>} : memref<1x1024x1024xf32, #tpu.memory_space<vmem>>, vector<1x32x1024xf32>,
    %148 = vector.extract_strided_slice %3 {offsets = [24, 0], sizes = [1, 1024], strides = [1, 1]} : vector<32x1024xf32> to vector<1x1024xf32>
    %149 = vector.shape_cast %148 : vector<1x1024xf32> to vector<1x1024xf32>
    %150 = vector.broadcast %149 : vector<1x1024xf32> to vector<32x1024xf32>
    %c0_53 = arith.constant 0 : index
    %c768 = arith.constant 768 : index
    %c0_54 = arith.constant 0 : index
    %151 = vector.load %arg3[%c0_53, %c768, %c0_54] : memref<1x1024x1024xf32, #tpu.memory_space<vmem>>, vector<1x32x1024xf32>
    %152 = vector.shape_cast %151 : vector<1x32x1024xf32> to vector<32x1024xf32>
    %153 = vector.shape_cast %150 : vector<32x1024xf32> to vector<1x32x1024xf32>
    tpu.vector_store %arg3[%c0_53, %c768, %c0_54], %153 {strides = array<i32>} : memref<1x1024x1024xf32, #tpu.memory_space<vmem>>, vector<1x32x1024xf32>,
    %154 = vector.extract_strided_slice %3 {offsets = [25, 0], sizes = [1, 1024], strides = [1, 1]} : vector<32x1024xf32> to vector<1x1024xf32>
    %155 = vector.shape_cast %154 : vector<1x1024xf32> to vector<1x1024xf32>
    %156 = vector.broadcast %155 : vector<1x1024xf32> to vector<32x1024xf32>
    %c0_55 = arith.constant 0 : index
    %c800 = arith.constant 800 : index
    %c0_56 = arith.constant 0 : index
    %157 = vector.load %arg3[%c0_55, %c800, %c0_56] : memref<1x1024x1024xf32, #tpu.memory_space<vmem>>, vector<1x32x1024xf32>
    %158 = vector.shape_cast %157 : vector<1x32x1024xf32> to vector<32x1024xf32>
    %159 = vector.shape_cast %156 : vector<32x1024xf32> to vector<1x32x1024xf32>
    tpu.vector_store %arg3[%c0_55, %c800, %c0_56], %159 {strides = array<i32>} : memref<1x1024x1024xf32, #tpu.memory_space<vmem>>, vector<1x32x1024xf32>,
    %160 = vector.extract_strided_slice %3 {offsets = [26, 0], sizes = [1, 1024], strides = [1, 1]} : vector<32x1024xf32> to vector<1x1024xf32>
    %161 = vector.shape_cast %160 : vector<1x1024xf32> to vector<1x1024xf32>
    %162 = vector.broadcast %161 : vector<1x1024xf32> to vector<32x1024xf32>
    %c0_57 = arith.constant 0 : index
    %c832 = arith.constant 832 : index
    %c0_58 = arith.constant 0 : index
    %163 = vector.load %arg3[%c0_57, %c832, %c0_58] : memref<1x1024x1024xf32, #tpu.memory_space<vmem>>, vector<1x32x1024xf32>
    %164 = vector.shape_cast %163 : vector<1x32x1024xf32> to vector<32x1024xf32>
    %165 = vector.shape_cast %162 : vector<32x1024xf32> to vector<1x32x1024xf32>
    tpu.vector_store %arg3[%c0_57, %c832, %c0_58], %165 {strides = array<i32>} : memref<1x1024x1024xf32, #tpu.memory_space<vmem>>, vector<1x32x1024xf32>,
    %166 = vector.extract_strided_slice %3 {offsets = [27, 0], sizes = [1, 1024], strides = [1, 1]} : vector<32x1024xf32> to vector<1x1024xf32>
    %167 = vector.shape_cast %166 : vector<1x1024xf32> to vector<1x1024xf32>
    %168 = vector.broadcast %167 : vector<1x1024xf32> to vector<32x1024xf32>
    %c0_59 = arith.constant 0 : index
    %c864 = arith.constant 864 : index
    %c0_60 = arith.constant 0 : index
    %169 = vector.load %arg3[%c0_59, %c864, %c0_60] : memref<1x1024x1024xf32, #tpu.memory_space<vmem>>, vector<1x32x1024xf32>
    %170 = vector.shape_cast %169 : vector<1x32x1024xf32> to vector<32x1024xf32>
    %171 = vector.shape_cast %168 : vector<32x1024xf32> to vector<1x32x1024xf32>
    tpu.vector_store %arg3[%c0_59, %c864, %c0_60], %171 {strides = array<i32>} : memref<1x1024x1024xf32, #tpu.memory_space<vmem>>, vector<1x32x1024xf32>,
    %172 = vector.extract_strided_slice %3 {offsets = [28, 0], sizes = [1, 1024], strides = [1, 1]} : vector<32x1024xf32> to vector<1x1024xf32>
    %173 = vector.shape_cast %172 : vector<1x1024xf32> to vector<1x1024xf32>
    %174 = vector.broadcast %173 : vector<1x1024xf32> to vector<32x1024xf32>
    %c0_61 = arith.constant 0 : index
    %c896 = arith.constant 896 : index
    %c0_62 = arith.constant 0 : index
    %175 = vector.load %arg3[%c0_61, %c896, %c0_62] : memref<1x1024x1024xf32, #tpu.memory_space<vmem>>, vector<1x32x1024xf32>
    %176 = vector.shape_cast %175 : vector<1x32x1024xf32> to vector<32x1024xf32>
    %177 = vector.shape_cast %174 : vector<32x1024xf32> to vector<1x32x1024xf32>
    tpu.vector_store %arg3[%c0_61, %c896, %c0_62], %177 {strides = array<i32>} : memref<1x1024x1024xf32, #tpu.memory_space<vmem>>, vector<1x32x1024xf32>,
    %178 = vector.extract_strided_slice %3 {offsets = [29, 0], sizes = [1, 1024], strides = [1, 1]} : vector<32x1024xf32> to vector<1x1024xf32>
    %179 = vector.shape_cast %178 : vector<1x1024xf32> to vector<1x1024xf32>
    %180 = vector.broadcast %179 : vector<1x1024xf32> to vector<32x1024xf32>
    %c0_63 = arith.constant 0 : index
    %c928 = arith.constant 928 : index
    %c0_64 = arith.constant 0 : index
    %181 = vector.load %arg3[%c0_63, %c928, %c0_64] : memref<1x1024x1024xf32, #tpu.memory_space<vmem>>, vector<1x32x1024xf32>
    %182 = vector.shape_cast %181 : vector<1x32x1024xf32> to vector<32x1024xf32>
    %183 = vector.shape_cast %180 : vector<32x1024xf32> to vector<1x32x1024xf32>
    tpu.vector_store %arg3[%c0_63, %c928, %c0_64], %183 {strides = array<i32>} : memref<1x1024x1024xf32, #tpu.memory_space<vmem>>, vector<1x32x1024xf32>,
    %184 = vector.extract_strided_slice %3 {offsets = [30, 0], sizes = [1, 1024], strides = [1, 1]} : vector<32x1024xf32> to vector<1x1024xf32>
    %185 = vector.shape_cast %184 : vector<1x1024xf32> to vector<1x1024xf32>
    %186 = vector.broadcast %185 : vector<1x1024xf32> to vector<32x1024xf32>
    %c0_65 = arith.constant 0 : index
    %c960 = arith.constant 960 : index
    %c0_66 = arith.constant 0 : index
    %187 = vector.load %arg3[%c0_65, %c960, %c0_66] : memref<1x1024x1024xf32, #tpu.memory_space<vmem>>, vector<1x32x1024xf32>
    %188 = vector.shape_cast %187 : vector<1x32x1024xf32> to vector<32x1024xf32>
    %189 = vector.shape_cast %186 : vector<32x1024xf32> to vector<1x32x1024xf32>
    tpu.vector_store %arg3[%c0_65, %c960, %c0_66], %189 {strides = array<i32>} : memref<1x1024x1024xf32, #tpu.memory_space<vmem>>, vector<1x32x1024xf32>,
    %190 = vector.extract_strided_slice %3 {offsets = [31, 0], sizes = [1, 1024], strides = [1, 1]} : vector<32x1024xf32> to vector<1x1024xf32>
    %191 = vector.shape_cast %190 : vector<1x1024xf32> to vector<1x1024xf32>
    %192 = vector.broadcast %191 : vector<1x1024xf32> to vector<32x1024xf32>
    %c0_67 = arith.constant 0 : index
    %c992 = arith.constant 992 : index
    %c0_68 = arith.constant 0 : index
    %193 = vector.load %arg3[%c0_67, %c992, %c0_68] : memref<1x1024x1024xf32, #tpu.memory_space<vmem>>, vector<1x32x1024xf32>
    %194 = vector.shape_cast %193 : vector<1x32x1024xf32> to vector<32x1024xf32>
    %195 = vector.shape_cast %192 : vector<32x1024xf32> to vector<1x32x1024xf32>
    tpu.vector_store %arg3[%c0_67, %c992, %c0_68], %195 {strides = array<i32>} : memref<1x1024x1024xf32, #tpu.memory_space<vmem>>, vector<1x32x1024xf32>,
    return
  }
  func.func @transform_0(%arg0: i32) -> (i32, i32, i32) {
    %c0_i32 = arith.constant 0 : i32
    %c0_i32_0 = arith.constant 0 : i32
    %c0_i32_1 = arith.constant 0 : i32
    return %arg0, %c0_i32, %c0_i32_0 : i32, i32, i32
  }
  func.func @transform_1(%arg0: i32) -> (i32, i32) {
    %c0_i32 = arith.constant 0 : i32
    %c0_i32_0 = arith.constant 0 : i32
    %c0_i32_1 = arith.constant 0 : i32
    return %c0_i32, %c0_i32_0 : i32, i32
  }
  func.func @transform_2(%arg0: i32) -> (i32, i32, i32) {
    %c0_i32 = arith.constant 0 : i32
    %c0_i32_0 = arith.constant 0 : i32
    %c0_i32_1 = arith.constant 0 : i32
    return %arg0, %c0_i32, %c0_i32_0 : i32, i32, i32
  }
}

</mosaic_0001>

<bundles_post_ra>
// kernel: non_id_reconstructor_forward.3
= control target key start
LH: loop header
LB: loop body
LE: loop exit
PB: predicated region body
PF: predicated region fallthrough
CT: control target
= control target key end

     0   :  { %7 = vsyncpa [#allocation3], 0  ;;  %s4702_s0 = inlined_call_operand.vmem [shape: f32[6,32,32], index: 0, kind: input, shape index: {}]   ;;  %s4703_s1 = inlined_call_operand.vmem [shape: f32[32,1024], index: 1, kind: input, shape index: {}]   ;;  %s4704_s2 = inlined_call_operand.hbm [shape: f32[6,1024,1024], index: 2, kind: output, shape index: {}]  }
   0x1   :  { %9 = vsyncpa [#allocation3 + $0x1], 0  ;;  %s2858_s9 = smov 0   ;;  %s2860_s10 = smov 0  }
   0x2   :  { %s2862_s11 = smov 0   ;;  %s2864_s12 = smov 0  }
   0x3 LB: > { %s2879_s13 = sadd.s32 4294967295, %s2837_s12   ;;  %s2671_s14 = sadd.s32 4294967294, %s2837_s12   ;;  %s2837_s12 = sphi %s2864_s12, %s4710_s12   ;;  %s2833_s11 = sphi %s2862_s11, %s4709_s11   ;;  %s2829_s10 = sphi %s2860_s10, %s4708_s10   ;;  %s2825_s9 = sphi %s2858_s9, %s4707_s9  }
   0x4   : > { %s2883_s15 = sadd.s32 1, %s2837_s12   ;;  %s69_s16 = sadd.s32 1, %s2833_s11 }
   0x5   : > { %s66_s17 = ssub.s32 %s2837_s12, %s2883_s15  ;;  %p79_p0 = scmp.ne.s32.totalorder %s2833_s11, %s2829_s10 }
   0x6   : > { %p67_p1 = scmp.eq.s32.totalorder %s66_s17, 0  ;;  %p80_p2 = scmp.eq.s32.totalorder %s2879_s13, 5 }
   0x7   : > { %p85_p3 = scmp.ne.s32.totalorder %s2829_s10, %s2825_s9  ;;  %p86_p4 = scmp.eq.s32.totalorder %s2671_s14, 5 }
   0x8   : > { %s2894_s18 = scalar_select %p67_p1, %s2833_s11, %s69_s16  }
   0x9   : > { %p2896_p5 = por %p80_p2, %p79_p0  ;;  %p2900_p6 = por %p86_p4, %p85_p3 }
   0xa   : > { %p2674_p7 = scmp.ge.s32.totalorder %s2837_s12, 1  ;;  %p115_p8 = scmp.lt.s32.totalorder %s2837_s12, 7 }
   0xc   : > { %p116_p9 = pnand %p2674_p7, %p115_p8 }
   0xd   : > { %v147_v0 = vld [vmem:[%s4703_s1 + $0x8] sm:$0xff] (!%p116_p9)  ;;  %v149_v2 = vld [vmem:[%s4703_s1 + $0x18] sm:$0xff] (!%p116_p9)  ;;  %p137_p10 = scmp.lt.s32.totalorder (!%p116_p9), %s2879_s13, 5  ;;  %v146_v5 = vld [vmem:[%s4703_s1] sm:$0xff] (!%p116_p9)  ;;  %v2839_v7 = vmov (!%p116_p9), 0.0   ;;  %vm178_vm0 = vcmask (!%p116_p9), 261120   ;;  %v547_v53 = vlaneseq (!%p116_p9) }
   0xe   : > { %119 = sbr.rel (%p116_p9) target bundleno = 766 (0x2fe), region = 28  ;;  %v155_v1 = vld [vmem:[%s4703_s1 + $0x48] sm:$0xff] (!%p116_p9)  ;;  %v157_v4 = vld [vmem:[%s4703_s1 + $0x58] sm:$0xff] (!%p116_p9)  ;;  %v154_v6 = vld [vmem:[%s4703_s1 + $0x40] sm:$0xff] (!%p116_p9)  ;;  %255 = vmatprep.mubr.f32.mxu0 (!%p116_p9), %v2839_v7  ;;  %344 = vmatprep.mubr.f32.mxu1 (!%p116_p9), %v2839_v7  ;;  %s2700_s8 = sshll.u32 (!%p116_p9), %s2879_s13, 17 }
   0xf   : > { %v2701_v3 = vpack.c.bf16 (!%p116_p9), %v155_v1, %v147_v0  ;;  %v2709_v8 = vpack.c.bf16 (!%p116_p9), %v157_v4, %v149_v2  ;;  %v2703_v9 = vpack.c.bf16 (!%p116_p9), %v154_v6, %v146_v5  ;;  %v148_v10 = vld [vmem:[%s4703_s1 + $0x10] sm:$0xff] (!%p116_p9)  ;;  %v163_v12 = vld [vmem:[%s4703_s1 + $0x88] sm:$0xff] (!%p116_p9)  ;;  %v165_v15 = vld [vmem:[%s4703_s1 + $0x98] sm:$0xff] (!%p116_p9)  ;;  %v548_v54 = vshrl.u32 (!%p116_p9), %v547_v53, 7  ;;  %s4597_s23 = scalar_lea.hbm (!%p116_p9), %s4704_s2, %s2700_s8 }
  0x10   : > { %v156_v11 = vld [vmem:[%s4703_s1 + $0x50] sm:$0xff] (!%p116_p9)  ;;  %v171_v14 = vld [vmem:[%s4703_s1 + $0xc8] sm:$0xff] (!%p116_p9)  ;;  %v173_v16 = vld [vmem:[%s4703_s1 + $0xd8] sm:$0xff] (!%p116_p9) }
  0x11   : > { %2702 = vmatprep.subr.bf16.mxu0 (!%p116_p9), %v2701_v3  ;;  %v2711_v13 = vpack.c.bf16 (!%p116_p9), %v156_v11, %v148_v10  ;;  %2710 = vmatprep.subr.bf16.mxu1 (!%p116_p9), %v2709_v8  ;;  %v2705_v17 = vpack.c.bf16 (!%p116_p9), %v171_v14, %v163_v12  ;;  %v2713_v18 = vpack.c.bf16 (!%p116_p9), %v173_v16, %v165_v15  ;;  %v162_v19 = vld [vmem:[%s4703_s1 + $0x80] sm:$0xff] (!%p116_p9)  ;;  %v164_v21 = vld [vmem:[%s4703_s1 + $0x90] sm:$0xff] (!%p116_p9)  ;;  %v151_v24 = vld [vmem:[%s4703_s1 + $0x28] sm:$0xff] (!%p116_p9)  ;;  %v3048_v55 = vsub.s32 (!%p116_p9), 0, %v548_v54 }
  0x12   : > { %2704 = vmatpush1.bf16.msra.mxu0 (!%p116_p9), %v2703_v9  ;;  %v170_v20 = vld [vmem:[%s4703_s1 + $0xc0] sm:$0xff] (!%p116_p9)  ;;  %v172_v23 = vld [vmem:[%s4703_s1 + $0xd0] sm:$0xff] (!%p116_p9)  ;;  %v159_v25 = vld [vmem:[%s4703_s1 + $0x68] sm:$0xff] (!%p116_p9)  ;;  %v3050_v56 = vsub.s32 (!%p116_p9), 1, %v548_v54  ;;  %v3052_v57 = vsub.s32 (!%p116_p9), 2, %v548_v54  ;;  %v3054_v58 = vsub.s32 (!%p116_p9), 3, %v548_v54 }
  0x13   : > { %2712 = vmatpush1.bf16.msra.mxu1 (!%p116_p9), %v2711_v13  ;;  %v2707_v22 = vpack.c.bf16 (!%p116_p9), %v170_v20, %v162_v19  ;;  %2706 = vmatprep.subr.bf16.mxu0 (!%p116_p9), %v2705_v17  ;;  %v2715_v26 = vpack.c.bf16 (!%p116_p9), %v172_v23, %v164_v21  ;;  %v2717_v27 = vpack.c.bf16 (!%p116_p9), %v159_v25, %v151_v24  ;;  %v153_v28 = vld [vmem:[%s4703_s1 + $0x38] sm:$0xff] (!%p116_p9)  ;;  %v150_v31 = vld [vmem:[%s4703_s1 + $0x20] sm:$0xff] (!%p116_p9)  ;;  %v152_v33 = vld [vmem:[%s4703_s1 + $0x30] sm:$0xff] (!%p116_p9)  ;;  %v3056_v59 = vsub.s32 (!%p116_p9), 4, %v548_v54 }
  0x14   : > { %2714 = vmatprep.subr.bf16.mxu1 (!%p116_p9), %v2713_v18  ;;  %v161_v29 = vld [vmem:[%s4703_s1 + $0x78] sm:$0xff] (!%p116_p9)  ;;  %v158_v32 = vld [vmem:[%s4703_s1 + $0x60] sm:$0xff] (!%p116_p9)  ;;  %v160_v36 = vld [vmem:[%s4703_s1 + $0x70] sm:$0xff] (!%p116_p9)  ;;  %v3058_v60 = vsub.s32 (!%p116_p9), 5, %v548_v54  ;;  %v3060_v61 = vsub.s32 (!%p116_p9), 6, %v548_v54  ;;  %v3062_v62 = vsub.s32 (!%p116_p9), 7, %v548_v54 }
  0x15   : > { %s138_s17 = scalar_select %p137_p10, %s2879_s13, 5  ;;  %v2725_v30 = vpack.c.bf16 %v161_v29, %v153_v28  ;;  %v2719_v35 = vpack.c.bf16 %v158_v32, %v150_v31  ;;  %v2727_v37 = vpack.c.bf16 %v160_v36, %v152_v33  ;;  %v167_v38 = vld [vmem:[%s4703_s1 + $0xa8] sm:$0xff]  ;;  %v169_v40 = vld [vmem:[%s4703_s1 + $0xb8] sm:$0xff]  ;;  %v166_v43 = vld [vmem:[%s4703_s1 + $0xa0] sm:$0xff] }
  0x16   : > { %2708 = vmatpush1.bf16.msra.mxu0 %v2707_v22  ;;  %v175_v39 = vld [vmem:[%s4703_s1 + $0xe8] sm:$0xff]  ;;  %v177_v42 = vld [vmem:[%s4703_s1 + $0xf8] sm:$0xff]  ;;  %v174_v44 = vld [vmem:[%s4703_s1 + $0xe0] sm:$0xff] }
  0x17   : > { %s2699_s5 = sshll.u32 %s138_s17, 5  ;;  %2716 = vmatpush1.bf16.msra.mxu1 %v2715_v26  ;;  %2718 = vmatprep.subr.bf16.mxu0 %v2717_v27  ;;  %v2721_v41 = vpack.c.bf16 %v175_v39, %v167_v38  ;;  %v2729_v45 = vpack.c.bf16 %v177_v42, %v169_v40  ;;  %v168_v46 = vld [vmem:[%s4703_s1 + $0xb0] sm:$0xff]  ;;  %v2723_v49 = vpack.c.bf16 %v174_v44, %v166_v43  ;;  %s2840_s17 = smov [#allocation2]  }
  0x18   : > { %s2961_s16 = scalar_lea.vmem %s4702_s0, %s2699_s5  ;;  %2726 = vmatprep.subr.bf16.mxu1 %v2725_v30  ;;  %v176_v47 = vld [vmem:[%s4703_s1 + $0xf0] sm:$0xff]  ;;  %s2779_s25 = sshll.u32 %s2840_s17, 4  ;;  %s2780_s25 = int_to_ptr.vmem [resolvable:$false] %s2779_s25 }
  0x19   : > { %v142_v34 = vld [vmem:[%s2961_s16] sm:$0xff]  ;;  %v143_v48 = vld [vmem:[%s2961_s16 + $0x8] sm:$0xff]  ;;  %v2731_v50 = vpack.c.bf16 %v176_v47, %v168_v46  ;;  %v144_v51 = vld [vmem:[%s2961_s16 + $0x10] sm:$0xff]  ;;  %s2781_s26 = scalar_lea.vmem %s2780_s25, 262144 }
  0x1a   : > { %2678 = vmatmul.mubr.msk.f32.vlgmr.msra.gmra.mrb[0].mxu0 %vm178_vm0, %v142_v34  ;;  %2682 = vmatmul.mubr.msk.f32.vlgmr.msra.gmra.mrb[0].mxu1 %vm178_vm0, %v142_v34  ;;  %v145_v52 = vld [vmem:[%s2961_s16 + $0x18] sm:$0xff]  ;;  %s134_s16 = sand.u32 1, %s2829_s10  }
  0x1b   : > { %2720 = vmatpush1.bf16.msra.mxu0 %v2719_v35  ;;  %2728 = vmatpush1.bf16.msra.mxu1 %v2727_v37  ;;  %s2675_s6 = sshll.u32 %s134_s16, 13  ;;  %s4661_s13 = scalar_lea.sflag [#allocation3], %s134_s16 }
  0x1c   : > { %261 = vmatprep.mubr.f32.mxu0 %v2839_v7  ;;  %350 = vmatprep.mubr.f32.mxu1 %v2839_v7  ;;  %s3076_s7 = scalar_lea.vmem [#allocation2], %s2675_s6 }
  0x1d   : > { %2722 = vmatprep.subr.bf16.mxu0 %v2721_v41  ;;  %2730 = vmatprep.subr.bf16.mxu1 %v2729_v45  ;;  %s2609_s14 = sshll.u32 %s3076_s7, 4  ;;  %s4601_s14 = int_to_ptr.vmem [resolvable:$true] %s2609_s14 }
  0x1e   : > { %2679 = vmatmul.mubr.msk.f32.gmra.mrb[2].mxu0 %vm178_vm0, %v143_v48  ;;  %2683 = vmatmul.mubr.msk.f32.gmra.mrb[2].mxu1 %vm178_vm0, %v143_v48  ;;  %s2775_s24 = scalar_lea.vmem %s4601_s14, 131072  ;;  %p2782_p0 = scmp.lt.s32.totalorder %s4601_s14, %s2780_s25 }
  0x1f   : > { %267 = vmatprep.mubr.f32.mxu0 %v2839_v7  ;;  %356 = vmatprep.mubr.f32.mxu1 %v2839_v7  ;;  %p2776_p11 = scmp.ne.s32.totalorder %s4601_s14, %s2775_s24  ;;  %p2783_p1 = scmp.lt.s32.totalorder %s2781_s26, %s2775_s24 }
  0x20   : > { %2724 = vmatpush1.bf16.msra.mxu0 %v2723_v49  ;;  %2732 = vmatpush1.bf16.msra.mxu1 %v2731_v50 }
  0x21   : > { %p2777_p12 = pnand %p2776_p11, %p2896_p5  ;;  %p2784_p2 = por %p2783_p1, %p2782_p0 }
  0x22   : > { %2680 = vmatmul.mubr.msk.f32.gmra.mrb[4].mxu0 %vm178_vm0, %v144_v51  ;;  %2684 = vmatmul.mubr.msk.f32.gmra.mrb[4].mxu1 %vm178_vm0, %v144_v51 }
  0x23   : > { %273 = vmatprep.mubr.f32.mxu0 %v2839_v7  ;;  %362 = vmatprep.mubr.f32.mxu1 %v2839_v7  ;;  %p2778_p13 = pneg %p2777_p12 }
  0x25   : > { %p2785_p3 = pnand %p2784_p2, %p2778_p13 }
  0x26   : > { %2681 = vmatmul.mubr.msk.f32.gmra.mrb[6].mxu0 %vm178_vm0, %v145_v52  ;;  %2685 = vmatmul.mubr.msk.f32.gmra.mrb[6].mxu1 %vm178_vm0, %v145_v52 }
  0x27   : > { %433 = vmatprep.mubr.f32.mxu0 %v2839_v7  ;;  %522 = vmatprep.mubr.f32.mxu1 %v2839_v7 }
  0x2a   : > { %2686 = vmatmul.mubr.msk.f32.vlgmr.msra.gmra.mrb[8].mxu0 %vm178_vm0, %v142_v34  ;;  %2690 = vmatmul.mubr.msk.f32.vlgmr.msra.gmra.mrb[8].mxu1 %vm178_vm0, %v142_v34 }
  0x2b   : > { %439 = vmatprep.mubr.f32.mxu0 %v2839_v7  ;;  %528 = vmatprep.mubr.f32.mxu1 %v2839_v7 }
  0x2e   : > { %2687 = vmatmul.mubr.msk.f32.gmra.mrb[10].mxu0 %vm178_vm0, %v143_v48  ;;  %2691 = vmatmul.mubr.msk.f32.gmra.mrb[10].mxu1 %vm178_vm0, %v143_v48 }
  0x2f   : > { %445 = vmatprep.mubr.f32.mxu0 %v2839_v7  ;;  %534 = vmatprep.mubr.f32.mxu1 %v2839_v7 }
  0x32   : > { %2688 = vmatmul.mubr.msk.f32.gmra.mrb[12].mxu0 %vm178_vm0, %v144_v51  ;;  %2692 = vmatmul.mubr.msk.f32.gmra.mrb[12].mxu1 %vm178_vm0, %v144_v51 }
  0x33   : > { %451 = vmatprep.mubr.f32.mxu0 %v2839_v7  ;;  %540 = vmatprep.mubr.f32.mxu1 %v2839_v7 }
  0x36   : > { %2689 = vmatmul.mubr.msk.f32.gmra.mrb[14].mxu0 %vm178_vm0, %v145_v52  ;;  %2693 = vmatmul.mubr.msk.f32.gmra.mrb[14].mxu1 %vm178_vm0, %v145_v52 }
  0xed   : > { %v257_v63 = vpop.f32.mrb[0].mxu0  ;;  %v346_v4 = vpop.f32.mrb[0].mxu1 }
  0xee   : > { %v550_v0 = vrot.slane %v257_v63, %v3048_v55  ;;  %v614_v1 = vrot.slane %v257_v63, %v3050_v56  ;;  %v678_v2 = vrot.slane %v257_v63, %v3052_v57  ;;  %v742_v3 = vrot.slane %v257_v63, %v3054_v58  ;;  %v3068_v5 = vpop.f32.mrb[1].mxu0  ;;  %v3074_v10 = vpop.f32.mrb[1].mxu1 }
  0xef   : > { %v806_v6 = vrot.slane %v257_v63, %v3056_v59  ;;  %v870_v7 = vrot.slane %v257_v63, %v3058_v60  ;;  %v934_v8 = vrot.slane %v257_v63, %v3060_v61  ;;  %v998_v9 = vrot.slane %v257_v63, %v3062_v62 }
  0xf0   : > { %579 = vst [vmem:[%s3076_s7] sm:$0xff] %v550_v0  ;;  %587 = vst [vmem:[%s3076_s7 + $0x40] sm:$0xff] %v550_v0  ;;  %v558_v11 = vrot.slane %v346_v4, %v3048_v55  ;;  %v622_v12 = vrot.slane %v346_v4, %v3050_v56  ;;  %v686_v13 = vrot.slane %v346_v4, %v3052_v57 }
  0xf1   : > { %595 = vst [vmem:[%s3076_s7 + $0x80] sm:$0xff] %v550_v0  ;;  %603 = vst [vmem:[%s3076_s7 + $0xc0] sm:$0xff] %v550_v0  ;;  %v750_v14 = vrot.slane %v346_v4, %v3054_v58  ;;  %v814_v15 = vrot.slane %v346_v4, %v3056_v59  ;;  %v878_v16 = vrot.slane %v346_v4, %v3058_v60  ;;  %v3118_v19 = vpop.f32.mrb[2].mxu0  ;;  %v3144_v24 = vpop.f32.mrb[2].mxu1 }
  0xf2   : > { %643 = vst [vmem:[%s3076_s7 + $0x100] sm:$0xff] %v614_v1  ;;  %651 = vst [vmem:[%s3076_s7 + $0x140] sm:$0xff] %v614_v1  ;;  %v942_v17 = vrot.slane %v346_v4, %v3060_v61  ;;  %v1006_v18 = vrot.slane %v346_v4, %v3062_v62  ;;  %v554_v20 = vrot.slane %v3068_v5, %v3048_v55  ;;  %v3146_v25 = vpop.f32.mrb[3].mxu0  ;;  %v3172_v30 = vpop.f32.mrb[3].mxu1 }
  0xf3   : > { %659 = vst [vmem:[%s3076_s7 + $0x180] sm:$0xff] %v614_v1  ;;  %667 = vst [vmem:[%s3076_s7 + $0x1c0] sm:$0xff] %v614_v1  ;;  %v618_v21 = vrot.slane %v3068_v5, %v3050_v56  ;;  %v682_v22 = vrot.slane %v3068_v5, %v3052_v57  ;;  %v746_v23 = vrot.slane %v3068_v5, %v3054_v58 }
  0xf4   : > { %707 = vst [vmem:[%s3076_s7 + $0x200] sm:$0xff] %v678_v2  ;;  %715 = vst [vmem:[%s3076_s7 + $0x240] sm:$0xff] %v678_v2  ;;  %v810_v26 = vrot.slane %v3068_v5, %v3056_v59  ;;  %v874_v27 = vrot.slane %v3068_v5, %v3058_v60  ;;  %v938_v28 = vrot.slane %v3068_v5, %v3060_v61 }
  0xf5   : > { %723 = vst [vmem:[%s3076_s7 + $0x280] sm:$0xff] %v678_v2  ;;  %731 = vst [vmem:[%s3076_s7 + $0x2c0] sm:$0xff] %v678_v2  ;;  %v1002_v29 = vrot.slane %v3068_v5, %v3062_v62  ;;  %v562_v31 = vrot.slane %v3074_v10, %v3048_v55  ;;  %v626_v32 = vrot.slane %v3074_v10, %v3050_v56  ;;  %v3222_v39 = vpop.f32.mrb[4].mxu0  ;;  %v3248_v44 = vpop.f32.mrb[4].mxu1 }
  0xf6   : > { %771 = vst [vmem:[%s3076_s7 + $0x300] sm:$0xff] %v742_v3  ;;  %779 = vst [vmem:[%s3076_s7 + $0x340] sm:$0xff] %v742_v3  ;;  %v690_v33 = vrot.slane %v3074_v10, %v3052_v57  ;;  %v754_v34 = vrot.slane %v3074_v10, %v3054_v58  ;;  %v818_v35 = vrot.slane %v3074_v10, %v3056_v59  ;;  %v3250_v45 = vpop.f32.mrb[5].mxu0  ;;  %v3276_v50 = vpop.f32.mrb[5].mxu1 }
  0xf7   : > { %787 = vst [vmem:[%s3076_s7 + $0x380] sm:$0xff] %v742_v3  ;;  %795 = vst [vmem:[%s3076_s7 + $0x3c0] sm:$0xff] %v742_v3  ;;  %v882_v36 = vrot.slane %v3074_v10, %v3058_v60  ;;  %v946_v37 = vrot.slane %v3074_v10, %v3060_v61  ;;  %v1010_v38 = vrot.slane %v3074_v10, %v3062_v62 }
  0xf8   : > { %835 = vst [vmem:[%s3076_s7 + $0x400] sm:$0xff] %v806_v6  ;;  %843 = vst [vmem:[%s3076_s7 + $0x440] sm:$0xff] %v806_v6  ;;  %v1062_v40 = vrot.slane %v3118_v19, %v3048_v55  ;;  %v1126_v41 = vrot.slane %v3118_v19, %v3050_v56  ;;  %v1190_v42 = vrot.slane %v3118_v19, %v3052_v57 }
  0xf9   : > { %851 = vst [vmem:[%s3076_s7 + $0x480] sm:$0xff] %v806_v6  ;;  %859 = vst [vmem:[%s3076_s7 + $0x4c0] sm:$0xff] %v806_v6  ;;  %v1254_v43 = vrot.slane %v3118_v19, %v3054_v58  ;;  %v1318_v46 = vrot.slane %v3118_v19, %v3056_v59  ;;  %v1382_v47 = vrot.slane %v3118_v19, %v3058_v60  ;;  %v3326_v3 = vpop.f32.mrb[6].mxu0 }
  0xfa   : > { %899 = vst [vmem:[%s3076_s7 + $0x500] sm:$0xff] %v870_v7  ;;  %907 = vst [vmem:[%s3076_s7 + $0x540] sm:$0xff] %v870_v7  ;;  %v1446_v48 = vrot.slane %v3118_v19, %v3060_v61  ;;  %v1510_v49 = vrot.slane %v3118_v19, %v3062_v62  ;;  %v1070_v51 = vrot.slane %v3144_v24, %v3048_v55 }
  0xfb   : > { %915 = vst [vmem:[%s3076_s7 + $0x580] sm:$0xff] %v870_v7  ;;  %923 = vst [vmem:[%s3076_s7 + $0x5c0] sm:$0xff] %v870_v7  ;;  %v1134_v52 = vrot.slane %v3144_v24, %v3050_v56  ;;  %v1198_v53 = vrot.slane %v3144_v24, %v3052_v57  ;;  %v1262_v54 = vrot.slane %v3144_v24, %v3054_v58 }
  0xfc   : > { %963 = vst [vmem:[%s3076_s7 + $0x600] sm:$0xff] %v934_v8  ;;  %971 = vst [vmem:[%s3076_s7 + $0x640] sm:$0xff] %v934_v8  ;;  %v1326_v63 = vrot.slane %v3144_v24, %v3056_v59  ;;  %v1390_v0 = vrot.slane %v3144_v24, %v3058_v60  ;;  %v1454_v1 = vrot.slane %v3144_v24, %v3060_v61 }
  0xfd   : > { %979 = vst [vmem:[%s3076_s7 + $0x680] sm:$0xff] %v934_v8  ;;  %987 = vst [vmem:[%s3076_s7 + $0x6c0] sm:$0xff] %v934_v8  ;;  %v1518_v2 = vrot.slane %v3144_v24, %v3062_v62  ;;  %v1066_v4 = vrot.slane %v3146_v25, %v3048_v55  ;;  %v1130_v5 = vrot.slane %v3146_v25, %v3050_v56  ;;  %v3352_v8 = vpop.f32.mrb[6].mxu1 }
  0xfe   : > { %1027 = vst [vmem:[%s3076_s7 + $0x700] sm:$0xff] %v998_v9  ;;  %1035 = vst [vmem:[%s3076_s7 + $0x740] sm:$0xff] %v998_v9  ;;  %v1194_v6 = vrot.slane %v3146_v25, %v3052_v57  ;;  %v1258_v7 = vrot.slane %v3146_v25, %v3054_v58  ;;  %v1322_v10 = vrot.slane %v3146_v25, %v3056_v59 }
  0xff   : > { %1043 = vst [vmem:[%s3076_s7 + $0x780] sm:$0xff] %v998_v9  ;;  %1051 = vst [vmem:[%s3076_s7 + $0x7c0] sm:$0xff] %v998_v9  ;;  %v3354_v9 = vpop.f32.mrb[7].mxu0  ;;  %v1330_v19 = vrot.slane %v3172_v30, %v3056_v59  ;;  %v1574_v24 = vrot.slane %v3222_v39, %v3048_v55 }
 0x100   : > { %581 = vst [vmem:[%s3076_s7 + $0x10] sm:$0xff] %v558_v11  ;;  %589 = vst [vmem:[%s3076_s7 + $0x50] sm:$0xff] %v558_v11 }
 0x101   : > { %597 = vst [vmem:[%s3076_s7 + $0x90] sm:$0xff] %v558_v11  ;;  %605 = vst [vmem:[%s3076_s7 + $0xd0] sm:$0xff] %v558_v11  ;;  %v1386_v11 = vrot.slane %v3146_v25, %v3058_v60 }
 0x102   : > { %645 = vst [vmem:[%s3076_s7 + $0x110] sm:$0xff] %v622_v12  ;;  %653 = vst [vmem:[%s3076_s7 + $0x150] sm:$0xff] %v622_v12 }
 0x103   : > { %661 = vst [vmem:[%s3076_s7 + $0x190] sm:$0xff] %v622_v12  ;;  %669 = vst [vmem:[%s3076_s7 + $0x1d0] sm:$0xff] %v622_v12  ;;  %v1450_v12 = vrot.slane %v3146_v25, %v3060_v61 }
 0x104   : > { %709 = vst [vmem:[%s3076_s7 + $0x210] sm:$0xff] %v686_v13  ;;  %717 = vst [vmem:[%s3076_s7 + $0x250] sm:$0xff] %v686_v13 }
 0x105   : > { %725 = vst [vmem:[%s3076_s7 + $0x290] sm:$0xff] %v686_v13  ;;  %733 = vst [vmem:[%s3076_s7 + $0x2d0] sm:$0xff] %v686_v13  ;;  %v1514_v13 = vrot.slane %v3146_v25, %v3062_v62  ;;  %v1638_v25 = vrot.slane %v3222_v39, %v3050_v56 }
 0x106   : > { %773 = vst [vmem:[%s3076_s7 + $0x310] sm:$0xff] %v750_v14  ;;  %781 = vst [vmem:[%s3076_s7 + $0x350] sm:$0xff] %v750_v14 }
 0x107   : > { %789 = vst [vmem:[%s3076_s7 + $0x390] sm:$0xff] %v750_v14  ;;  %797 = vst [vmem:[%s3076_s7 + $0x3d0] sm:$0xff] %v750_v14  ;;  %v3380_v14 = vpop.f32.mrb[7].mxu1 }
 0x108   : > { %837 = vst [vmem:[%s3076_s7 + $0x410] sm:$0xff] %v814_v15  ;;  %845 = vst [vmem:[%s3076_s7 + $0x450] sm:$0xff] %v814_v15 }
 0x109   : > { %853 = vst [vmem:[%s3076_s7 + $0x490] sm:$0xff] %v814_v15  ;;  %861 = vst [vmem:[%s3076_s7 + $0x4d0] sm:$0xff] %v814_v15  ;;  %v1074_v15 = vrot.slane %v3172_v30, %v3048_v55 }
 0x10a   : > { %901 = vst [vmem:[%s3076_s7 + $0x510] sm:$0xff] %v878_v16  ;;  %909 = vst [vmem:[%s3076_s7 + $0x550] sm:$0xff] %v878_v16 }
 0x10b   : > { %917 = vst [vmem:[%s3076_s7 + $0x590] sm:$0xff] %v878_v16  ;;  %925 = vst [vmem:[%s3076_s7 + $0x5d0] sm:$0xff] %v878_v16  ;;  %v1138_v16 = vrot.slane %v3172_v30, %v3050_v56 }
 0x10c   : > { %965 = vst [vmem:[%s3076_s7 + $0x610] sm:$0xff] %v942_v17  ;;  %973 = vst [vmem:[%s3076_s7 + $0x650] sm:$0xff] %v942_v17 }
 0x10d   : > { %981 = vst [vmem:[%s3076_s7 + $0x690] sm:$0xff] %v942_v17  ;;  %989 = vst [vmem:[%s3076_s7 + $0x6d0] sm:$0xff] %v942_v17  ;;  %v1202_v17 = vrot.slane %v3172_v30, %v3052_v57 }
 0x10e   : > { %1029 = vst [vmem:[%s3076_s7 + $0x710] sm:$0xff] %v1006_v18  ;;  %1037 = vst [vmem:[%s3076_s7 + $0x750] sm:$0xff] %v1006_v18 }
 0x10f   : > { %1045 = vst [vmem:[%s3076_s7 + $0x790] sm:$0xff] %v1006_v18  ;;  %1053 = vst [vmem:[%s3076_s7 + $0x7d0] sm:$0xff] %v1006_v18  ;;  %v1266_v18 = vrot.slane %v3172_v30, %v3054_v58 }
 0x110   : > { %580 = vst [vmem:[%s3076_s7 + $0x8] sm:$0xff] %v554_v20  ;;  %588 = vst [vmem:[%s3076_s7 + $0x48] sm:$0xff] %v554_v20 }
 0x111   : > { %596 = vst [vmem:[%s3076_s7 + $0x88] sm:$0xff] %v554_v20  ;;  %604 = vst [vmem:[%s3076_s7 + $0xc8] sm:$0xff] %v554_v20  ;;  %v1394_v20 = vrot.slane %v3172_v30, %v3058_v60 }
 0x112   : > { %644 = vst [vmem:[%s3076_s7 + $0x108] sm:$0xff] %v618_v21  ;;  %652 = vst [vmem:[%s3076_s7 + $0x148] sm:$0xff] %v618_v21 }
 0x113   : > { %660 = vst [vmem:[%s3076_s7 + $0x188] sm:$0xff] %v618_v21  ;;  %668 = vst [vmem:[%s3076_s7 + $0x1c8] sm:$0xff] %v618_v21  ;;  %v1458_v21 = vrot.slane %v3172_v30, %v3060_v61 }
 0x114   : > { %708 = vst [vmem:[%s3076_s7 + $0x208] sm:$0xff] %v682_v22  ;;  %716 = vst [vmem:[%s3076_s7 + $0x248] sm:$0xff] %v682_v22 }
 0x115   : > { %724 = vst [vmem:[%s3076_s7 + $0x288] sm:$0xff] %v682_v22  ;;  %732 = vst [vmem:[%s3076_s7 + $0x2c8] sm:$0xff] %v682_v22  ;;  %v1522_v22 = vrot.slane %v3172_v30, %v3062_v62  ;;  %v1830_v30 = vrot.slane %v3222_v39, %v3056_v59 }
 0x116   : > { %772 = vst [vmem:[%s3076_s7 + $0x308] sm:$0xff] %v746_v23  ;;  %780 = vst [vmem:[%s3076_s7 + $0x348] sm:$0xff] %v746_v23 }
 0x117   : > { %788 = vst [vmem:[%s3076_s7 + $0x388] sm:$0xff] %v746_v23  ;;  %796 = vst [vmem:[%s3076_s7 + $0x3c8] sm:$0xff] %v746_v23  ;;  %v3430_v23 = vpop.f32.mrb[8].mxu0 }
 0x118   : > { %836 = vst [vmem:[%s3076_s7 + $0x408] sm:$0xff] %v810_v26  ;;  %844 = vst [vmem:[%s3076_s7 + $0x448] sm:$0xff] %v810_v26 }
 0x119   : > { %852 = vst [vmem:[%s3076_s7 + $0x488] sm:$0xff] %v810_v26  ;;  %860 = vst [vmem:[%s3076_s7 + $0x4c8] sm:$0xff] %v810_v26  ;;  %v1702_v26 = vrot.slane %v3222_v39, %v3052_v57 }
 0x11a   : > { %900 = vst [vmem:[%s3076_s7 + $0x508] sm:$0xff] %v874_v27  ;;  %908 = vst [vmem:[%s3076_s7 + $0x548] sm:$0xff] %v874_v27 }
 0x11b   : > { %916 = vst [vmem:[%s3076_s7 + $0x588] sm:$0xff] %v874_v27  ;;  %924 = vst [vmem:[%s3076_s7 + $0x5c8] sm:$0xff] %v874_v27  ;;  %v1766_v27 = vrot.slane %v3222_v39, %v3054_v58 }
 0x11c   : > { %964 = vst [vmem:[%s3076_s7 + $0x608] sm:$0xff] %v938_v28  ;;  %972 = vst [vmem:[%s3076_s7 + $0x648] sm:$0xff] %v938_v28 }
 0x11d   : > { %980 = vst [vmem:[%s3076_s7 + $0x688] sm:$0xff] %v938_v28  ;;  %988 = vst [vmem:[%s3076_s7 + $0x6c8] sm:$0xff] %v938_v28  ;;  %v3456_v28 = vpop.f32.mrb[8].mxu1 }
 0x11e   : > { %1028 = vst [vmem:[%s3076_s7 + $0x708] sm:$0xff] %v1002_v29  ;;  %1036 = vst [vmem:[%s3076_s7 + $0x748] sm:$0xff] %v1002_v29 }
 0x11f   : > { %1044 = vst [vmem:[%s3076_s7 + $0x788] sm:$0xff] %v1002_v29  ;;  %1052 = vst [vmem:[%s3076_s7 + $0x7c8] sm:$0xff] %v1002_v29  ;;  %v3458_v29 = vpop.f32.mrb[9].mxu0 }
 0x120   : > { %582 = vst [vmem:[%s3076_s7 + $0x18] sm:$0xff] %v562_v31  ;;  %590 = vst [vmem:[%s3076_s7 + $0x58] sm:$0xff] %v562_v31 }
 0x121   : > { %598 = vst [vmem:[%s3076_s7 + $0x98] sm:$0xff] %v562_v31  ;;  %606 = vst [vmem:[%s3076_s7 + $0xd8] sm:$0xff] %v562_v31  ;;  %v1894_v31 = vrot.slane %v3222_v39, %v3058_v60 }
 0x122   : > { %646 = vst [vmem:[%s3076_s7 + $0x118] sm:$0xff] %v626_v32  ;;  %654 = vst [vmem:[%s3076_s7 + $0x158] sm:$0xff] %v626_v32 }
 0x123   : > { %662 = vst [vmem:[%s3076_s7 + $0x198] sm:$0xff] %v626_v32  ;;  %670 = vst [vmem:[%s3076_s7 + $0x1d8] sm:$0xff] %v626_v32  ;;  %v1958_v32 = vrot.slane %v3222_v39, %v3060_v61 }
 0x124   : > { %710 = vst [vmem:[%s3076_s7 + $0x218] sm:$0xff] %v690_v33  ;;  %718 = vst [vmem:[%s3076_s7 + $0x258] sm:$0xff] %v690_v33 }
 0x125   : > { %726 = vst [vmem:[%s3076_s7 + $0x298] sm:$0xff] %v690_v33  ;;  %734 = vst [vmem:[%s3076_s7 + $0x2d8] sm:$0xff] %v690_v33  ;;  %v2022_v33 = vrot.slane %v3222_v39, %v3062_v62  ;;  %v1838_v39 = vrot.slane %v3248_v44, %v3056_v59 }
 0x126   : > { %774 = vst [vmem:[%s3076_s7 + $0x318] sm:$0xff] %v754_v34  ;;  %782 = vst [vmem:[%s3076_s7 + $0x358] sm:$0xff] %v754_v34 }
 0x127   : > { %790 = vst [vmem:[%s3076_s7 + $0x398] sm:$0xff] %v754_v34  ;;  %798 = vst [vmem:[%s3076_s7 + $0x3d8] sm:$0xff] %v754_v34  ;;  %v3484_v34 = vpop.f32.mrb[9].mxu1 }
 0x128   : > { %838 = vst [vmem:[%s3076_s7 + $0x418] sm:$0xff] %v818_v35  ;;  %846 = vst [vmem:[%s3076_s7 + $0x458] sm:$0xff] %v818_v35 }
 0x129   : > { %854 = vst [vmem:[%s3076_s7 + $0x498] sm:$0xff] %v818_v35  ;;  %862 = vst [vmem:[%s3076_s7 + $0x4d8] sm:$0xff] %v818_v35  ;;  %v1582_v35 = vrot.slane %v3248_v44, %v3048_v55 }
 0x12a   : > { %902 = vst [vmem:[%s3076_s7 + $0x518] sm:$0xff] %v882_v36  ;;  %910 = vst [vmem:[%s3076_s7 + $0x558] sm:$0xff] %v882_v36 }
 0x12b   : > { %918 = vst [vmem:[%s3076_s7 + $0x598] sm:$0xff] %v882_v36  ;;  %926 = vst [vmem:[%s3076_s7 + $0x5d8] sm:$0xff] %v882_v36  ;;  %v1646_v36 = vrot.slane %v3248_v44, %v3050_v56 }
 0x12c   : > { %966 = vst [vmem:[%s3076_s7 + $0x618] sm:$0xff] %v946_v37  ;;  %974 = vst [vmem:[%s3076_s7 + $0x658] sm:$0xff] %v946_v37 }
 0x12d   : > { %982 = vst [vmem:[%s3076_s7 + $0x698] sm:$0xff] %v946_v37  ;;  %990 = vst [vmem:[%s3076_s7 + $0x6d8] sm:$0xff] %v946_v37  ;;  %v1710_v37 = vrot.slane %v3248_v44, %v3052_v57 }
 0x12e   : > { %1030 = vst [vmem:[%s3076_s7 + $0x718] sm:$0xff] %v1010_v38  ;;  %1038 = vst [vmem:[%s3076_s7 + $0x758] sm:$0xff] %v1010_v38 }
 0x12f   : > { %1046 = vst [vmem:[%s3076_s7 + $0x798] sm:$0xff] %v1010_v38  ;;  %1054 = vst [vmem:[%s3076_s7 + $0x7d8] sm:$0xff] %v1010_v38  ;;  %v1774_v38 = vrot.slane %v3248_v44, %v3054_v58 }
 0x130   : > { %1091 = vst [vmem:[%s3076_s7 + $0x800] sm:$0xff] %v1062_v40  ;;  %1099 = vst [vmem:[%s3076_s7 + $0x840] sm:$0xff] %v1062_v40 }
 0x131   : > { %1107 = vst [vmem:[%s3076_s7 + $0x880] sm:$0xff] %v1062_v40  ;;  %1115 = vst [vmem:[%s3076_s7 + $0x8c0] sm:$0xff] %v1062_v40  ;;  %v1902_v40 = vrot.slane %v3248_v44, %v3058_v60 }
 0x132   : > { %1155 = vst [vmem:[%s3076_s7 + $0x900] sm:$0xff] %v1126_v41  ;;  %1163 = vst [vmem:[%s3076_s7 + $0x940] sm:$0xff] %v1126_v41 }
 0x133   : > { %1171 = vst [vmem:[%s3076_s7 + $0x980] sm:$0xff] %v1126_v41  ;;  %1179 = vst [vmem:[%s3076_s7 + $0x9c0] sm:$0xff] %v1126_v41  ;;  %v1966_v41 = vrot.slane %v3248_v44, %v3060_v61 }
 0x134   : > { %1219 = vst [vmem:[%s3076_s7 + $0xa00] sm:$0xff] %v1190_v42  ;;  %1227 = vst [vmem:[%s3076_s7 + $0xa40] sm:$0xff] %v1190_v42 }
 0x135   : > { %1235 = vst [vmem:[%s3076_s7 + $0xa80] sm:$0xff] %v1190_v42  ;;  %1243 = vst [vmem:[%s3076_s7 + $0xac0] sm:$0xff] %v1190_v42  ;;  %v2030_v42 = vrot.slane %v3248_v44, %v3062_v62  ;;  %v1578_v44 = vrot.slane %v3250_v45, %v3048_v55 }
 0x136   : > { %1283 = vst [vmem:[%s3076_s7 + $0xb00] sm:$0xff] %v1254_v43  ;;  %1291 = vst [vmem:[%s3076_s7 + $0xb40] sm:$0xff] %v1254_v43 }
 0x137   : > { %1299 = vst [vmem:[%s3076_s7 + $0xb80] sm:$0xff] %v1254_v43  ;;  %1307 = vst [vmem:[%s3076_s7 + $0xbc0] sm:$0xff] %v1254_v43  ;;  %v3534_v43 = vpop.f32.mrb[10].mxu0 }
 0x138   : > { %1347 = vst [vmem:[%s3076_s7 + $0xc00] sm:$0xff] %v1318_v46  ;;  %1355 = vst [vmem:[%s3076_s7 + $0xc40] sm:$0xff] %v1318_v46 }
 0x139   : > { %1363 = vst [vmem:[%s3076_s7 + $0xc80] sm:$0xff] %v1318_v46  ;;  %1371 = vst [vmem:[%s3076_s7 + $0xcc0] sm:$0xff] %v1318_v46  ;;  %v1642_v46 = vrot.slane %v3250_v45, %v3050_v56 }
 0x13a   : > { %1411 = vst [vmem:[%s3076_s7 + $0xd00] sm:$0xff] %v1382_v47  ;;  %1419 = vst [vmem:[%s3076_s7 + $0xd40] sm:$0xff] %v1382_v47 }
 0x13b   : > { %1427 = vst [vmem:[%s3076_s7 + $0xd80] sm:$0xff] %v1382_v47  ;;  %1435 = vst [vmem:[%s3076_s7 + $0xdc0] sm:$0xff] %v1382_v47  ;;  %v1706_v47 = vrot.slane %v3250_v45, %v3052_v57 }
 0x13c   : > { %1475 = vst [vmem:[%s3076_s7 + $0xe00] sm:$0xff] %v1446_v48  ;;  %1483 = vst [vmem:[%s3076_s7 + $0xe40] sm:$0xff] %v1446_v48 }
 0x13d   : > { %1491 = vst [vmem:[%s3076_s7 + $0xe80] sm:$0xff] %v1446_v48  ;;  %1499 = vst [vmem:[%s3076_s7 + $0xec0] sm:$0xff] %v1446_v48  ;;  %v1770_v48 = vrot.slane %v3250_v45, %v3054_v58 }
 0x13e   : > { %1539 = vst [vmem:[%s3076_s7 + $0xf00] sm:$0xff] %v1510_v49  ;;  %1547 = vst [vmem:[%s3076_s7 + $0xf40] sm:$0xff] %v1510_v49 }
 0x13f   : > { %1555 = vst [vmem:[%s3076_s7 + $0xf80] sm:$0xff] %v1510_v49  ;;  %1563 = vst [vmem:[%s3076_s7 + $0xfc0] sm:$0xff] %v1510_v49  ;;  %v3560_v49 = vpop.f32.mrb[10].mxu1 }
 0x140   : > { %1093 = vst [vmem:[%s3076_s7 + $0x810] sm:$0xff] %v1070_v51  ;;  %1101 = vst [vmem:[%s3076_s7 + $0x850] sm:$0xff] %v1070_v51 }
 0x141   : > { %1109 = vst [vmem:[%s3076_s7 + $0x890] sm:$0xff] %v1070_v51  ;;  %1117 = vst [vmem:[%s3076_s7 + $0x8d0] sm:$0xff] %v1070_v51  ;;  %v3562_v51 = vpop.f32.mrb[11].mxu0 }
 0x142   : > { %1157 = vst [vmem:[%s3076_s7 + $0x910] sm:$0xff] %v1134_v52  ;;  %1165 = vst [vmem:[%s3076_s7 + $0x950] sm:$0xff] %v1134_v52 }
 0x143   : > { %1173 = vst [vmem:[%s3076_s7 + $0x990] sm:$0xff] %v1134_v52  ;;  %1181 = vst [vmem:[%s3076_s7 + $0x9d0] sm:$0xff] %v1134_v52  ;;  %v1834_v52 = vrot.slane %v3250_v45, %v3056_v59 }
 0x144   : > { %1221 = vst [vmem:[%s3076_s7 + $0xa10] sm:$0xff] %v1198_v53  ;;  %1229 = vst [vmem:[%s3076_s7 + $0xa50] sm:$0xff] %v1198_v53 }
 0x145   : > { %1237 = vst [vmem:[%s3076_s7 + $0xa90] sm:$0xff] %v1198_v53  ;;  %1245 = vst [vmem:[%s3076_s7 + $0xad0] sm:$0xff] %v1198_v53  ;;  %v1898_v53 = vrot.slane %v3250_v45, %v3058_v60 }
 0x146   : > { %1285 = vst [vmem:[%s3076_s7 + $0xb10] sm:$0xff] %v1262_v54  ;;  %1293 = vst [vmem:[%s3076_s7 + $0xb50] sm:$0xff] %v1262_v54 }
 0x147   : > { %1301 = vst [vmem:[%s3076_s7 + $0xb90] sm:$0xff] %v1262_v54  ;;  %1309 = vst [vmem:[%s3076_s7 + $0xbd0] sm:$0xff] %v1262_v54  ;;  %v1962_v54 = vrot.slane %v3250_v45, %v3060_v61 }
 0x148   : > { %1349 = vst [vmem:[%s3076_s7 + $0xc10] sm:$0xff] %v1326_v63  ;;  %1357 = vst [vmem:[%s3076_s7 + $0xc50] sm:$0xff] %v1326_v63 }
 0x149   : > { %1365 = vst [vmem:[%s3076_s7 + $0xc90] sm:$0xff] %v1326_v63  ;;  %1373 = vst [vmem:[%s3076_s7 + $0xcd0] sm:$0xff] %v1326_v63  ;;  %v2026_v63 = vrot.slane %v3250_v45, %v3062_v62  ;;  %v1586_v45 = vrot.slane %v3276_v50, %v3048_v55 }
 0x14a   : > { %1413 = vst [vmem:[%s3076_s7 + $0xd10] sm:$0xff] %v1390_v0  ;;  %1421 = vst [vmem:[%s3076_s7 + $0xd50] sm:$0xff] %v1390_v0 }
 0x14b   : > { %1429 = vst [vmem:[%s3076_s7 + $0xd90] sm:$0xff] %v1390_v0  ;;  %1437 = vst [vmem:[%s3076_s7 + $0xdd0] sm:$0xff] %v1390_v0  ;;  %v3588_v0 = vpop.f32.mrb[11].mxu1 }
 0x14c   : > { %1477 = vst [vmem:[%s3076_s7 + $0xe10] sm:$0xff] %v1454_v1  ;;  %1485 = vst [vmem:[%s3076_s7 + $0xe50] sm:$0xff] %v1454_v1 }
 0x14d   : > { %1493 = vst [vmem:[%s3076_s7 + $0xe90] sm:$0xff] %v1454_v1  ;;  %1501 = vst [vmem:[%s3076_s7 + $0xed0] sm:$0xff] %v1454_v1  ;;  %v1650_v1 = vrot.slane %v3276_v50, %v3050_v56 }
 0x14e   : > { %1541 = vst [vmem:[%s3076_s7 + $0xf10] sm:$0xff] %v1518_v2  ;;  %1549 = vst [vmem:[%s3076_s7 + $0xf50] sm:$0xff] %v1518_v2 }
 0x14f   : > { %1557 = vst [vmem:[%s3076_s7 + $0xf90] sm:$0xff] %v1518_v2  ;;  %1565 = vst [vmem:[%s3076_s7 + $0xfd0] sm:$0xff] %v1518_v2  ;;  %v1714_v2 = vrot.slane %v3276_v50, %v3052_v57 }
 0x150   : > { %1092 = vst [vmem:[%s3076_s7 + $0x808] sm:$0xff] %v1066_v4  ;;  %1100 = vst [vmem:[%s3076_s7 + $0x848] sm:$0xff] %v1066_v4 }
 0x151   : > { %1108 = vst [vmem:[%s3076_s7 + $0x888] sm:$0xff] %v1066_v4  ;;  %1116 = vst [vmem:[%s3076_s7 + $0x8c8] sm:$0xff] %v1066_v4  ;;  %v1778_v4 = vrot.slane %v3276_v50, %v3054_v58 }
 0x152   : > { %1156 = vst [vmem:[%s3076_s7 + $0x908] sm:$0xff] %v1130_v5  ;;  %1164 = vst [vmem:[%s3076_s7 + $0x948] sm:$0xff] %v1130_v5 }
 0x153   : > { %1172 = vst [vmem:[%s3076_s7 + $0x988] sm:$0xff] %v1130_v5  ;;  %1180 = vst [vmem:[%s3076_s7 + $0x9c8] sm:$0xff] %v1130_v5  ;;  %v1842_v5 = vrot.slane %v3276_v50, %v3056_v59 }
 0x154   : > { %1220 = vst [vmem:[%s3076_s7 + $0xa08] sm:$0xff] %v1194_v6  ;;  %1228 = vst [vmem:[%s3076_s7 + $0xa48] sm:$0xff] %v1194_v6 }
 0x155   : > { %1236 = vst [vmem:[%s3076_s7 + $0xa88] sm:$0xff] %v1194_v6  ;;  %1244 = vst [vmem:[%s3076_s7 + $0xac8] sm:$0xff] %v1194_v6  ;;  %v1906_v6 = vrot.slane %v3276_v50, %v3058_v60 }
 0x156   : > { %1284 = vst [vmem:[%s3076_s7 + $0xb08] sm:$0xff] %v1258_v7  ;;  %1292 = vst [vmem:[%s3076_s7 + $0xb48] sm:$0xff] %v1258_v7 }
 0x157   : > { %1300 = vst [vmem:[%s3076_s7 + $0xb88] sm:$0xff] %v1258_v7  ;;  %1308 = vst [vmem:[%s3076_s7 + $0xbc8] sm:$0xff] %v1258_v7  ;;  %v1970_v7 = vrot.slane %v3276_v50, %v3060_v61 }
 0x158   : > { %1348 = vst [vmem:[%s3076_s7 + $0xc08] sm:$0xff] %v1322_v10  ;;  %1356 = vst [vmem:[%s3076_s7 + $0xc48] sm:$0xff] %v1322_v10 }
 0x159   : > { %1364 = vst [vmem:[%s3076_s7 + $0xc88] sm:$0xff] %v1322_v10  ;;  %1372 = vst [vmem:[%s3076_s7 + $0xcc8] sm:$0xff] %v1322_v10  ;;  %v2034_v10 = vrot.slane %v3276_v50, %v3062_v62  ;;  %v2086_v50 = vrot.slane %v3326_v3, %v3048_v55 }
 0x15a   : > { %1412 = vst [vmem:[%s3076_s7 + $0xd08] sm:$0xff] %v1386_v11  ;;  %1420 = vst [vmem:[%s3076_s7 + $0xd48] sm:$0xff] %v1386_v11 }
 0x15b   : > { %1428 = vst [vmem:[%s3076_s7 + $0xd88] sm:$0xff] %v1386_v11  ;;  %1436 = vst [vmem:[%s3076_s7 + $0xdc8] sm:$0xff] %v1386_v11  ;;  %v3638_v11 = vpop.f32.mrb[12].mxu0 }
 0x15c   : > { %1476 = vst [vmem:[%s3076_s7 + $0xe08] sm:$0xff] %v1450_v12  ;;  %1484 = vst [vmem:[%s3076_s7 + $0xe48] sm:$0xff] %v1450_v12 }
 0x15d   : > { %1492 = vst [vmem:[%s3076_s7 + $0xe88] sm:$0xff] %v1450_v12  ;;  %1500 = vst [vmem:[%s3076_s7 + $0xec8] sm:$0xff] %v1450_v12  ;;  %v2150_v12 = vrot.slane %v3326_v3, %v3050_v56 }
 0x15e   : > { %1540 = vst [vmem:[%s3076_s7 + $0xf08] sm:$0xff] %v1514_v13  ;;  %1548 = vst [vmem:[%s3076_s7 + $0xf48] sm:$0xff] %v1514_v13 }
 0x15f   : > { %1556 = vst [vmem:[%s3076_s7 + $0xf88] sm:$0xff] %v1514_v13  ;;  %1564 = vst [vmem:[%s3076_s7 + $0xfc8] sm:$0xff] %v1514_v13  ;;  %v2214_v13 = vrot.slane %v3326_v3, %v3052_v57 }
 0x160   : > { %1094 = vst [vmem:[%s3076_s7 + $0x818] sm:$0xff] %v1074_v15  ;;  %1102 = vst [vmem:[%s3076_s7 + $0x858] sm:$0xff] %v1074_v15 }
 0x161   : > { %1110 = vst [vmem:[%s3076_s7 + $0x898] sm:$0xff] %v1074_v15  ;;  %1118 = vst [vmem:[%s3076_s7 + $0x8d8] sm:$0xff] %v1074_v15  ;;  %v2278_v15 = vrot.slane %v3326_v3, %v3054_v58 }
 0x162   : > { %1158 = vst [vmem:[%s3076_s7 + $0x918] sm:$0xff] %v1138_v16  ;;  %1166 = vst [vmem:[%s3076_s7 + $0x958] sm:$0xff] %v1138_v16 }
 0x163   : > { %1174 = vst [vmem:[%s3076_s7 + $0x998] sm:$0xff] %v1138_v16  ;;  %1182 = vst [vmem:[%s3076_s7 + $0x9d8] sm:$0xff] %v1138_v16  ;;  %v3664_v16 = vpop.f32.mrb[12].mxu1 }
 0x164   : > { %1222 = vst [vmem:[%s3076_s7 + $0xa18] sm:$0xff] %v1202_v17  ;;  %1230 = vst [vmem:[%s3076_s7 + $0xa58] sm:$0xff] %v1202_v17 }
 0x165   : > { %1238 = vst [vmem:[%s3076_s7 + $0xa98] sm:$0xff] %v1202_v17  ;;  %1246 = vst [vmem:[%s3076_s7 + $0xad8] sm:$0xff] %v1202_v17  ;;  %v3666_v17 = vpop.f32.mrb[13].mxu0 }
 0x166   : > { %1286 = vst [vmem:[%s3076_s7 + $0xb18] sm:$0xff] %v1266_v18  ;;  %1294 = vst [vmem:[%s3076_s7 + $0xb58] sm:$0xff] %v1266_v18 }
 0x167   : > { %1302 = vst [vmem:[%s3076_s7 + $0xb98] sm:$0xff] %v1266_v18  ;;  %1310 = vst [vmem:[%s3076_s7 + $0xbd8] sm:$0xff] %v1266_v18  ;;  %v2342_v18 = vrot.slane %v3326_v3, %v3056_v59 }
 0x168   : > { %1350 = vst [vmem:[%s3076_s7 + $0xc18] sm:$0xff] %v1330_v19  ;;  %1358 = vst [vmem:[%s3076_s7 + $0xc58] sm:$0xff] %v1330_v19 }
 0x169   : > { %1366 = vst [vmem:[%s3076_s7 + $0xc98] sm:$0xff] %v1330_v19  ;;  %1374 = vst [vmem:[%s3076_s7 + $0xcd8] sm:$0xff] %v1330_v19  ;;  %v2406_v19 = vrot.slane %v3326_v3, %v3058_v60 }
 0x16a   : > { %1414 = vst [vmem:[%s3076_s7 + $0xd18] sm:$0xff] %v1394_v20  ;;  %1422 = vst [vmem:[%s3076_s7 + $0xd58] sm:$0xff] %v1394_v20 }
 0x16b   : > { %1430 = vst [vmem:[%s3076_s7 + $0xd98] sm:$0xff] %v1394_v20  ;;  %1438 = vst [vmem:[%s3076_s7 + $0xdd8] sm:$0xff] %v1394_v20  ;;  %v2470_v20 = vrot.slane %v3326_v3, %v3060_v61 }
 0x16c   : > { %1478 = vst [vmem:[%s3076_s7 + $0xe18] sm:$0xff] %v1458_v21  ;;  %1486 = vst [vmem:[%s3076_s7 + $0xe58] sm:$0xff] %v1458_v21 }
 0x16d   : > { %1494 = vst [vmem:[%s3076_s7 + $0xe98] sm:$0xff] %v1458_v21  ;;  %1502 = vst [vmem:[%s3076_s7 + $0xed8] sm:$0xff] %v1458_v21  ;;  %v2534_v21 = vrot.slane %v3326_v3, %v3062_v62  ;;  %v2094_v3 = vrot.slane %v3352_v8, %v3048_v55 }
 0x16e   : > { %1542 = vst [vmem:[%s3076_s7 + $0xf18] sm:$0xff] %v1522_v22  ;;  %1550 = vst [vmem:[%s3076_s7 + $0xf58] sm:$0xff] %v1522_v22 }
 0x16f   : > { %1558 = vst [vmem:[%s3076_s7 + $0xf98] sm:$0xff] %v1522_v22  ;;  %1566 = vst [vmem:[%s3076_s7 + $0xfd8] sm:$0xff] %v1522_v22  ;;  %v3692_v22 = vpop.f32.mrb[13].mxu1 }
 0x170   : > { %1603 = vst [vmem:[%s3076_s7 + $0x1000] sm:$0xff] %v1574_v24  ;;  %1611 = vst [vmem:[%s3076_s7 + $0x1040] sm:$0xff] %v1574_v24 }
 0x171   : > { %1619 = vst [vmem:[%s3076_s7 + $0x1080] sm:$0xff] %v1574_v24  ;;  %1627 = vst [vmem:[%s3076_s7 + $0x10c0] sm:$0xff] %v1574_v24  ;;  %v2158_v24 = vrot.slane %v3352_v8, %v3050_v56 }
 0x172   : > { %1667 = vst [vmem:[%s3076_s7 + $0x1100] sm:$0xff] %v1638_v25  ;;  %1675 = vst [vmem:[%s3076_s7 + $0x1140] sm:$0xff] %v1638_v25 }
 0x173   : > { %1683 = vst [vmem:[%s3076_s7 + $0x1180] sm:$0xff] %v1638_v25  ;;  %1691 = vst [vmem:[%s3076_s7 + $0x11c0] sm:$0xff] %v1638_v25  ;;  %v2222_v25 = vrot.slane %v3352_v8, %v3052_v57 }
 0x174   : > { %1731 = vst [vmem:[%s3076_s7 + $0x1200] sm:$0xff] %v1702_v26  ;;  %1739 = vst [vmem:[%s3076_s7 + $0x1240] sm:$0xff] %v1702_v26 }
 0x175   : > { %1747 = vst [vmem:[%s3076_s7 + $0x1280] sm:$0xff] %v1702_v26  ;;  %1755 = vst [vmem:[%s3076_s7 + $0x12c0] sm:$0xff] %v1702_v26  ;;  %v2286_v26 = vrot.slane %v3352_v8, %v3054_v58 }
 0x176   : > { %1795 = vst [vmem:[%s3076_s7 + $0x1300] sm:$0xff] %v1766_v27  ;;  %1803 = vst [vmem:[%s3076_s7 + $0x1340] sm:$0xff] %v1766_v27 }
 0x177   : > { %1811 = vst [vmem:[%s3076_s7 + $0x1380] sm:$0xff] %v1766_v27  ;;  %1819 = vst [vmem:[%s3076_s7 + $0x13c0] sm:$0xff] %v1766_v27  ;;  %v2350_v27 = vrot.slane %v3352_v8, %v3056_v59 }
 0x178   : > { %1859 = vst [vmem:[%s3076_s7 + $0x1400] sm:$0xff] %v1830_v30  ;;  %1867 = vst [vmem:[%s3076_s7 + $0x1440] sm:$0xff] %v1830_v30 }
 0x179   : > { %1875 = vst [vmem:[%s3076_s7 + $0x1480] sm:$0xff] %v1830_v30  ;;  %1883 = vst [vmem:[%s3076_s7 + $0x14c0] sm:$0xff] %v1830_v30  ;;  %v2414_v30 = vrot.slane %v3352_v8, %v3058_v60 }
 0x17a   : > { %1923 = vst [vmem:[%s3076_s7 + $0x1500] sm:$0xff] %v1894_v31  ;;  %1931 = vst [vmem:[%s3076_s7 + $0x1540] sm:$0xff] %v1894_v31 }
 0x17b   : > { %1939 = vst [vmem:[%s3076_s7 + $0x1580] sm:$0xff] %v1894_v31  ;;  %1947 = vst [vmem:[%s3076_s7 + $0x15c0] sm:$0xff] %v1894_v31  ;;  %v2478_v31 = vrot.slane %v3352_v8, %v3060_v61 }
 0x17c   : > { %1987 = vst [vmem:[%s3076_s7 + $0x1600] sm:$0xff] %v1958_v32  ;;  %1995 = vst [vmem:[%s3076_s7 + $0x1640] sm:$0xff] %v1958_v32 }
 0x17d   : > { %2003 = vst [vmem:[%s3076_s7 + $0x1680] sm:$0xff] %v1958_v32  ;;  %2011 = vst [vmem:[%s3076_s7 + $0x16c0] sm:$0xff] %v1958_v32  ;;  %v2542_v32 = vrot.slane %v3352_v8, %v3062_v62  ;;  %v2090_v8 = vrot.slane %v3354_v9, %v3048_v55 }
 0x17e   : > { %2051 = vst [vmem:[%s3076_s7 + $0x1700] sm:$0xff] %v2022_v33  ;;  %2059 = vst [vmem:[%s3076_s7 + $0x1740] sm:$0xff] %v2022_v33 }
 0x17f   : > { %2067 = vst [vmem:[%s3076_s7 + $0x1780] sm:$0xff] %v2022_v33  ;;  %2075 = vst [vmem:[%s3076_s7 + $0x17c0] sm:$0xff] %v2022_v33  ;;  %v3742_v33 = vpop.f32.mrb[14].mxu0 }
 0x180   : > { %1605 = vst [vmem:[%s3076_s7 + $0x1010] sm:$0xff] %v1582_v35  ;;  %1613 = vst [vmem:[%s3076_s7 + $0x1050] sm:$0xff] %v1582_v35 }
 0x181   : > { %1621 = vst [vmem:[%s3076_s7 + $0x1090] sm:$0xff] %v1582_v35  ;;  %1629 = vst [vmem:[%s3076_s7 + $0x10d0] sm:$0xff] %v1582_v35  ;;  %v2154_v35 = vrot.slane %v3354_v9, %v3050_v56 }
 0x182   : > { %1669 = vst [vmem:[%s3076_s7 + $0x1110] sm:$0xff] %v1646_v36  ;;  %1677 = vst [vmem:[%s3076_s7 + $0x1150] sm:$0xff] %v1646_v36 }
 0x183   : > { %1685 = vst [vmem:[%s3076_s7 + $0x1190] sm:$0xff] %v1646_v36  ;;  %1693 = vst [vmem:[%s3076_s7 + $0x11d0] sm:$0xff] %v1646_v36  ;;  %v2218_v36 = vrot.slane %v3354_v9, %v3052_v57 }
 0x184   : > { %1733 = vst [vmem:[%s3076_s7 + $0x1210] sm:$0xff] %v1710_v37  ;;  %1741 = vst [vmem:[%s3076_s7 + $0x1250] sm:$0xff] %v1710_v37 }
 0x185   : > { %1749 = vst [vmem:[%s3076_s7 + $0x1290] sm:$0xff] %v1710_v37  ;;  %1757 = vst [vmem:[%s3076_s7 + $0x12d0] sm:$0xff] %v1710_v37  ;;  %v2282_v37 = vrot.slane %v3354_v9, %v3054_v58 }
 0x186   : > { %1797 = vst [vmem:[%s3076_s7 + $0x1310] sm:$0xff] %v1774_v38  ;;  %1805 = vst [vmem:[%s3076_s7 + $0x1350] sm:$0xff] %v1774_v38 }
 0x187   : > { %1813 = vst [vmem:[%s3076_s7 + $0x1390] sm:$0xff] %v1774_v38  ;;  %1821 = vst [vmem:[%s3076_s7 + $0x13d0] sm:$0xff] %v1774_v38  ;;  %v3768_v38 = vpop.f32.mrb[14].mxu1 }
 0x188   : > { %1861 = vst [vmem:[%s3076_s7 + $0x1410] sm:$0xff] %v1838_v39  ;;  %1869 = vst [vmem:[%s3076_s7 + $0x1450] sm:$0xff] %v1838_v39 }
 0x189   : > { %1877 = vst [vmem:[%s3076_s7 + $0x1490] sm:$0xff] %v1838_v39  ;;  %1885 = vst [vmem:[%s3076_s7 + $0x14d0] sm:$0xff] %v1838_v39  ;;  %v3770_v39 = vpop.f32.mrb[15].mxu0 }
 0x18a   : > { %1925 = vst [vmem:[%s3076_s7 + $0x1510] sm:$0xff] %v1902_v40  ;;  %1933 = vst [vmem:[%s3076_s7 + $0x1550] sm:$0xff] %v1902_v40 }
 0x18b   : > { %1941 = vst [vmem:[%s3076_s7 + $0x1590] sm:$0xff] %v1902_v40  ;;  %1949 = vst [vmem:[%s3076_s7 + $0x15d0] sm:$0xff] %v1902_v40  ;;  %v2346_v40 = vrot.slane %v3354_v9, %v3056_v59 }
 0x18c   : > { %1989 = vst [vmem:[%s3076_s7 + $0x1610] sm:$0xff] %v1966_v41  ;;  %1997 = vst [vmem:[%s3076_s7 + $0x1650] sm:$0xff] %v1966_v41 }
 0x18d   : > { %2005 = vst [vmem:[%s3076_s7 + $0x1690] sm:$0xff] %v1966_v41  ;;  %2013 = vst [vmem:[%s3076_s7 + $0x16d0] sm:$0xff] %v1966_v41  ;;  %v2410_v41 = vrot.slane %v3354_v9, %v3058_v60 }
 0x18e   : > { %2053 = vst [vmem:[%s3076_s7 + $0x1710] sm:$0xff] %v2030_v42  ;;  %2061 = vst [vmem:[%s3076_s7 + $0x1750] sm:$0xff] %v2030_v42 }
 0x18f   : > { %2069 = vst [vmem:[%s3076_s7 + $0x1790] sm:$0xff] %v2030_v42  ;;  %2077 = vst [vmem:[%s3076_s7 + $0x17d0] sm:$0xff] %v2030_v42  ;;  %v2474_v42 = vrot.slane %v3354_v9, %v3060_v61 }
 0x190   : > { %1604 = vst [vmem:[%s3076_s7 + $0x1008] sm:$0xff] %v1578_v44  ;;  %1612 = vst [vmem:[%s3076_s7 + $0x1048] sm:$0xff] %v1578_v44 }
 0x191   : > { %1620 = vst [vmem:[%s3076_s7 + $0x1088] sm:$0xff] %v1578_v44  ;;  %1628 = vst [vmem:[%s3076_s7 + $0x10c8] sm:$0xff] %v1578_v44  ;;  %v2538_v44 = vrot.slane %v3354_v9, %v3062_v62  ;;  %v2098_v9 = vrot.slane %v3380_v14, %v3048_v55 }
 0x192   : > { %1668 = vst [vmem:[%s3076_s7 + $0x1108] sm:$0xff] %v1642_v46  ;;  %1676 = vst [vmem:[%s3076_s7 + $0x1148] sm:$0xff] %v1642_v46 }
 0x193   : > { %1684 = vst [vmem:[%s3076_s7 + $0x1188] sm:$0xff] %v1642_v46  ;;  %1692 = vst [vmem:[%s3076_s7 + $0x11c8] sm:$0xff] %v1642_v46  ;;  %v3796_v46 = vpop.f32.mrb[15].mxu1 }
 0x194   : > { %1732 = vst [vmem:[%s3076_s7 + $0x1208] sm:$0xff] %v1706_v47  ;;  %1740 = vst [vmem:[%s3076_s7 + $0x1248] sm:$0xff] %v1706_v47 }
 0x195   : > { %1748 = vst [vmem:[%s3076_s7 + $0x1288] sm:$0xff] %v1706_v47  ;;  %1756 = vst [vmem:[%s3076_s7 + $0x12c8] sm:$0xff] %v1706_v47  ;;  %v2162_v47 = vrot.slane %v3380_v14, %v3050_v56 }
 0x196   : > { %1796 = vst [vmem:[%s3076_s7 + $0x1308] sm:$0xff] %v1770_v48  ;;  %1804 = vst [vmem:[%s3076_s7 + $0x1348] sm:$0xff] %v1770_v48 }
 0x197   : > { %1812 = vst [vmem:[%s3076_s7 + $0x1388] sm:$0xff] %v1770_v48  ;;  %1820 = vst [vmem:[%s3076_s7 + $0x13c8] sm:$0xff] %v1770_v48  ;;  %v2226_v48 = vrot.slane %v3380_v14, %v3052_v57 }
 0x198   : > { %1860 = vst [vmem:[%s3076_s7 + $0x1408] sm:$0xff] %v1834_v52  ;;  %1868 = vst [vmem:[%s3076_s7 + $0x1448] sm:$0xff] %v1834_v52 }
 0x199   : > { %1876 = vst [vmem:[%s3076_s7 + $0x1488] sm:$0xff] %v1834_v52  ;;  %1884 = vst [vmem:[%s3076_s7 + $0x14c8] sm:$0xff] %v1834_v52  ;;  %v2290_v52 = vrot.slane %v3380_v14, %v3054_v58 }
 0x19a   : > { %1924 = vst [vmem:[%s3076_s7 + $0x1508] sm:$0xff] %v1898_v53  ;;  %1932 = vst [vmem:[%s3076_s7 + $0x1548] sm:$0xff] %v1898_v53 }
 0x19b   : > { %1940 = vst [vmem:[%s3076_s7 + $0x1588] sm:$0xff] %v1898_v53  ;;  %1948 = vst [vmem:[%s3076_s7 + $0x15c8] sm:$0xff] %v1898_v53  ;;  %v2354_v53 = vrot.slane %v3380_v14, %v3056_v59 }
 0x19c   : > { %1988 = vst [vmem:[%s3076_s7 + $0x1608] sm:$0xff] %v1962_v54  ;;  %1996 = vst [vmem:[%s3076_s7 + $0x1648] sm:$0xff] %v1962_v54 }
 0x19d   : > { %2004 = vst [vmem:[%s3076_s7 + $0x1688] sm:$0xff] %v1962_v54  ;;  %2012 = vst [vmem:[%s3076_s7 + $0x16c8] sm:$0xff] %v1962_v54  ;;  %v2418_v54 = vrot.slane %v3380_v14, %v3058_v60 }
 0x19e   : > { %2052 = vst [vmem:[%s3076_s7 + $0x1708] sm:$0xff] %v2026_v63  ;;  %2060 = vst [vmem:[%s3076_s7 + $0x1748] sm:$0xff] %v2026_v63 }
 0x19f   : > { %2068 = vst [vmem:[%s3076_s7 + $0x1788] sm:$0xff] %v2026_v63  ;;  %2076 = vst [vmem:[%s3076_s7 + $0x17c8] sm:$0xff] %v2026_v63  ;;  %v2482_v63 = vrot.slane %v3380_v14, %v3060_v61 }
 0x1a0   : > { %1606 = vst [vmem:[%s3076_s7 + $0x1018] sm:$0xff] %v1586_v45  ;;  %1614 = vst [vmem:[%s3076_s7 + $0x1058] sm:$0xff] %v1586_v45 }
 0x1a1   : > { %1622 = vst [vmem:[%s3076_s7 + $0x1098] sm:$0xff] %v1586_v45  ;;  %1630 = vst [vmem:[%s3076_s7 + $0x10d8] sm:$0xff] %v1586_v45  ;;  %v2546_v45 = vrot.slane %v3380_v14, %v3062_v62  ;;  %v566_v14 = vrot.slane %v3430_v23, %v3048_v55 }
 0x1a2   : > { %1670 = vst [vmem:[%s3076_s7 + $0x1118] sm:$0xff] %v1650_v1  ;;  %1678 = vst [vmem:[%s3076_s7 + $0x1158] sm:$0xff] %v1650_v1 }
 0x1a3   : > { %1686 = vst [vmem:[%s3076_s7 + $0x1198] sm:$0xff] %v1650_v1  ;;  %1694 = vst [vmem:[%s3076_s7 + $0x11d8] sm:$0xff] %v1650_v1  ;;  %v630_v1 = vrot.slane %v3430_v23, %v3050_v56 }
 0x1a4   : > { %1734 = vst [vmem:[%s3076_s7 + $0x1218] sm:$0xff] %v1714_v2  ;;  %1742 = vst [vmem:[%s3076_s7 + $0x1258] sm:$0xff] %v1714_v2 }
 0x1a5   : > { %1750 = vst [vmem:[%s3076_s7 + $0x1298] sm:$0xff] %v1714_v2  ;;  %1758 = vst [vmem:[%s3076_s7 + $0x12d8] sm:$0xff] %v1714_v2  ;;  %v694_v2 = vrot.slane %v3430_v23, %v3052_v57 }
 0x1a6   : > { %1798 = vst [vmem:[%s3076_s7 + $0x1318] sm:$0xff] %v1778_v4  ;;  %1806 = vst [vmem:[%s3076_s7 + $0x1358] sm:$0xff] %v1778_v4 }
 0x1a7   : > { %1814 = vst [vmem:[%s3076_s7 + $0x1398] sm:$0xff] %v1778_v4  ;;  %1822 = vst [vmem:[%s3076_s7 + $0x13d8] sm:$0xff] %v1778_v4  ;;  %v758_v4 = vrot.slane %v3430_v23, %v3054_v58 }
 0x1a8   : > { %1862 = vst [vmem:[%s3076_s7 + $0x1418] sm:$0xff] %v1842_v5  ;;  %1870 = vst [vmem:[%s3076_s7 + $0x1458] sm:$0xff] %v1842_v5 }
 0x1a9   : > { %1878 = vst [vmem:[%s3076_s7 + $0x1498] sm:$0xff] %v1842_v5  ;;  %1886 = vst [vmem:[%s3076_s7 + $0x14d8] sm:$0xff] %v1842_v5  ;;  %v822_v5 = vrot.slane %v3430_v23, %v3056_v59 }
 0x1aa   : > { %1926 = vst [vmem:[%s3076_s7 + $0x1518] sm:$0xff] %v1906_v6  ;;  %1934 = vst [vmem:[%s3076_s7 + $0x1558] sm:$0xff] %v1906_v6 }
 0x1ab   : > { %1942 = vst [vmem:[%s3076_s7 + $0x1598] sm:$0xff] %v1906_v6  ;;  %1950 = vst [vmem:[%s3076_s7 + $0x15d8] sm:$0xff] %v1906_v6  ;;  %v886_v6 = vrot.slane %v3430_v23, %v3058_v60 }
 0x1ac   : > { %1990 = vst [vmem:[%s3076_s7 + $0x1618] sm:$0xff] %v1970_v7  ;;  %1998 = vst [vmem:[%s3076_s7 + $0x1658] sm:$0xff] %v1970_v7 }
 0x1ad   : > { %2006 = vst [vmem:[%s3076_s7 + $0x1698] sm:$0xff] %v1970_v7  ;;  %2014 = vst [vmem:[%s3076_s7 + $0x16d8] sm:$0xff] %v1970_v7  ;;  %v950_v7 = vrot.slane %v3430_v23, %v3060_v61 }
 0x1ae   : > { %2054 = vst [vmem:[%s3076_s7 + $0x1718] sm:$0xff] %v2034_v10  ;;  %2062 = vst [vmem:[%s3076_s7 + $0x1758] sm:$0xff] %v2034_v10 }
 0x1af   : > { %2070 = vst [vmem:[%s3076_s7 + $0x1798] sm:$0xff] %v2034_v10  ;;  %2078 = vst [vmem:[%s3076_s7 + $0x17d8] sm:$0xff] %v2034_v10  ;;  %v1014_v10 = vrot.slane %v3430_v23, %v3062_v62  ;;  %v574_v23 = vrot.slane %v3456_v28, %v3048_v55 }
 0x1b0   : > { %2115 = vst [vmem:[%s3076_s7 + $0x1800] sm:$0xff] %v2086_v50  ;;  %2123 = vst [vmem:[%s3076_s7 + $0x1840] sm:$0xff] %v2086_v50 }
 0x1b1   : > { %2131 = vst [vmem:[%s3076_s7 + $0x1880] sm:$0xff] %v2086_v50  ;;  %2139 = vst [vmem:[%s3076_s7 + $0x18c0] sm:$0xff] %v2086_v50  ;;  %v638_v50 = vrot.slane %v3456_v28, %v3050_v56 }
 0x1b2   : > { %2179 = vst [vmem:[%s3076_s7 + $0x1900] sm:$0xff] %v2150_v12  ;;  %2187 = vst [vmem:[%s3076_s7 + $0x1940] sm:$0xff] %v2150_v12 }
 0x1b3   : > { %2195 = vst [vmem:[%s3076_s7 + $0x1980] sm:$0xff] %v2150_v12  ;;  %2203 = vst [vmem:[%s3076_s7 + $0x19c0] sm:$0xff] %v2150_v12  ;;  %v702_v12 = vrot.slane %v3456_v28, %v3052_v57 }
 0x1b4   : > { %2243 = vst [vmem:[%s3076_s7 + $0x1a00] sm:$0xff] %v2214_v13  ;;  %2251 = vst [vmem:[%s3076_s7 + $0x1a40] sm:$0xff] %v2214_v13 }
 0x1b5   : > { %2259 = vst [vmem:[%s3076_s7 + $0x1a80] sm:$0xff] %v2214_v13  ;;  %2267 = vst [vmem:[%s3076_s7 + $0x1ac0] sm:$0xff] %v2214_v13  ;;  %v766_v13 = vrot.slane %v3456_v28, %v3054_v58 }
 0x1b6   : > { %2307 = vst [vmem:[%s3076_s7 + $0x1b00] sm:$0xff] %v2278_v15  ;;  %2315 = vst [vmem:[%s3076_s7 + $0x1b40] sm:$0xff] %v2278_v15 }
 0x1b7   : > { %2323 = vst [vmem:[%s3076_s7 + $0x1b80] sm:$0xff] %v2278_v15  ;;  %2331 = vst [vmem:[%s3076_s7 + $0x1bc0] sm:$0xff] %v2278_v15  ;;  %v830_v15 = vrot.slane %v3456_v28, %v3056_v59 }
 0x1b8   : > { %2371 = vst [vmem:[%s3076_s7 + $0x1c00] sm:$0xff] %v2342_v18  ;;  %2379 = vst [vmem:[%s3076_s7 + $0x1c40] sm:$0xff] %v2342_v18 }
 0x1b9   : > { %2387 = vst [vmem:[%s3076_s7 + $0x1c80] sm:$0xff] %v2342_v18  ;;  %2395 = vst [vmem:[%s3076_s7 + $0x1cc0] sm:$0xff] %v2342_v18  ;;  %v894_v18 = vrot.slane %v3456_v28, %v3058_v60 }
 0x1ba   : > { %2435 = vst [vmem:[%s3076_s7 + $0x1d00] sm:$0xff] %v2406_v19  ;;  %2443 = vst [vmem:[%s3076_s7 + $0x1d40] sm:$0xff] %v2406_v19 }
 0x1bb   : > { %2451 = vst [vmem:[%s3076_s7 + $0x1d80] sm:$0xff] %v2406_v19  ;;  %2459 = vst [vmem:[%s3076_s7 + $0x1dc0] sm:$0xff] %v2406_v19  ;;  %v958_v19 = vrot.slane %v3456_v28, %v3060_v61 }
 0x1bc   : > { %2499 = vst [vmem:[%s3076_s7 + $0x1e00] sm:$0xff] %v2470_v20  ;;  %2507 = vst [vmem:[%s3076_s7 + $0x1e40] sm:$0xff] %v2470_v20 }
 0x1bd   : > { %2515 = vst [vmem:[%s3076_s7 + $0x1e80] sm:$0xff] %v2470_v20  ;;  %2523 = vst [vmem:[%s3076_s7 + $0x1ec0] sm:$0xff] %v2470_v20  ;;  %v1022_v20 = vrot.slane %v3456_v28, %v3062_v62  ;;  %v570_v28 = vrot.slane %v3458_v29, %v3048_v55 }
 0x1be   : > { %2563 = vst [vmem:[%s3076_s7 + $0x1f00] sm:$0xff] %v2534_v21  ;;  %2571 = vst [vmem:[%s3076_s7 + $0x1f40] sm:$0xff] %v2534_v21 }
 0x1bf   : > { %2579 = vst [vmem:[%s3076_s7 + $0x1f80] sm:$0xff] %v2534_v21  ;;  %2587 = vst [vmem:[%s3076_s7 + $0x1fc0] sm:$0xff] %v2534_v21  ;;  %v634_v21 = vrot.slane %v3458_v29, %v3050_v56 }
 0x1c0   : > { %2117 = vst [vmem:[%s3076_s7 + $0x1810] sm:$0xff] %v2094_v3  ;;  %2125 = vst [vmem:[%s3076_s7 + $0x1850] sm:$0xff] %v2094_v3 }
 0x1c1   : > { %2133 = vst [vmem:[%s3076_s7 + $0x1890] sm:$0xff] %v2094_v3  ;;  %2141 = vst [vmem:[%s3076_s7 + $0x18d0] sm:$0xff] %v2094_v3  ;;  %v698_v3 = vrot.slane %v3458_v29, %v3052_v57 }
 0x1c2   : > { %2181 = vst [vmem:[%s3076_s7 + $0x1910] sm:$0xff] %v2158_v24  ;;  %2189 = vst [vmem:[%s3076_s7 + $0x1950] sm:$0xff] %v2158_v24 }
 0x1c3   : > { %2197 = vst [vmem:[%s3076_s7 + $0x1990] sm:$0xff] %v2158_v24  ;;  %2205 = vst [vmem:[%s3076_s7 + $0x19d0] sm:$0xff] %v2158_v24  ;;  %v762_v24 = vrot.slane %v3458_v29, %v3054_v58 }
 0x1c4   : > { %2245 = vst [vmem:[%s3076_s7 + $0x1a10] sm:$0xff] %v2222_v25  ;;  %2253 = vst [vmem:[%s3076_s7 + $0x1a50] sm:$0xff] %v2222_v25 }
 0x1c5   : > { %2261 = vst [vmem:[%s3076_s7 + $0x1a90] sm:$0xff] %v2222_v25  ;;  %2269 = vst [vmem:[%s3076_s7 + $0x1ad0] sm:$0xff] %v2222_v25  ;;  %v826_v25 = vrot.slane %v3458_v29, %v3056_v59 }
 0x1c6   : > { %2309 = vst [vmem:[%s3076_s7 + $0x1b10] sm:$0xff] %v2286_v26  ;;  %2317 = vst [vmem:[%s3076_s7 + $0x1b50] sm:$0xff] %v2286_v26 }
 0x1c7   : > { %2325 = vst [vmem:[%s3076_s7 + $0x1b90] sm:$0xff] %v2286_v26  ;;  %2333 = vst [vmem:[%s3076_s7 + $0x1bd0] sm:$0xff] %v2286_v26  ;;  %v890_v26 = vrot.slane %v3458_v29, %v3058_v60 }
 0x1c8   : > { %2373 = vst [vmem:[%s3076_s7 + $0x1c10] sm:$0xff] %v2350_v27  ;;  %2381 = vst [vmem:[%s3076_s7 + $0x1c50] sm:$0xff] %v2350_v27 }
 0x1c9   : > { %2389 = vst [vmem:[%s3076_s7 + $0x1c90] sm:$0xff] %v2350_v27  ;;  %2397 = vst [vmem:[%s3076_s7 + $0x1cd0] sm:$0xff] %v2350_v27  ;;  %v954_v27 = vrot.slane %v3458_v29, %v3060_v61 }
 0x1ca   : > { %2437 = vst [vmem:[%s3076_s7 + $0x1d10] sm:$0xff] %v2414_v30  ;;  %2445 = vst [vmem:[%s3076_s7 + $0x1d50] sm:$0xff] %v2414_v30 }
 0x1cb   : > { %2453 = vst [vmem:[%s3076_s7 + $0x1d90] sm:$0xff] %v2414_v30  ;;  %2461 = vst [vmem:[%s3076_s7 + $0x1dd0] sm:$0xff] %v2414_v30  ;;  %v1018_v30 = vrot.slane %v3458_v29, %v3062_v62  ;;  %v578_v29 = vrot.slane %v3484_v34, %v3048_v55 }
 0x1cc   : > { %2501 = vst [vmem:[%s3076_s7 + $0x1e10] sm:$0xff] %v2478_v31  ;;  %2509 = vst [vmem:[%s3076_s7 + $0x1e50] sm:$0xff] %v2478_v31 }
 0x1cd   : > { %2517 = vst [vmem:[%s3076_s7 + $0x1e90] sm:$0xff] %v2478_v31  ;;  %2525 = vst [vmem:[%s3076_s7 + $0x1ed0] sm:$0xff] %v2478_v31  ;;  %v642_v31 = vrot.slane %v3484_v34, %v3050_v56 }
 0x1ce   : > { %2565 = vst [vmem:[%s3076_s7 + $0x1f10] sm:$0xff] %v2542_v32  ;;  %2573 = vst [vmem:[%s3076_s7 + $0x1f50] sm:$0xff] %v2542_v32 }
 0x1cf   : > { %2581 = vst [vmem:[%s3076_s7 + $0x1f90] sm:$0xff] %v2542_v32  ;;  %2589 = vst [vmem:[%s3076_s7 + $0x1fd0] sm:$0xff] %v2542_v32  ;;  %v706_v32 = vrot.slane %v3484_v34, %v3052_v57 }
 0x1d0   : > { %2116 = vst [vmem:[%s3076_s7 + $0x1808] sm:$0xff] %v2090_v8  ;;  %2124 = vst [vmem:[%s3076_s7 + $0x1848] sm:$0xff] %v2090_v8 }
 0x1d1   : > { %2132 = vst [vmem:[%s3076_s7 + $0x1888] sm:$0xff] %v2090_v8  ;;  %2140 = vst [vmem:[%s3076_s7 + $0x18c8] sm:$0xff] %v2090_v8  ;;  %v770_v8 = vrot.slane %v3484_v34, %v3054_v58 }
 0x1d2   : > { %2180 = vst [vmem:[%s3076_s7 + $0x1908] sm:$0xff] %v2154_v35  ;;  %2188 = vst [vmem:[%s3076_s7 + $0x1948] sm:$0xff] %v2154_v35 }
 0x1d3   : > { %2196 = vst [vmem:[%s3076_s7 + $0x1988] sm:$0xff] %v2154_v35  ;;  %2204 = vst [vmem:[%s3076_s7 + $0x19c8] sm:$0xff] %v2154_v35  ;;  %v834_v35 = vrot.slane %v3484_v34, %v3056_v59 }
 0x1d4   : > { %2244 = vst [vmem:[%s3076_s7 + $0x1a08] sm:$0xff] %v2218_v36  ;;  %2252 = vst [vmem:[%s3076_s7 + $0x1a48] sm:$0xff] %v2218_v36 }
 0x1d5   : > { %2260 = vst [vmem:[%s3076_s7 + $0x1a88] sm:$0xff] %v2218_v36  ;;  %2268 = vst [vmem:[%s3076_s7 + $0x1ac8] sm:$0xff] %v2218_v36  ;;  %v898_v36 = vrot.slane %v3484_v34, %v3058_v60 }
 0x1d6   : > { %2308 = vst [vmem:[%s3076_s7 + $0x1b08] sm:$0xff] %v2282_v37  ;;  %2316 = vst [vmem:[%s3076_s7 + $0x1b48] sm:$0xff] %v2282_v37 }
 0x1d7   : > { %2324 = vst [vmem:[%s3076_s7 + $0x1b88] sm:$0xff] %v2282_v37  ;;  %2332 = vst [vmem:[%s3076_s7 + $0x1bc8] sm:$0xff] %v2282_v37  ;;  %v962_v37 = vrot.slane %v3484_v34, %v3060_v61 }
 0x1d8   : > { %2372 = vst [vmem:[%s3076_s7 + $0x1c08] sm:$0xff] %v2346_v40  ;;  %2380 = vst [vmem:[%s3076_s7 + $0x1c48] sm:$0xff] %v2346_v40 }
 0x1d9   : > { %2388 = vst [vmem:[%s3076_s7 + $0x1c88] sm:$0xff] %v2346_v40  ;;  %2396 = vst [vmem:[%s3076_s7 + $0x1cc8] sm:$0xff] %v2346_v40  ;;  %v1026_v40 = vrot.slane %v3484_v34, %v3062_v62  ;;  %v1078_v34 = vrot.slane %v3534_v43, %v3048_v55 }
 0x1da   : > { %2436 = vst [vmem:[%s3076_s7 + $0x1d08] sm:$0xff] %v2410_v41  ;;  %2444 = vst [vmem:[%s3076_s7 + $0x1d48] sm:$0xff] %v2410_v41 }
 0x1db   : > { %2452 = vst [vmem:[%s3076_s7 + $0x1d88] sm:$0xff] %v2410_v41  ;;  %2460 = vst [vmem:[%s3076_s7 + $0x1dc8] sm:$0xff] %v2410_v41  ;;  %v1142_v41 = vrot.slane %v3534_v43, %v3050_v56 }
 0x1dc   : > { %2500 = vst [vmem:[%s3076_s7 + $0x1e08] sm:$0xff] %v2474_v42  ;;  %2508 = vst [vmem:[%s3076_s7 + $0x1e48] sm:$0xff] %v2474_v42 }
 0x1dd   : > { %2516 = vst [vmem:[%s3076_s7 + $0x1e88] sm:$0xff] %v2474_v42  ;;  %2524 = vst [vmem:[%s3076_s7 + $0x1ec8] sm:$0xff] %v2474_v42  ;;  %v1206_v42 = vrot.slane %v3534_v43, %v3052_v57 }
 0x1de   : > { %2564 = vst [vmem:[%s3076_s7 + $0x1f08] sm:$0xff] %v2538_v44  ;;  %2572 = vst [vmem:[%s3076_s7 + $0x1f48] sm:$0xff] %v2538_v44 }
 0x1df   : > { %2580 = vst [vmem:[%s3076_s7 + $0x1f88] sm:$0xff] %v2538_v44  ;;  %2588 = vst [vmem:[%s3076_s7 + $0x1fc8] sm:$0xff] %v2538_v44  ;;  %v1270_v44 = vrot.slane %v3534_v43, %v3054_v58 }
 0x1e0   : > { %2118 = vst [vmem:[%s3076_s7 + $0x1818] sm:$0xff] %v2098_v9  ;;  %2126 = vst [vmem:[%s3076_s7 + $0x1858] sm:$0xff] %v2098_v9 }
 0x1e1   : > { %2134 = vst [vmem:[%s3076_s7 + $0x1898] sm:$0xff] %v2098_v9  ;;  %2142 = vst [vmem:[%s3076_s7 + $0x18d8] sm:$0xff] %v2098_v9  ;;  %v1334_v9 = vrot.slane %v3534_v43, %v3056_v59 }
 0x1e2   : > { %2182 = vst [vmem:[%s3076_s7 + $0x1918] sm:$0xff] %v2162_v47  ;;  %2190 = vst [vmem:[%s3076_s7 + $0x1958] sm:$0xff] %v2162_v47 }
 0x1e3   : > { %2198 = vst [vmem:[%s3076_s7 + $0x1998] sm:$0xff] %v2162_v47  ;;  %2206 = vst [vmem:[%s3076_s7 + $0x19d8] sm:$0xff] %v2162_v47  ;;  %v1398_v47 = vrot.slane %v3534_v43, %v3058_v60 }
 0x1e4   : > { %2246 = vst [vmem:[%s3076_s7 + $0x1a18] sm:$0xff] %v2226_v48  ;;  %2254 = vst [vmem:[%s3076_s7 + $0x1a58] sm:$0xff] %v2226_v48 }
 0x1e5   : > { %2262 = vst [vmem:[%s3076_s7 + $0x1a98] sm:$0xff] %v2226_v48  ;;  %2270 = vst [vmem:[%s3076_s7 + $0x1ad8] sm:$0xff] %v2226_v48  ;;  %v1462_v48 = vrot.slane %v3534_v43, %v3060_v61 }
 0x1e6   : > { %2310 = vst [vmem:[%s3076_s7 + $0x1b18] sm:$0xff] %v2290_v52  ;;  %2318 = vst [vmem:[%s3076_s7 + $0x1b58] sm:$0xff] %v2290_v52 }
 0x1e7   : > { %2326 = vst [vmem:[%s3076_s7 + $0x1b98] sm:$0xff] %v2290_v52  ;;  %2334 = vst [vmem:[%s3076_s7 + $0x1bd8] sm:$0xff] %v2290_v52  ;;  %v1526_v52 = vrot.slane %v3534_v43, %v3062_v62  ;;  %v1086_v43 = vrot.slane %v3560_v49, %v3048_v55 }
 0x1e8   : > { %2374 = vst [vmem:[%s3076_s7 + $0x1c18] sm:$0xff] %v2354_v53  ;;  %2382 = vst [vmem:[%s3076_s7 + $0x1c58] sm:$0xff] %v2354_v53 }
 0x1e9   : > { %2390 = vst [vmem:[%s3076_s7 + $0x1c98] sm:$0xff] %v2354_v53  ;;  %2398 = vst [vmem:[%s3076_s7 + $0x1cd8] sm:$0xff] %v2354_v53  ;;  %v1150_v53 = vrot.slane %v3560_v49, %v3050_v56 }
 0x1ea   : > { %2438 = vst [vmem:[%s3076_s7 + $0x1d18] sm:$0xff] %v2418_v54  ;;  %2446 = vst [vmem:[%s3076_s7 + $0x1d58] sm:$0xff] %v2418_v54 }
 0x1eb   : > { %2454 = vst [vmem:[%s3076_s7 + $0x1d98] sm:$0xff] %v2418_v54  ;;  %2462 = vst [vmem:[%s3076_s7 + $0x1dd8] sm:$0xff] %v2418_v54  ;;  %v1214_v54 = vrot.slane %v3560_v49, %v3052_v57 }
 0x1ec   : > { %2502 = vst [vmem:[%s3076_s7 + $0x1e18] sm:$0xff] %v2482_v63  ;;  %2510 = vst [vmem:[%s3076_s7 + $0x1e58] sm:$0xff] %v2482_v63 }
 0x1ed   : > { %2518 = vst [vmem:[%s3076_s7 + $0x1e98] sm:$0xff] %v2482_v63  ;;  %2526 = vst [vmem:[%s3076_s7 + $0x1ed8] sm:$0xff] %v2482_v63  ;;  %v1278_v63 = vrot.slane %v3560_v49, %v3054_v58 }
 0x1ee   : > { %2566 = vst [vmem:[%s3076_s7 + $0x1f18] sm:$0xff] %v2546_v45  ;;  %2574 = vst [vmem:[%s3076_s7 + $0x1f58] sm:$0xff] %v2546_v45 }
 0x1ef   : > { %2582 = vst [vmem:[%s3076_s7 + $0x1f98] sm:$0xff] %v2546_v45  ;;  %2590 = vst [vmem:[%s3076_s7 + $0x1fd8] sm:$0xff] %v2546_v45  ;;  %v1342_v45 = vrot.slane %v3560_v49, %v3056_v59 }
 0x1f0   : > { %583 = vst [vmem:[%s3076_s7 + $0x20] sm:$0xff] %v566_v14  ;;  %591 = vst [vmem:[%s3076_s7 + $0x60] sm:$0xff] %v566_v14 }
 0x1f1   : > { %599 = vst [vmem:[%s3076_s7 + $0xa0] sm:$0xff] %v566_v14  ;;  %607 = vst [vmem:[%s3076_s7 + $0xe0] sm:$0xff] %v566_v14  ;;  %v1406_v14 = vrot.slane %v3560_v49, %v3058_v60 }
 0x1f2   : > { %647 = vst [vmem:[%s3076_s7 + $0x120] sm:$0xff] %v630_v1  ;;  %655 = vst [vmem:[%s3076_s7 + $0x160] sm:$0xff] %v630_v1 }
 0x1f3   : > { %663 = vst [vmem:[%s3076_s7 + $0x1a0] sm:$0xff] %v630_v1  ;;  %671 = vst [vmem:[%s3076_s7 + $0x1e0] sm:$0xff] %v630_v1  ;;  %v1470_v1 = vrot.slane %v3560_v49, %v3060_v61 }
 0x1f4   : > { %711 = vst [vmem:[%s3076_s7 + $0x220] sm:$0xff] %v694_v2  ;;  %719 = vst [vmem:[%s3076_s7 + $0x260] sm:$0xff] %v694_v2 }
 0x1f5   : > { %727 = vst [vmem:[%s3076_s7 + $0x2a0] sm:$0xff] %v694_v2  ;;  %735 = vst [vmem:[%s3076_s7 + $0x2e0] sm:$0xff] %v694_v2  ;;  %v1534_v2 = vrot.slane %v3560_v49, %v3062_v62  ;;  %v1082_v49 = vrot.slane %v3562_v51, %v3048_v55 }
 0x1f6   : > { %775 = vst [vmem:[%s3076_s7 + $0x320] sm:$0xff] %v758_v4  ;;  %783 = vst [vmem:[%s3076_s7 + $0x360] sm:$0xff] %v758_v4 }
 0x1f7   : > { %791 = vst [vmem:[%s3076_s7 + $0x3a0] sm:$0xff] %v758_v4  ;;  %799 = vst [vmem:[%s3076_s7 + $0x3e0] sm:$0xff] %v758_v4  ;;  %v1146_v4 = vrot.slane %v3562_v51, %v3050_v56 }
 0x1f8   : > { %839 = vst [vmem:[%s3076_s7 + $0x420] sm:$0xff] %v822_v5  ;;  %847 = vst [vmem:[%s3076_s7 + $0x460] sm:$0xff] %v822_v5 }
 0x1f9   : > { %855 = vst [vmem:[%s3076_s7 + $0x4a0] sm:$0xff] %v822_v5  ;;  %863 = vst [vmem:[%s3076_s7 + $0x4e0] sm:$0xff] %v822_v5  ;;  %v1210_v5 = vrot.slane %v3562_v51, %v3052_v57 }
 0x1fa   : > { %903 = vst [vmem:[%s3076_s7 + $0x520] sm:$0xff] %v886_v6  ;;  %911 = vst [vmem:[%s3076_s7 + $0x560] sm:$0xff] %v886_v6 }
 0x1fb   : > { %919 = vst [vmem:[%s3076_s7 + $0x5a0] sm:$0xff] %v886_v6  ;;  %927 = vst [vmem:[%s3076_s7 + $0x5e0] sm:$0xff] %v886_v6  ;;  %v1274_v6 = vrot.slane %v3562_v51, %v3054_v58 }
 0x1fc   : > { %967 = vst [vmem:[%s3076_s7 + $0x620] sm:$0xff] %v950_v7  ;;  %975 = vst [vmem:[%s3076_s7 + $0x660] sm:$0xff] %v950_v7 }
 0x1fd   : > { %983 = vst [vmem:[%s3076_s7 + $0x6a0] sm:$0xff] %v950_v7  ;;  %991 = vst [vmem:[%s3076_s7 + $0x6e0] sm:$0xff] %v950_v7  ;;  %v1338_v7 = vrot.slane %v3562_v51, %v3056_v59 }
 0x1fe   : > { %1031 = vst [vmem:[%s3076_s7 + $0x720] sm:$0xff] %v1014_v10  ;;  %1039 = vst [vmem:[%s3076_s7 + $0x760] sm:$0xff] %v1014_v10 }
 0x1ff   : > { %1047 = vst [vmem:[%s3076_s7 + $0x7a0] sm:$0xff] %v1014_v10  ;;  %1055 = vst [vmem:[%s3076_s7 + $0x7e0] sm:$0xff] %v1014_v10  ;;  %v1402_v10 = vrot.slane %v3562_v51, %v3058_v60 }
 0x200   : > { %585 = vst [vmem:[%s3076_s7 + $0x30] sm:$0xff] %v574_v23  ;;  %593 = vst [vmem:[%s3076_s7 + $0x70] sm:$0xff] %v574_v23 }
 0x201   : > { %601 = vst [vmem:[%s3076_s7 + $0xb0] sm:$0xff] %v574_v23  ;;  %609 = vst [vmem:[%s3076_s7 + $0xf0] sm:$0xff] %v574_v23  ;;  %v1466_v23 = vrot.slane %v3562_v51, %v3060_v61 }
 0x202   : > { %649 = vst [vmem:[%s3076_s7 + $0x130] sm:$0xff] %v638_v50  ;;  %657 = vst [vmem:[%s3076_s7 + $0x170] sm:$0xff] %v638_v50 }
 0x203   : > { %665 = vst [vmem:[%s3076_s7 + $0x1b0] sm:$0xff] %v638_v50  ;;  %673 = vst [vmem:[%s3076_s7 + $0x1f0] sm:$0xff] %v638_v50  ;;  %v1530_v50 = vrot.slane %v3562_v51, %v3062_v62  ;;  %v1090_v51 = vrot.slane %v3588_v0, %v3048_v55 }
 0x204   : > { %713 = vst [vmem:[%s3076_s7 + $0x230] sm:$0xff] %v702_v12  ;;  %721 = vst [vmem:[%s3076_s7 + $0x270] sm:$0xff] %v702_v12 }
 0x205   : > { %729 = vst [vmem:[%s3076_s7 + $0x2b0] sm:$0xff] %v702_v12  ;;  %737 = vst [vmem:[%s3076_s7 + $0x2f0] sm:$0xff] %v702_v12  ;;  %v1154_v12 = vrot.slane %v3588_v0, %v3050_v56 }
 0x206   : > { %777 = vst [vmem:[%s3076_s7 + $0x330] sm:$0xff] %v766_v13  ;;  %785 = vst [vmem:[%s3076_s7 + $0x370] sm:$0xff] %v766_v13 }
 0x207   : > { %793 = vst [vmem:[%s3076_s7 + $0x3b0] sm:$0xff] %v766_v13  ;;  %801 = vst [vmem:[%s3076_s7 + $0x3f0] sm:$0xff] %v766_v13  ;;  %v1218_v13 = vrot.slane %v3588_v0, %v3052_v57 }
 0x208   : > { %841 = vst [vmem:[%s3076_s7 + $0x430] sm:$0xff] %v830_v15  ;;  %849 = vst [vmem:[%s3076_s7 + $0x470] sm:$0xff] %v830_v15 }
 0x209   : > { %857 = vst [vmem:[%s3076_s7 + $0x4b0] sm:$0xff] %v830_v15  ;;  %865 = vst [vmem:[%s3076_s7 + $0x4f0] sm:$0xff] %v830_v15  ;;  %v1282_v15 = vrot.slane %v3588_v0, %v3054_v58 }
 0x20a   : > { %905 = vst [vmem:[%s3076_s7 + $0x530] sm:$0xff] %v894_v18  ;;  %913 = vst [vmem:[%s3076_s7 + $0x570] sm:$0xff] %v894_v18 }
 0x20b   : > { %921 = vst [vmem:[%s3076_s7 + $0x5b0] sm:$0xff] %v894_v18  ;;  %929 = vst [vmem:[%s3076_s7 + $0x5f0] sm:$0xff] %v894_v18  ;;  %v1346_v18 = vrot.slane %v3588_v0, %v3056_v59 }
 0x20c   : > { %969 = vst [vmem:[%s3076_s7 + $0x630] sm:$0xff] %v958_v19  ;;  %977 = vst [vmem:[%s3076_s7 + $0x670] sm:$0xff] %v958_v19 }
 0x20d   : > { %985 = vst [vmem:[%s3076_s7 + $0x6b0] sm:$0xff] %v958_v19  ;;  %993 = vst [vmem:[%s3076_s7 + $0x6f0] sm:$0xff] %v958_v19  ;;  %v1410_v19 = vrot.slane %v3588_v0, %v3058_v60 }
 0x20e   : > { %1033 = vst [vmem:[%s3076_s7 + $0x730] sm:$0xff] %v1022_v20  ;;  %1041 = vst [vmem:[%s3076_s7 + $0x770] sm:$0xff] %v1022_v20 }
 0x20f   : > { %1049 = vst [vmem:[%s3076_s7 + $0x7b0] sm:$0xff] %v1022_v20  ;;  %1057 = vst [vmem:[%s3076_s7 + $0x7f0] sm:$0xff] %v1022_v20  ;;  %v1474_v20 = vrot.slane %v3588_v0, %v3060_v61 }
 0x210   : > { %584 = vst [vmem:[%s3076_s7 + $0x28] sm:$0xff] %v570_v28  ;;  %592 = vst [vmem:[%s3076_s7 + $0x68] sm:$0xff] %v570_v28 }
 0x211   : > { %600 = vst [vmem:[%s3076_s7 + $0xa8] sm:$0xff] %v570_v28  ;;  %608 = vst [vmem:[%s3076_s7 + $0xe8] sm:$0xff] %v570_v28  ;;  %v1538_v28 = vrot.slane %v3588_v0, %v3062_v62  ;;  %v1590_v0 = vrot.slane %v3638_v11, %v3048_v55 }
 0x212   : > { %648 = vst [vmem:[%s3076_s7 + $0x128] sm:$0xff] %v634_v21  ;;  %656 = vst [vmem:[%s3076_s7 + $0x168] sm:$0xff] %v634_v21 }
 0x213   : > { %664 = vst [vmem:[%s3076_s7 + $0x1a8] sm:$0xff] %v634_v21  ;;  %672 = vst [vmem:[%s3076_s7 + $0x1e8] sm:$0xff] %v634_v21  ;;  %v1654_v21 = vrot.slane %v3638_v11, %v3050_v56 }
 0x214   : > { %712 = vst [vmem:[%s3076_s7 + $0x228] sm:$0xff] %v698_v3  ;;  %720 = vst [vmem:[%s3076_s7 + $0x268] sm:$0xff] %v698_v3 }
 0x215   : > { %728 = vst [vmem:[%s3076_s7 + $0x2a8] sm:$0xff] %v698_v3  ;;  %736 = vst [vmem:[%s3076_s7 + $0x2e8] sm:$0xff] %v698_v3  ;;  %v1718_v3 = vrot.slane %v3638_v11, %v3052_v57 }
 0x216   : > { %776 = vst [vmem:[%s3076_s7 + $0x328] sm:$0xff] %v762_v24  ;;  %784 = vst [vmem:[%s3076_s7 + $0x368] sm:$0xff] %v762_v24 }
 0x217   : > { %792 = vst [vmem:[%s3076_s7 + $0x3a8] sm:$0xff] %v762_v24  ;;  %800 = vst [vmem:[%s3076_s7 + $0x3e8] sm:$0xff] %v762_v24  ;;  %v1782_v24 = vrot.slane %v3638_v11, %v3054_v58 }
 0x218   : > { %840 = vst [vmem:[%s3076_s7 + $0x428] sm:$0xff] %v826_v25  ;;  %848 = vst [vmem:[%s3076_s7 + $0x468] sm:$0xff] %v826_v25 }
 0x219   : > { %856 = vst [vmem:[%s3076_s7 + $0x4a8] sm:$0xff] %v826_v25  ;;  %864 = vst [vmem:[%s3076_s7 + $0x4e8] sm:$0xff] %v826_v25  ;;  %v1846_v25 = vrot.slane %v3638_v11, %v3056_v59 }
 0x21a   : > { %904 = vst [vmem:[%s3076_s7 + $0x528] sm:$0xff] %v890_v26  ;;  %912 = vst [vmem:[%s3076_s7 + $0x568] sm:$0xff] %v890_v26 }
 0x21b   : > { %920 = vst [vmem:[%s3076_s7 + $0x5a8] sm:$0xff] %v890_v26  ;;  %928 = vst [vmem:[%s3076_s7 + $0x5e8] sm:$0xff] %v890_v26  ;;  %v1910_v26 = vrot.slane %v3638_v11, %v3058_v60 }
 0x21c   : > { %968 = vst [vmem:[%s3076_s7 + $0x628] sm:$0xff] %v954_v27  ;;  %976 = vst [vmem:[%s3076_s7 + $0x668] sm:$0xff] %v954_v27 }
 0x21d   : > { %984 = vst [vmem:[%s3076_s7 + $0x6a8] sm:$0xff] %v954_v27  ;;  %992 = vst [vmem:[%s3076_s7 + $0x6e8] sm:$0xff] %v954_v27  ;;  %v1974_v27 = vrot.slane %v3638_v11, %v3060_v61 }
 0x21e   : > { %1032 = vst [vmem:[%s3076_s7 + $0x728] sm:$0xff] %v1018_v30  ;;  %1040 = vst [vmem:[%s3076_s7 + $0x768] sm:$0xff] %v1018_v30 }
 0x21f   : > { %1048 = vst [vmem:[%s3076_s7 + $0x7a8] sm:$0xff] %v1018_v30  ;;  %1056 = vst [vmem:[%s3076_s7 + $0x7e8] sm:$0xff] %v1018_v30  ;;  %v2038_v30 = vrot.slane %v3638_v11, %v3062_v62  ;;  %v1598_v11 = vrot.slane %v3664_v16, %v3048_v55 }
 0x220   : > { %586 = vst [vmem:[%s3076_s7 + $0x38] sm:$0xff] %v578_v29  ;;  %594 = vst [vmem:[%s3076_s7 + $0x78] sm:$0xff] %v578_v29 }
 0x221   : > { %602 = vst [vmem:[%s3076_s7 + $0xb8] sm:$0xff] %v578_v29  ;;  %610 = vst [vmem:[%s3076_s7 + $0xf8] sm:$0xff] %v578_v29  ;;  %v1662_v29 = vrot.slane %v3664_v16, %v3050_v56 }
 0x222   : > { %650 = vst [vmem:[%s3076_s7 + $0x138] sm:$0xff] %v642_v31  ;;  %658 = vst [vmem:[%s3076_s7 + $0x178] sm:$0xff] %v642_v31 }
 0x223   : > { %666 = vst [vmem:[%s3076_s7 + $0x1b8] sm:$0xff] %v642_v31  ;;  %674 = vst [vmem:[%s3076_s7 + $0x1f8] sm:$0xff] %v642_v31  ;;  %v1726_v31 = vrot.slane %v3664_v16, %v3052_v57 }
 0x224   : > { %714 = vst [vmem:[%s3076_s7 + $0x238] sm:$0xff] %v706_v32  ;;  %722 = vst [vmem:[%s3076_s7 + $0x278] sm:$0xff] %v706_v32 }
 0x225   : > { %730 = vst [vmem:[%s3076_s7 + $0x2b8] sm:$0xff] %v706_v32  ;;  %738 = vst [vmem:[%s3076_s7 + $0x2f8] sm:$0xff] %v706_v32  ;;  %v1790_v32 = vrot.slane %v3664_v16, %v3054_v58 }
 0x226   : > { %778 = vst [vmem:[%s3076_s7 + $0x338] sm:$0xff] %v770_v8  ;;  %786 = vst [vmem:[%s3076_s7 + $0x378] sm:$0xff] %v770_v8 }
 0x227   : > { %794 = vst [vmem:[%s3076_s7 + $0x3b8] sm:$0xff] %v770_v8  ;;  %802 = vst [vmem:[%s3076_s7 + $0x3f8] sm:$0xff] %v770_v8  ;;  %v1854_v8 = vrot.slane %v3664_v16, %v3056_v59 }
 0x228   : > { %842 = vst [vmem:[%s3076_s7 + $0x438] sm:$0xff] %v834_v35  ;;  %850 = vst [vmem:[%s3076_s7 + $0x478] sm:$0xff] %v834_v35 }
 0x229   : > { %858 = vst [vmem:[%s3076_s7 + $0x4b8] sm:$0xff] %v834_v35  ;;  %866 = vst [vmem:[%s3076_s7 + $0x4f8] sm:$0xff] %v834_v35  ;;  %v1918_v35 = vrot.slane %v3664_v16, %v3058_v60 }
 0x22a   : > { %906 = vst [vmem:[%s3076_s7 + $0x538] sm:$0xff] %v898_v36  ;;  %914 = vst [vmem:[%s3076_s7 + $0x578] sm:$0xff] %v898_v36 }
 0x22b   : > { %922 = vst [vmem:[%s3076_s7 + $0x5b8] sm:$0xff] %v898_v36  ;;  %930 = vst [vmem:[%s3076_s7 + $0x5f8] sm:$0xff] %v898_v36  ;;  %v1982_v36 = vrot.slane %v3664_v16, %v3060_v61 }
 0x22c   : > { %970 = vst [vmem:[%s3076_s7 + $0x638] sm:$0xff] %v962_v37  ;;  %978 = vst [vmem:[%s3076_s7 + $0x678] sm:$0xff] %v962_v37 }
 0x22d   : > { %986 = vst [vmem:[%s3076_s7 + $0x6b8] sm:$0xff] %v962_v37  ;;  %994 = vst [vmem:[%s3076_s7 + $0x6f8] sm:$0xff] %v962_v37  ;;  %v2046_v37 = vrot.slane %v3664_v16, %v3062_v62  ;;  %v1594_v16 = vrot.slane %v3666_v17, %v3048_v55 }
 0x22e   : > { %1034 = vst [vmem:[%s3076_s7 + $0x738] sm:$0xff] %v1026_v40  ;;  %1042 = vst [vmem:[%s3076_s7 + $0x778] sm:$0xff] %v1026_v40 }
 0x22f   : > { %1050 = vst [vmem:[%s3076_s7 + $0x7b8] sm:$0xff] %v1026_v40  ;;  %1058 = vst [vmem:[%s3076_s7 + $0x7f8] sm:$0xff] %v1026_v40  ;;  %v1658_v40 = vrot.slane %v3666_v17, %v3050_v56 }
 0x230   : > { %1095 = vst [vmem:[%s3076_s7 + $0x820] sm:$0xff] %v1078_v34  ;;  %1103 = vst [vmem:[%s3076_s7 + $0x860] sm:$0xff] %v1078_v34 }
 0x231   : > { %1111 = vst [vmem:[%s3076_s7 + $0x8a0] sm:$0xff] %v1078_v34  ;;  %1119 = vst [vmem:[%s3076_s7 + $0x8e0] sm:$0xff] %v1078_v34  ;;  %v1722_v34 = vrot.slane %v3666_v17, %v3052_v57 }
 0x232   : > { %1159 = vst [vmem:[%s3076_s7 + $0x920] sm:$0xff] %v1142_v41  ;;  %1167 = vst [vmem:[%s3076_s7 + $0x960] sm:$0xff] %v1142_v41 }
 0x233   : > { %1175 = vst [vmem:[%s3076_s7 + $0x9a0] sm:$0xff] %v1142_v41  ;;  %1183 = vst [vmem:[%s3076_s7 + $0x9e0] sm:$0xff] %v1142_v41  ;;  %v1786_v41 = vrot.slane %v3666_v17, %v3054_v58 }
 0x234   : > { %1223 = vst [vmem:[%s3076_s7 + $0xa20] sm:$0xff] %v1206_v42  ;;  %1231 = vst [vmem:[%s3076_s7 + $0xa60] sm:$0xff] %v1206_v42 }
 0x235   : > { %1239 = vst [vmem:[%s3076_s7 + $0xaa0] sm:$0xff] %v1206_v42  ;;  %1247 = vst [vmem:[%s3076_s7 + $0xae0] sm:$0xff] %v1206_v42  ;;  %v1850_v42 = vrot.slane %v3666_v17, %v3056_v59 }
 0x236   : > { %1287 = vst [vmem:[%s3076_s7 + $0xb20] sm:$0xff] %v1270_v44  ;;  %1295 = vst [vmem:[%s3076_s7 + $0xb60] sm:$0xff] %v1270_v44 }
 0x237   : > { %1303 = vst [vmem:[%s3076_s7 + $0xba0] sm:$0xff] %v1270_v44  ;;  %1311 = vst [vmem:[%s3076_s7 + $0xbe0] sm:$0xff] %v1270_v44  ;;  %v1914_v44 = vrot.slane %v3666_v17, %v3058_v60 }
 0x238   : > { %1351 = vst [vmem:[%s3076_s7 + $0xc20] sm:$0xff] %v1334_v9  ;;  %1359 = vst [vmem:[%s3076_s7 + $0xc60] sm:$0xff] %v1334_v9 }
 0x239   : > { %1367 = vst [vmem:[%s3076_s7 + $0xca0] sm:$0xff] %v1334_v9  ;;  %1375 = vst [vmem:[%s3076_s7 + $0xce0] sm:$0xff] %v1334_v9  ;;  %v1978_v9 = vrot.slane %v3666_v17, %v3060_v61 }
 0x23a   : > { %1415 = vst [vmem:[%s3076_s7 + $0xd20] sm:$0xff] %v1398_v47  ;;  %1423 = vst [vmem:[%s3076_s7 + $0xd60] sm:$0xff] %v1398_v47 }
 0x23b   : > { %1431 = vst [vmem:[%s3076_s7 + $0xda0] sm:$0xff] %v1398_v47  ;;  %1439 = vst [vmem:[%s3076_s7 + $0xde0] sm:$0xff] %v1398_v47  ;;  %v2042_v47 = vrot.slane %v3666_v17, %v3062_v62  ;;  %v1602_v17 = vrot.slane %v3692_v22, %v3048_v55 }
 0x23c   : > { %1479 = vst [vmem:[%s3076_s7 + $0xe20] sm:$0xff] %v1462_v48  ;;  %1487 = vst [vmem:[%s3076_s7 + $0xe60] sm:$0xff] %v1462_v48 }
 0x23d   : > { %1495 = vst [vmem:[%s3076_s7 + $0xea0] sm:$0xff] %v1462_v48  ;;  %1503 = vst [vmem:[%s3076_s7 + $0xee0] sm:$0xff] %v1462_v48  ;;  %v1666_v48 = vrot.slane %v3692_v22, %v3050_v56 }
 0x23e   : > { %1543 = vst [vmem:[%s3076_s7 + $0xf20] sm:$0xff] %v1526_v52  ;;  %1551 = vst [vmem:[%s3076_s7 + $0xf60] sm:$0xff] %v1526_v52 }
 0x23f   : > { %1559 = vst [vmem:[%s3076_s7 + $0xfa0] sm:$0xff] %v1526_v52  ;;  %1567 = vst [vmem:[%s3076_s7 + $0xfe0] sm:$0xff] %v1526_v52  ;;  %v1730_v52 = vrot.slane %v3692_v22, %v3052_v57 }
 0x240   : > { %1097 = vst [vmem:[%s3076_s7 + $0x830] sm:$0xff] %v1086_v43  ;;  %1105 = vst [vmem:[%s3076_s7 + $0x870] sm:$0xff] %v1086_v43 }
 0x241   : > { %1113 = vst [vmem:[%s3076_s7 + $0x8b0] sm:$0xff] %v1086_v43  ;;  %1121 = vst [vmem:[%s3076_s7 + $0x8f0] sm:$0xff] %v1086_v43  ;;  %v1794_v43 = vrot.slane %v3692_v22, %v3054_v58 }
 0x242   : > { %1161 = vst [vmem:[%s3076_s7 + $0x930] sm:$0xff] %v1150_v53  ;;  %1169 = vst [vmem:[%s3076_s7 + $0x970] sm:$0xff] %v1150_v53 }
 0x243   : > { %1177 = vst [vmem:[%s3076_s7 + $0x9b0] sm:$0xff] %v1150_v53  ;;  %1185 = vst [vmem:[%s3076_s7 + $0x9f0] sm:$0xff] %v1150_v53  ;;  %v1858_v53 = vrot.slane %v3692_v22, %v3056_v59 }
 0x244   : > { %1225 = vst [vmem:[%s3076_s7 + $0xa30] sm:$0xff] %v1214_v54  ;;  %1233 = vst [vmem:[%s3076_s7 + $0xa70] sm:$0xff] %v1214_v54 }
 0x245   : > { %1241 = vst [vmem:[%s3076_s7 + $0xab0] sm:$0xff] %v1214_v54  ;;  %1249 = vst [vmem:[%s3076_s7 + $0xaf0] sm:$0xff] %v1214_v54  ;;  %v1922_v54 = vrot.slane %v3692_v22, %v3058_v60 }
 0x246   : > { %1289 = vst [vmem:[%s3076_s7 + $0xb30] sm:$0xff] %v1278_v63  ;;  %1297 = vst [vmem:[%s3076_s7 + $0xb70] sm:$0xff] %v1278_v63 }
 0x247   : > { %1305 = vst [vmem:[%s3076_s7 + $0xbb0] sm:$0xff] %v1278_v63  ;;  %1313 = vst [vmem:[%s3076_s7 + $0xbf0] sm:$0xff] %v1278_v63  ;;  %v1986_v63 = vrot.slane %v3692_v22, %v3060_v61 }
 0x248   : > { %1353 = vst [vmem:[%s3076_s7 + $0xc30] sm:$0xff] %v1342_v45  ;;  %1361 = vst [vmem:[%s3076_s7 + $0xc70] sm:$0xff] %v1342_v45 }
 0x249   : > { %1369 = vst [vmem:[%s3076_s7 + $0xcb0] sm:$0xff] %v1342_v45  ;;  %1377 = vst [vmem:[%s3076_s7 + $0xcf0] sm:$0xff] %v1342_v45  ;;  %v2050_v45 = vrot.slane %v3692_v22, %v3062_v62  ;;  %v2102_v22 = vrot.slane %v3742_v33, %v3048_v55 }
 0x24a   : > { %1417 = vst [vmem:[%s3076_s7 + $0xd30] sm:$0xff] %v1406_v14  ;;  %1425 = vst [vmem:[%s3076_s7 + $0xd70] sm:$0xff] %v1406_v14 }
 0x24b   : > { %1433 = vst [vmem:[%s3076_s7 + $0xdb0] sm:$0xff] %v1406_v14  ;;  %1441 = vst [vmem:[%s3076_s7 + $0xdf0] sm:$0xff] %v1406_v14  ;;  %v2166_v14 = vrot.slane %v3742_v33, %v3050_v56 }
 0x24c   : > { %1481 = vst [vmem:[%s3076_s7 + $0xe30] sm:$0xff] %v1470_v1  ;;  %1489 = vst [vmem:[%s3076_s7 + $0xe70] sm:$0xff] %v1470_v1 }
 0x24d   : > { %1497 = vst [vmem:[%s3076_s7 + $0xeb0] sm:$0xff] %v1470_v1  ;;  %1505 = vst [vmem:[%s3076_s7 + $0xef0] sm:$0xff] %v1470_v1  ;;  %v2230_v1 = vrot.slane %v3742_v33, %v3052_v57 }
 0x24e   : > { %1545 = vst [vmem:[%s3076_s7 + $0xf30] sm:$0xff] %v1534_v2  ;;  %1553 = vst [vmem:[%s3076_s7 + $0xf70] sm:$0xff] %v1534_v2 }
 0x24f   : > { %1561 = vst [vmem:[%s3076_s7 + $0xfb0] sm:$0xff] %v1534_v2  ;;  %1569 = vst [vmem:[%s3076_s7 + $0xff0] sm:$0xff] %v1534_v2  ;;  %v2294_v2 = vrot.slane %v3742_v33, %v3054_v58 }
 0x250   : > { %1096 = vst [vmem:[%s3076_s7 + $0x828] sm:$0xff] %v1082_v49  ;;  %1104 = vst [vmem:[%s3076_s7 + $0x868] sm:$0xff] %v1082_v49 }
 0x251   : > { %1112 = vst [vmem:[%s3076_s7 + $0x8a8] sm:$0xff] %v1082_v49  ;;  %1120 = vst [vmem:[%s3076_s7 + $0x8e8] sm:$0xff] %v1082_v49  ;;  %v2358_v49 = vrot.slane %v3742_v33, %v3056_v59 }
 0x252   : > { %1160 = vst [vmem:[%s3076_s7 + $0x928] sm:$0xff] %v1146_v4  ;;  %1168 = vst [vmem:[%s3076_s7 + $0x968] sm:$0xff] %v1146_v4 }
 0x253   : > { %1176 = vst [vmem:[%s3076_s7 + $0x9a8] sm:$0xff] %v1146_v4  ;;  %1184 = vst [vmem:[%s3076_s7 + $0x9e8] sm:$0xff] %v1146_v4  ;;  %v2422_v4 = vrot.slane %v3742_v33, %v3058_v60 }
 0x254   : > { %1224 = vst [vmem:[%s3076_s7 + $0xa28] sm:$0xff] %v1210_v5  ;;  %1232 = vst [vmem:[%s3076_s7 + $0xa68] sm:$0xff] %v1210_v5 }
 0x255   : > { %1240 = vst [vmem:[%s3076_s7 + $0xaa8] sm:$0xff] %v1210_v5  ;;  %1248 = vst [vmem:[%s3076_s7 + $0xae8] sm:$0xff] %v1210_v5  ;;  %v2486_v5 = vrot.slane %v3742_v33, %v3060_v61 }
 0x256   : > { %1288 = vst [vmem:[%s3076_s7 + $0xb28] sm:$0xff] %v1274_v6  ;;  %1296 = vst [vmem:[%s3076_s7 + $0xb68] sm:$0xff] %v1274_v6 }
 0x257   : > { %1304 = vst [vmem:[%s3076_s7 + $0xba8] sm:$0xff] %v1274_v6  ;;  %1312 = vst [vmem:[%s3076_s7 + $0xbe8] sm:$0xff] %v1274_v6  ;;  %v2550_v6 = vrot.slane %v3742_v33, %v3062_v62  ;;  %v2110_v33 = vrot.slane %v3768_v38, %v3048_v55 }
 0x258   : > { %1352 = vst [vmem:[%s3076_s7 + $0xc28] sm:$0xff] %v1338_v7  ;;  %1360 = vst [vmem:[%s3076_s7 + $0xc68] sm:$0xff] %v1338_v7 }
 0x259   : > { %1368 = vst [vmem:[%s3076_s7 + $0xca8] sm:$0xff] %v1338_v7  ;;  %1376 = vst [vmem:[%s3076_s7 + $0xce8] sm:$0xff] %v1338_v7  ;;  %v2174_v7 = vrot.slane %v3768_v38, %v3050_v56 }
 0x25a   : > { %1416 = vst [vmem:[%s3076_s7 + $0xd28] sm:$0xff] %v1402_v10  ;;  %1424 = vst [vmem:[%s3076_s7 + $0xd68] sm:$0xff] %v1402_v10 }
 0x25b   : > { %1432 = vst [vmem:[%s3076_s7 + $0xda8] sm:$0xff] %v1402_v10  ;;  %1440 = vst [vmem:[%s3076_s7 + $0xde8] sm:$0xff] %v1402_v10  ;;  %v2238_v10 = vrot.slane %v3768_v38, %v3052_v57 }
 0x25c   : > { %1480 = vst [vmem:[%s3076_s7 + $0xe28] sm:$0xff] %v1466_v23  ;;  %1488 = vst [vmem:[%s3076_s7 + $0xe68] sm:$0xff] %v1466_v23 }
 0x25d   : > { %1496 = vst [vmem:[%s3076_s7 + $0xea8] sm:$0xff] %v1466_v23  ;;  %1504 = vst [vmem:[%s3076_s7 + $0xee8] sm:$0xff] %v1466_v23  ;;  %v2302_v23 = vrot.slane %v3768_v38, %v3054_v58 }
 0x25e   : > { %1544 = vst [vmem:[%s3076_s7 + $0xf28] sm:$0xff] %v1530_v50  ;;  %1552 = vst [vmem:[%s3076_s7 + $0xf68] sm:$0xff] %v1530_v50 }
 0x25f   : > { %1560 = vst [vmem:[%s3076_s7 + $0xfa8] sm:$0xff] %v1530_v50  ;;  %1568 = vst [vmem:[%s3076_s7 + $0xfe8] sm:$0xff] %v1530_v50  ;;  %v2366_v50 = vrot.slane %v3768_v38, %v3056_v59 }
 0x260   : > { %1098 = vst [vmem:[%s3076_s7 + $0x838] sm:$0xff] %v1090_v51  ;;  %1106 = vst [vmem:[%s3076_s7 + $0x878] sm:$0xff] %v1090_v51 }
 0x261   : > { %1114 = vst [vmem:[%s3076_s7 + $0x8b8] sm:$0xff] %v1090_v51  ;;  %1122 = vst [vmem:[%s3076_s7 + $0x8f8] sm:$0xff] %v1090_v51  ;;  %v2430_v51 = vrot.slane %v3768_v38, %v3058_v60 }
 0x262   : > { %1162 = vst [vmem:[%s3076_s7 + $0x938] sm:$0xff] %v1154_v12  ;;  %1170 = vst [vmem:[%s3076_s7 + $0x978] sm:$0xff] %v1154_v12 }
 0x263   : > { %1178 = vst [vmem:[%s3076_s7 + $0x9b8] sm:$0xff] %v1154_v12  ;;  %1186 = vst [vmem:[%s3076_s7 + $0x9f8] sm:$0xff] %v1154_v12  ;;  %v2494_v12 = vrot.slane %v3768_v38, %v3060_v61 }
 0x264   : > { %1226 = vst [vmem:[%s3076_s7 + $0xa38] sm:$0xff] %v1218_v13  ;;  %1234 = vst [vmem:[%s3076_s7 + $0xa78] sm:$0xff] %v1218_v13 }
 0x265   : > { %1242 = vst [vmem:[%s3076_s7 + $0xab8] sm:$0xff] %v1218_v13  ;;  %1250 = vst [vmem:[%s3076_s7 + $0xaf8] sm:$0xff] %v1218_v13  ;;  %v2558_v13 = vrot.slane %v3768_v38, %v3062_v62  ;;  %v2106_v38 = vrot.slane %v3770_v39, %v3048_v55 }
 0x266   : > { %1290 = vst [vmem:[%s3076_s7 + $0xb38] sm:$0xff] %v1282_v15  ;;  %1298 = vst [vmem:[%s3076_s7 + $0xb78] sm:$0xff] %v1282_v15 }
 0x267   : > { %1306 = vst [vmem:[%s3076_s7 + $0xbb8] sm:$0xff] %v1282_v15  ;;  %1314 = vst [vmem:[%s3076_s7 + $0xbf8] sm:$0xff] %v1282_v15  ;;  %v2170_v15 = vrot.slane %v3770_v39, %v3050_v56 }
 0x268   : > { %1354 = vst [vmem:[%s3076_s7 + $0xc38] sm:$0xff] %v1346_v18  ;;  %1362 = vst [vmem:[%s3076_s7 + $0xc78] sm:$0xff] %v1346_v18 }
 0x269   : > { %1370 = vst [vmem:[%s3076_s7 + $0xcb8] sm:$0xff] %v1346_v18  ;;  %1378 = vst [vmem:[%s3076_s7 + $0xcf8] sm:$0xff] %v1346_v18  ;;  %v2234_v18 = vrot.slane %v3770_v39, %v3052_v57 }
 0x26a   : > { %1418 = vst [vmem:[%s3076_s7 + $0xd38] sm:$0xff] %v1410_v19  ;;  %1426 = vst [vmem:[%s3076_s7 + $0xd78] sm:$0xff] %v1410_v19 }
 0x26b   : > { %1434 = vst [vmem:[%s3076_s7 + $0xdb8] sm:$0xff] %v1410_v19  ;;  %1442 = vst [vmem:[%s3076_s7 + $0xdf8] sm:$0xff] %v1410_v19  ;;  %v2298_v19 = vrot.slane %v3770_v39, %v3054_v58 }
 0x26c   : > { %1482 = vst [vmem:[%s3076_s7 + $0xe38] sm:$0xff] %v1474_v20  ;;  %1490 = vst [vmem:[%s3076_s7 + $0xe78] sm:$0xff] %v1474_v20 }
 0x26d   : > { %1498 = vst [vmem:[%s3076_s7 + $0xeb8] sm:$0xff] %v1474_v20  ;;  %1506 = vst [vmem:[%s3076_s7 + $0xef8] sm:$0xff] %v1474_v20  ;;  %v2362_v20 = vrot.slane %v3770_v39, %v3056_v59 }
 0x26e   : > { %1546 = vst [vmem:[%s3076_s7 + $0xf38] sm:$0xff] %v1538_v28  ;;  %1554 = vst [vmem:[%s3076_s7 + $0xf78] sm:$0xff] %v1538_v28 }
 0x26f   : > { %1562 = vst [vmem:[%s3076_s7 + $0xfb8] sm:$0xff] %v1538_v28  ;;  %1570 = vst [vmem:[%s3076_s7 + $0xff8] sm:$0xff] %v1538_v28  ;;  %v2426_v28 = vrot.slane %v3770_v39, %v3058_v60 }
 0x270   : > { %1607 = vst [vmem:[%s3076_s7 + $0x1020] sm:$0xff] %v1590_v0  ;;  %1615 = vst [vmem:[%s3076_s7 + $0x1060] sm:$0xff] %v1590_v0 }
 0x271   : > { %1623 = vst [vmem:[%s3076_s7 + $0x10a0] sm:$0xff] %v1590_v0  ;;  %1631 = vst [vmem:[%s3076_s7 + $0x10e0] sm:$0xff] %v1590_v0  ;;  %v2490_v0 = vrot.slane %v3770_v39, %v3060_v61 }
 0x272   : > { %1671 = vst [vmem:[%s3076_s7 + $0x1120] sm:$0xff] %v1654_v21  ;;  %1679 = vst [vmem:[%s3076_s7 + $0x1160] sm:$0xff] %v1654_v21 }
 0x273   : > { %1687 = vst [vmem:[%s3076_s7 + $0x11a0] sm:$0xff] %v1654_v21  ;;  %1695 = vst [vmem:[%s3076_s7 + $0x11e0] sm:$0xff] %v1654_v21  ;;  %v2554_v21 = vrot.slane %v3770_v39, %v3062_v62  ;;  %v2114_v39 = vrot.slane %v3796_v46, %v3048_v55  ;;  %v2370_v55 = vrot.slane %v3796_v46, %v3056_v59 }
 0x274   : > { %1735 = vst [vmem:[%s3076_s7 + $0x1220] sm:$0xff] %v1718_v3  ;;  %1743 = vst [vmem:[%s3076_s7 + $0x1260] sm:$0xff] %v1718_v3 }
 0x275   : > { %1751 = vst [vmem:[%s3076_s7 + $0x12a0] sm:$0xff] %v1718_v3  ;;  %1759 = vst [vmem:[%s3076_s7 + $0x12e0] sm:$0xff] %v1718_v3  ;;  %v2178_v3 = vrot.slane %v3796_v46, %v3050_v56  ;;  %v2434_v56 = vrot.slane %v3796_v46, %v3058_v60 }
 0x276   : > { %1799 = vst [vmem:[%s3076_s7 + $0x1320] sm:$0xff] %v1782_v24  ;;  %1807 = vst [vmem:[%s3076_s7 + $0x1360] sm:$0xff] %v1782_v24 }
 0x277   : > { %1815 = vst [vmem:[%s3076_s7 + $0x13a0] sm:$0xff] %v1782_v24  ;;  %1823 = vst [vmem:[%s3076_s7 + $0x13e0] sm:$0xff] %v1782_v24  ;;  %v2242_v24 = vrot.slane %v3796_v46, %v3052_v57  ;;  %v2498_v57 = vrot.slane %v3796_v46, %v3060_v61 }
 0x278   : > { %1863 = vst [vmem:[%s3076_s7 + $0x1420] sm:$0xff] %v1846_v25  ;;  %1871 = vst [vmem:[%s3076_s7 + $0x1460] sm:$0xff] %v1846_v25 }
 0x279   : > { %1879 = vst [vmem:[%s3076_s7 + $0x14a0] sm:$0xff] %v1846_v25  ;;  %1887 = vst [vmem:[%s3076_s7 + $0x14e0] sm:$0xff] %v1846_v25  ;;  %v2306_v25 = vrot.slane %v3796_v46, %v3054_v58  ;;  %v2562_v58 = vrot.slane %v3796_v46, %v3062_v62 }
 0x27a   : > { %1927 = vst [vmem:[%s3076_s7 + $0x1520] sm:$0xff] %v1910_v26  ;;  %1935 = vst [vmem:[%s3076_s7 + $0x1560] sm:$0xff] %v1910_v26 }
 0x27b   : > { %1943 = vst [vmem:[%s3076_s7 + $0x15a0] sm:$0xff] %v1910_v26  ;;  %1951 = vst [vmem:[%s3076_s7 + $0x15e0] sm:$0xff] %v1910_v26 }
 0x27c   : > { %1991 = vst [vmem:[%s3076_s7 + $0x1620] sm:$0xff] %v1974_v27  ;;  %1999 = vst [vmem:[%s3076_s7 + $0x1660] sm:$0xff] %v1974_v27 }
 0x27d   : > { %2007 = vst [vmem:[%s3076_s7 + $0x16a0] sm:$0xff] %v1974_v27  ;;  %2015 = vst [vmem:[%s3076_s7 + $0x16e0] sm:$0xff] %v1974_v27 }
 0x27e   : > { %2055 = vst [vmem:[%s3076_s7 + $0x1720] sm:$0xff] %v2038_v30  ;;  %2063 = vst [vmem:[%s3076_s7 + $0x1760] sm:$0xff] %v2038_v30 }
 0x27f   : > { %2071 = vst [vmem:[%s3076_s7 + $0x17a0] sm:$0xff] %v2038_v30  ;;  %2079 = vst [vmem:[%s3076_s7 + $0x17e0] sm:$0xff] %v2038_v30 }
 0x280   : > { %1609 = vst [vmem:[%s3076_s7 + $0x1030] sm:$0xff] %v1598_v11  ;;  %1617 = vst [vmem:[%s3076_s7 + $0x1070] sm:$0xff] %v1598_v11 }
 0x281   : > { %1625 = vst [vmem:[%s3076_s7 + $0x10b0] sm:$0xff] %v1598_v11  ;;  %1633 = vst [vmem:[%s3076_s7 + $0x10f0] sm:$0xff] %v1598_v11 }
 0x282   : > { %1673 = vst [vmem:[%s3076_s7 + $0x1130] sm:$0xff] %v1662_v29  ;;  %1681 = vst [vmem:[%s3076_s7 + $0x1170] sm:$0xff] %v1662_v29 }
 0x283   : > { %1689 = vst [vmem:[%s3076_s7 + $0x11b0] sm:$0xff] %v1662_v29  ;;  %1697 = vst [vmem:[%s3076_s7 + $0x11f0] sm:$0xff] %v1662_v29 }
 0x284   : > { %1737 = vst [vmem:[%s3076_s7 + $0x1230] sm:$0xff] %v1726_v31  ;;  %1745 = vst [vmem:[%s3076_s7 + $0x1270] sm:$0xff] %v1726_v31 }
 0x285   : > { %1753 = vst [vmem:[%s3076_s7 + $0x12b0] sm:$0xff] %v1726_v31  ;;  %1761 = vst [vmem:[%s3076_s7 + $0x12f0] sm:$0xff] %v1726_v31 }
 0x286   : > { %1801 = vst [vmem:[%s3076_s7 + $0x1330] sm:$0xff] %v1790_v32  ;;  %1809 = vst [vmem:[%s3076_s7 + $0x1370] sm:$0xff] %v1790_v32 }
 0x287   : > { %1817 = vst [vmem:[%s3076_s7 + $0x13b0] sm:$0xff] %v1790_v32  ;;  %1825 = vst [vmem:[%s3076_s7 + $0x13f0] sm:$0xff] %v1790_v32 }
 0x288   : > { %1865 = vst [vmem:[%s3076_s7 + $0x1430] sm:$0xff] %v1854_v8  ;;  %1873 = vst [vmem:[%s3076_s7 + $0x1470] sm:$0xff] %v1854_v8 }
 0x289   : > { %1881 = vst [vmem:[%s3076_s7 + $0x14b0] sm:$0xff] %v1854_v8  ;;  %1889 = vst [vmem:[%s3076_s7 + $0x14f0] sm:$0xff] %v1854_v8 }
 0x28a   : > { %1929 = vst [vmem:[%s3076_s7 + $0x1530] sm:$0xff] %v1918_v35  ;;  %1937 = vst [vmem:[%s3076_s7 + $0x1570] sm:$0xff] %v1918_v35 }
 0x28b   : > { %1945 = vst [vmem:[%s3076_s7 + $0x15b0] sm:$0xff] %v1918_v35  ;;  %1953 = vst [vmem:[%s3076_s7 + $0x15f0] sm:$0xff] %v1918_v35 }
 0x28c   : > { %1993 = vst [vmem:[%s3076_s7 + $0x1630] sm:$0xff] %v1982_v36  ;;  %2001 = vst [vmem:[%s3076_s7 + $0x1670] sm:$0xff] %v1982_v36 }
 0x28d   : > { %2009 = vst [vmem:[%s3076_s7 + $0x16b0] sm:$0xff] %v1982_v36  ;;  %2017 = vst [vmem:[%s3076_s7 + $0x16f0] sm:$0xff] %v1982_v36 }
 0x28e   : > { %2057 = vst [vmem:[%s3076_s7 + $0x1730] sm:$0xff] %v2046_v37  ;;  %2065 = vst [vmem:[%s3076_s7 + $0x1770] sm:$0xff] %v2046_v37 }
 0x28f   : > { %2073 = vst [vmem:[%s3076_s7 + $0x17b0] sm:$0xff] %v2046_v37  ;;  %2081 = vst [vmem:[%s3076_s7 + $0x17f0] sm:$0xff] %v2046_v37 }
 0x290   : > { %1608 = vst [vmem:[%s3076_s7 + $0x1028] sm:$0xff] %v1594_v16  ;;  %1616 = vst [vmem:[%s3076_s7 + $0x1068] sm:$0xff] %v1594_v16 }
 0x291   : > { %1624 = vst [vmem:[%s3076_s7 + $0x10a8] sm:$0xff] %v1594_v16  ;;  %1632 = vst [vmem:[%s3076_s7 + $0x10e8] sm:$0xff] %v1594_v16 }
 0x292   : > { %1672 = vst [vmem:[%s3076_s7 + $0x1128] sm:$0xff] %v1658_v40  ;;  %1680 = vst [vmem:[%s3076_s7 + $0x1168] sm:$0xff] %v1658_v40 }
 0x293   : > { %1688 = vst [vmem:[%s3076_s7 + $0x11a8] sm:$0xff] %v1658_v40  ;;  %1696 = vst [vmem:[%s3076_s7 + $0x11e8] sm:$0xff] %v1658_v40 }
 0x294   : > { %1736 = vst [vmem:[%s3076_s7 + $0x1228] sm:$0xff] %v1722_v34  ;;  %1744 = vst [vmem:[%s3076_s7 + $0x1268] sm:$0xff] %v1722_v34 }
 0x295   : > { %1752 = vst [vmem:[%s3076_s7 + $0x12a8] sm:$0xff] %v1722_v34  ;;  %1760 = vst [vmem:[%s3076_s7 + $0x12e8] sm:$0xff] %v1722_v34 }
 0x296   : > { %1800 = vst [vmem:[%s3076_s7 + $0x1328] sm:$0xff] %v1786_v41  ;;  %1808 = vst [vmem:[%s3076_s7 + $0x1368] sm:$0xff] %v1786_v41 }
 0x297   : > { %1816 = vst [vmem:[%s3076_s7 + $0x13a8] sm:$0xff] %v1786_v41  ;;  %1824 = vst [vmem:[%s3076_s7 + $0x13e8] sm:$0xff] %v1786_v41 }
 0x298   : > { %1864 = vst [vmem:[%s3076_s7 + $0x1428] sm:$0xff] %v1850_v42  ;;  %1872 = vst [vmem:[%s3076_s7 + $0x1468] sm:$0xff] %v1850_v42 }
 0x299   : > { %1880 = vst [vmem:[%s3076_s7 + $0x14a8] sm:$0xff] %v1850_v42  ;;  %1888 = vst [vmem:[%s3076_s7 + $0x14e8] sm:$0xff] %v1850_v42 }
 0x29a   : > { %1928 = vst [vmem:[%s3076_s7 + $0x1528] sm:$0xff] %v1914_v44  ;;  %1936 = vst [vmem:[%s3076_s7 + $0x1568] sm:$0xff] %v1914_v44 }
 0x29b   : > { %1944 = vst [vmem:[%s3076_s7 + $0x15a8] sm:$0xff] %v1914_v44  ;;  %1952 = vst [vmem:[%s3076_s7 + $0x15e8] sm:$0xff] %v1914_v44 }
 0x29c   : > { %1992 = vst [vmem:[%s3076_s7 + $0x1628] sm:$0xff] %v1978_v9  ;;  %2000 = vst [vmem:[%s3076_s7 + $0x1668] sm:$0xff] %v1978_v9 }
 0x29d   : > { %2008 = vst [vmem:[%s3076_s7 + $0x16a8] sm:$0xff] %v1978_v9  ;;  %2016 = vst [vmem:[%s3076_s7 + $0x16e8] sm:$0xff] %v1978_v9 }
 0x29e   : > { %2056 = vst [vmem:[%s3076_s7 + $0x1728] sm:$0xff] %v2042_v47  ;;  %2064 = vst [vmem:[%s3076_s7 + $0x1768] sm:$0xff] %v2042_v47 }
 0x29f   : > { %2072 = vst [vmem:[%s3076_s7 + $0x17a8] sm:$0xff] %v2042_v47  ;;  %2080 = vst [vmem:[%s3076_s7 + $0x17e8] sm:$0xff] %v2042_v47 }
 0x2a0   : > { %1610 = vst [vmem:[%s3076_s7 + $0x1038] sm:$0xff] %v1602_v17  ;;  %1618 = vst [vmem:[%s3076_s7 + $0x1078] sm:$0xff] %v1602_v17 }
 0x2a1   : > { %1626 = vst [vmem:[%s3076_s7 + $0x10b8] sm:$0xff] %v1602_v17  ;;  %1634 = vst [vmem:[%s3076_s7 + $0x10f8] sm:$0xff] %v1602_v17 }
 0x2a2   : > { %1674 = vst [vmem:[%s3076_s7 + $0x1138] sm:$0xff] %v1666_v48  ;;  %1682 = vst [vmem:[%s3076_s7 + $0x1178] sm:$0xff] %v1666_v48 }
 0x2a3   : > { %1690 = vst [vmem:[%s3076_s7 + $0x11b8] sm:$0xff] %v1666_v48  ;;  %1698 = vst [vmem:[%s3076_s7 + $0x11f8] sm:$0xff] %v1666_v48 }
 0x2a4   : > { %1738 = vst [vmem:[%s3076_s7 + $0x1238] sm:$0xff] %v1730_v52  ;;  %1746 = vst [vmem:[%s3076_s7 + $0x1278] sm:$0xff] %v1730_v52 }
 0x2a5   : > { %1754 = vst [vmem:[%s3076_s7 + $0x12b8] sm:$0xff] %v1730_v52  ;;  %1762 = vst [vmem:[%s3076_s7 + $0x12f8] sm:$0xff] %v1730_v52 }
 0x2a6   : > { %1802 = vst [vmem:[%s3076_s7 + $0x1338] sm:$0xff] %v1794_v43  ;;  %1810 = vst [vmem:[%s3076_s7 + $0x1378] sm:$0xff] %v1794_v43 }
 0x2a7   : > { %1818 = vst [vmem:[%s3076_s7 + $0x13b8] sm:$0xff] %v1794_v43  ;;  %1826 = vst [vmem:[%s3076_s7 + $0x13f8] sm:$0xff] %v1794_v43 }
 0x2a8   : > { %1866 = vst [vmem:[%s3076_s7 + $0x1438] sm:$0xff] %v1858_v53  ;;  %1874 = vst [vmem:[%s3076_s7 + $0x1478] sm:$0xff] %v1858_v53 }
 0x2a9   : > { %1882 = vst [vmem:[%s3076_s7 + $0x14b8] sm:$0xff] %v1858_v53  ;;  %1890 = vst [vmem:[%s3076_s7 + $0x14f8] sm:$0xff] %v1858_v53 }
 0x2aa   : > { %1930 = vst [vmem:[%s3076_s7 + $0x1538] sm:$0xff] %v1922_v54  ;;  %1938 = vst [vmem:[%s3076_s7 + $0x1578] sm:$0xff] %v1922_v54 }
 0x2ab   : > { %1946 = vst [vmem:[%s3076_s7 + $0x15b8] sm:$0xff] %v1922_v54  ;;  %1954 = vst [vmem:[%s3076_s7 + $0x15f8] sm:$0xff] %v1922_v54 }
 0x2ac   : > { %1994 = vst [vmem:[%s3076_s7 + $0x1638] sm:$0xff] %v1986_v63  ;;  %2002 = vst [vmem:[%s3076_s7 + $0x1678] sm:$0xff] %v1986_v63 }
 0x2ad   : > { %2010 = vst [vmem:[%s3076_s7 + $0x16b8] sm:$0xff] %v1986_v63  ;;  %2018 = vst [vmem:[%s3076_s7 + $0x16f8] sm:$0xff] %v1986_v63 }
 0x2ae   : > { %2058 = vst [vmem:[%s3076_s7 + $0x1738] sm:$0xff] %v2050_v45  ;;  %2066 = vst [vmem:[%s3076_s7 + $0x1778] sm:$0xff] %v2050_v45 }
 0x2af   : > { %2074 = vst [vmem:[%s3076_s7 + $0x17b8] sm:$0xff] %v2050_v45  ;;  %2082 = vst [vmem:[%s3076_s7 + $0x17f8] sm:$0xff] %v2050_v45 }
 0x2b0   : > { %2119 = vst [vmem:[%s3076_s7 + $0x1820] sm:$0xff] %v2102_v22  ;;  %2127 = vst [vmem:[%s3076_s7 + $0x1860] sm:$0xff] %v2102_v22 }
 0x2b1   : > { %2135 = vst [vmem:[%s3076_s7 + $0x18a0] sm:$0xff] %v2102_v22  ;;  %2143 = vst [vmem:[%s3076_s7 + $0x18e0] sm:$0xff] %v2102_v22 }
 0x2b2   : > { %2183 = vst [vmem:[%s3076_s7 + $0x1920] sm:$0xff] %v2166_v14  ;;  %2191 = vst [vmem:[%s3076_s7 + $0x1960] sm:$0xff] %v2166_v14 }
 0x2b3   : > { %2199 = vst [vmem:[%s3076_s7 + $0x19a0] sm:$0xff] %v2166_v14  ;;  %2207 = vst [vmem:[%s3076_s7 + $0x19e0] sm:$0xff] %v2166_v14 }
 0x2b4   : > { %2247 = vst [vmem:[%s3076_s7 + $0x1a20] sm:$0xff] %v2230_v1  ;;  %2255 = vst [vmem:[%s3076_s7 + $0x1a60] sm:$0xff] %v2230_v1 }
 0x2b5   : > { %2263 = vst [vmem:[%s3076_s7 + $0x1aa0] sm:$0xff] %v2230_v1  ;;  %2271 = vst [vmem:[%s3076_s7 + $0x1ae0] sm:$0xff] %v2230_v1 }
 0x2b6   : > { %2311 = vst [vmem:[%s3076_s7 + $0x1b20] sm:$0xff] %v2294_v2  ;;  %2319 = vst [vmem:[%s3076_s7 + $0x1b60] sm:$0xff] %v2294_v2 }
 0x2b7   : > { %2327 = vst [vmem:[%s3076_s7 + $0x1ba0] sm:$0xff] %v2294_v2  ;;  %2335 = vst [vmem:[%s3076_s7 + $0x1be0] sm:$0xff] %v2294_v2 }
 0x2b8   : > { %2375 = vst [vmem:[%s3076_s7 + $0x1c20] sm:$0xff] %v2358_v49  ;;  %2383 = vst [vmem:[%s3076_s7 + $0x1c60] sm:$0xff] %v2358_v49 }
 0x2b9   : > { %2391 = vst [vmem:[%s3076_s7 + $0x1ca0] sm:$0xff] %v2358_v49  ;;  %2399 = vst [vmem:[%s3076_s7 + $0x1ce0] sm:$0xff] %v2358_v49 }
 0x2ba   : > { %2439 = vst [vmem:[%s3076_s7 + $0x1d20] sm:$0xff] %v2422_v4  ;;  %2447 = vst [vmem:[%s3076_s7 + $0x1d60] sm:$0xff] %v2422_v4 }
 0x2bb   : > { %2455 = vst [vmem:[%s3076_s7 + $0x1da0] sm:$0xff] %v2422_v4  ;;  %2463 = vst [vmem:[%s3076_s7 + $0x1de0] sm:$0xff] %v2422_v4 }
 0x2bc   : > { %2503 = vst [vmem:[%s3076_s7 + $0x1e20] sm:$0xff] %v2486_v5  ;;  %2511 = vst [vmem:[%s3076_s7 + $0x1e60] sm:$0xff] %v2486_v5 }
 0x2bd   : > { %2519 = vst [vmem:[%s3076_s7 + $0x1ea0] sm:$0xff] %v2486_v5  ;;  %2527 = vst [vmem:[%s3076_s7 + $0x1ee0] sm:$0xff] %v2486_v5 }
 0x2be   : > { %2567 = vst [vmem:[%s3076_s7 + $0x1f20] sm:$0xff] %v2550_v6  ;;  %2575 = vst [vmem:[%s3076_s7 + $0x1f60] sm:$0xff] %v2550_v6 }
 0x2bf   : > { %2583 = vst [vmem:[%s3076_s7 + $0x1fa0] sm:$0xff] %v2550_v6  ;;  %2591 = vst [vmem:[%s3076_s7 + $0x1fe0] sm:$0xff] %v2550_v6 }
 0x2c0   : > { %2121 = vst [vmem:[%s3076_s7 + $0x1830] sm:$0xff] %v2110_v33  ;;  %2129 = vst [vmem:[%s3076_s7 + $0x1870] sm:$0xff] %v2110_v33 }
 0x2c1   : > { %2137 = vst [vmem:[%s3076_s7 + $0x18b0] sm:$0xff] %v2110_v33  ;;  %2145 = vst [vmem:[%s3076_s7 + $0x18f0] sm:$0xff] %v2110_v33 }
 0x2c2   : > { %2185 = vst [vmem:[%s3076_s7 + $0x1930] sm:$0xff] %v2174_v7  ;;  %2193 = vst [vmem:[%s3076_s7 + $0x1970] sm:$0xff] %v2174_v7 }
 0x2c3   : > { %2201 = vst [vmem:[%s3076_s7 + $0x19b0] sm:$0xff] %v2174_v7  ;;  %2209 = vst [vmem:[%s3076_s7 + $0x19f0] sm:$0xff] %v2174_v7 }
 0x2c4   : > { %2249 = vst [vmem:[%s3076_s7 + $0x1a30] sm:$0xff] %v2238_v10  ;;  %2257 = vst [vmem:[%s3076_s7 + $0x1a70] sm:$0xff] %v2238_v10 }
 0x2c5   : > { %2265 = vst [vmem:[%s3076_s7 + $0x1ab0] sm:$0xff] %v2238_v10  ;;  %2273 = vst [vmem:[%s3076_s7 + $0x1af0] sm:$0xff] %v2238_v10 }
 0x2c6   : > { %2313 = vst [vmem:[%s3076_s7 + $0x1b30] sm:$0xff] %v2302_v23  ;;  %2321 = vst [vmem:[%s3076_s7 + $0x1b70] sm:$0xff] %v2302_v23 }
 0x2c7   : > { %2329 = vst [vmem:[%s3076_s7 + $0x1bb0] sm:$0xff] %v2302_v23  ;;  %2337 = vst [vmem:[%s3076_s7 + $0x1bf0] sm:$0xff] %v2302_v23 }
 0x2c8   : > { %2377 = vst [vmem:[%s3076_s7 + $0x1c30] sm:$0xff] %v2366_v50  ;;  %2385 = vst [vmem:[%s3076_s7 + $0x1c70] sm:$0xff] %v2366_v50 }
 0x2c9   : > { %2393 = vst [vmem:[%s3076_s7 + $0x1cb0] sm:$0xff] %v2366_v50  ;;  %2401 = vst [vmem:[%s3076_s7 + $0x1cf0] sm:$0xff] %v2366_v50 }
 0x2ca   : > { %2441 = vst [vmem:[%s3076_s7 + $0x1d30] sm:$0xff] %v2430_v51  ;;  %2449 = vst [vmem:[%s3076_s7 + $0x1d70] sm:$0xff] %v2430_v51 }
 0x2cb   : > { %2457 = vst [vmem:[%s3076_s7 + $0x1db0] sm:$0xff] %v2430_v51  ;;  %2465 = vst [vmem:[%s3076_s7 + $0x1df0] sm:$0xff] %v2430_v51 }
 0x2cc   : > { %2505 = vst [vmem:[%s3076_s7 + $0x1e30] sm:$0xff] %v2494_v12  ;;  %2513 = vst [vmem:[%s3076_s7 + $0x1e70] sm:$0xff] %v2494_v12 }
 0x2cd   : > { %2521 = vst [vmem:[%s3076_s7 + $0x1eb0] sm:$0xff] %v2494_v12  ;;  %2529 = vst [vmem:[%s3076_s7 + $0x1ef0] sm:$0xff] %v2494_v12 }
 0x2ce   : > { %2569 = vst [vmem:[%s3076_s7 + $0x1f30] sm:$0xff] %v2558_v13  ;;  %2577 = vst [vmem:[%s3076_s7 + $0x1f70] sm:$0xff] %v2558_v13 }
 0x2cf   : > { %2585 = vst [vmem:[%s3076_s7 + $0x1fb0] sm:$0xff] %v2558_v13  ;;  %2593 = vst [vmem:[%s3076_s7 + $0x1ff0] sm:$0xff] %v2558_v13 }
 0x2d0   : > { %2120 = vst [vmem:[%s3076_s7 + $0x1828] sm:$0xff] %v2106_v38  ;;  %2128 = vst [vmem:[%s3076_s7 + $0x1868] sm:$0xff] %v2106_v38 }
 0x2d1   : > { %2136 = vst [vmem:[%s3076_s7 + $0x18a8] sm:$0xff] %v2106_v38  ;;  %2144 = vst [vmem:[%s3076_s7 + $0x18e8] sm:$0xff] %v2106_v38 }
 0x2d2   : > { %2184 = vst [vmem:[%s3076_s7 + $0x1928] sm:$0xff] %v2170_v15  ;;  %2192 = vst [vmem:[%s3076_s7 + $0x1968] sm:$0xff] %v2170_v15 }
 0x2d3   : > { %2200 = vst [vmem:[%s3076_s7 + $0x19a8] sm:$0xff] %v2170_v15  ;;  %2208 = vst [vmem:[%s3076_s7 + $0x19e8] sm:$0xff] %v2170_v15 }
 0x2d4   : > { %2248 = vst [vmem:[%s3076_s7 + $0x1a28] sm:$0xff] %v2234_v18  ;;  %2256 = vst [vmem:[%s3076_s7 + $0x1a68] sm:$0xff] %v2234_v18 }
 0x2d5   : > { %2264 = vst [vmem:[%s3076_s7 + $0x1aa8] sm:$0xff] %v2234_v18  ;;  %2272 = vst [vmem:[%s3076_s7 + $0x1ae8] sm:$0xff] %v2234_v18 }
 0x2d6   : > { %2312 = vst [vmem:[%s3076_s7 + $0x1b28] sm:$0xff] %v2298_v19  ;;  %2320 = vst [vmem:[%s3076_s7 + $0x1b68] sm:$0xff] %v2298_v19 }
 0x2d7   : > { %2328 = vst [vmem:[%s3076_s7 + $0x1ba8] sm:$0xff] %v2298_v19  ;;  %2336 = vst [vmem:[%s3076_s7 + $0x1be8] sm:$0xff] %v2298_v19 }
 0x2d8   : > { %2376 = vst [vmem:[%s3076_s7 + $0x1c28] sm:$0xff] %v2362_v20  ;;  %2384 = vst [vmem:[%s3076_s7 + $0x1c68] sm:$0xff] %v2362_v20 }
 0x2d9   : > { %2392 = vst [vmem:[%s3076_s7 + $0x1ca8] sm:$0xff] %v2362_v20  ;;  %2400 = vst [vmem:[%s3076_s7 + $0x1ce8] sm:$0xff] %v2362_v20 }
 0x2da   : > { %2440 = vst [vmem:[%s3076_s7 + $0x1d28] sm:$0xff] %v2426_v28  ;;  %2448 = vst [vmem:[%s3076_s7 + $0x1d68] sm:$0xff] %v2426_v28 }
 0x2db   : > { %2456 = vst [vmem:[%s3076_s7 + $0x1da8] sm:$0xff] %v2426_v28  ;;  %2464 = vst [vmem:[%s3076_s7 + $0x1de8] sm:$0xff] %v2426_v28 }
 0x2dc   : > { %2504 = vst [vmem:[%s3076_s7 + $0x1e28] sm:$0xff] %v2490_v0  ;;  %2512 = vst [vmem:[%s3076_s7 + $0x1e68] sm:$0xff] %v2490_v0 }
 0x2dd   : > { %2520 = vst [vmem:[%s3076_s7 + $0x1ea8] sm:$0xff] %v2490_v0  ;;  %2528 = vst [vmem:[%s3076_s7 + $0x1ee8] sm:$0xff] %v2490_v0 }
 0x2de   : > { %2568 = vst [vmem:[%s3076_s7 + $0x1f28] sm:$0xff] %v2554_v21  ;;  %2576 = vst [vmem:[%s3076_s7 + $0x1f68] sm:$0xff] %v2554_v21 }
 0x2df   : > { %2584 = vst [vmem:[%s3076_s7 + $0x1fa8] sm:$0xff] %v2554_v21  ;;  %2592 = vst [vmem:[%s3076_s7 + $0x1fe8] sm:$0xff] %v2554_v21 }
 0x2e0   : > { %2122 = vst [vmem:[%s3076_s7 + $0x1838] sm:$0xff] %v2114_v39  ;;  %2130 = vst [vmem:[%s3076_s7 + $0x1878] sm:$0xff] %v2114_v39 }
 0x2e1   : > { %2138 = vst [vmem:[%s3076_s7 + $0x18b8] sm:$0xff] %v2114_v39  ;;  %2146 = vst [vmem:[%s3076_s7 + $0x18f8] sm:$0xff] %v2114_v39 }
 0x2e2   : > { %2186 = vst [vmem:[%s3076_s7 + $0x1938] sm:$0xff] %v2178_v3  ;;  %2194 = vst [vmem:[%s3076_s7 + $0x1978] sm:$0xff] %v2178_v3 }
 0x2e3   : > { %2202 = vst [vmem:[%s3076_s7 + $0x19b8] sm:$0xff] %v2178_v3  ;;  %2210 = vst [vmem:[%s3076_s7 + $0x19f8] sm:$0xff] %v2178_v3 }
 0x2e4   : > { %2250 = vst [vmem:[%s3076_s7 + $0x1a38] sm:$0xff] %v2242_v24  ;;  %2258 = vst [vmem:[%s3076_s7 + $0x1a78] sm:$0xff] %v2242_v24 }
 0x2e5   : > { %2266 = vst [vmem:[%s3076_s7 + $0x1ab8] sm:$0xff] %v2242_v24  ;;  %2274 = vst [vmem:[%s3076_s7 + $0x1af8] sm:$0xff] %v2242_v24 }
 0x2e6   : > { %2314 = vst [vmem:[%s3076_s7 + $0x1b38] sm:$0xff] %v2306_v25  ;;  %2322 = vst [vmem:[%s3076_s7 + $0x1b78] sm:$0xff] %v2306_v25 }
 0x2e7   : > { %2330 = vst [vmem:[%s3076_s7 + $0x1bb8] sm:$0xff] %v2306_v25  ;;  %2338 = vst [vmem:[%s3076_s7 + $0x1bf8] sm:$0xff] %v2306_v25 }
 0x2e8   : > { %2378 = vst [vmem:[%s3076_s7 + $0x1c38] sm:$0xff] %v2370_v55  ;;  %2386 = vst [vmem:[%s3076_s7 + $0x1c78] sm:$0xff] %v2370_v55 }
 0x2e9   : > { %2394 = vst [vmem:[%s3076_s7 + $0x1cb8] sm:$0xff] %v2370_v55  ;;  %2402 = vst [vmem:[%s3076_s7 + $0x1cf8] sm:$0xff] %v2370_v55 }
 0x2ea   : > { %2442 = vst [vmem:[%s3076_s7 + $0x1d38] sm:$0xff] %v2434_v56  ;;  %2450 = vst [vmem:[%s3076_s7 + $0x1d78] sm:$0xff] %v2434_v56 }
 0x2eb   : > { %2458 = vst [vmem:[%s3076_s7 + $0x1db8] sm:$0xff] %v2434_v56  ;;  %2466 = vst [vmem:[%s3076_s7 + $0x1df8] sm:$0xff] %v2434_v56 }
 0x2ec   : > { %2506 = vst [vmem:[%s3076_s7 + $0x1e38] sm:$0xff] %v2498_v57  ;;  %2514 = vst [vmem:[%s3076_s7 + $0x1e78] sm:$0xff] %v2498_v57 }
 0x2ed   : > { %2522 = vst [vmem:[%s3076_s7 + $0x1eb8] sm:$0xff] %v2498_v57  ;;  %2530 = vst [vmem:[%s3076_s7 + $0x1ef8] sm:$0xff] %v2498_v57 }
 0x2ee   : > { %2570 = vst [vmem:[%s3076_s7 + $0x1f38] sm:$0xff] %v2562_v58  ;;  %2578 = vst [vmem:[%s3076_s7 + $0x1f78] sm:$0xff] %v2562_v58 }
 0x2ef   : > { %2586 = vst [vmem:[%s3076_s7 + $0x1fb8] sm:$0xff] %v2562_v58  ;;  %2594 = vst [vmem:[%s3076_s7 + $0x1ff8] sm:$0xff] %v2562_v58 }
 0x2f0   : > { %2788 = shalt.err (!%p2785_p3)
}
 0x2f1   : > { %s2789_s27 = scalar_lea.hbm %s4597_s23, 131072  ;;  %s2793_s30 = scalar_lea.hbm %s4704_s2, 786432 }
 0x2f2   : > { %p2790_p4 = scmp.ne.s32.totalorder %s4597_s23, %s2789_s27  ;;  %p2794_p9 = scmp.lt.u32.totalorder %s4597_s23, %s4704_s2 }
 0x2f3   : > { %p2795_p10 = scmp.lt.u32.totalorder %s2793_s30, %s2789_s27  ;;  %p2797_p12 = scmp.lt.u32.totalorder %s2789_s27, %s4597_s23 }
 0x2f4   : > { %p2791_p7 = pnand %p2790_p4, %p2896_p5 }
 0x2f5   : > { %p2796_p11 = por %p2795_p10, %p2794_p9 }
 0x2f6   : > { %p2792_p8 = pneg %p2791_p7 }
 0x2f7   : > { %p2798_p13 = por %p2797_p12, %p2796_p11 }
 0x2f9   : > { %p2799_p0 = pnand %p2798_p13, %p2792_p8 }
 0x2fb   : > { %2802 = shalt.err (!%p2799_p0)
}
 0x2fc   : > { %s2841_s5 = smov 1024   ;;  %s2842_s16 = smov 64  }
 0x2fd   : > { %2733 = dma.vmem_to_hbm [thread:$0]  (%p2896_p5), %s4601_s14, 131072, %s4597_s23, %s4661_s13, %s2841_s5, %s2841_s5, %s2842_s16  }
 0x2fe PF: > { %p2739_p1 = scmp.ge.s32.totalorder %s2837_s12, 2  ;;  %s2624_s6 = sand.u32 1, %s2825_s9  }
 0x2ff   : > { %s2625_s7 = scalar_lea.sflag [#allocation3], %s2624_s6 }
 0x300   : > { %p2736_p2 = pnand %p2739_p1, %p2900_p6 }
 0x302   : > { %2820 = dma.done.wait (!%p2736_p2), %s2625_s7, 131072  }
 0x303   : > { %2822 = vsyncadd (!%p2736_p2), %s2625_s7, 4294836224  ;;  %p12_p3 = scmp.ge.s32.totalorder %s2883_s15, 8   ;;  %s4707_s9 = smov %s2829_s10 }
 0x304   : > { %s4708_s10 = smov %s2833_s11  ;;  %s4709_s11 = smov %s2894_s18 }
 0x305   : > { %s4710_s12 = smov %s2883_s15  ;;  %14 = sbr.rel (!%p12_p3) target bundleno = 3 (0x3), region = 63 }
 0x30c   :  { %2630 = vsyncpa [#allocation3], 1 }
 0x30d   :  { %2632 = vsyncpa [#allocation3 + $0x1], 1 }

// kernel: non_id_reconstructor_forward.2
= control target key start
LH: loop header
LB: loop body
LE: loop exit
PB: predicated region body
PF: predicated region fallthrough
CT: control target
= control target key end

     0   :  { %11 = vsyncpa [#allocation3], 0  ;;  %s15082_s0 = inlined_call_operand.vmem [shape: f32[2,18,512], index: 0, kind: input, shape index: {}]   ;;  %s15083_s1 = inlined_call_operand.hbm [shape: bf16[512,3072], index: 1, kind: input, shape index: {}]   ;;  %s15084_s2 = inlined_call_operand.hbm [shape: bf16[3072,512], index: 2, kind: input, shape index: {}]   ;;  %s15085_s3 = inlined_call_operand.hbm [shape: f32[1,512], index: 3, kind: input, shape index: {}]   ;;  %s15086_s4 = inlined_call_operand.vmem [shape: f32[2,3072], index: 4, kind: output, shape index: {0}]   ;;  %s15087_s5 = inlined_call_operand.vmem [shape: f32[2,512], index: 5, kind: output, shape index: {1}]  }
   0x1   :  { %12 = vsyncpa [#allocation5], 0  ;;  %s14676_s18 = smov [#allocation4]   ;;  %s14606_s22 = scalar_lea.hbm %s15084_s2, 98304 }
   0x2   :  { %s32_s19 = sshll.u32 %s14676_s18, 4  ;;  %p14607_p0 = scmp.ne.s32.totalorder %s15084_s2, %s14606_s22  ;;  %s33_s19 = int_to_ptr.vmem [resolvable:$true] %s32_s19 }
   0x3   :  { %p14610_p1 = scmp.lt.u32.totalorder %s14606_s22, %s15084_s2 }
   0x5   :  { %p14612_p2 = pnand %p14610_p1, %p14607_p0 }
   0x7   :  { %14615 = shalt.err (!%p14612_p2)
}
   0x8   :  { %s14616_s27 = scalar_lea.vmem %s33_s19, 98304  ;;  %p14621_p4 = scmp.lt.s32.totalorder %s33_s19, %s33_s19 }
   0x9   :  { %p14617_p3 = scmp.ne.s32.totalorder %s33_s19, %s14616_s27  ;;  %p14622_p5 = scmp.lt.s32.totalorder %s14616_s27, %s14616_s27 }
   0xb   :  { %p14623_p6 = por %p14622_p5, %p14621_p4 }
   0xd   :  { %p14624_p7 = pnand %p14623_p6, %p14617_p3 }
   0xf   :  { %14627 = shalt.err (!%p14624_p7)
}
  0x10   :  { %s14677_s28 = smov 256   ;;  %s14678_s29 = smov 16  }
  0x11   :  { %38 = dma.hbm_to_vmem [thread:$0]  %s15084_s2, 98304, %s33_s19, [#allocation5], %s14677_s28, %s14677_s28, %s14678_s29  }
  0x12   :  { %s14679_s7 = smov [#allocation2]   ;;  %s14628_s11 = scalar_lea.hbm %s15083_s1, 98304 }
  0x13   :  { %s20_s8 = sshll.u32 %s14679_s7, 4  ;;  %p14629_p8 = scmp.ne.s32.totalorder %s15083_s1, %s14628_s11  ;;  %s21_s8 = int_to_ptr.vmem [resolvable:$true] %s20_s8 }
  0x14   :  { %p14632_p9 = scmp.lt.u32.totalorder %s14628_s11, %s15083_s1 }
  0x16   :  { %p14634_p10 = pnand %p14632_p9, %p14629_p8 }
  0x18   :  { %14637 = shalt.err (!%p14634_p10)
}
  0x19   :  { %s14638_s16 = scalar_lea.vmem %s21_s8, 98304  ;;  %p14643_p12 = scmp.lt.s32.totalorder %s21_s8, %s21_s8 }
  0x1a   :  { %p14639_p11 = scmp.ne.s32.totalorder %s21_s8, %s14638_s16  ;;  %p14644_p13 = scmp.lt.s32.totalorder %s14638_s16, %s14638_s16 }
  0x1c   :  { %p14645_p0 = por %p14644_p13, %p14643_p12 }
  0x1e   :  { %p14646_p1 = pnand %p14645_p0, %p14639_p11 }
  0x20   :  { %14649 = shalt.err (!%p14646_p1)
}
  0x21   :  { %s14680_s2 = smov 1536   ;;  %s14681_s17 = smov 96  }
  0x22   :  { %26 = dma.hbm_to_vmem [thread:$0]  %s15083_s1, 98304, %s21_s8, [#allocation3], %s14680_s2, %s14680_s2, %s14681_s17  }
  0x23   :  { %s14682_s20 = smov [#allocation6]   ;;  %s14650_s24 = scalar_lea.hbm %s15085_s3, 64 }
  0x24   :  { %s45_s21 = sshll.u32 %s14682_s20, 4  ;;  %p14651_p2 = scmp.ne.s32.totalorder %s15085_s3, %s14650_s24  ;;  %s46_s21 = int_to_ptr.vmem [resolvable:$true] %s45_s21 }
  0x25   :  { %p14654_p3 = scmp.lt.u32.totalorder %s14650_s24, %s15085_s3 }
  0x27   :  { %p14656_p4 = pnand %p14654_p3, %p14651_p2 }
  0x29   :  { %14659 = shalt.err (!%p14656_p4)
}
  0x2a   :  { %s14660_s29 = scalar_lea.vmem %s46_s21, 64  ;;  %p14665_p6 = scmp.lt.s32.totalorder %s46_s21, %s46_s21 }
  0x2b   :  { %p14661_p5 = scmp.ne.s32.totalorder %s46_s21, %s14660_s29  ;;  %p14666_p7 = scmp.lt.s32.totalorder %s14660_s29, %s14660_s29 }
  0x2d   :  { %p14667_p8 = por %p14666_p7, %p14665_p6 }
  0x2f   :  { %p14668_p9 = pnand %p14667_p8, %p14661_p5 }
  0x31   :  { %14671 = shalt.err (!%p14668_p9)
}
  0x32   :  { %48 = dma.hbm_to_vmem [thread:$0]  %s15085_s3, 64, %s46_s21, [#allocation5]  }
  0x33   :  { %14672 = dma.done.wait [#allocation3], 98304  }
  0x34   :  { %14673 = vsyncadd [#allocation3], 4294868992 }
  0x35   :  { %14674 = dma.done.wait [#allocation5], 98368  }
  0x36   :  { %14675 = vsyncadd [#allocation5], 4294868928  ;;  %v172_v0 = vld [vmem:[#allocation2] sm:$0xff]  ;;  %v173_v2 = vld [vmem:[#allocation2 + $0x8] sm:$0xff]  ;;  %vm83_vm0 = vcmask 1041408   ;;  %vm956_vm1 = vcmask 1041409  }
  0x37   :  { %v184_v1 = vld [vmem:[#allocation2 + $0x60] sm:$0xff]  ;;  %v185_v4 = vld [vmem:[#allocation2 + $0x68] sm:$0xff] }
  0x38   :  { %v11723_v3 = vcombine.high %v172_v0, %v184_v1  ;;  %v11722_v5 = vcombine.low %v172_v0, %v184_v1  ;;  %v196_v6 = vld [vmem:[#allocation2 + $0xc0] sm:$0xff]  ;;  %v11725_v8 = vcombine.high %v173_v2, %v185_v4  ;;  %v11724_v9 = vcombine.low %v173_v2, %v185_v4  ;;  %v197_v11 = vld [vmem:[#allocation2 + $0xc8] sm:$0xff] }
  0x39   :  { %v208_v7 = vld [vmem:[#allocation2 + $0x120] sm:$0xff]  ;;  %v209_v12 = vld [vmem:[#allocation2 + $0x128] sm:$0xff] }
  0x3a   :  { %v11747_v10 = vcombine.high %v196_v6, %v208_v7  ;;  %v220_v13 = vld [vmem:[#allocation2 + $0x180] sm:$0xff]  ;;  %4809 = vmatprep.subr.bf16.mxu0 %v11723_v3  ;;  %v11749_v14 = vcombine.high %v197_v11, %v209_v12  ;;  %v221_v16 = vld [vmem:[#allocation2 + $0x188] sm:$0xff]  ;;  %4891 = vmatprep.subr.bf16.mxu1 %v11725_v8  ;;  %v11746_v18 = vcombine.low %v196_v6, %v208_v7 }
  0x3b   :  { %v232_v15 = vld [vmem:[#allocation2 + $0x1e0] sm:$0xff]  ;;  %v233_v17 = vld [vmem:[#allocation2 + $0x1e8] sm:$0xff]  ;;  %4810 = vmatpush1.bf16.msra.mxu0 %v11722_v5  ;;  %4892 = vmatpush1.bf16.msra.mxu1 %v11724_v9  ;;  %v11748_v19 = vcombine.low %v197_v11, %v209_v12 }
  0x3c   :  { %4811 = vmatprep.subr.bf16.mxu0 %v11747_v10  ;;  %v11771_v20 = vcombine.high %v220_v13, %v232_v15  ;;  %4893 = vmatprep.subr.bf16.mxu1 %v11749_v14  ;;  %v11773_v21 = vcombine.high %v221_v16, %v233_v17  ;;  %v244_v22 = vld [vmem:[#allocation2 + $0x240] sm:$0xff]  ;;  %v245_v24 = vld [vmem:[#allocation2 + $0x248] sm:$0xff]  ;;  %v11770_v26 = vcombine.low %v220_v13, %v232_v15 }
  0x3d   :  { %v256_v23 = vld [vmem:[#allocation2 + $0x2a0] sm:$0xff]  ;;  %v257_v25 = vld [vmem:[#allocation2 + $0x2a8] sm:$0xff]  ;;  %v11772_v27 = vcombine.low %v221_v16, %v233_v17 }
  0x3e   :  { %v11795_v28 = vcombine.high %v244_v22, %v256_v23  ;;  %v11797_v29 = vcombine.high %v245_v24, %v257_v25  ;;  %v268_v30 = vld [vmem:[#allocation2 + $0x300] sm:$0xff]  ;;  %v269_v32 = vld [vmem:[#allocation2 + $0x308] sm:$0xff]  ;;  %v11794_v34 = vcombine.low %v244_v22, %v256_v23  ;;  %v11796_v35 = vcombine.low %v245_v24, %v257_v25 }
  0x3f   :  { %4812 = vmatpush1.bf16.msra.mxu0 %v11746_v18  ;;  %4894 = vmatpush1.bf16.msra.mxu1 %v11748_v19  ;;  %v280_v31 = vld [vmem:[#allocation2 + $0x360] sm:$0xff]  ;;  %v281_v33 = vld [vmem:[#allocation2 + $0x368] sm:$0xff] }
  0x40   :  { %4813 = vmatprep.subr.bf16.mxu0 %v11771_v20  ;;  %4895 = vmatprep.subr.bf16.mxu1 %v11773_v21  ;;  %v11819_v36 = vcombine.high %v268_v30, %v280_v31  ;;  %v11821_v37 = vcombine.high %v269_v32, %v281_v33  ;;  %v292_v38 = vld [vmem:[#allocation2 + $0x3c0] sm:$0xff]  ;;  %v293_v40 = vld [vmem:[#allocation2 + $0x3c8] sm:$0xff]  ;;  %v11818_v42 = vcombine.low %v268_v30, %v280_v31 }
  0x41   :  { %v304_v39 = vld [vmem:[#allocation2 + $0x420] sm:$0xff]  ;;  %v305_v41 = vld [vmem:[#allocation2 + $0x428] sm:$0xff]  ;;  %v11820_v43 = vcombine.low %v269_v32, %v281_v33 }
  0x42   :  { %v11843_v44 = vcombine.high %v292_v38, %v304_v39  ;;  %v11845_v45 = vcombine.high %v293_v40, %v305_v41  ;;  %v316_v46 = vld [vmem:[#allocation2 + $0x480] sm:$0xff]  ;;  %v317_v48 = vld [vmem:[#allocation2 + $0x488] sm:$0xff]  ;;  %v11842_v50 = vcombine.low %v292_v38, %v304_v39  ;;  %v11844_v52 = vcombine.low %v293_v40, %v305_v41 }
  0x43   :  { %4814 = vmatpush1.bf16.msra.mxu0 %v11770_v26  ;;  %4896 = vmatpush1.bf16.msra.mxu1 %v11772_v27  ;;  %v328_v47 = vld [vmem:[#allocation2 + $0x4e0] sm:$0xff]  ;;  %v329_v49 = vld [vmem:[#allocation2 + $0x4e8] sm:$0xff] }
  0x44   :  { %4815 = vmatprep.subr.bf16.mxu0 %v11795_v28  ;;  %4897 = vmatprep.subr.bf16.mxu1 %v11797_v29  ;;  %v14750_v51 = vld [vmem:[#allocation2 + $0x540] sm:$0xff]  ;;  %v11867_v53 = vcombine.high %v316_v46, %v328_v47  ;;  %v59_v55 = vld [vmem:[%s15082_s0 + $0x8] sm:$0xff]  ;;  %v11869_v57 = vcombine.high %v317_v48, %v329_v49  ;;  %v11866_v3 = vcombine.low %v316_v46, %v328_v47 }
  0x45   :  { %v352_v54 = vld [vmem:[#allocation2 + $0x5a0] sm:$0xff]  ;;  %v63_v56 = vld [vmem:[%s15082_s0 + $0x28] sm:$0xff]  ;;  %v11868_v8 = vcombine.low %v317_v48, %v329_v49 }
  0x46   :  { %v67_v58 = vld [vmem:[%s15082_s0 + $0x48] sm:$0x3]  ;;  %v92_v61 = vadd.f32 %v63_v56, %v59_v55  ;;  %v14771_v4 = vld [vmem:[#allocation2 + $0x600] sm:$0xff]  ;;  %v11891_v9 = vcombine.high %v14750_v51, %v352_v54  ;;  %v11890_v26 = vcombine.low %v14750_v51, %v352_v54 }
  0x47   :  { %4816 = vmatpush1.bf16.msra.mxu0 %v11794_v34  ;;  %4898 = vmatpush1.bf16.msra.mxu1 %v11796_v35  ;;  %v71_v59 = vld [vmem:[%s15082_s0 + $0x68] sm:$0xff]  ;;  %v93_v1 = vsel %vm83_vm0, %v67_v58, 0.0  ;;  %v58_v7 = vld [vmem:[%s15082_s0] sm:$0xff] }
  0x48   :  { %4817 = vmatprep.subr.bf16.mxu0 %v11819_v36  ;;  %4899 = vmatprep.subr.bf16.mxu1 %v11821_v37  ;;  %v75_v60 = vld [vmem:[%s15082_s0 + $0x88] sm:$0xff]  ;;  %v94_v5 = vadd.f32 %v93_v1, %v92_v61  ;;  %v62_v11 = vld [vmem:[%s15082_s0 + $0x20] sm:$0xff] }
  0x49   :  { %v341_v62 = vld [vmem:[#allocation2 + $0x548] sm:$0xff]  ;;  %v128_v2 = vadd.f32 %v75_v60, %v71_v59  ;;  %v66_v12 = vld [vmem:[%s15082_s0 + $0x40] sm:$0x3]  ;;  %v82_v19 = vadd.f32 %v62_v11, %v58_v7 }
  0x4a   :  { %v353_v63 = vld [vmem:[#allocation2 + $0x5a8] sm:$0xff]  ;;  %v70_v13 = vld [vmem:[%s15082_s0 + $0x60] sm:$0xff]  ;;  %v95_v16 = vrot.slane %v94_v5, 4  ;;  %v84_v20 = vsel %vm83_vm0, %v66_v12, 0.0 }
  0x4b   :  { %4818 = vmatpush1.bf16.msra.mxu0 %v11818_v42  ;;  %4900 = vmatpush1.bf16.msra.mxu1 %v11820_v43  ;;  %v79_v0 = vld [vmem:[%s15082_s0 + $0xa8] sm:$0x3]  ;;  %v11893_v14 = vcombine.high %v341_v62, %v353_v63  ;;  %v376_v15 = vld [vmem:[#allocation2 + $0x660] sm:$0xff]  ;;  %v11892_v27 = vcombine.low %v341_v62, %v353_v63  ;;  %v85_v29 = vadd.f32 %v84_v20, %v82_v19 }
  0x4c   :  { %4819 = vmatprep.subr.bf16.mxu0 %v11843_v44  ;;  %4901 = vmatprep.subr.bf16.mxu1 %v11845_v45  ;;  %v129_v6 = vsel %vm83_vm0, %v79_v0, 0.0  ;;  %v74_v17 = vld [vmem:[%s15082_s0 + $0x80] sm:$0xff]  ;;  %v365_v21 = vld [vmem:[#allocation2 + $0x608] sm:$0xff]  ;;  %v96_v28 = vadd.f32 %v95_v16, %v94_v5  ;;  %v11915_v30 = vcombine.high %v14771_v4, %v376_v15  ;;  %v11914_v42 = vcombine.low %v14771_v4, %v376_v15 }
  0x4d   :  { %v130_v10 = vadd.f32 %v129_v6, %v128_v2  ;;  %v78_v18 = vld [vmem:[%s15082_s0 + $0xa0] sm:$0x3]  ;;  %v377_v22 = vld [vmem:[#allocation2 + $0x668] sm:$0xff]  ;;  %v119_v24 = vadd.f32 %v74_v17, %v70_v13  ;;  %v86_v37 = vrot.slane %v85_v29, 4 }
  0x4e   :  { %v120_v25 = vsel %vm83_vm0, %v78_v18, 0.0  ;;  %v11917_v33 = vcombine.high %v365_v21, %v377_v22  ;;  %v388_v34 = vld [vmem:[#allocation2 + $0x6c0] sm:$0xff]  ;;  %v97_v36 = vrot.slane %v96_v28, 2  ;;  %v389_v38 = vld [vmem:[#allocation2 + $0x6c8] sm:$0xff]  ;;  %v11916_v43 = vcombine.low %v365_v21, %v377_v22 }
  0x4f   :  { %4820 = vmatpush1.bf16.msra.mxu0 %v11842_v50  ;;  %4902 = vmatpush1.bf16.msra.mxu1 %v11844_v52  ;;  %v131_v23 = vrot.slane %v130_v10, 4  ;;  %v121_v32 = vadd.f32 %v120_v25, %v119_v24  ;;  %v400_v35 = vld [vmem:[#allocation2 + $0x720] sm:$0xff]  ;;  %v401_v39 = vld [vmem:[#allocation2 + $0x728] sm:$0xff]  ;;  %v87_v45 = vadd.f32 %v86_v37, %v85_v29 }
  0x50   :  { %4821 = vmatprep.subr.bf16.mxu0 %v11867_v53  ;;  %4903 = vmatprep.subr.bf16.mxu1 %v11869_v57  ;;  %v98_v44 = vadd.f32 %v97_v36, %v96_v28  ;;  %v11939_v46 = vcombine.high %v388_v34, %v400_v35  ;;  %v11941_v49 = vcombine.high %v389_v38, %v401_v39  ;;  %v412_v50 = vld [vmem:[#allocation2 + $0x780] sm:$0xff]  ;;  %v413_v54 = vld [vmem:[#allocation2 + $0x788] sm:$0xff] }
  0x51   :  { %v132_v31 = vadd.f32 %v131_v23, %v130_v10  ;;  %v122_v41 = vrot.slane %v121_v32, 4  ;;  %v424_v51 = vld [vmem:[#allocation2 + $0x7e0] sm:$0xff]  ;;  %v88_v53 = vrot.slane %v87_v45, 2  ;;  %v425_v55 = vld [vmem:[#allocation2 + $0x7e8] sm:$0xff]  ;;  %v11938_v58 = vcombine.low %v388_v34, %v400_v35 }
  0x52   :  { %v99_v52 = vrot.slane %v98_v44, 1  ;;  %v11940_v59 = vcombine.low %v389_v38, %v401_v39  ;;  %v11963_v62 = vcombine.high %v412_v50, %v424_v51  ;;  %v11965_v1 = vcombine.high %v413_v54, %v425_v55  ;;  %v436_v2 = vld [vmem:[#allocation2 + $0x840] sm:$0xff]  ;;  %v437_v5 = vld [vmem:[#allocation2 + $0x848] sm:$0xff] }
  0x53   :  { %4822 = vmatpush1.bf16.msra.mxu0 %v11866_v3  ;;  %4904 = vmatpush1.bf16.msra.mxu1 %v11868_v8  ;;  %v133_v40 = vrot.slane %v132_v31, 2  ;;  %v123_v48 = vadd.f32 %v122_v41, %v121_v32  ;;  %v89_v61 = vadd.f32 %v88_v53, %v87_v45  ;;  %v448_v3 = vld [vmem:[#allocation2 + $0x8a0] sm:$0xff]  ;;  %v449_v6 = vld [vmem:[#allocation2 + $0x8a8] sm:$0xff]  ;;  %v11962_v8 = vcombine.low %v412_v50, %v424_v51  ;;  %v65_v45 = vld [vmem:[%s15082_s0 + $0x38] sm:$0xff] }
  0x54   :  { %4823 = vmatprep.subr.bf16.mxu0 %v11891_v9  ;;  %4905 = vmatprep.subr.bf16.mxu1 %v11893_v14  ;;  %v100_v60 = vadd.f32 %v99_v52, %v98_v44  ;;  %v11964_v12 = vcombine.low %v413_v54, %v425_v55  ;;  %v11987_v13 = vcombine.high %v436_v2, %v448_v3  ;;  %v460_v16 = vld [vmem:[#allocation2 + $0x900] sm:$0xff]  ;;  %v461_v19 = vld [vmem:[#allocation2 + $0x908] sm:$0xff]  ;;  %v61_v44 = vld [vmem:[%s15082_s0 + $0x18] sm:$0xff] }
  0x55   :  { %v134_v47 = vadd.f32 %v133_v40, %v132_v31  ;;  %v124_v57 = vrot.slane %v123_v48, 2  ;;  %v90_v10 = vrot.slane %v89_v61, 1  ;;  %v11989_v15 = vcombine.high %v437_v5, %v449_v6  ;;  %v472_v17 = vld [vmem:[#allocation2 + $0x960] sm:$0xff]  ;;  %v473_v20 = vld [vmem:[#allocation2 + $0x968] sm:$0xff]  ;;  %v81_v50 = vld [vmem:[%s15082_s0 + $0xb8] sm:$0x3] }
  0x56   :  { %v157_v4 = vmul.f32 0.055555556, %v100_v60  ;;  %v11986_v22 = vcombine.low %v436_v2, %v448_v3  ;;  %v11988_v25 = vcombine.low %v437_v5, %v449_v6  ;;  %v12013_v28 = vcombine.high %v461_v19, %v473_v20  ;;  %v484_v29 = vld [vmem:[#allocation2 + $0x9c0] sm:$0xff]  ;;  %v485_v32 = vld [vmem:[#allocation2 + $0x9c8] sm:$0xff]  ;;  %v68_v51 = vld [vmem:[%s15082_s0 + $0x50] sm:$0x3] }
  0x57   :  { %4824 = vmatpush1.bf16.msra.mxu0 %v11890_v26  ;;  %4906 = vmatpush1.bf16.msra.mxu1 %v11892_v27  ;;  %v135_v56 = vrot.slane %v134_v47, 1  ;;  %v125_v0 = vadd.f32 %v124_v57, %v123_v48  ;;  %v91_v23 = vadd.f32 %v90_v10, %v89_v61  ;;  %v12011_v26 = vcombine.high %v460_v16, %v472_v17  ;;  %v14801_v35 = vld [vmem:[#allocation2 + $0xa80] sm:$0xff]  ;;  %v14804_v41 = vld [vmem:[#allocation2 + $0xa88] sm:$0xff]  ;;  %v64_v57 = vld [vmem:[%s15082_s0 + $0x30] sm:$0xff] }
  0x58   :  { %4825 = vmatprep.subr.bf16.mxu0 %v11915_v30  ;;  %4907 = vmatprep.subr.bf16.mxu1 %v11917_v33  ;;  %v165_v9 = vpack.c.bf16 %v157_v4, %v157_v4  ;;  %v496_v30 = vld [vmem:[#allocation2 + $0xa20] sm:$0xff]  ;;  %v497_v33 = vld [vmem:[#allocation2 + $0xa28] sm:$0xff]  ;;  %v12010_v34 = vcombine.low %v460_v16, %v472_v17  ;;  %v12012_v38 = vcombine.low %v461_v19, %v473_v20  ;;  %v147_v3 = vsel %vm83_vm0, %v81_v50, 0.0 }
  0x59   :  { %v136_v63 = vadd.f32 %v135_v56, %v134_v47  ;;  %v126_v11 = vrot.slane %v125_v0, 1  ;;  %v156_v36 = vmul.f32 0.055555556, %v91_v23  ;;  %v12035_v39 = vcombine.high %v484_v29, %v496_v30  ;;  %v520_v40 = vld [vmem:[#allocation2 + $0xae0] sm:$0xff]  ;;  %v73_v47 = vld [vmem:[%s15082_s0 + $0x78] sm:$0xff]  ;;  %v60_v56 = vld [vmem:[%s15082_s0 + $0x10] sm:$0xff] }
  0x5a   :  { %v949_v18 = vunpack.c.l.b16 %v165_v9  ;;  %v14821_v48 = vld [vmem:[#allocation2 + $0xb40] sm:$0xff]  ;;  %v12034_v52 = vcombine.low %v484_v29, %v496_v30  ;;  %v12036_v53 = vcombine.low %v485_v32, %v497_v33  ;;  %v12058_v61 = vcombine.low %v14801_v35, %v520_v40  ;;  %v533_v5 = vld [vmem:[#allocation2 + $0xb48] sm:$0xff] }
  0x5b   :  { %4826 = vmatpush1.bf16.msra.mxu0 %v11914_v42  ;;  %4908 = vmatpush1.bf16.msra.mxu1 %v11916_v43  ;;  %v161_v7 = vmul.f32 0.055555556, %v136_v63  ;;  %v127_v24 = vadd.f32 %v126_v11, %v125_v0  ;;  %v14806_v42 = vld [vmem:[#allocation2 + $0xae8] sm:$0xff]  ;;  %v12037_v43 = vcombine.high %v485_v32, %v497_v33  ;;  %v164_v54 = vpack.c.bf16 %v156_v36, %v156_v36  ;;  %v72_v63 = vld [vmem:[%s15082_s0 + $0x70] sm:$0xff]  ;;  %v568_v16 = vld [vmem:[#allocation2 + $0xc60] sm:$0xff] }
  0x5c   :  { %4827 = vmatprep.subr.bf16.mxu0 %v11939_v46  ;;  %4909 = vmatprep.subr.bf16.mxu1 %v11941_v49  ;;  %v69_v46 = vld [vmem:[%s15082_s0 + $0x58] sm:$0x3]  ;;  %v12061_v60 = vcombine.high %v14804_v41, %v14806_v42  ;;  %v76_v0 = vld [vmem:[%s15082_s0 + $0x90] sm:$0xff]  ;;  %v102_v4 = vsel %vm83_vm0, %v68_v51, 0.0  ;;  %v545_v6 = vld [vmem:[#allocation2 + $0xba8] sm:$0xff]  ;;  %v101_v9 = vadd.f32 %v64_v57, %v60_v56 }
  0x5d   :  { %v169_v14 = vpack.c.bf16 %v161_v7, %v161_v7  ;;  %v160_v37 = vmul.f32 0.055555556, %v127_v24  ;;  %v77_v49 = vld [vmem:[%s15082_s0 + $0x98] sm:$0xff]  ;;  %v111_v2 = vsel %vm83_vm0, %v69_v46, 0.0  ;;  %v110_v7 = vadd.f32 %v65_v45, %v61_v44  ;;  %v557_v23 = vld [vmem:[#allocation2 + $0xc08] sm:$0xff]  ;;  %v580_v33 = vld [vmem:[#allocation2 + $0xcc0] sm:$0xff] }
  0x5e   :  { %v103_v19 = vadd.f32 %v102_v4, %v101_v9  ;;  %v12085_v20 = vcombine.high %v533_v5, %v545_v6  ;;  %v569_v24 = vld [vmem:[#allocation2 + $0xc68] sm:$0xff]  ;;  %v604_v50 = vld [vmem:[#allocation2 + $0xd80] sm:$0xff] }
  0x5f   :  { %4828 = vmatpush1.bf16.msra.mxu0 %v11938_v58  ;;  %4910 = vmatpush1.bf16.msra.mxu1 %v11940_v59  ;;  %v953_v21 = vunpack.c.l.b16 %v169_v14  ;;  %v168_v55 = vpack.c.bf16 %v160_v37, %v160_v37  ;;  %v80_v58 = vld [vmem:[%s15082_s0 + $0xb0] sm:$0x3]  ;;  %v12059_v59 = vcombine.high %v14801_v35, %v520_v40  ;;  %v137_v14 = vadd.f32 %v76_v0, %v72_v63  ;;  %v616_v51 = vld [vmem:[#allocation2 + $0xde0] sm:$0xff]  ;;  %v605_v57 = vld [vmem:[#allocation2 + $0xd88] sm:$0xff] }
  0x60   :  { %4829 = vmatprep.subr.bf16.mxu0 %v11963_v62  ;;  %4911 = vmatprep.subr.bf16.mxu1 %v11965_v1  ;;  %v544_v62 = vld [vmem:[#allocation2 + $0xba0] sm:$0xff]  ;;  %v12060_v1 = vcombine.low %v14804_v41, %v14806_v42  ;;  %v138_v10 = vsel %vm83_vm0, %v80_v58, 0.0  ;;  %v112_v17 = vadd.f32 %v111_v2, %v110_v7  ;;  %v581_v41 = vld [vmem:[#allocation2 + $0xcc8] sm:$0xff]  ;;  %v12155_v0 = vcombine.high %v604_v50, %v616_v51 }
  0x61   :  { %v958_v27 = vsel %vm956_vm1, %v953_v21, %v949_v18  ;;  %v12083_v11 = vcombine.high %v14821_v48, %v544_v62  ;;  %v139_v21 = vadd.f32 %v138_v10, %v137_v14  ;;  %v593_v42 = vld [vmem:[#allocation2 + $0xd28] sm:$0xff]  ;;  %v628_v2 = vld [vmem:[#allocation2 + $0xe40] sm:$0xff]  ;;  %v12154_v14 = vcombine.low %v604_v50, %v616_v51 }
  0x62   :  { %v14799_v31 = vpack.c.b16 %v958_v27, %v958_v27  ;;  %v104_v27 = vrot.slane %v103_v19, 4  ;;  %v617_v58 = vld [vmem:[#allocation2 + $0xde8] sm:$0xff]  ;;  %v12132_v63 = vcombine.low %v581_v41, %v593_v42 }
  0x63   :  { %4830 = vmatpush1.bf16.msra.mxu0 %v11962_v8  ;;  %4912 = vmatpush1.bf16.msra.mxu1 %v11964_v12  ;;  %v146_v8 = vadd.f32 %v77_v49, %v73_v47  ;;  %v948_v12 = vunpack.c.l.b16 %v164_v54  ;;  %v140_v32 = vrot.slane %v139_v21, 4  ;;  %v12108_v47 = vcombine.low %v557_v23, %v569_v24  ;;  %v641_v9 = vld [vmem:[#allocation2 + $0xea8] sm:$0xff] }
  0x64   :  { %4831 = vmatprep.subr.bf16.mxu0 %v11987_v13  ;;  %4913 = vmatprep.subr.bf16.mxu1 %v11989_v15  ;;  %v952_v13 = vunpack.c.l.b16 %v168_v55  ;;  %v556_v15 = vld [vmem:[#allocation2 + $0xc00] sm:$0xff]  ;;  %v105_v37 = vadd.f32 %v104_v27, %v103_v19  ;;  %v12133_v55 = vcombine.high %v581_v41, %v593_v42  ;;  %v12157_v7 = vcombine.high %v605_v57, %v617_v58  ;;  %v689_v41 = vld [vmem:[#allocation2 + $0x1028] sm:$0xff] }
  0x65   :  { %4841 = vmatprep.mubr.bf16.mxu0 %v14799_v31  ;;  %4923 = vmatprep.mubr.bf16.mxu1 %v14799_v31  ;;  %v148_v18 = vadd.f32 %v147_v3, %v146_v8  ;;  %v12107_v29 = vcombine.high %v556_v15, %v568_v16  ;;  %v12106_v46 = vcombine.low %v556_v15, %v568_v16  ;;  %v640_v3 = vld [vmem:[#allocation2 + $0xea0] sm:$0xff]  ;;  %v629_v8 = vld [vmem:[#allocation2 + $0xe48] sm:$0xff] }
  0x66   :  { %v957_v30 = vsel %vm956_vm1, %v952_v13, %v948_v12  ;;  %v106_v45 = vrot.slane %v105_v37, 2  ;;  %v12156_v15 = vcombine.low %v605_v57, %v617_v58  ;;  %v12179_v16 = vcombine.high %v628_v2, %v640_v3  ;;  %v713_v51 = vld [vmem:[#allocation2 + $0x10e8] sm:$0xff] }
  0x67   :  { %4832 = vmatpush1.bf16.msra.mxu0 %v11986_v22  ;;  %4914 = vmatpush1.bf16.msra.mxu1 %v11988_v25  ;;  %v12082_v22 = vcombine.low %v14821_v48, %v544_v62  ;;  %v113_v25 = vrot.slane %v112_v17, 4  ;;  %v14860_v40 = vpack.c.b16 %v957_v30, %v957_v30  ;;  %v12178_v30 = vcombine.low %v628_v2, %v640_v3  ;;  %v725_v57 = vld [vmem:[#allocation2 + $0x1148] sm:$0xff] }
  0x68   :  { %4833 = vmatprep.subr.bf16.mxu0 %v12011_v26  ;;  %4915 = vmatprep.subr.bf16.mxu1 %v12013_v28  ;;  %v149_v26 = vrot.slane %v148_v18, 4  ;;  %v12084_v28 = vcombine.low %v533_v5, %v545_v6  ;;  %v107_v54 = vadd.f32 %v106_v45, %v105_v37  ;;  %v677_v37 = vld [vmem:[#allocation2 + $0xfc8] sm:$0xff] }
  0x69   :  { %v114_v35 = vadd.f32 %v113_v25, %v112_v17  ;;  %v653_v25 = vld [vmem:[#allocation2 + $0xf08] sm:$0xff]  ;;  %v12229_v50 = vcombine.high %v677_v37, %v689_v41 }
  0x6a   :  { %v150_v36 = vadd.f32 %v149_v26, %v148_v18  ;;  %v665_v26 = vld [vmem:[#allocation2 + $0xf68] sm:$0xff] }
  0x6b   :  { %4834 = vmatpush1.bf16.msra.mxu0 %v12010_v34  ;;  %4916 = vmatpush1.bf16.msra.mxu1 %v12012_v38  ;;  %v592_v34 = vld [vmem:[#allocation2 + $0xd20] sm:$0xff]  ;;  %v12109_v38 = vcombine.high %v557_v23, %v569_v24  ;;  %v12204_v45 = vcombine.low %v653_v25, %v665_v26  ;;  %v761_v3 = vld [vmem:[#allocation2 + $0x1268] sm:$0xff] }
  0x6c   :  { %4835 = vmatprep.subr.bf16.mxu0 %v12035_v39  ;;  %4917 = vmatprep.subr.bf16.mxu1 %v12037_v43  ;;  %v141_v39 = vadd.f32 %v140_v32, %v139_v21  ;;  %v115_v43 = vrot.slane %v114_v35, 2  ;;  %v151_v44 = vrot.slane %v150_v36, 2  ;;  %v12131_v48 = vcombine.high %v580_v33, %v592_v34  ;;  %v664_v23 = vld [vmem:[#allocation2 + $0xf60] sm:$0xff] }
  0x6d   :  { %v12130_v62 = vcombine.low %v580_v33, %v592_v34  ;;  %v12181_v21 = vcombine.high %v629_v8, %v641_v9  ;;  %v12180_v33 = vcombine.low %v629_v8, %v641_v9  ;;  %v784_v8 = vld [vmem:[#allocation2 + $0x1320] sm:$0xff]  ;;  %v773_v9 = vld [vmem:[#allocation2 + $0x12c8] sm:$0xff] }
  0x6e   :  { %v142_v49 = vrot.slane %v141_v39, 2 }
  0x6f   :  { %4836 = vmatpush1.bf16.msra.mxu0 %v12034_v52  ;;  %4918 = vmatpush1.bf16.msra.mxu1 %v12036_v53  ;;  %v116_v52 = vadd.f32 %v115_v43, %v114_v35  ;;  %v152_v53 = vadd.f32 %v151_v44, %v150_v36  ;;  %v676_v35 = vld [vmem:[#allocation2 + $0xfc0] sm:$0xff] }
  0x70   :  { %4837 = vmatprep.subr.bf16.mxu0 %v12059_v59  ;;  %4919 = vmatprep.subr.bf16.mxu1 %v12061_v60  ;;  %v143_v56 = vadd.f32 %v142_v49, %v141_v39  ;;  %v688_v36 = vld [vmem:[#allocation2 + $0x1020] sm:$0xff]  ;;  %v12205_v39 = vcombine.high %v653_v25, %v665_v26  ;;  %v701_v49 = vld [vmem:[#allocation2 + $0x1088] sm:$0xff] }
  0x71   :  { %v117_v59 = vrot.slane %v116_v52, 1  ;;  %v153_v60 = vrot.slane %v152_v53, 1  ;;  %v12253_v58 = vcombine.high %v701_v49, %v713_v51  ;;  %v821_v25 = vld [vmem:[#allocation2 + $0x1448] sm:$0xff] }
  0x73   :  { %4838 = vmatpush1.bf16.msra.mxu0 %v12058_v61  ;;  %4920 = vmatpush1.bf16.msra.mxu1 %v12060_v1  ;;  %v108_v61 = vrot.slane %v107_v54, 1  ;;  %v144_v1 = vrot.slane %v143_v56, 1  ;;  %v118_v4 = vadd.f32 %v117_v59, %v116_v52  ;;  %v154_v5 = vadd.f32 %v153_v60, %v152_v53  ;;  %v737_v59 = vld [vmem:[#allocation2 + $0x11a8] sm:$0xff] }
  0x74   :  { %4839 = vmatprep.subr.bf16.mxu0 %v12083_v11  ;;  %4921 = vmatprep.subr.bf16.mxu1 %v12085_v20  ;;  %v12226_v52 = vcombine.low %v676_v35, %v688_v36  ;;  %v12228_v53 = vcombine.low %v677_v37, %v689_v41  ;;  %v12277_v2 = vcombine.high %v725_v57, %v737_v59  ;;  %v868_v41 = vld [vmem:[#allocation2 + $0x15c0] sm:$0xff] }
  0x75   :  { %v109_v6 = vadd.f32 %v108_v61, %v107_v54  ;;  %v145_v10 = vadd.f32 %v144_v1, %v143_v56  ;;  %v159_v11 = vmul.f32 0.055555556, %v118_v4  ;;  %v163_v12 = vmul.f32 0.055555556, %v154_v5  ;;  %v736_v56 = vld [vmem:[#allocation2 + $0x11a0] sm:$0xff]  ;;  %v749_v1 = vld [vmem:[#allocation2 + $0x1208] sm:$0xff] }
  0x76   :  { %v12252_v61 = vcombine.low %v701_v49, %v713_v51  ;;  %v12276_v5 = vcombine.low %v725_v57, %v737_v59  ;;  %v892_v51 = vld [vmem:[#allocation2 + $0x1680] sm:$0xff] }
  0x77   :  { %4840 = vmatpush1.bf16.msra.mxu0 %v12082_v22  ;;  %4922 = vmatpush1.bf16.msra.mxu1 %v12084_v28  ;;  %v158_v13 = vmul.f32 0.055555556, %v109_v6  ;;  %v162_v17 = vmul.f32 0.055555556, %v145_v10  ;;  %v167_v18 = vpack.c.bf16 %v159_v11, %v159_v11  ;;  %v171_v19 = vpack.c.bf16 %v163_v12, %v163_v12  ;;  %v652_v22 = vld [vmem:[#allocation2 + $0xf00] sm:$0xff]  ;;  %v785_v11 = vld [vmem:[#allocation2 + $0x1328] sm:$0xff] }
  0x78   :  { %4850 = vmatprep.subr.bf16.mxu0 %v12107_v29  ;;  %4932 = vmatprep.subr.bf16.mxu1 %v12109_v38  ;;  %v12203_v34 = vcombine.high %v652_v22, %v664_v23  ;;  %v12202_v44 = vcombine.low %v652_v22, %v664_v23  ;;  %v12301_v10 = vcombine.high %v749_v1, %v761_v3  ;;  %v820_v23 = vld [vmem:[#allocation2 + $0x1440] sm:$0xff] }
  0x79   :  { %v166_v20 = vpack.c.bf16 %v158_v13, %v158_v13  ;;  %v170_v24 = vpack.c.bf16 %v162_v17, %v162_v17  ;;  %v951_v27 = vunpack.c.l.b16 %v167_v18  ;;  %v955_v28 = vunpack.c.l.b16 %v171_v19  ;;  %v797_v17 = vld [vmem:[#allocation2 + $0x1388] sm:$0xff]  ;;  %v916_v59 = vld [vmem:[#allocation2 + $0x1740] sm:$0xff] }
  0x7a   :  { %4842 = vmatmul.mubr.bf16.vlgmr.msra.gmra.mrb[0].mxu0 %v14860_v40  ;;  %4924 = vmatmul.mubr.bf16.vlgmr.msra.gmra.mrb[0].mxu1 %v14860_v40  ;;  %v12300_v13 = vcombine.low %v749_v1, %v761_v3  ;;  %v12325_v18 = vcombine.high %v773_v9, %v785_v11  ;;  %v809_v19 = vld [vmem:[#allocation2 + $0x13e8] sm:$0xff]  ;;  %v174_v3 = vld [vmem:[#allocation2 + $0x10] sm:$0xff] }
  0x7b   :  { %4851 = vmatpush1.bf16.msra.mxu0 %v12106_v46  ;;  %4933 = vmatpush1.bf16.msra.mxu1 %v12108_v47  ;;  %v950_v29 = vunpack.c.l.b16 %v166_v20  ;;  %v954_v32 = vunpack.c.l.b16 %v170_v24  ;;  %v960_v38 = vsel %vm956_vm1, %v955_v28, %v951_v27  ;;  %v12227_v46 = vcombine.high %v676_v35, %v688_v36  ;;  %v700_v47 = vld [vmem:[#allocation2 + $0x1080] sm:$0xff]  ;;  %v833_v27 = vld [vmem:[#allocation2 + $0x14a8] sm:$0xff] }
  0x7c   :  { %4852 = vmatprep.subr.bf16.mxu0 %v12131_v48  ;;  %4934 = vmatprep.subr.bf16.mxu1 %v12133_v55  ;;  %v14865_v42 = vpack.c.b16 %v960_v38, %v960_v38  ;;  %v712_v48 = vld [vmem:[#allocation2 + $0x10e0] sm:$0xff]  ;;  %v12349_v26 = vcombine.high %v797_v17, %v809_v19  ;;  %v12373_v35 = vcombine.high %v821_v25, %v833_v27  ;;  %v857_v36 = vld [vmem:[#allocation2 + $0x1568] sm:$0xff] }
  0x7d   :  { %v14868_v43 = vsel %vm956_vm1, %v954_v32, %v950_v29  ;;  %v12251_v54 = vcombine.high %v700_v47, %v712_v48  ;;  %v724_v55 = vld [vmem:[#allocation2 + $0x1140] sm:$0xff]  ;;  %v12250_v60 = vcombine.low %v700_v47, %v712_v48  ;;  %v12348_v29 = vcombine.low %v797_v17, %v809_v19  ;;  %v881_v47 = vld [vmem:[#allocation2 + $0x1628] sm:$0xff] }
  0x7e   :  { %4882 = vmatprep.mubr.bf16.mxu0 %v14865_v42  ;;  %4964 = vmatprep.mubr.bf16.mxu1 %v14865_v42  ;;  %v12274_v4 = vcombine.low %v724_v55, %v736_v56  ;;  %v832_v24 = vld [vmem:[#allocation2 + $0x14a0] sm:$0xff]  ;;  %v12372_v38 = vcombine.low %v821_v25, %v833_v27  ;;  %v246_v27 = vld [vmem:[#allocation2 + $0x250] sm:$0xff] }
  0x7f   :  { %4853 = vmatpush1.bf16.msra.mxu0 %v12130_v62  ;;  %4935 = vmatpush1.bf16.msra.mxu1 %v12132_v63  ;;  %v12275_v62 = vcombine.high %v724_v55, %v736_v56  ;;  %v748_v63 = vld [vmem:[#allocation2 + $0x1200] sm:$0xff]  ;;  %v12370_v37 = vcombine.low %v820_v23, %v832_v24  ;;  %v905_v55 = vld [vmem:[#allocation2 + $0x16e8] sm:$0xff] }
  0x80   :  { %4854 = vmatprep.subr.bf16.mxu0 %v12155_v0  ;;  %4936 = vmatprep.subr.bf16.mxu1 %v12157_v7  ;;  %v760_v0 = vld [vmem:[#allocation2 + $0x1260] sm:$0xff] }
  0x81   :  { %v12299_v6 = vcombine.high %v748_v63, %v760_v0  ;;  %v772_v7 = vld [vmem:[#allocation2 + $0x12c0] sm:$0xff]  ;;  %v12298_v12 = vcombine.low %v748_v63, %v760_v0  ;;  %v929_v63 = vld [vmem:[#allocation2 + $0x17a8] sm:$0xff] }
  0x82   :  { %v12322_v20 = vcombine.low %v772_v7, %v784_v8  ;;  %v844_v32 = vld [vmem:[#allocation2 + $0x1500] sm:$0xff] }
  0x83   :  { %4855 = vmatpush1.bf16.msra.mxu0 %v12154_v14  ;;  %4937 = vmatpush1.bf16.msra.mxu1 %v12156_v15  ;;  %v12323_v14 = vcombine.high %v772_v7, %v784_v8  ;;  %v796_v15 = vld [vmem:[#allocation2 + $0x1380] sm:$0xff]  ;;  %v187_v7 = vld [vmem:[#allocation2 + $0x78] sm:$0xff] }
  0x84   :  { %4856 = vmatprep.subr.bf16.mxu0 %v12179_v16  ;;  %4938 = vmatprep.subr.bf16.mxu1 %v12181_v21  ;;  %v808_v16 = vld [vmem:[#allocation2 + $0x13e0] sm:$0xff]  ;;  %v12324_v21 = vcombine.low %v773_v9, %v785_v11  ;;  %v198_v11 = vld [vmem:[#allocation2 + $0xd0] sm:$0xff] }
  0x85   :  { %v12347_v22 = vcombine.high %v796_v15, %v808_v16  ;;  %v12346_v28 = vcombine.low %v796_v15, %v808_v16  ;;  %v211_v15 = vld [vmem:[#allocation2 + $0x138] sm:$0xff]  ;;  %v14874_v16 = vpack.c.b16 %v14868_v43, %v14868_v43 }
  0x87   :  { %4857 = vmatpush1.bf16.msra.mxu0 %v12178_v30  ;;  %4939 = vmatpush1.bf16.msra.mxu1 %v12180_v33  ;;  %v12371_v30 = vcombine.high %v820_v23, %v832_v24  ;;  %v856_v33 = vld [vmem:[#allocation2 + $0x1560] sm:$0xff]  ;;  %v235_v24 = vld [vmem:[#allocation2 + $0x1f8] sm:$0xff] }
  0x88   :  { %4858 = vmatprep.subr.bf16.mxu0 %v12203_v34  ;;  %4940 = vmatprep.subr.bf16.mxu1 %v12205_v39  ;;  %v845_v34 = vld [vmem:[#allocation2 + $0x1508] sm:$0xff]  ;;  %v12395_v39 = vcombine.high %v844_v32, %v856_v33  ;;  %v12394_v48 = vcombine.low %v844_v32, %v856_v33  ;;  %v259_v32 = vld [vmem:[#allocation2 + $0x2b8] sm:$0xff] }
  0x89   :  { %v12396_v49 = vcombine.low %v845_v34, %v857_v36 }
  0x8b   :  { %4859 = vmatpush1.bf16.msra.mxu0 %v12202_v44  ;;  %4941 = vmatpush1.bf16.msra.mxu1 %v12204_v45  ;;  %v880_v44 = vld [vmem:[#allocation2 + $0x1620] sm:$0xff]  ;;  %v869_v45 = vld [vmem:[#allocation2 + $0x15c8] sm:$0xff] }
  0x8c   :  { %4860 = vmatprep.subr.bf16.mxu0 %v12227_v46  ;;  %4942 = vmatprep.subr.bf16.mxu1 %v12229_v50  ;;  %v12397_v46 = vcombine.high %v845_v34, %v857_v36  ;;  %v12419_v50 = vcombine.high %v868_v41, %v880_v44  ;;  %v12418_v56 = vcombine.low %v868_v41, %v880_v44  ;;  %v270_v36 = vld [vmem:[#allocation2 + $0x310] sm:$0xff]  ;;  %v283_v41 = vld [vmem:[#allocation2 + $0x378] sm:$0xff] }
  0x8d   :  { %v12420_v57 = vcombine.low %v869_v45, %v881_v47 }
  0x8f   :  { %4861 = vmatpush1.bf16.msra.mxu0 %v12226_v52  ;;  %4943 = vmatpush1.bf16.msra.mxu1 %v12228_v53  ;;  %v904_v52 = vld [vmem:[#allocation2 + $0x16e0] sm:$0xff]  ;;  %v893_v53 = vld [vmem:[#allocation2 + $0x1688] sm:$0xff] }
  0x90   :  { %4862 = vmatprep.subr.bf16.mxu0 %v12251_v54  ;;  %4944 = vmatprep.subr.bf16.mxu1 %v12253_v58  ;;  %v12421_v54 = vcombine.high %v869_v45, %v881_v47  ;;  %v12443_v58 = vcombine.high %v892_v51, %v904_v52  ;;  %v12442_v0 = vcombine.low %v892_v51, %v904_v52  ;;  %v294_v47 = vld [vmem:[#allocation2 + $0x3d0] sm:$0xff]  ;;  %v307_v51 = vld [vmem:[#allocation2 + $0x438] sm:$0xff] }
  0x91   :  { %v12444_v1 = vcombine.low %v893_v53, %v905_v55 }
  0x93   :  { %4863 = vmatpush1.bf16.msra.mxu0 %v12250_v60  ;;  %4945 = vmatpush1.bf16.msra.mxu1 %v12252_v61  ;;  %v928_v60 = vld [vmem:[#allocation2 + $0x17a0] sm:$0xff]  ;;  %v917_v61 = vld [vmem:[#allocation2 + $0x1748] sm:$0xff] }
  0x94   :  { %4864 = vmatprep.subr.bf16.mxu0 %v12275_v62  ;;  %4946 = vmatprep.subr.bf16.mxu1 %v12277_v2  ;;  %v12445_v62 = vcombine.high %v893_v53, %v905_v55  ;;  %v12467_v2 = vcombine.high %v916_v59, %v928_v60  ;;  %v12466_v8 = vcombine.low %v916_v59, %v928_v60  ;;  %v318_v55 = vld [vmem:[#allocation2 + $0x490] sm:$0xff]  ;;  %v331_v59 = vld [vmem:[#allocation2 + $0x4f8] sm:$0xff] }
  0x95   :  { %v12468_v9 = vcombine.low %v917_v61, %v929_v63 }
  0x97   :  { %4865 = vmatpush1.bf16.msra.mxu0 %v12274_v4  ;;  %4947 = vmatpush1.bf16.msra.mxu1 %v12276_v5  ;;  %v186_v4 = vld [vmem:[#allocation2 + $0x70] sm:$0xff]  ;;  %v175_v5 = vld [vmem:[#allocation2 + $0x18] sm:$0xff] }
  0x98   :  { %4866 = vmatprep.subr.bf16.mxu0 %v12299_v6  ;;  %4948 = vmatprep.subr.bf16.mxu1 %v12301_v10  ;;  %v12469_v6 = vcombine.high %v917_v61, %v929_v63  ;;  %v11727_v10 = vcombine.high %v174_v3, %v186_v4  ;;  %v11726_v17 = vcombine.low %v174_v3, %v186_v4  ;;  %v342_v63 = vld [vmem:[#allocation2 + $0x550] sm:$0xff]  ;;  %v355_v3 = vld [vmem:[#allocation2 + $0x5b8] sm:$0xff] }
  0x9b   :  { %4867 = vmatpush1.bf16.msra.mxu0 %v12298_v12  ;;  %4949 = vmatpush1.bf16.msra.mxu1 %v12300_v13  ;;  %v210_v12 = vld [vmem:[#allocation2 + $0x130] sm:$0xff]  ;;  %v199_v13 = vld [vmem:[#allocation2 + $0xd8] sm:$0xff] }
  0x9c   :  { %4868 = vmatprep.subr.bf16.mxu0 %v12323_v14  ;;  %4950 = vmatprep.subr.bf16.mxu1 %v12325_v18  ;;  %v11729_v14 = vcombine.high %v175_v5, %v187_v7  ;;  %v11728_v18 = vcombine.low %v175_v5, %v187_v7  ;;  %v11751_v19 = vcombine.high %v198_v11, %v210_v12  ;;  %v366_v7 = vld [vmem:[#allocation2 + $0x610] sm:$0xff] }
  0x9d   :  { %v11753_v23 = vcombine.high %v199_v13, %v211_v15  ;;  %v11750_v25 = vcombine.low %v198_v11, %v210_v12  ;;  %v11752_v43 = vcombine.low %v199_v13, %v211_v15  ;;  %v379_v11 = vld [vmem:[#allocation2 + $0x678] sm:$0xff]  ;;  %v390_v15 = vld [vmem:[#allocation2 + $0x6d0] sm:$0xff] }
  0x9f   :  { %4869 = vmatpush1.bf16.msra.mxu0 %v12322_v20  ;;  %4951 = vmatpush1.bf16.msra.mxu1 %v12324_v21  ;;  %v222_v20 = vld [vmem:[#allocation2 + $0x190] sm:$0xff] }
  0xa0   :  { %4870 = vmatprep.subr.bf16.mxu0 %v12347_v22  ;;  %4952 = vmatprep.subr.bf16.mxu1 %v12349_v26  ;;  %v234_v21 = vld [vmem:[#allocation2 + $0x1f0] sm:$0xff]  ;;  %v223_v22 = vld [vmem:[#allocation2 + $0x198] sm:$0xff] }
  0xa1   :  { %v11775_v26 = vcombine.high %v222_v20, %v234_v21  ;;  %v11774_v33 = vcombine.low %v222_v20, %v234_v21  ;;  %v11776_v34 = vcombine.low %v223_v22, %v235_v24  ;;  %v403_v20 = vld [vmem:[#allocation2 + $0x738] sm:$0xff] }
  0xa3   :  { %4871 = vmatpush1.bf16.msra.mxu0 %v12346_v28  ;;  %4953 = vmatpush1.bf16.msra.mxu1 %v12348_v29  ;;  %v258_v28 = vld [vmem:[#allocation2 + $0x2b0] sm:$0xff]  ;;  %v247_v29 = vld [vmem:[#allocation2 + $0x258] sm:$0xff] }
  0xa4   :  { %4872 = vmatprep.subr.bf16.mxu0 %v12371_v30  ;;  %4954 = vmatprep.subr.bf16.mxu1 %v12373_v35  ;;  %v11777_v30 = vcombine.high %v223_v22, %v235_v24  ;;  %v11799_v35 = vcombine.high %v246_v27, %v258_v28  ;;  %v11798_v44 = vcombine.low %v246_v27, %v258_v28  ;;  %v414_v24 = vld [vmem:[#allocation2 + $0x790] sm:$0xff]  ;;  %v427_v27 = vld [vmem:[#allocation2 + $0x7f8] sm:$0xff] }
  0xa5   :  { %v11800_v45 = vcombine.low %v247_v29, %v259_v32 }
  0xa7   :  { %4873 = vmatpush1.bf16.msra.mxu0 %v12370_v37  ;;  %4955 = vmatpush1.bf16.msra.mxu1 %v12372_v38  ;;  %v282_v37 = vld [vmem:[#allocation2 + $0x370] sm:$0xff]  ;;  %v271_v38 = vld [vmem:[#allocation2 + $0x318] sm:$0xff] }
  0xa8   :  { %4874 = vmatprep.subr.bf16.mxu0 %v12395_v39  ;;  %4956 = vmatprep.subr.bf16.mxu1 %v12397_v46  ;;  %v11801_v39 = vcombine.high %v247_v29, %v259_v32  ;;  %v11823_v46 = vcombine.high %v270_v36, %v282_v37  ;;  %v11822_v52 = vcombine.low %v270_v36, %v282_v37  ;;  %v438_v32 = vld [vmem:[#allocation2 + $0x850] sm:$0xff]  ;;  %v451_v36 = vld [vmem:[#allocation2 + $0x8b8] sm:$0xff] }
  0xa9   :  { %v11824_v53 = vcombine.low %v271_v38, %v283_v41 }
  0xab   :  { %4875 = vmatpush1.bf16.msra.mxu0 %v12394_v48  ;;  %4957 = vmatpush1.bf16.msra.mxu1 %v12396_v49  ;;  %v306_v48 = vld [vmem:[#allocation2 + $0x430] sm:$0xff]  ;;  %v295_v49 = vld [vmem:[#allocation2 + $0x3d8] sm:$0xff] }
  0xac   :  { %4876 = vmatprep.subr.bf16.mxu0 %v12419_v50  ;;  %4958 = vmatprep.subr.bf16.mxu1 %v12421_v54  ;;  %v11825_v50 = vcombine.high %v271_v38, %v283_v41  ;;  %v11847_v54 = vcombine.high %v294_v47, %v306_v48  ;;  %v11846_v60 = vcombine.low %v294_v47, %v306_v48  ;;  %v462_v41 = vld [vmem:[#allocation2 + $0x910] sm:$0xff]  ;;  %v475_v47 = vld [vmem:[#allocation2 + $0x978] sm:$0xff] }
  0xad   :  { %v11848_v61 = vcombine.low %v295_v49, %v307_v51 }
  0xaf   :  { %4877 = vmatpush1.bf16.msra.mxu0 %v12418_v56  ;;  %4959 = vmatpush1.bf16.msra.mxu1 %v12420_v57  ;;  %v330_v56 = vld [vmem:[#allocation2 + $0x4f0] sm:$0xff]  ;;  %v319_v57 = vld [vmem:[#allocation2 + $0x498] sm:$0xff] }
  0xb0   :  { %4878 = vmatprep.subr.bf16.mxu0 %v12443_v58  ;;  %4960 = vmatprep.subr.bf16.mxu1 %v12445_v62  ;;  %v11849_v58 = vcombine.high %v295_v49, %v307_v51  ;;  %v11871_v62 = vcombine.high %v318_v55, %v330_v56  ;;  %v11870_v4 = vcombine.low %v318_v55, %v330_v56  ;;  %v486_v51 = vld [vmem:[#allocation2 + $0x9d0] sm:$0xff]  ;;  %v499_v55 = vld [vmem:[#allocation2 + $0xa38] sm:$0xff] }
  0xb1   :  { %v11872_v5 = vcombine.low %v319_v57, %v331_v59 }
  0xb3   :  { %4879 = vmatpush1.bf16.msra.mxu0 %v12442_v0  ;;  %4961 = vmatpush1.bf16.msra.mxu1 %v12444_v1  ;;  %v354_v0 = vld [vmem:[#allocation2 + $0x5b0] sm:$0xff]  ;;  %v343_v1 = vld [vmem:[#allocation2 + $0x558] sm:$0xff] }
  0xb4   :  { %4880 = vmatprep.subr.bf16.mxu0 %v12467_v2  ;;  %4962 = vmatprep.subr.bf16.mxu1 %v12469_v6  ;;  %v11873_v2 = vcombine.high %v319_v57, %v331_v59  ;;  %v11895_v6 = vcombine.high %v342_v63, %v354_v0  ;;  %v11894_v12 = vcombine.low %v342_v63, %v354_v0  ;;  %v510_v59 = vld [vmem:[#allocation2 + $0xa90] sm:$0xff]  ;;  %v523_v63 = vld [vmem:[#allocation2 + $0xaf8] sm:$0xff] }
  0xb5   :  { %v11896_v13 = vcombine.low %v343_v1, %v355_v3 }
  0xb7   :  { %4881 = vmatpush1.bf16.msra.mxu0 %v12466_v8  ;;  %4963 = vmatpush1.bf16.msra.mxu1 %v12468_v9  ;;  %v378_v8 = vld [vmem:[#allocation2 + $0x670] sm:$0xff]  ;;  %v367_v9 = vld [vmem:[#allocation2 + $0x618] sm:$0xff] }
  0xb8   :  { %4973 = vmatprep.subr.bf16.mxu0 %v11727_v10  ;;  %5055 = vmatprep.subr.bf16.mxu1 %v11729_v14  ;;  %v11897_v10 = vcombine.high %v343_v1, %v355_v3  ;;  %v11919_v14 = vcombine.high %v366_v7, %v378_v8  ;;  %v11918_v21 = vcombine.low %v366_v7, %v378_v8  ;;  %v534_v3 = vld [vmem:[#allocation2 + $0xb50] sm:$0xff]  ;;  %v547_v7 = vld [vmem:[#allocation2 + $0xbb8] sm:$0xff] }
  0xb9   :  { %v11920_v22 = vcombine.low %v367_v9, %v379_v11 }
  0xba   :  { %4883 = vmatmul.mubr.bf16.vlgmr.msra.gmra.mrb[0].mxu0 %v14874_v16  ;;  %4965 = vmatmul.mubr.bf16.vlgmr.msra.gmra.mrb[0].mxu1 %v14874_v16 }
  0xbb   :  { %4974 = vmatpush1.bf16.msra.mxu0 %v11726_v17  ;;  %5056 = vmatpush1.bf16.msra.mxu1 %v11728_v18  ;;  %v402_v17 = vld [vmem:[#allocation2 + $0x730] sm:$0xff]  ;;  %v391_v18 = vld [vmem:[#allocation2 + $0x6d8] sm:$0xff] }
  0xbc   :  { %4975 = vmatprep.subr.bf16.mxu0 %v11751_v19  ;;  %5057 = vmatprep.subr.bf16.mxu1 %v11753_v23  ;;  %v11921_v19 = vcombine.high %v367_v9, %v379_v11  ;;  %v11943_v23 = vcombine.high %v390_v15, %v402_v17  ;;  %v11942_v28 = vcombine.low %v390_v15, %v402_v17  ;;  %v558_v11 = vld [vmem:[#allocation2 + $0xc10] sm:$0xff]  ;;  %v571_v15 = vld [vmem:[#allocation2 + $0xc78] sm:$0xff] }
  0xbd   :  { %5005 = vmatprep.mubr.bf16.mxu0 %v14799_v31  ;;  %5087 = vmatprep.mubr.bf16.mxu1 %v14799_v31  ;;  %v11944_v29 = vcombine.low %v391_v18, %v403_v20 }
  0xbf   :  { %4976 = vmatpush1.bf16.msra.mxu0 %v11750_v25  ;;  %5058 = vmatpush1.bf16.msra.mxu1 %v11752_v43  ;;  %v426_v25 = vld [vmem:[#allocation2 + $0x7f0] sm:$0xff]  ;;  %v415_v43 = vld [vmem:[#allocation2 + $0x798] sm:$0xff] }
  0xc0   :  { %4977 = vmatprep.subr.bf16.mxu0 %v11775_v26  ;;  %5059 = vmatprep.subr.bf16.mxu1 %v11777_v30  ;;  %v11945_v26 = vcombine.high %v391_v18, %v403_v20  ;;  %v11967_v30 = vcombine.high %v414_v24, %v426_v25  ;;  %v11966_v37 = vcombine.low %v414_v24, %v426_v25  ;;  %v582_v20 = vld [vmem:[#allocation2 + $0xcd0] sm:$0xff]  ;;  %v595_v24 = vld [vmem:[#allocation2 + $0xd38] sm:$0xff] }
  0xc1   :  { %v11968_v38 = vcombine.low %v415_v43, %v427_v27 }
  0xc3   :  { %4978 = vmatpush1.bf16.msra.mxu0 %v11774_v33  ;;  %5060 = vmatpush1.bf16.msra.mxu1 %v11776_v34  ;;  %v450_v33 = vld [vmem:[#allocation2 + $0x8b0] sm:$0xff]  ;;  %v439_v34 = vld [vmem:[#allocation2 + $0x858] sm:$0xff] }
  0xc4   :  { %4979 = vmatprep.subr.bf16.mxu0 %v11799_v35  ;;  %5061 = vmatprep.subr.bf16.mxu1 %v11801_v39  ;;  %v11969_v35 = vcombine.high %v415_v43, %v427_v27  ;;  %v11991_v39 = vcombine.high %v438_v32, %v450_v33  ;;  %v11990_v48 = vcombine.low %v438_v32, %v450_v33  ;;  %v606_v27 = vld [vmem:[#allocation2 + $0xd90] sm:$0xff]  ;;  %v619_v32 = vld [vmem:[#allocation2 + $0xdf8] sm:$0xff] }
  0xc5   :  { %v11992_v49 = vcombine.low %v439_v34, %v451_v36 }
  0xc7   :  { %4980 = vmatpush1.bf16.msra.mxu0 %v11798_v44  ;;  %5062 = vmatpush1.bf16.msra.mxu1 %v11800_v45  ;;  %v474_v44 = vld [vmem:[#allocation2 + $0x970] sm:$0xff]  ;;  %v463_v45 = vld [vmem:[#allocation2 + $0x918] sm:$0xff] }
  0xc8   :  { %4981 = vmatprep.subr.bf16.mxu0 %v11823_v46  ;;  %5063 = vmatprep.subr.bf16.mxu1 %v11825_v50  ;;  %v11993_v46 = vcombine.high %v439_v34, %v451_v36  ;;  %v12015_v50 = vcombine.high %v462_v41, %v474_v44  ;;  %v12014_v56 = vcombine.low %v462_v41, %v474_v44  ;;  %v630_v36 = vld [vmem:[#allocation2 + $0xe50] sm:$0xff]  ;;  %v643_v41 = vld [vmem:[#allocation2 + $0xeb8] sm:$0xff] }
  0xc9   :  { %v12016_v57 = vcombine.low %v463_v45, %v475_v47 }
  0xcb   :  { %4982 = vmatpush1.bf16.msra.mxu0 %v11822_v52  ;;  %5064 = vmatpush1.bf16.msra.mxu1 %v11824_v53  ;;  %v498_v52 = vld [vmem:[#allocation2 + $0xa30] sm:$0xff]  ;;  %v487_v53 = vld [vmem:[#allocation2 + $0x9d8] sm:$0xff] }
  0xcc   :  { %4983 = vmatprep.subr.bf16.mxu0 %v11847_v54  ;;  %5065 = vmatprep.subr.bf16.mxu1 %v11849_v58  ;;  %v12017_v54 = vcombine.high %v463_v45, %v475_v47  ;;  %v12039_v58 = vcombine.high %v486_v51, %v498_v52  ;;  %v12038_v0 = vcombine.low %v486_v51, %v498_v52  ;;  %v654_v47 = vld [vmem:[#allocation2 + $0xf10] sm:$0xff]  ;;  %v667_v51 = vld [vmem:[#allocation2 + $0xf78] sm:$0xff] }
  0xcd   :  { %v12040_v1 = vcombine.low %v487_v53, %v499_v55 }
  0xcf   :  { %4984 = vmatpush1.bf16.msra.mxu0 %v11846_v60  ;;  %5066 = vmatpush1.bf16.msra.mxu1 %v11848_v61  ;;  %v522_v60 = vld [vmem:[#allocation2 + $0xaf0] sm:$0xff]  ;;  %v511_v61 = vld [vmem:[#allocation2 + $0xa98] sm:$0xff] }
  0xd0   :  { %4985 = vmatprep.subr.bf16.mxu0 %v11871_v62  ;;  %5067 = vmatprep.subr.bf16.mxu1 %v11873_v2  ;;  %v12041_v62 = vcombine.high %v487_v53, %v499_v55  ;;  %v12063_v2 = vcombine.high %v510_v59, %v522_v60  ;;  %v12062_v8 = vcombine.low %v510_v59, %v522_v60  ;;  %v678_v55 = vld [vmem:[#allocation2 + $0xfd0] sm:$0xff]  ;;  %v691_v59 = vld [vmem:[#allocation2 + $0x1038] sm:$0xff] }
  0xd1   :  { %v12064_v9 = vcombine.low %v511_v61, %v523_v63 }
  0xd3   :  { %4986 = vmatpush1.bf16.msra.mxu0 %v11870_v4  ;;  %5068 = vmatpush1.bf16.msra.mxu1 %v11872_v5  ;;  %v546_v4 = vld [vmem:[#allocation2 + $0xbb0] sm:$0xff]  ;;  %v535_v5 = vld [vmem:[#allocation2 + $0xb58] sm:$0xff] }
  0xd4   :  { %4987 = vmatprep.subr.bf16.mxu0 %v11895_v6  ;;  %5069 = vmatprep.subr.bf16.mxu1 %v11897_v10  ;;  %v12065_v6 = vcombine.high %v511_v61, %v523_v63  ;;  %v12087_v10 = vcombine.high %v534_v3, %v546_v4  ;;  %v12086_v17 = vcombine.low %v534_v3, %v546_v4  ;;  %v702_v63 = vld [vmem:[#allocation2 + $0x1090] sm:$0xff]  ;;  %v715_v3 = vld [vmem:[#allocation2 + $0x10f8] sm:$0xff] }
  0xd5   :  { %v12088_v18 = vcombine.low %v535_v5, %v547_v7 }
  0xd7   :  { %4988 = vmatpush1.bf16.msra.mxu0 %v11894_v12  ;;  %5070 = vmatpush1.bf16.msra.mxu1 %v11896_v13  ;;  %v570_v12 = vld [vmem:[#allocation2 + $0xc70] sm:$0xff]  ;;  %v559_v13 = vld [vmem:[#allocation2 + $0xc18] sm:$0xff] }
  0xd8   :  { %4989 = vmatprep.subr.bf16.mxu0 %v11919_v14  ;;  %5071 = vmatprep.subr.bf16.mxu1 %v11921_v19  ;;  %v12089_v14 = vcombine.high %v535_v5, %v547_v7  ;;  %v12111_v19 = vcombine.high %v558_v11, %v570_v12  ;;  %v12110_v25 = vcombine.low %v558_v11, %v570_v12  ;;  %v739_v11 = vld [vmem:[#allocation2 + $0x11b8] sm:$0xff] }
  0xd9   :  { %v12112_v43 = vcombine.low %v559_v13, %v571_v15 }
  0xdb   :  { %4990 = vmatpush1.bf16.msra.mxu0 %v11918_v21  ;;  %5072 = vmatpush1.bf16.msra.mxu1 %v11920_v22  ;;  %v594_v21 = vld [vmem:[#allocation2 + $0xd30] sm:$0xff]  ;;  %v583_v22 = vld [vmem:[#allocation2 + $0xcd8] sm:$0xff] }
  0xdc   :  { %4991 = vmatprep.subr.bf16.mxu0 %v11943_v23  ;;  %5073 = vmatprep.subr.bf16.mxu1 %v11945_v26  ;;  %v12113_v23 = vcombine.high %v559_v13, %v571_v15  ;;  %v12135_v26 = vcombine.high %v582_v20, %v594_v21  ;;  %v12134_v33 = vcombine.low %v582_v20, %v594_v21  ;;  %v763_v20 = vld [vmem:[#allocation2 + $0x1278] sm:$0xff] }
  0xdd   :  { %v12136_v34 = vcombine.low %v583_v22, %v595_v24 }
  0xdf   :  { %4992 = vmatpush1.bf16.msra.mxu0 %v11942_v28  ;;  %5074 = vmatpush1.bf16.msra.mxu1 %v11944_v29  ;;  %v618_v28 = vld [vmem:[#allocation2 + $0xdf0] sm:$0xff]  ;;  %v607_v29 = vld [vmem:[#allocation2 + $0xd98] sm:$0xff] }
  0xe0   :  { %4993 = vmatprep.subr.bf16.mxu0 %v11967_v30  ;;  %5075 = vmatprep.subr.bf16.mxu1 %v11969_v35  ;;  %v12137_v30 = vcombine.high %v583_v22, %v595_v24  ;;  %v12159_v35 = vcombine.high %v606_v27, %v618_v28  ;;  %v12158_v44 = vcombine.low %v606_v27, %v618_v28  ;;  %v787_v27 = vld [vmem:[#allocation2 + $0x1338] sm:$0xff] }
  0xe1   :  { %v12160_v45 = vcombine.low %v607_v29, %v619_v32 }
  0xe3   :  { %4994 = vmatpush1.bf16.msra.mxu0 %v11966_v37  ;;  %5076 = vmatpush1.bf16.msra.mxu1 %v11968_v38  ;;  %v642_v37 = vld [vmem:[#allocation2 + $0xeb0] sm:$0xff]  ;;  %v631_v38 = vld [vmem:[#allocation2 + $0xe58] sm:$0xff] }
  0xe4   :  { %4995 = vmatprep.subr.bf16.mxu0 %v11991_v39  ;;  %5077 = vmatprep.subr.bf16.mxu1 %v11993_v46  ;;  %v12161_v39 = vcombine.high %v607_v29, %v619_v32  ;;  %v12183_v46 = vcombine.high %v630_v36, %v642_v37  ;;  %v12182_v52 = vcombine.low %v630_v36, %v642_v37  ;;  %v811_v36 = vld [vmem:[#allocation2 + $0x13f8] sm:$0xff] }
  0xe5   :  { %v12184_v53 = vcombine.low %v631_v38, %v643_v41 }
  0xe7   :  { %4996 = vmatpush1.bf16.msra.mxu0 %v11990_v48  ;;  %5078 = vmatpush1.bf16.msra.mxu1 %v11992_v49  ;;  %v666_v48 = vld [vmem:[#allocation2 + $0xf70] sm:$0xff]  ;;  %v655_v49 = vld [vmem:[#allocation2 + $0xf18] sm:$0xff] }
  0xe8   :  { %4997 = vmatprep.subr.bf16.mxu0 %v12015_v50  ;;  %5079 = vmatprep.subr.bf16.mxu1 %v12017_v54  ;;  %v12185_v50 = vcombine.high %v631_v38, %v643_v41  ;;  %v12207_v54 = vcombine.high %v654_v47, %v666_v48  ;;  %v12206_v60 = vcombine.low %v654_v47, %v666_v48  ;;  %v835_v47 = vld [vmem:[#allocation2 + $0x14b8] sm:$0xff] }
  0xe9   :  { %v12208_v61 = vcombine.low %v655_v49, %v667_v51 }
  0xeb   :  { %4998 = vmatpush1.bf16.msra.mxu0 %v12014_v56  ;;  %5080 = vmatpush1.bf16.msra.mxu1 %v12016_v57  ;;  %v690_v56 = vld [vmem:[#allocation2 + $0x1030] sm:$0xff]  ;;  %v679_v57 = vld [vmem:[#allocation2 + $0xfd8] sm:$0xff] }
  0xec   :  { %4999 = vmatprep.subr.bf16.mxu0 %v12039_v58  ;;  %5081 = vmatprep.subr.bf16.mxu1 %v12041_v62  ;;  %v12209_v58 = vcombine.high %v655_v49, %v667_v51  ;;  %v12231_v62 = vcombine.high %v678_v55, %v690_v56  ;;  %v12230_v4 = vcombine.low %v678_v55, %v690_v56  ;;  %v859_v55 = vld [vmem:[#allocation2 + $0x1578] sm:$0xff] }
  0xed   :  { %v12232_v5 = vcombine.low %v679_v57, %v691_v59 }
  0xef   :  { %5000 = vmatpush1.bf16.msra.mxu0 %v12038_v0  ;;  %5082 = vmatpush1.bf16.msra.mxu1 %v12040_v1  ;;  %v714_v0 = vld [vmem:[#allocation2 + $0x10f0] sm:$0xff]  ;;  %v703_v1 = vld [vmem:[#allocation2 + $0x1098] sm:$0xff] }
  0xf0   :  { %5001 = vmatprep.subr.bf16.mxu0 %v12063_v2  ;;  %5083 = vmatprep.subr.bf16.mxu1 %v12065_v6  ;;  %v12233_v2 = vcombine.high %v679_v57, %v691_v59  ;;  %v12255_v6 = vcombine.high %v702_v63, %v714_v0  ;;  %v12257_v7 = vcombine.high %v703_v1, %v715_v3 }
  0xf1   :  { %v12254_v12 = vcombine.low %v702_v63, %v714_v0  ;;  %v12256_v13 = vcombine.low %v703_v1, %v715_v3  ;;  %v883_v63 = vld [vmem:[#allocation2 + $0x1638] sm:$0xff] }
  0xf3   :  { %5002 = vmatpush1.bf16.msra.mxu0 %v12062_v8  ;;  %5084 = vmatpush1.bf16.msra.mxu1 %v12064_v9  ;;  %v726_v8 = vld [vmem:[#allocation2 + $0x1150] sm:$0xff] }
  0xf4   :  { %5003 = vmatprep.subr.bf16.mxu0 %v12087_v10  ;;  %5085 = vmatprep.subr.bf16.mxu1 %v12089_v14  ;;  %v738_v9 = vld [vmem:[#allocation2 + $0x11b0] sm:$0xff]  ;;  %v727_v10 = vld [vmem:[#allocation2 + $0x1158] sm:$0xff] }
  0xf5   :  { %v12279_v14 = vcombine.high %v726_v8, %v738_v9  ;;  %v12281_v15 = vcombine.high %v727_v10, %v739_v11  ;;  %v12278_v21 = vcombine.low %v726_v8, %v738_v9  ;;  %v12280_v22 = vcombine.low %v727_v10, %v739_v11  ;;  %v918_v11 = vld [vmem:[#allocation2 + $0x1750] sm:$0xff] }
  0xf7   :  { %5004 = vmatpush1.bf16.msra.mxu0 %v12086_v17  ;;  %5086 = vmatpush1.bf16.msra.mxu1 %v12088_v18  ;;  %v750_v17 = vld [vmem:[#allocation2 + $0x1210] sm:$0xff] }
  0xf8   :  { %5014 = vmatprep.subr.bf16.mxu0 %v12111_v19  ;;  %5096 = vmatprep.subr.bf16.mxu1 %v12113_v23  ;;  %v762_v18 = vld [vmem:[#allocation2 + $0x1270] sm:$0xff]  ;;  %v751_v19 = vld [vmem:[#allocation2 + $0x1218] sm:$0xff] }
  0xf9   :  { %v12303_v23 = vcombine.high %v750_v17, %v762_v18  ;;  %v12305_v24 = vcombine.high %v751_v19, %v763_v20  ;;  %v12302_v28 = vcombine.low %v750_v17, %v762_v18  ;;  %v12304_v29 = vcombine.low %v751_v19, %v763_v20  ;;  %v176_v20 = vld [vmem:[#allocation2 + $0x20] sm:$0xff] }
  0xfa   :  { %5006 = vmatmul.mubr.bf16.vlgmr.msra.gmra.mrb[4].mxu0 %v14860_v40  ;;  %5088 = vmatmul.mubr.bf16.vlgmr.msra.gmra.mrb[4].mxu1 %v14860_v40 }
  0xfb   :  { %5015 = vmatpush1.bf16.msra.mxu0 %v12110_v25  ;;  %5097 = vmatpush1.bf16.msra.mxu1 %v12112_v43  ;;  %v774_v25 = vld [vmem:[#allocation2 + $0x12d0] sm:$0xff] }
  0xfc   :  { %5016 = vmatprep.subr.bf16.mxu0 %v12135_v26  ;;  %5098 = vmatprep.subr.bf16.mxu1 %v12137_v30  ;;  %v786_v43 = vld [vmem:[#allocation2 + $0x1330] sm:$0xff]  ;;  %v775_v26 = vld [vmem:[#allocation2 + $0x12d8] sm:$0xff] }
  0xfd   :  { %5046 = vmatprep.mubr.bf16.mxu0 %v14865_v42  ;;  %5128 = vmatprep.mubr.bf16.mxu1 %v14865_v42  ;;  %v12327_v30 = vcombine.high %v774_v25, %v786_v43  ;;  %v12329_v32 = vcombine.high %v775_v26, %v787_v27  ;;  %v12326_v37 = vcombine.low %v774_v25, %v786_v43 }
  0xfe   :  { %v12328_v38 = vcombine.low %v775_v26, %v787_v27  ;;  %v200_v27 = vld [vmem:[#allocation2 + $0xe0] sm:$0xff] }
  0xff   :  { %5017 = vmatpush1.bf16.msra.mxu0 %v12134_v33  ;;  %5099 = vmatpush1.bf16.msra.mxu1 %v12136_v34  ;;  %v798_v33 = vld [vmem:[#allocation2 + $0x1390] sm:$0xff] }
 0x100   :  { %5018 = vmatprep.subr.bf16.mxu0 %v12159_v35  ;;  %5100 = vmatprep.subr.bf16.mxu1 %v12161_v39  ;;  %v810_v34 = vld [vmem:[#allocation2 + $0x13f0] sm:$0xff]  ;;  %v799_v35 = vld [vmem:[#allocation2 + $0x1398] sm:$0xff] }
 0x101   :  { %v12351_v39 = vcombine.high %v798_v33, %v810_v34  ;;  %v12353_v41 = vcombine.high %v799_v35, %v811_v36  ;;  %v12350_v48 = vcombine.low %v798_v33, %v810_v34  ;;  %v12352_v49 = vcombine.low %v799_v35, %v811_v36 }
 0x103   :  { %5019 = vmatpush1.bf16.msra.mxu0 %v12158_v44  ;;  %5101 = vmatpush1.bf16.msra.mxu1 %v12160_v45  ;;  %v822_v44 = vld [vmem:[#allocation2 + $0x1450] sm:$0xff] }
 0x104   :  { %5020 = vmatprep.subr.bf16.mxu0 %v12183_v46  ;;  %5102 = vmatprep.subr.bf16.mxu1 %v12185_v50  ;;  %v834_v45 = vld [vmem:[#allocation2 + $0x14b0] sm:$0xff]  ;;  %v823_v46 = vld [vmem:[#allocation2 + $0x1458] sm:$0xff] }
 0x105   :  { %v12375_v50 = vcombine.high %v822_v44, %v834_v45  ;;  %v12377_v51 = vcombine.high %v823_v46, %v835_v47  ;;  %v12374_v56 = vcombine.low %v822_v44, %v834_v45  ;;  %v12376_v57 = vcombine.low %v823_v46, %v835_v47  ;;  %v248_v47 = vld [vmem:[#allocation2 + $0x260] sm:$0xff] }
 0x107   :  { %5021 = vmatpush1.bf16.msra.mxu0 %v12182_v52  ;;  %5103 = vmatpush1.bf16.msra.mxu1 %v12184_v53  ;;  %v846_v52 = vld [vmem:[#allocation2 + $0x1510] sm:$0xff] }
 0x108   :  { %5022 = vmatprep.subr.bf16.mxu0 %v12207_v54  ;;  %5104 = vmatprep.subr.bf16.mxu1 %v12209_v58  ;;  %v858_v53 = vld [vmem:[#allocation2 + $0x1570] sm:$0xff]  ;;  %v847_v54 = vld [vmem:[#allocation2 + $0x1518] sm:$0xff] }
 0x109   :  { %v12399_v58 = vcombine.high %v846_v52, %v858_v53  ;;  %v12401_v59 = vcombine.high %v847_v54, %v859_v55  ;;  %v12398_v0 = vcombine.low %v846_v52, %v858_v53  ;;  %v12400_v1 = vcombine.low %v847_v54, %v859_v55  ;;  %v272_v55 = vld [vmem:[#allocation2 + $0x320] sm:$0xff] }
 0x10b   :  { %5023 = vmatpush1.bf16.msra.mxu0 %v12206_v60  ;;  %5105 = vmatpush1.bf16.msra.mxu1 %v12208_v61  ;;  %v870_v60 = vld [vmem:[#allocation2 + $0x15d0] sm:$0xff] }
 0x10c   :  { %5024 = vmatprep.subr.bf16.mxu0 %v12231_v62  ;;  %5106 = vmatprep.subr.bf16.mxu1 %v12233_v2  ;;  %v882_v61 = vld [vmem:[#allocation2 + $0x1630] sm:$0xff]  ;;  %v871_v62 = vld [vmem:[#allocation2 + $0x15d8] sm:$0xff] }
 0x10d   :  { %v12423_v2 = vcombine.high %v870_v60, %v882_v61  ;;  %v12425_v3 = vcombine.high %v871_v62, %v883_v63  ;;  %v12422_v8 = vcombine.low %v870_v60, %v882_v61  ;;  %v12424_v9 = vcombine.low %v871_v62, %v883_v63  ;;  %v296_v63 = vld [vmem:[#allocation2 + $0x3e0] sm:$0xff] }
 0x10f   :  { %5025 = vmatpush1.bf16.msra.mxu0 %v12230_v4  ;;  %5107 = vmatpush1.bf16.msra.mxu1 %v12232_v5  ;;  %v894_v4 = vld [vmem:[#allocation2 + $0x1690] sm:$0xff] }
 0x110   :  { %5026 = vmatprep.subr.bf16.mxu0 %v12255_v6  ;;  %5108 = vmatprep.subr.bf16.mxu1 %v12257_v7  ;;  %v906_v5 = vld [vmem:[#allocation2 + $0x16f0] sm:$0xff]  ;;  %v895_v6 = vld [vmem:[#allocation2 + $0x1698] sm:$0xff] }
 0x111   :  { %v907_v7 = vld [vmem:[#allocation2 + $0x16f8] sm:$0xff]  ;;  %v12447_v10 = vcombine.high %v894_v4, %v906_v5  ;;  %v12446_v17 = vcombine.low %v894_v4, %v906_v5 }
 0x112   :  { %v12448_v18 = vcombine.low %v895_v6, %v907_v7 }
 0x113   :  { %5027 = vmatpush1.bf16.msra.mxu0 %v12254_v12  ;;  %5109 = vmatpush1.bf16.msra.mxu1 %v12256_v13  ;;  %v930_v12 = vld [vmem:[#allocation2 + $0x17b0] sm:$0xff]  ;;  %v919_v13 = vld [vmem:[#allocation2 + $0x1758] sm:$0xff] }
 0x114   :  { %5028 = vmatprep.subr.bf16.mxu0 %v12279_v14  ;;  %5110 = vmatprep.subr.bf16.mxu1 %v12281_v15  ;;  %v12449_v14 = vcombine.high %v895_v6, %v907_v7  ;;  %v931_v15 = vld [vmem:[#allocation2 + $0x17b8] sm:$0xff]  ;;  %v12471_v19 = vcombine.high %v918_v11, %v930_v12  ;;  %v12470_v25 = vcombine.low %v918_v11, %v930_v12  ;;  %v320_v7 = vld [vmem:[#allocation2 + $0x4a0] sm:$0xff]  ;;  %v333_v11 = vld [vmem:[#allocation2 + $0x508] sm:$0xff] }
 0x115   :  { %v12472_v43 = vcombine.low %v919_v13, %v931_v15 }
 0x117   :  { %5029 = vmatpush1.bf16.msra.mxu0 %v12278_v21  ;;  %5111 = vmatpush1.bf16.msra.mxu1 %v12280_v22  ;;  %v188_v21 = vld [vmem:[#allocation2 + $0x80] sm:$0xff]  ;;  %v177_v22 = vld [vmem:[#allocation2 + $0x28] sm:$0xff] }
 0x118   :  { %5030 = vmatprep.subr.bf16.mxu0 %v12303_v23  ;;  %5112 = vmatprep.subr.bf16.mxu1 %v12305_v24  ;;  %v12473_v23 = vcombine.high %v919_v13, %v931_v15  ;;  %v189_v24 = vld [vmem:[#allocation2 + $0x88] sm:$0xff]  ;;  %v11731_v26 = vcombine.high %v176_v20, %v188_v21  ;;  %v11730_v33 = vcombine.low %v176_v20, %v188_v21  ;;  %v344_v15 = vld [vmem:[#allocation2 + $0x560] sm:$0xff] }
 0x119   :  { %v11732_v34 = vcombine.low %v177_v22, %v189_v24  ;;  %v357_v20 = vld [vmem:[#allocation2 + $0x5c8] sm:$0xff] }
 0x11b   :  { %5031 = vmatpush1.bf16.msra.mxu0 %v12302_v28  ;;  %5113 = vmatpush1.bf16.msra.mxu1 %v12304_v29  ;;  %v212_v28 = vld [vmem:[#allocation2 + $0x140] sm:$0xff]  ;;  %v201_v29 = vld [vmem:[#allocation2 + $0xe8] sm:$0xff] }
 0x11c   :  { %5032 = vmatprep.subr.bf16.mxu0 %v12327_v30  ;;  %5114 = vmatprep.subr.bf16.mxu1 %v12329_v32  ;;  %v11733_v30 = vcombine.high %v177_v22, %v189_v24  ;;  %v213_v32 = vld [vmem:[#allocation2 + $0x148] sm:$0xff]  ;;  %v11755_v35 = vcombine.high %v200_v27, %v212_v28  ;;  %v11754_v44 = vcombine.low %v200_v27, %v212_v28  ;;  %v368_v24 = vld [vmem:[#allocation2 + $0x620] sm:$0xff] }
 0x11d   :  { %v11757_v36 = vcombine.high %v201_v29, %v213_v32  ;;  %v11756_v45 = vcombine.low %v201_v29, %v213_v32  ;;  %v381_v27 = vld [vmem:[#allocation2 + $0x688] sm:$0xff]  ;;  %v392_v32 = vld [vmem:[#allocation2 + $0x6e0] sm:$0xff] }
 0x11f   :  { %5033 = vmatpush1.bf16.msra.mxu0 %v12326_v37  ;;  %5115 = vmatpush1.bf16.msra.mxu1 %v12328_v38  ;;  %v224_v37 = vld [vmem:[#allocation2 + $0x1a0] sm:$0xff] }
 0x120   :  { %5034 = vmatprep.subr.bf16.mxu0 %v12351_v39  ;;  %5116 = vmatprep.subr.bf16.mxu1 %v12353_v41  ;;  %v236_v38 = vld [vmem:[#allocation2 + $0x200] sm:$0xff]  ;;  %v225_v39 = vld [vmem:[#allocation2 + $0x1a8] sm:$0xff] }
 0x121   :  { %v237_v41 = vld [vmem:[#allocation2 + $0x208] sm:$0xff]  ;;  %v11779_v46 = vcombine.high %v224_v37, %v236_v38  ;;  %v11778_v52 = vcombine.low %v224_v37, %v236_v38 }
 0x122   :  { %v11780_v53 = vcombine.low %v225_v39, %v237_v41 }
 0x123   :  { %5035 = vmatpush1.bf16.msra.mxu0 %v12350_v48  ;;  %5117 = vmatpush1.bf16.msra.mxu1 %v12352_v49  ;;  %v260_v48 = vld [vmem:[#allocation2 + $0x2c0] sm:$0xff]  ;;  %v249_v49 = vld [vmem:[#allocation2 + $0x268] sm:$0xff] }
 0x124   :  { %5036 = vmatprep.subr.bf16.mxu0 %v12375_v50  ;;  %5118 = vmatprep.subr.bf16.mxu1 %v12377_v51  ;;  %v11781_v50 = vcombine.high %v225_v39, %v237_v41  ;;  %v261_v51 = vld [vmem:[#allocation2 + $0x2c8] sm:$0xff]  ;;  %v11803_v54 = vcombine.high %v248_v47, %v260_v48  ;;  %v11802_v60 = vcombine.low %v248_v47, %v260_v48  ;;  %v416_v41 = vld [vmem:[#allocation2 + $0x7a0] sm:$0xff] }
 0x125   :  { %v11804_v61 = vcombine.low %v249_v49, %v261_v51  ;;  %v429_v47 = vld [vmem:[#allocation2 + $0x808] sm:$0xff] }
 0x127   :  { %5037 = vmatpush1.bf16.msra.mxu0 %v12374_v56  ;;  %5119 = vmatpush1.bf16.msra.mxu1 %v12376_v57  ;;  %v284_v56 = vld [vmem:[#allocation2 + $0x380] sm:$0xff]  ;;  %v273_v57 = vld [vmem:[#allocation2 + $0x328] sm:$0xff] }
 0x128   :  { %5038 = vmatprep.subr.bf16.mxu0 %v12399_v58  ;;  %5120 = vmatprep.subr.bf16.mxu1 %v12401_v59  ;;  %v11805_v58 = vcombine.high %v249_v49, %v261_v51  ;;  %v285_v59 = vld [vmem:[#allocation2 + $0x388] sm:$0xff]  ;;  %v11827_v62 = vcombine.high %v272_v55, %v284_v56  ;;  %v11826_v4 = vcombine.low %v272_v55, %v284_v56  ;;  %v440_v51 = vld [vmem:[#allocation2 + $0x860] sm:$0xff] }
 0x129   :  { %v11828_v5 = vcombine.low %v273_v57, %v285_v59  ;;  %v453_v55 = vld [vmem:[#allocation2 + $0x8c8] sm:$0xff] }
 0x12b   :  { %5039 = vmatpush1.bf16.msra.mxu0 %v12398_v0  ;;  %5121 = vmatpush1.bf16.msra.mxu1 %v12400_v1  ;;  %v308_v0 = vld [vmem:[#allocation2 + $0x440] sm:$0xff]  ;;  %v297_v1 = vld [vmem:[#allocation2 + $0x3e8] sm:$0xff] }
 0x12c   :  { %5040 = vmatprep.subr.bf16.mxu0 %v12423_v2  ;;  %5122 = vmatprep.subr.bf16.mxu1 %v12425_v3  ;;  %v11829_v2 = vcombine.high %v273_v57, %v285_v59  ;;  %v309_v3 = vld [vmem:[#allocation2 + $0x448] sm:$0xff]  ;;  %v11851_v6 = vcombine.high %v296_v63, %v308_v0  ;;  %v11850_v12 = vcombine.low %v296_v63, %v308_v0  ;;  %v464_v59 = vld [vmem:[#allocation2 + $0x920] sm:$0xff] }
 0x12d   :  { %v11852_v13 = vcombine.low %v297_v1, %v309_v3  ;;  %v477_v63 = vld [vmem:[#allocation2 + $0x988] sm:$0xff] }
 0x12f   :  { %5041 = vmatpush1.bf16.msra.mxu0 %v12422_v8  ;;  %5123 = vmatpush1.bf16.msra.mxu1 %v12424_v9  ;;  %v332_v8 = vld [vmem:[#allocation2 + $0x500] sm:$0xff]  ;;  %v321_v9 = vld [vmem:[#allocation2 + $0x4a8] sm:$0xff] }
 0x130   :  { %5042 = vmatprep.subr.bf16.mxu0 %v12447_v10  ;;  %5124 = vmatprep.subr.bf16.mxu1 %v12449_v14  ;;  %v11853_v10 = vcombine.high %v297_v1, %v309_v3  ;;  %v11875_v14 = vcombine.high %v320_v7, %v332_v8  ;;  %v11874_v21 = vcombine.low %v320_v7, %v332_v8  ;;  %v488_v3 = vld [vmem:[#allocation2 + $0x9e0] sm:$0xff]  ;;  %v501_v7 = vld [vmem:[#allocation2 + $0xa48] sm:$0xff] }
 0x131   :  { %v11876_v22 = vcombine.low %v321_v9, %v333_v11 }
 0x133   :  { %5043 = vmatpush1.bf16.msra.mxu0 %v12446_v17  ;;  %5125 = vmatpush1.bf16.msra.mxu1 %v12448_v18  ;;  %v356_v17 = vld [vmem:[#allocation2 + $0x5c0] sm:$0xff]  ;;  %v345_v18 = vld [vmem:[#allocation2 + $0x568] sm:$0xff] }
 0x134   :  { %5044 = vmatprep.subr.bf16.mxu0 %v12471_v19  ;;  %5126 = vmatprep.subr.bf16.mxu1 %v12473_v23  ;;  %v11877_v19 = vcombine.high %v321_v9, %v333_v11  ;;  %v11899_v23 = vcombine.high %v344_v15, %v356_v17  ;;  %v11898_v28 = vcombine.low %v344_v15, %v356_v17  ;;  %v512_v11 = vld [vmem:[#allocation2 + $0xaa0] sm:$0xff]  ;;  %v525_v15 = vld [vmem:[#allocation2 + $0xb08] sm:$0xff] }
 0x135   :  { %v11900_v29 = vcombine.low %v345_v18, %v357_v20 }
 0x137   :  { %5045 = vmatpush1.bf16.msra.mxu0 %v12470_v25  ;;  %5127 = vmatpush1.bf16.msra.mxu1 %v12472_v43  ;;  %v380_v25 = vld [vmem:[#allocation2 + $0x680] sm:$0xff]  ;;  %v369_v43 = vld [vmem:[#allocation2 + $0x628] sm:$0xff] }
 0x138   :  { %5137 = vmatprep.subr.bf16.mxu0 %v11731_v26  ;;  %5219 = vmatprep.subr.bf16.mxu1 %v11733_v30  ;;  %v11901_v26 = vcombine.high %v345_v18, %v357_v20  ;;  %v11923_v30 = vcombine.high %v368_v24, %v380_v25  ;;  %v11922_v37 = vcombine.low %v368_v24, %v380_v25  ;;  %v536_v20 = vld [vmem:[#allocation2 + $0xb60] sm:$0xff]  ;;  %v549_v24 = vld [vmem:[#allocation2 + $0xbc8] sm:$0xff] }
 0x139   :  { %v11924_v38 = vcombine.low %v369_v43, %v381_v27 }
 0x13a   :  { %5047 = vmatmul.mubr.bf16.vlgmr.msra.gmra.mrb[4].mxu0 %v14874_v16  ;;  %5129 = vmatmul.mubr.bf16.vlgmr.msra.gmra.mrb[4].mxu1 %v14874_v16 }
 0x13b   :  { %5138 = vmatpush1.bf16.msra.mxu0 %v11730_v33  ;;  %5220 = vmatpush1.bf16.msra.mxu1 %v11732_v34  ;;  %v404_v33 = vld [vmem:[#allocation2 + $0x740] sm:$0xff]  ;;  %v393_v34 = vld [vmem:[#allocation2 + $0x6e8] sm:$0xff] }
 0x13c   :  { %5139 = vmatprep.subr.bf16.mxu0 %v11755_v35  ;;  %5221 = vmatprep.subr.bf16.mxu1 %v11757_v36  ;;  %v11925_v35 = vcombine.high %v369_v43, %v381_v27  ;;  %v405_v36 = vld [vmem:[#allocation2 + $0x748] sm:$0xff]  ;;  %v11947_v39 = vcombine.high %v392_v32, %v404_v33  ;;  %v11946_v48 = vcombine.low %v392_v32, %v404_v33  ;;  %v560_v27 = vld [vmem:[#allocation2 + $0xc20] sm:$0xff] }
 0x13d   :  { %5169 = vmatprep.mubr.bf16.mxu0 %v14799_v31  ;;  %5251 = vmatprep.mubr.bf16.mxu1 %v14799_v31  ;;  %v11948_v49 = vcombine.low %v393_v34, %v405_v36  ;;  %v573_v32 = vld [vmem:[#allocation2 + $0xc88] sm:$0xff] }
 0x13f   :  { %5140 = vmatpush1.bf16.msra.mxu0 %v11754_v44  ;;  %5222 = vmatpush1.bf16.msra.mxu1 %v11756_v45  ;;  %v428_v44 = vld [vmem:[#allocation2 + $0x800] sm:$0xff]  ;;  %v417_v45 = vld [vmem:[#allocation2 + $0x7a8] sm:$0xff] }
 0x140   :  { %5141 = vmatprep.subr.bf16.mxu0 %v11779_v46  ;;  %5223 = vmatprep.subr.bf16.mxu1 %v11781_v50  ;;  %v11949_v46 = vcombine.high %v393_v34, %v405_v36  ;;  %v11971_v50 = vcombine.high %v416_v41, %v428_v44  ;;  %v11970_v56 = vcombine.low %v416_v41, %v428_v44  ;;  %v584_v36 = vld [vmem:[#allocation2 + $0xce0] sm:$0xff]  ;;  %v597_v41 = vld [vmem:[#allocation2 + $0xd48] sm:$0xff] }
 0x141   :  { %v11972_v57 = vcombine.low %v417_v45, %v429_v47 }
 0x143   :  { %5142 = vmatpush1.bf16.msra.mxu0 %v11778_v52  ;;  %5224 = vmatpush1.bf16.msra.mxu1 %v11780_v53  ;;  %v452_v52 = vld [vmem:[#allocation2 + $0x8c0] sm:$0xff]  ;;  %v441_v53 = vld [vmem:[#allocation2 + $0x868] sm:$0xff] }
 0x144   :  { %5143 = vmatprep.subr.bf16.mxu0 %v11803_v54  ;;  %5225 = vmatprep.subr.bf16.mxu1 %v11805_v58  ;;  %v11973_v54 = vcombine.high %v417_v45, %v429_v47  ;;  %v11995_v58 = vcombine.high %v440_v51, %v452_v52  ;;  %v11994_v0 = vcombine.low %v440_v51, %v452_v52  ;;  %v608_v47 = vld [vmem:[#allocation2 + $0xda0] sm:$0xff]  ;;  %v621_v51 = vld [vmem:[#allocation2 + $0xe08] sm:$0xff] }
 0x145   :  { %v11996_v1 = vcombine.low %v441_v53, %v453_v55 }
 0x147   :  { %5144 = vmatpush1.bf16.msra.mxu0 %v11802_v60  ;;  %5226 = vmatpush1.bf16.msra.mxu1 %v11804_v61  ;;  %v476_v60 = vld [vmem:[#allocation2 + $0x980] sm:$0xff]  ;;  %v465_v61 = vld [vmem:[#allocation2 + $0x928] sm:$0xff] }
 0x148   :  { %5145 = vmatprep.subr.bf16.mxu0 %v11827_v62  ;;  %5227 = vmatprep.subr.bf16.mxu1 %v11829_v2  ;;  %v11997_v62 = vcombine.high %v441_v53, %v453_v55  ;;  %v12019_v2 = vcombine.high %v464_v59, %v476_v60  ;;  %v12018_v8 = vcombine.low %v464_v59, %v476_v60  ;;  %v632_v55 = vld [vmem:[#allocation2 + $0xe60] sm:$0xff]  ;;  %v645_v59 = vld [vmem:[#allocation2 + $0xec8] sm:$0xff] }
 0x149   :  { %v12020_v9 = vcombine.low %v465_v61, %v477_v63 }
 0x14b   :  { %5146 = vmatpush1.bf16.msra.mxu0 %v11826_v4  ;;  %5228 = vmatpush1.bf16.msra.mxu1 %v11828_v5  ;;  %v500_v4 = vld [vmem:[#allocation2 + $0xa40] sm:$0xff]  ;;  %v489_v5 = vld [vmem:[#allocation2 + $0x9e8] sm:$0xff] }
 0x14c   :  { %5147 = vmatprep.subr.bf16.mxu0 %v11851_v6  ;;  %5229 = vmatprep.subr.bf16.mxu1 %v11853_v10  ;;  %v12021_v6 = vcombine.high %v465_v61, %v477_v63  ;;  %v12043_v10 = vcombine.high %v488_v3, %v500_v4  ;;  %v12042_v17 = vcombine.low %v488_v3, %v500_v4  ;;  %v656_v63 = vld [vmem:[#allocation2 + $0xf20] sm:$0xff]  ;;  %v669_v3 = vld [vmem:[#allocation2 + $0xf88] sm:$0xff] }
 0x14d   :  { %v12044_v18 = vcombine.low %v489_v5, %v501_v7 }
 0x14f   :  { %5148 = vmatpush1.bf16.msra.mxu0 %v11850_v12  ;;  %5230 = vmatpush1.bf16.msra.mxu1 %v11852_v13  ;;  %v524_v12 = vld [vmem:[#allocation2 + $0xb00] sm:$0xff]  ;;  %v513_v13 = vld [vmem:[#allocation2 + $0xaa8] sm:$0xff] }
 0x150   :  { %5149 = vmatprep.subr.bf16.mxu0 %v11875_v14  ;;  %5231 = vmatprep.subr.bf16.mxu1 %v11877_v19  ;;  %v12045_v14 = vcombine.high %v489_v5, %v501_v7  ;;  %v12067_v19 = vcombine.high %v512_v11, %v524_v12  ;;  %v12066_v25 = vcombine.low %v512_v11, %v524_v12  ;;  %v680_v7 = vld [vmem:[#allocation2 + $0xfe0] sm:$0xff]  ;;  %v693_v11 = vld [vmem:[#allocation2 + $0x1048] sm:$0xff] }
 0x151   :  { %v12068_v43 = vcombine.low %v513_v13, %v525_v15 }
 0x153   :  { %5150 = vmatpush1.bf16.msra.mxu0 %v11874_v21  ;;  %5232 = vmatpush1.bf16.msra.mxu1 %v11876_v22  ;;  %v548_v21 = vld [vmem:[#allocation2 + $0xbc0] sm:$0xff]  ;;  %v537_v22 = vld [vmem:[#allocation2 + $0xb68] sm:$0xff] }
 0x154   :  { %5151 = vmatprep.subr.bf16.mxu0 %v11899_v23  ;;  %5233 = vmatprep.subr.bf16.mxu1 %v11901_v26  ;;  %v12069_v23 = vcombine.high %v513_v13, %v525_v15  ;;  %v12091_v26 = vcombine.high %v536_v20, %v548_v21  ;;  %v12090_v33 = vcombine.low %v536_v20, %v548_v21  ;;  %v704_v15 = vld [vmem:[#allocation2 + $0x10a0] sm:$0xff]  ;;  %v717_v20 = vld [vmem:[#allocation2 + $0x1108] sm:$0xff] }
 0x155   :  { %v12092_v34 = vcombine.low %v537_v22, %v549_v24 }
 0x157   :  { %5152 = vmatpush1.bf16.msra.mxu0 %v11898_v28  ;;  %5234 = vmatpush1.bf16.msra.mxu1 %v11900_v29  ;;  %v572_v28 = vld [vmem:[#allocation2 + $0xc80] sm:$0xff]  ;;  %v561_v29 = vld [vmem:[#allocation2 + $0xc28] sm:$0xff] }
 0x158   :  { %5153 = vmatprep.subr.bf16.mxu0 %v11923_v30  ;;  %5235 = vmatprep.subr.bf16.mxu1 %v11925_v35  ;;  %v12093_v30 = vcombine.high %v537_v22, %v549_v24  ;;  %v12115_v35 = vcombine.high %v560_v27, %v572_v28  ;;  %v12114_v44 = vcombine.low %v560_v27, %v572_v28  ;;  %v729_v27 = vld [vmem:[#allocation2 + $0x1168] sm:$0xff] }
 0x159   :  { %v12116_v45 = vcombine.low %v561_v29, %v573_v32 }
 0x15b   :  { %5154 = vmatpush1.bf16.msra.mxu0 %v11922_v37  ;;  %5236 = vmatpush1.bf16.msra.mxu1 %v11924_v38  ;;  %v596_v37 = vld [vmem:[#allocation2 + $0xd40] sm:$0xff]  ;;  %v585_v38 = vld [vmem:[#allocation2 + $0xce8] sm:$0xff] }
 0x15c   :  { %5155 = vmatprep.subr.bf16.mxu0 %v11947_v39  ;;  %5237 = vmatprep.subr.bf16.mxu1 %v11949_v46  ;;  %v12117_v39 = vcombine.high %v561_v29, %v573_v32  ;;  %v12139_v46 = vcombine.high %v584_v36, %v596_v37  ;;  %v12138_v52 = vcombine.low %v584_v36, %v596_v37 }
 0x15d   :  { %v12140_v53 = vcombine.low %v585_v38, %v597_v41 }
 0x15f   :  { %5156 = vmatpush1.bf16.msra.mxu0 %v11946_v48  ;;  %5238 = vmatpush1.bf16.msra.mxu1 %v11948_v49  ;;  %v620_v48 = vld [vmem:[#allocation2 + $0xe00] sm:$0xff]  ;;  %v609_v49 = vld [vmem:[#allocation2 + $0xda8] sm:$0xff] }
 0x160   :  { %5157 = vmatprep.subr.bf16.mxu0 %v11971_v50  ;;  %5239 = vmatprep.subr.bf16.mxu1 %v11973_v54  ;;  %v12141_v50 = vcombine.high %v585_v38, %v597_v41  ;;  %v12163_v54 = vcombine.high %v608_v47, %v620_v48  ;;  %v12162_v60 = vcombine.low %v608_v47, %v620_v48  ;;  %v765_v47 = vld [vmem:[#allocation2 + $0x1288] sm:$0xff] }
 0x161   :  { %v12164_v61 = vcombine.low %v609_v49, %v621_v51 }
 0x163   :  { %5158 = vmatpush1.bf16.msra.mxu0 %v11970_v56  ;;  %5240 = vmatpush1.bf16.msra.mxu1 %v11972_v57  ;;  %v644_v56 = vld [vmem:[#allocation2 + $0xec0] sm:$0xff]  ;;  %v633_v57 = vld [vmem:[#allocation2 + $0xe68] sm:$0xff] }
 0x164   :  { %5159 = vmatprep.subr.bf16.mxu0 %v11995_v58  ;;  %5241 = vmatprep.subr.bf16.mxu1 %v11997_v62  ;;  %v12165_v58 = vcombine.high %v609_v49, %v621_v51  ;;  %v12187_v62 = vcombine.high %v632_v55, %v644_v56  ;;  %v12186_v4 = vcombine.low %v632_v55, %v644_v56  ;;  %v789_v55 = vld [vmem:[#allocation2 + $0x1348] sm:$0xff] }
 0x165   :  { %v12188_v5 = vcombine.low %v633_v57, %v645_v59 }
 0x167   :  { %5160 = vmatpush1.bf16.msra.mxu0 %v11994_v0  ;;  %5242 = vmatpush1.bf16.msra.mxu1 %v11996_v1  ;;  %v668_v0 = vld [vmem:[#allocation2 + $0xf80] sm:$0xff]  ;;  %v657_v1 = vld [vmem:[#allocation2 + $0xf28] sm:$0xff] }
 0x168   :  { %5161 = vmatprep.subr.bf16.mxu0 %v12019_v2  ;;  %5243 = vmatprep.subr.bf16.mxu1 %v12021_v6  ;;  %v12189_v2 = vcombine.high %v633_v57, %v645_v59  ;;  %v12211_v6 = vcombine.high %v656_v63, %v668_v0  ;;  %v12210_v12 = vcombine.low %v656_v63, %v668_v0  ;;  %v5942_v0 = vlaneseq }
 0x169   :  { %v12212_v13 = vcombine.low %v657_v1, %v669_v3 }
 0x16b   :  { %5162 = vmatpush1.bf16.msra.mxu0 %v12018_v8  ;;  %5244 = vmatpush1.bf16.msra.mxu1 %v12020_v9  ;;  %v692_v8 = vld [vmem:[#allocation2 + $0x1040] sm:$0xff]  ;;  %v681_v9 = vld [vmem:[#allocation2 + $0xfe8] sm:$0xff] }
 0x16c   :  { %5163 = vmatprep.subr.bf16.mxu0 %v12043_v10  ;;  %5245 = vmatprep.subr.bf16.mxu1 %v12045_v14  ;;  %v12213_v10 = vcombine.high %v657_v1, %v669_v3  ;;  %v12235_v14 = vcombine.high %v680_v7, %v692_v8  ;;  %v12234_v21 = vcombine.low %v680_v7, %v692_v8  ;;  %v812_v3 = vld [vmem:[#allocation2 + $0x1400] sm:$0xff]  ;;  %v813_v7 = vld [vmem:[#allocation2 + $0x1408] sm:$0xff] }
 0x16d   :  { %v12236_v22 = vcombine.low %v681_v9, %v693_v11 }
 0x16f   :  { %5164 = vmatpush1.bf16.msra.mxu0 %v12042_v17  ;;  %5246 = vmatpush1.bf16.msra.mxu1 %v12044_v18  ;;  %v716_v17 = vld [vmem:[#allocation2 + $0x1100] sm:$0xff]  ;;  %v705_v18 = vld [vmem:[#allocation2 + $0x10a8] sm:$0xff] }
 0x170   :  { %5165 = vmatprep.subr.bf16.mxu0 %v12067_v19  ;;  %5247 = vmatprep.subr.bf16.mxu1 %v12069_v23  ;;  %v12237_v19 = vcombine.high %v681_v9, %v693_v11  ;;  %v12259_v23 = vcombine.high %v704_v15, %v716_v17  ;;  %v12260_v37 = vcombine.low %v705_v18, %v717_v20 }
 0x173   :  { %5166 = vmatpush1.bf16.msra.mxu0 %v12066_v25  ;;  %5248 = vmatpush1.bf16.msra.mxu1 %v12068_v43  ;;  %v12261_v25 = vcombine.high %v705_v18, %v717_v20  ;;  %v728_v43 = vld [vmem:[#allocation2 + $0x1160] sm:$0xff]  ;;  %v14892_v20 = vshrl.u32 %v5942_v0, 7 }
 0x174   :  { %5167 = vmatprep.subr.bf16.mxu0 %v12091_v26  ;;  %5249 = vmatprep.subr.bf16.mxu1 %v12093_v30  ;;  %v740_v26 = vld [vmem:[#allocation2 + $0x11c0] sm:$0xff]  ;;  %v741_v30 = vld [vmem:[#allocation2 + $0x11c8] sm:$0xff] }
 0x175   :  { %v12283_v38 = vcombine.high %v728_v43, %v740_v26  ;;  %v12285_v41 = vcombine.high %v729_v27, %v741_v30  ;;  %v12282_v48 = vcombine.low %v728_v43, %v740_v26  ;;  %v12284_v49 = vcombine.low %v729_v27, %v741_v30  ;;  %v837_v26 = vld [vmem:[#allocation2 + $0x14c8] sm:$0xff]  ;;  %v908_v0 = vld [vmem:[#allocation2 + $0x1700] sm:$0xff] }
 0x177   :  { %5168 = vmatpush1.bf16.msra.mxu0 %v12090_v33  ;;  %5250 = vmatpush1.bf16.msra.mxu1 %v12092_v34  ;;  %v12258_v34 = vcombine.low %v704_v15, %v716_v17 }
 0x178   :  { %5178 = vmatprep.subr.bf16.mxu0 %v12115_v35  ;;  %5260 = vmatprep.subr.bf16.mxu1 %v12117_v39 }
 0x17a   :  { %5170 = vmatmul.mubr.bf16.vlgmr.msra.gmra.mrb[8].mxu0 %v14860_v40  ;;  %5252 = vmatmul.mubr.bf16.vlgmr.msra.gmra.mrb[8].mxu1 %v14860_v40 }
 0x17b   :  { %5179 = vmatpush1.bf16.msra.mxu0 %v12114_v44  ;;  %5261 = vmatpush1.bf16.msra.mxu1 %v12116_v45  ;;  %v752_v44 = vld [vmem:[#allocation2 + $0x1220] sm:$0xff] }
 0x17c   :  { %5180 = vmatprep.subr.bf16.mxu0 %v12139_v46  ;;  %5262 = vmatprep.subr.bf16.mxu1 %v12141_v50  ;;  %v764_v45 = vld [vmem:[#allocation2 + $0x1280] sm:$0xff]  ;;  %v753_v46 = vld [vmem:[#allocation2 + $0x1228] sm:$0xff] }
 0x17d   :  { %5210 = vmatprep.mubr.bf16.mxu0 %v14865_v42  ;;  %5292 = vmatprep.mubr.bf16.mxu1 %v14865_v42  ;;  %v12307_v50 = vcombine.high %v752_v44, %v764_v45  ;;  %v12309_v51 = vcombine.high %v753_v46, %v765_v47  ;;  %v12306_v56 = vcombine.low %v752_v44, %v764_v45  ;;  %v861_v45 = vld [vmem:[#allocation2 + $0x1588] sm:$0xff] }
 0x17f   :  { %5181 = vmatpush1.bf16.msra.mxu0 %v12138_v52  ;;  %5263 = vmatpush1.bf16.msra.mxu1 %v12140_v53  ;;  %v776_v52 = vld [vmem:[#allocation2 + $0x12e0] sm:$0xff] }
 0x180   :  { %5182 = vmatprep.subr.bf16.mxu0 %v12163_v54  ;;  %5264 = vmatprep.subr.bf16.mxu1 %v12165_v58  ;;  %v788_v53 = vld [vmem:[#allocation2 + $0x1340] sm:$0xff]  ;;  %v777_v54 = vld [vmem:[#allocation2 + $0x12e8] sm:$0xff]  ;;  %v14683_v58 = vmov 1983009808  }
 0x181   :  { %v5940_v59 = vunpack.c.l.s4 %v14683_v58  ;;  %v12333_v1 = vcombine.high %v777_v54, %v789_v55  ;;  %v12330_v11 = vcombine.low %v776_v52, %v788_v53 }
 0x183   :  { %5183 = vmatpush1.bf16.msra.mxu0 %v12162_v60  ;;  %5265 = vmatpush1.bf16.msra.mxu1 %v12164_v61  ;;  %v12308_v60 = vcombine.low %v753_v46, %v765_v47  ;;  %v12331_v61 = vcombine.high %v776_v52, %v788_v53  ;;  %v872_v53 = vld [vmem:[#allocation2 + $0x15e0] sm:$0xff] }
 0x184   :  { %5184 = vmatprep.subr.bf16.mxu0 %v12187_v62  ;;  %5266 = vmatprep.subr.bf16.mxu1 %v12189_v2  ;;  %v800_v2 = vld [vmem:[#allocation2 + $0x13a0] sm:$0xff] }
 0x185   :  { %v12355_v17 = vcombine.high %v800_v2, %v812_v3 }
 0x187   :  { %5185 = vmatpush1.bf16.msra.mxu0 %v12186_v4  ;;  %5267 = vmatpush1.bf16.msra.mxu1 %v12188_v5  ;;  %v801_v4 = vld [vmem:[#allocation2 + $0x13a8] sm:$0xff] }
 0x188   :  { %5186 = vmatprep.subr.bf16.mxu0 %v12211_v6  ;;  %5268 = vmatprep.subr.bf16.mxu1 %v12213_v10 }
 0x18b   :  { %5187 = vmatpush1.bf16.msra.mxu0 %v12210_v12  ;;  %5269 = vmatpush1.bf16.msra.mxu1 %v12212_v13  ;;  %v12332_v12 = vcombine.low %v777_v54, %v789_v55  ;;  %v884_v54 = vld [vmem:[#allocation2 + $0x1640] sm:$0xff]  ;;  %v873_v55 = vld [vmem:[#allocation2 + $0x15e8] sm:$0xff] }
 0x18c   :  { %5188 = vmatprep.subr.bf16.mxu0 %v12235_v14  ;;  %5270 = vmatprep.subr.bf16.mxu1 %v12237_v19  ;;  %v5941_v14 = vunpack.c.0.s8 %v5940_v59 }
 0x18d   :  { %v4884_v24 = vpop.f32.mrb[0].mxu0  ;;  %v4966_v28 = vpop.f32.mrb[0].mxu1 }
 0x18e   :  { %14558 = vtanh.f32 %v4884_v24  ;;  %v4886_v29 = vpop.f32.mrb[1].mxu0  ;;  %v4968_v32 = vpop.f32.mrb[1].mxu1  ;;  %v825_v24 = vld [vmem:[#allocation2 + $0x1468] sm:$0xff] }
 0x18f   :  { %14560 = vtanh.f32 %v4966_v28  ;;  %v4888_v33 = vpop.f32.mrb[2].mxu0  ;;  %5189 = vmatpush1.bf16.msra.mxu0 %v12234_v21  ;;  %v4970_v35 = vpop.f32.mrb[2].mxu1  ;;  %5271 = vmatpush1.bf16.msra.mxu1 %v12236_v22  ;;  %v12357_v21 = vcombine.high %v801_v4, %v813_v7  ;;  %v824_v22 = vld [vmem:[#allocation2 + $0x1460] sm:$0xff] }
 0x190   :  { %14562 = vtanh.f32 %v4886_v29  ;;  %v4889_v36 = vpop.f32.mrb[3].mxu0  ;;  %5190 = vmatprep.subr.bf16.mxu0 %v12259_v23  ;;  %v4971_v39 = vpop.f32.mrb[3].mxu1  ;;  %5272 = vmatprep.subr.bf16.mxu1 %v12261_v25  ;;  %v836_v23 = vld [vmem:[#allocation2 + $0x14c0] sm:$0xff]  ;;  %v12354_v29 = vcombine.low %v800_v2, %v812_v3  ;;  %v12356_v33 = vcombine.low %v801_v4, %v813_v7  ;;  %v909_v2 = vld [vmem:[#allocation2 + $0x1708] sm:$0xff]  ;;  %v12426_v3 = vcombine.low %v872_v53, %v884_v54 }
 0x191   :  { %14564 = vtanh.f32 %v4968_v32  ;;  %v14901_v36 = vsub.s32 %v5941_v14, %v14892_v20  ;;  %v860_v39 = vld [vmem:[#allocation2 + $0x1580] sm:$0xff]  ;;  %v12378_v47 = vcombine.low %v824_v22, %v836_v23  ;;  %v178_v14 = vld [vmem:[#allocation2 + $0x30] sm:$0xff] }
 0x192   :  { %v932_v7 = vld [vmem:[#allocation2 + $0x17c0] sm:$0xff] }
 0x193   :  { %5191 = vmatpush1.bf16.msra.mxu0 %v12258_v34  ;;  %5273 = vmatpush1.bf16.msra.mxu1 %v12260_v37  ;;  %v12379_v34 = vcombine.high %v824_v22, %v836_v23  ;;  %v12381_v37 = vcombine.high %v825_v24, %v837_v26 }
 0x194   :  { %5192 = vmatprep.subr.bf16.mxu0 %v12283_v38  ;;  %5274 = vmatprep.subr.bf16.mxu1 %v12285_v41  ;;  %v848_v38 = vld [vmem:[#allocation2 + $0x1520] sm:$0xff]  ;;  %v849_v41 = vld [vmem:[#allocation2 + $0x1528] sm:$0xff] }
 0x195   :  { %v12405_v52 = vcombine.high %v849_v41, %v861_v45  ;;  %v12402_v58 = vcombine.low %v848_v38, %v860_v39 }
 0x197   :  { %5193 = vmatpush1.bf16.msra.mxu0 %v12282_v48  ;;  %5275 = vmatpush1.bf16.msra.mxu1 %v12284_v49  ;;  %v12380_v49 = vcombine.low %v825_v24, %v837_v26  ;;  %v202_v24 = vld [vmem:[#allocation2 + $0xf0] sm:$0xff] }
 0x198   :  { %v14559_v57 = vpop.eup %14558  ;;  %5194 = vmatprep.subr.bf16.mxu0 %v12307_v50  ;;  %5276 = vmatprep.subr.bf16.mxu1 %v12309_v51  ;;  %v12403_v50 = vcombine.high %v848_v38, %v860_v39  ;;  %v238_v38 = vld [vmem:[#allocation2 + $0x210] sm:$0xff]  ;;  %v227_v39 = vld [vmem:[#allocation2 + $0x1b8] sm:$0xff] }
 0x199   :  { %v14561_v62 = vpop.eup %14560  ;;  %v5817_v63 = vmul.f32 127.5, %v14559_v57  ;;  %v885_v57 = vld [vmem:[#allocation2 + $0x1648] sm:$0xff] }
 0x19a   :  { %v14563_v5 = vpop.eup %14562  ;;  %v5819_v6 = vmul.f32 127.5, %v14561_v62  ;;  %v12429_v62 = vcombine.high %v873_v55, %v885_v57  ;;  %v12428_v4 = vcombine.low %v873_v55, %v885_v57  ;;  %v286_v57 = vld [vmem:[#allocation2 + $0x390] sm:$0xff] }
 0x19b   :  { %v14565_v8 = vpop.eup %14564  ;;  %v5841_v9 = vadd.f32 128.0, %v5817_v63  ;;  %v5818_v10 = vmul.f32 127.5, %v14563_v5  ;;  %5195 = vmatpush1.bf16.msra.mxu0 %v12306_v56  ;;  %5277 = vmatpush1.bf16.msra.mxu1 %v12308_v60  ;;  %v12404_v60 = vcombine.low %v849_v41, %v861_v45  ;;  %v896_v63 = vld [vmem:[#allocation2 + $0x16a0] sm:$0xff]  ;;  %v239_v41 = vld [vmem:[#allocation2 + $0x218] sm:$0xff] }
 0x19c   :  { %v5843_v13 = vadd.f32 128.0, %v5819_v6  ;;  %v5820_v15 = vmul.f32 127.5, %v14565_v8  ;;  %5196 = vmatprep.subr.bf16.mxu0 %v12331_v61  ;;  %5278 = vmatprep.subr.bf16.mxu1 %v12333_v1  ;;  %v12427_v61 = vcombine.high %v872_v53, %v884_v54  ;;  %v897_v1 = vld [vmem:[#allocation2 + $0x16a8] sm:$0xff]  ;;  %v12451_v5 = vcombine.high %v896_v63, %v908_v0  ;;  %v920_v6 = vld [vmem:[#allocation2 + $0x1760] sm:$0xff] }
 0x19d   :  { %v5865_v18 = vmax.f32 %v5841_v9, 0.0  ;;  %v5842_v19 = vadd.f32 128.0, %v5818_v10  ;;  %v921_v8 = vld [vmem:[#allocation2 + $0x1768] sm:$0xff]  ;;  %v12453_v9 = vcombine.high %v897_v1, %v909_v2  ;;  %v11784_v54 = vcombine.low %v227_v39, %v239_v41 }
 0x19e   :  { %v5867_v25 = vmax.f32 %v5843_v13, 0.0  ;;  %v5844_v43 = vadd.f32 128.0, %v5820_v15  ;;  %v933_v10 = vld [vmem:[#allocation2 + $0x17c8] sm:$0xff]  ;;  %v12475_v13 = vcombine.high %v920_v6, %v932_v7  ;;  %v190_v15 = vld [vmem:[#allocation2 + $0x90] sm:$0xff] }
 0x19f   :  { %v14894_v27 = vmin.f32 %v5865_v18, 255.0  ;;  %v5866_v28 = vmax.f32 %v5842_v19, 0.0  ;;  %5197 = vmatpush1.bf16.msra.mxu0 %v12330_v11  ;;  %5279 = vmatpush1.bf16.msra.mxu1 %v12332_v12  ;;  %v12450_v11 = vcombine.low %v896_v63, %v908_v0  ;;  %v12452_v12 = vcombine.low %v897_v1, %v909_v2  ;;  %v191_v19 = vld [vmem:[#allocation2 + $0x98] sm:$0xff]  ;;  %v298_v0 = vld [vmem:[#allocation2 + $0x3f0] sm:$0xff] }
 0x1a0   :  { %v14896_v30 = vmin.f32 %v5867_v25, 255.0  ;;  %v5868_v32 = vmax.f32 %v5844_v43, 0.0  ;;  %5198 = vmatprep.subr.bf16.mxu0 %v12355_v17  ;;  %5280 = vmatprep.subr.bf16.mxu1 %v12357_v21  ;;  %v179_v17 = vld [vmem:[#allocation2 + $0x38] sm:$0xff]  ;;  %v12477_v18 = vcombine.high %v921_v8, %v933_v10  ;;  %v12474_v21 = vcombine.low %v920_v6, %v932_v7  ;;  %v214_v25 = vld [vmem:[#allocation2 + $0x150] sm:$0xff] }
 0x1a1   :  { %v14898_v35 = vmin.f32 %v5866_v28, 255.0  ;;  %v12476_v22 = vcombine.low %v921_v8, %v933_v10  ;;  %v11735_v23 = vcombine.high %v178_v14, %v190_v15  ;;  %v203_v43 = vld [vmem:[#allocation2 + $0xf8] sm:$0xff]  ;;  %v11737_v26 = vcombine.high %v179_v17, %v191_v19  ;;  %v310_v1 = vld [vmem:[#allocation2 + $0x450] sm:$0xff] }
 0x1a2   :  { %v14903_v44 = vmin.f32 %v5868_v32, 255.0  ;;  %v215_v28 = vld [vmem:[#allocation2 + $0x158] sm:$0xff]  ;;  %v11736_v32 = vcombine.low %v179_v17, %v191_v19  ;;  %v11758_v45 = vcombine.low %v202_v24, %v214_v25  ;;  %v11855_v7 = vcombine.high %v298_v0, %v310_v1  ;;  %v322_v8 = vld [vmem:[#allocation2 + $0x4b0] sm:$0xff] }
 0x1a3   :  { %v5937_v46 = vcombine.low %v14894_v27, %v14898_v35  ;;  %5199 = vmatpush1.bf16.msra.mxu0 %v12354_v29  ;;  %5281 = vmatpush1.bf16.msra.mxu1 %v12356_v33  ;;  %v11734_v29 = vcombine.low %v178_v14, %v190_v15  ;;  %v11759_v33 = vcombine.high %v202_v24, %v214_v25  ;;  %v299_v2 = vld [vmem:[#allocation2 + $0x3f8] sm:$0xff]  ;;  %v346_v17 = vld [vmem:[#allocation2 + $0x570] sm:$0xff] }
 0x1a4   :  { %v5938_v48 = vcombine.low %v14896_v30, %v14903_v44  ;;  %5200 = vmatprep.subr.bf16.mxu0 %v12379_v34  ;;  %5282 = vmatprep.subr.bf16.mxu1 %v12381_v37  ;;  %v11761_v34 = vcombine.high %v203_v43, %v215_v28  ;;  %v226_v37 = vld [vmem:[#allocation2 + $0x1b0] sm:$0xff]  ;;  %v323_v10 = vld [vmem:[#allocation2 + $0x4b8] sm:$0xff] }
 0x1a5   :  { %v5945_v51 = vrot.slane %v5937_v46, %v14901_v36  ;;  %v11760_v46 = vcombine.low %v203_v43, %v215_v28  ;;  %v11782_v53 = vcombine.low %v226_v37, %v238_v38  ;;  %v347_v19 = vld [vmem:[#allocation2 + $0x578] sm:$0xff]  ;;  %v370_v43 = vld [vmem:[#allocation2 + $0x630] sm:$0xff] }
 0x1a6   :  { %v5952_v56 = vrot.slane %v5938_v48, %v14901_v36  ;;  %v250_v48 = vld [vmem:[#allocation2 + $0x270] sm:$0xff]  ;;  %v371_v28 = vld [vmem:[#allocation2 + $0x638] sm:$0xff] }
 0x1a7   :  { %5201 = vmatpush1.bf16.msra.mxu0 %v12378_v47  ;;  %5283 = vmatpush1.bf16.msra.mxu1 %v12380_v49  ;;  %v11783_v47 = vcombine.high %v226_v37, %v238_v38  ;;  %v262_v49 = vld [vmem:[#allocation2 + $0x2d0] sm:$0xff] }
 0x1a8   :  { %v5953_v59 = vcombine.low %v5945_v51, %v5952_v56  ;;  %5202 = vmatprep.subr.bf16.mxu0 %v12403_v50  ;;  %5284 = vmatprep.subr.bf16.mxu1 %v12405_v52  ;;  %v251_v50 = vld [vmem:[#allocation2 + $0x278] sm:$0xff]  ;;  %v11785_v51 = vcombine.high %v227_v39, %v239_v41  ;;  %v11807_v55 = vcombine.high %v250_v48, %v262_v49  ;;  %v274_v56 = vld [vmem:[#allocation2 + $0x330] sm:$0xff] }
 0x1a9   :  { %v263_v52 = vld [vmem:[#allocation2 + $0x2d8] sm:$0xff]  ;;  %v11831_v63 = vcombine.high %v274_v56, %v286_v57  ;;  %v394_v38 = vld [vmem:[#allocation2 + $0x6f0] sm:$0xff] }
 0x1aa   :  { %6045 = vst [vmem:[%s15086_s4] sm:$0xff] %v5953_v59  ;;  %v11809_v59 = vcombine.high %v251_v50, %v263_v52  ;;  %v406_v39 = vld [vmem:[#allocation2 + $0x750] sm:$0xff]  ;;  %v395_v41 = vld [vmem:[#allocation2 + $0x6f8] sm:$0xff] }
 0x1ab   :  { %5203 = vmatpush1.bf16.msra.mxu0 %v12402_v58  ;;  %5285 = vmatpush1.bf16.msra.mxu1 %v12404_v60  ;;  %v275_v58 = vld [vmem:[#allocation2 + $0x338] sm:$0xff] }
 0x1ac   :  { %5204 = vmatprep.subr.bf16.mxu0 %v12427_v61  ;;  %5286 = vmatprep.subr.bf16.mxu1 %v12429_v62  ;;  %v287_v60 = vld [vmem:[#allocation2 + $0x398] sm:$0xff]  ;;  %v11806_v61 = vcombine.low %v250_v48, %v262_v49  ;;  %v11808_v62 = vcombine.low %v251_v50, %v263_v52  ;;  %v11951_v49 = vcombine.high %v394_v38, %v406_v39  ;;  %v418_v50 = vld [vmem:[#allocation2 + $0x7b0] sm:$0xff] }
 0x1ad   :  { %v11832_v6 = vcombine.low %v275_v58, %v287_v60  ;;  %v419_v52 = vld [vmem:[#allocation2 + $0x7b8] sm:$0xff] }
 0x1af   :  { %5205 = vmatpush1.bf16.msra.mxu0 %v12426_v3  ;;  %5287 = vmatpush1.bf16.msra.mxu1 %v12428_v4  ;;  %v11833_v3 = vcombine.high %v275_v58, %v287_v60  ;;  %v311_v4 = vld [vmem:[#allocation2 + $0x458] sm:$0xff]  ;;  %v442_v58 = vld [vmem:[#allocation2 + $0x870] sm:$0xff] }
 0x1b0   :  { %5206 = vmatprep.subr.bf16.mxu0 %v12451_v5  ;;  %5288 = vmatprep.subr.bf16.mxu1 %v12453_v9  ;;  %v11830_v5 = vcombine.low %v274_v56, %v286_v57  ;;  %v334_v9 = vld [vmem:[#allocation2 + $0x510] sm:$0xff]  ;;  %v11856_v14 = vcombine.low %v299_v2, %v311_v4  ;;  %v443_v60 = vld [vmem:[#allocation2 + $0x878] sm:$0xff] }
 0x1b1   :  { %v11879_v15 = vcombine.high %v322_v8, %v334_v9 }
 0x1b3   :  { %5207 = vmatpush1.bf16.msra.mxu0 %v12450_v11  ;;  %5289 = vmatpush1.bf16.msra.mxu1 %v12452_v12  ;;  %v11857_v11 = vcombine.high %v299_v2, %v311_v4  ;;  %v335_v12 = vld [vmem:[#allocation2 + $0x518] sm:$0xff]  ;;  %v466_v2 = vld [vmem:[#allocation2 + $0x930] sm:$0xff] }
 0x1b4   :  { %5208 = vmatprep.subr.bf16.mxu0 %v12475_v13  ;;  %5290 = vmatprep.subr.bf16.mxu1 %v12477_v18  ;;  %v11854_v13 = vcombine.low %v298_v0, %v310_v1  ;;  %v358_v18 = vld [vmem:[#allocation2 + $0x5d0] sm:$0xff]  ;;  %v11880_v24 = vcombine.low %v323_v10, %v335_v12  ;;  %v467_v4 = vld [vmem:[#allocation2 + $0x938] sm:$0xff] }
 0x1b5   :  { %v11903_v25 = vcombine.high %v346_v17, %v358_v18 }
 0x1b7   :  { %5209 = vmatpush1.bf16.msra.mxu0 %v12474_v21  ;;  %5291 = vmatpush1.bf16.msra.mxu1 %v12476_v22  ;;  %v11881_v21 = vcombine.high %v323_v10, %v335_v12  ;;  %v359_v22 = vld [vmem:[#allocation2 + $0x5d8] sm:$0xff]  ;;  %v490_v10 = vld [vmem:[#allocation2 + $0x9f0] sm:$0xff] }
 0x1b8   :  { %5301 = vmatprep.subr.bf16.mxu0 %v11735_v23  ;;  %5383 = vmatprep.subr.bf16.mxu1 %v11737_v26  ;;  %v11878_v23 = vcombine.low %v322_v8, %v334_v9  ;;  %v382_v26 = vld [vmem:[#allocation2 + $0x690] sm:$0xff]  ;;  %v491_v12 = vld [vmem:[#allocation2 + $0x9f8] sm:$0xff] }
 0x1b9   :  { %v11927_v37 = vcombine.high %v370_v43, %v382_v26 }
 0x1ba   :  { %5211 = vmatmul.mubr.bf16.vlgmr.msra.gmra.mrb[8].mxu0 %v14874_v16  ;;  %5293 = vmatmul.mubr.bf16.vlgmr.msra.gmra.mrb[8].mxu1 %v14874_v16 }
 0x1bb   :  { %5302 = vmatpush1.bf16.msra.mxu0 %v11734_v29  ;;  %5384 = vmatpush1.bf16.msra.mxu1 %v11736_v32  ;;  %v11905_v29 = vcombine.high %v347_v19, %v359_v22  ;;  %v383_v32 = vld [vmem:[#allocation2 + $0x698] sm:$0xff] }
 0x1bc   :  { %5303 = vmatprep.subr.bf16.mxu0 %v11759_v33  ;;  %5385 = vmatprep.subr.bf16.mxu1 %v11761_v34  ;;  %v11902_v33 = vcombine.low %v346_v17, %v358_v18  ;;  %v11904_v34 = vcombine.low %v347_v19, %v359_v22  ;;  %v11928_v48 = vcombine.low %v371_v28, %v383_v32  ;;  %v514_v19 = vld [vmem:[#allocation2 + $0xab0] sm:$0xff]  ;;  %v515_v22 = vld [vmem:[#allocation2 + $0xab8] sm:$0xff] }
 0x1bd   :  { %5333 = vmatprep.mubr.bf16.mxu0 %v14799_v31  ;;  %5415 = vmatprep.mubr.bf16.mxu1 %v14799_v31 }
 0x1bf   :  { %5304 = vmatpush1.bf16.msra.mxu0 %v11758_v45  ;;  %5386 = vmatpush1.bf16.msra.mxu1 %v11760_v46  ;;  %v11929_v45 = vcombine.high %v371_v28, %v383_v32  ;;  %v407_v46 = vld [vmem:[#allocation2 + $0x758] sm:$0xff]  ;;  %v538_v28 = vld [vmem:[#allocation2 + $0xb70] sm:$0xff] }
 0x1c0   :  { %5305 = vmatprep.subr.bf16.mxu0 %v11783_v47  ;;  %5387 = vmatprep.subr.bf16.mxu1 %v11785_v51  ;;  %v11926_v47 = vcombine.low %v370_v43, %v382_v26  ;;  %v430_v51 = vld [vmem:[#allocation2 + $0x810] sm:$0xff]  ;;  %v11952_v56 = vcombine.low %v395_v41, %v407_v46  ;;  %v539_v32 = vld [vmem:[#allocation2 + $0xb78] sm:$0xff] }
 0x1c1   :  { %v11975_v57 = vcombine.high %v418_v50, %v430_v51 }
 0x1c3   :  { %5306 = vmatpush1.bf16.msra.mxu0 %v11782_v53  ;;  %5388 = vmatpush1.bf16.msra.mxu1 %v11784_v54  ;;  %v11953_v53 = vcombine.high %v395_v41, %v407_v46  ;;  %v431_v54 = vld [vmem:[#allocation2 + $0x818] sm:$0xff]  ;;  %v562_v41 = vld [vmem:[#allocation2 + $0xc30] sm:$0xff] }
 0x1c4   :  { %5307 = vmatprep.subr.bf16.mxu0 %v11807_v55  ;;  %5389 = vmatprep.subr.bf16.mxu1 %v11809_v59  ;;  %v11950_v55 = vcombine.low %v394_v38, %v406_v39  ;;  %v454_v59 = vld [vmem:[#allocation2 + $0x8d0] sm:$0xff]  ;;  %v11976_v0 = vcombine.low %v419_v52, %v431_v54  ;;  %v563_v46 = vld [vmem:[#allocation2 + $0xc38] sm:$0xff] }
 0x1c5   :  { %v11999_v1 = vcombine.high %v442_v58, %v454_v59 }
 0x1c7   :  { %5308 = vmatpush1.bf16.msra.mxu0 %v11806_v61  ;;  %5390 = vmatpush1.bf16.msra.mxu1 %v11808_v62  ;;  %v11977_v61 = vcombine.high %v419_v52, %v431_v54  ;;  %v455_v62 = vld [vmem:[#allocation2 + $0x8d8] sm:$0xff]  ;;  %v586_v52 = vld [vmem:[#allocation2 + $0xcf0] sm:$0xff] }
 0x1c8   :  { %5309 = vmatprep.subr.bf16.mxu0 %v11831_v63  ;;  %5391 = vmatprep.subr.bf16.mxu1 %v11833_v3  ;;  %v11974_v63 = vcombine.low %v418_v50, %v430_v51  ;;  %v478_v3 = vld [vmem:[#allocation2 + $0x990] sm:$0xff]  ;;  %v12000_v8 = vcombine.low %v443_v60, %v455_v62  ;;  %v587_v54 = vld [vmem:[#allocation2 + $0xcf8] sm:$0xff] }
 0x1c9   :  { %v12023_v9 = vcombine.high %v466_v2, %v478_v3 }
 0x1cb   :  { %5310 = vmatpush1.bf16.msra.mxu0 %v11830_v5  ;;  %5392 = vmatpush1.bf16.msra.mxu1 %v11832_v6  ;;  %v12001_v5 = vcombine.high %v443_v60, %v455_v62  ;;  %v479_v6 = vld [vmem:[#allocation2 + $0x998] sm:$0xff]  ;;  %v610_v60 = vld [vmem:[#allocation2 + $0xdb0] sm:$0xff] }
 0x1cc   :  { %5311 = vmatprep.subr.bf16.mxu0 %v11855_v7  ;;  %5393 = vmatprep.subr.bf16.mxu1 %v11857_v11  ;;  %v11998_v7 = vcombine.low %v442_v58, %v454_v59  ;;  %v502_v11 = vld [vmem:[#allocation2 + $0xa50] sm:$0xff]  ;;  %v12024_v17 = vcombine.low %v467_v4, %v479_v6  ;;  %v611_v62 = vld [vmem:[#allocation2 + $0xdb8] sm:$0xff] }
 0x1cd   :  { %v12047_v18 = vcombine.high %v490_v10, %v502_v11 }
 0x1cf   :  { %5312 = vmatpush1.bf16.msra.mxu0 %v11854_v13  ;;  %5394 = vmatpush1.bf16.msra.mxu1 %v11856_v14  ;;  %v12025_v13 = vcombine.high %v467_v4, %v479_v6  ;;  %v503_v14 = vld [vmem:[#allocation2 + $0xa58] sm:$0xff]  ;;  %v634_v4 = vld [vmem:[#allocation2 + $0xe70] sm:$0xff] }
 0x1d0   :  { %5313 = vmatprep.subr.bf16.mxu0 %v11879_v15  ;;  %5395 = vmatprep.subr.bf16.mxu1 %v11881_v21  ;;  %v12022_v15 = vcombine.low %v466_v2, %v478_v3  ;;  %v526_v21 = vld [vmem:[#allocation2 + $0xb10] sm:$0xff]  ;;  %v12048_v43 = vcombine.low %v491_v12, %v503_v14  ;;  %v635_v6 = vld [vmem:[#allocation2 + $0xe78] sm:$0xff] }
 0x1d1   :  { %v12071_v26 = vcombine.high %v514_v19, %v526_v21 }
 0x1d3   :  { %5314 = vmatpush1.bf16.msra.mxu0 %v11878_v23  ;;  %5396 = vmatpush1.bf16.msra.mxu1 %v11880_v24  ;;  %v12049_v23 = vcombine.high %v491_v12, %v503_v14  ;;  %v527_v24 = vld [vmem:[#allocation2 + $0xb18] sm:$0xff]  ;;  %v658_v12 = vld [vmem:[#allocation2 + $0xf30] sm:$0xff] }
 0x1d4   :  { %5315 = vmatprep.subr.bf16.mxu0 %v11903_v25  ;;  %5397 = vmatprep.subr.bf16.mxu1 %v11905_v29  ;;  %v12046_v25 = vcombine.low %v490_v10, %v502_v11  ;;  %v550_v29 = vld [vmem:[#allocation2 + $0xbd0] sm:$0xff]  ;;  %v12072_v38 = vcombine.low %v515_v22, %v527_v24  ;;  %v659_v14 = vld [vmem:[#allocation2 + $0xf38] sm:$0xff] }
 0x1d5   :  { %v12095_v39 = vcombine.high %v538_v28, %v550_v29 }
 0x1d7   :  { %5316 = vmatpush1.bf16.msra.mxu0 %v11902_v33  ;;  %5398 = vmatpush1.bf16.msra.mxu1 %v11904_v34  ;;  %v12073_v33 = vcombine.high %v515_v22, %v527_v24  ;;  %v551_v34 = vld [vmem:[#allocation2 + $0xbd8] sm:$0xff]  ;;  %v694_v24 = vld [vmem:[#allocation2 + $0x1050] sm:$0xff] }
 0x1d8   :  { %5317 = vmatprep.subr.bf16.mxu0 %v11927_v37  ;;  %5399 = vmatprep.subr.bf16.mxu1 %v11929_v45  ;;  %v12070_v37 = vcombine.low %v514_v19, %v526_v21  ;;  %v574_v45 = vld [vmem:[#allocation2 + $0xc90] sm:$0xff]  ;;  %v12096_v50 = vcombine.low %v539_v32, %v551_v34 }
 0x1d9   :  { %v12119_v51 = vcombine.high %v562_v41, %v574_v45 }
 0x1db   :  { %5318 = vmatpush1.bf16.msra.mxu0 %v11926_v47  ;;  %5400 = vmatpush1.bf16.msra.mxu1 %v11928_v48  ;;  %v12097_v47 = vcombine.high %v539_v32, %v551_v34  ;;  %v575_v48 = vld [vmem:[#allocation2 + $0xc98] sm:$0xff]  ;;  %v718_v34 = vld [vmem:[#allocation2 + $0x1110] sm:$0xff] }
 0x1dc   :  { %5319 = vmatprep.subr.bf16.mxu0 %v11951_v49  ;;  %5401 = vmatprep.subr.bf16.mxu1 %v11953_v53  ;;  %v12094_v49 = vcombine.low %v538_v28, %v550_v29  ;;  %v598_v53 = vld [vmem:[#allocation2 + $0xd50] sm:$0xff]  ;;  %v12120_v58 = vcombine.low %v563_v46, %v575_v48 }
 0x1dd   :  { %v12143_v59 = vcombine.high %v586_v52, %v598_v53 }
 0x1df   :  { %5320 = vmatpush1.bf16.msra.mxu0 %v11950_v55  ;;  %5402 = vmatpush1.bf16.msra.mxu1 %v11952_v56  ;;  %v12121_v55 = vcombine.high %v563_v46, %v575_v48  ;;  %v599_v56 = vld [vmem:[#allocation2 + $0xd58] sm:$0xff]  ;;  %v730_v48 = vld [vmem:[#allocation2 + $0x1170] sm:$0xff] }
 0x1e0   :  { %5321 = vmatprep.subr.bf16.mxu0 %v11975_v57  ;;  %5403 = vmatprep.subr.bf16.mxu1 %v11977_v61  ;;  %v12118_v57 = vcombine.low %v562_v41, %v574_v45  ;;  %v622_v61 = vld [vmem:[#allocation2 + $0xe10] sm:$0xff]  ;;  %v12144_v2 = vcombine.low %v587_v54, %v599_v56 }
 0x1e1   :  { %v12167_v3 = vcombine.high %v610_v60, %v622_v61 }
 0x1e3   :  { %5322 = vmatpush1.bf16.msra.mxu0 %v11974_v63  ;;  %5404 = vmatpush1.bf16.msra.mxu1 %v11976_v0  ;;  %v12145_v63 = vcombine.high %v587_v54, %v599_v56  ;;  %v623_v0 = vld [vmem:[#allocation2 + $0xe18] sm:$0xff] }
 0x1e4   :  { %5323 = vmatprep.subr.bf16.mxu0 %v11999_v1  ;;  %5405 = vmatprep.subr.bf16.mxu1 %v12001_v5  ;;  %v12142_v1 = vcombine.low %v586_v52, %v598_v53  ;;  %v646_v5 = vld [vmem:[#allocation2 + $0xed0] sm:$0xff]  ;;  %v12168_v10 = vcombine.low %v611_v62, %v623_v0  ;;  %v731_v52 = vld [vmem:[#allocation2 + $0x1178] sm:$0xff] }
 0x1e5   :  { %v12191_v11 = vcombine.high %v634_v4, %v646_v5  ;;  %v743_v53 = vld [vmem:[#allocation2 + $0x11d8] sm:$0xff] }
 0x1e7   :  { %5324 = vmatpush1.bf16.msra.mxu0 %v11998_v7  ;;  %5406 = vmatpush1.bf16.msra.mxu1 %v12000_v8  ;;  %v12169_v7 = vcombine.high %v611_v62, %v623_v0  ;;  %v647_v8 = vld [vmem:[#allocation2 + $0xed8] sm:$0xff]  ;;  %v12289_v62 = vcombine.high %v731_v52, %v743_v53  ;;  %v766_v0 = vld [vmem:[#allocation2 + $0x1290] sm:$0xff] }
 0x1e8   :  { %5325 = vmatprep.subr.bf16.mxu0 %v12023_v9  ;;  %5407 = vmatprep.subr.bf16.mxu1 %v12025_v13  ;;  %v12166_v9 = vcombine.low %v610_v60, %v622_v61  ;;  %v670_v13 = vld [vmem:[#allocation2 + $0xf90] sm:$0xff]  ;;  %v12192_v19 = vcombine.low %v635_v6, %v647_v8 }
 0x1e9   :  { %v12215_v21 = vcombine.high %v658_v12, %v670_v13 }
 0x1eb   :  { %5326 = vmatpush1.bf16.msra.mxu0 %v12022_v15  ;;  %5408 = vmatpush1.bf16.msra.mxu1 %v12024_v17  ;;  %v12193_v15 = vcombine.high %v635_v6, %v647_v8  ;;  %v671_v17 = vld [vmem:[#allocation2 + $0xf98] sm:$0xff]  ;;  %v790_v8 = vld [vmem:[#allocation2 + $0x1350] sm:$0xff] }
 0x1ec   :  { %5327 = vmatprep.subr.bf16.mxu0 %v12047_v18  ;;  %5409 = vmatprep.subr.bf16.mxu1 %v12049_v23  ;;  %v12190_v18 = vcombine.low %v634_v4, %v646_v5  ;;  %v12217_v22 = vcombine.high %v659_v14, %v671_v17  ;;  %v682_v23 = vld [vmem:[#allocation2 + $0xff0] sm:$0xff]  ;;  %v12216_v28 = vcombine.low %v659_v14, %v671_v17 }
 0x1ed   :  { %v12239_v29 = vcombine.high %v682_v23, %v694_v24  ;;  %v12288_v4 = vcombine.low %v731_v52, %v743_v53 }
 0x1ef   :  { %5328 = vmatpush1.bf16.msra.mxu0 %v12046_v25  ;;  %5410 = vmatpush1.bf16.msra.mxu1 %v12048_v43  ;;  %v683_v25 = vld [vmem:[#allocation2 + $0xff8] sm:$0xff] }
 0x1f0   :  { %5329 = vmatprep.subr.bf16.mxu0 %v12071_v26  ;;  %5411 = vmatprep.subr.bf16.mxu1 %v12073_v33  ;;  %v695_v43 = vld [vmem:[#allocation2 + $0x1058] sm:$0xff]  ;;  %v12214_v26 = vcombine.low %v658_v12, %v670_v13  ;;  %v706_v33 = vld [vmem:[#allocation2 + $0x10b0] sm:$0xff] }
 0x1f1   :  { %v12241_v32 = vcombine.high %v683_v25, %v695_v43  ;;  %v12240_v41 = vcombine.low %v683_v25, %v695_v43  ;;  %v12263_v45 = vcombine.high %v706_v33, %v718_v34  ;;  %v12262_v56 = vcombine.low %v706_v33, %v718_v34  ;;  %v815_v25 = vld [vmem:[#allocation2 + $0x1418] sm:$0xff] }
 0x1f3   :  { %5330 = vmatpush1.bf16.msra.mxu0 %v12070_v37  ;;  %5412 = vmatpush1.bf16.msra.mxu1 %v12072_v38  ;;  %v707_v37 = vld [vmem:[#allocation2 + $0x10b8] sm:$0xff] }
 0x1f4   :  { %5331 = vmatprep.subr.bf16.mxu0 %v12095_v39  ;;  %5413 = vmatprep.subr.bf16.mxu1 %v12097_v47  ;;  %v719_v38 = vld [vmem:[#allocation2 + $0x1118] sm:$0xff]  ;;  %v12238_v39 = vcombine.low %v682_v23, %v694_v24 }
 0x1f5   :  { %v12265_v47 = vcombine.high %v707_v37, %v719_v38  ;;  %v803_v24 = vld [vmem:[#allocation2 + $0x13b8] sm:$0xff] }
 0x1f7   :  { %5332 = vmatpush1.bf16.msra.mxu0 %v12094_v49  ;;  %5414 = vmatpush1.bf16.msra.mxu1 %v12096_v50  ;;  %v742_v49 = vld [vmem:[#allocation2 + $0x11d0] sm:$0xff] }
 0x1f8   :  { %5342 = vmatprep.subr.bf16.mxu0 %v12119_v51  ;;  %5424 = vmatprep.subr.bf16.mxu1 %v12121_v55  ;;  %v12287_v60 = vcombine.high %v730_v48, %v742_v49 }
 0x1fa   :  { %5334 = vmatmul.mubr.bf16.vlgmr.msra.gmra.mrb[12].mxu0 %v14860_v40  ;;  %5416 = vmatmul.mubr.bf16.vlgmr.msra.gmra.mrb[12].mxu1 %v14860_v40 }
 0x1fb   :  { %5343 = vmatpush1.bf16.msra.mxu0 %v12118_v57  ;;  %5425 = vmatpush1.bf16.msra.mxu1 %v12120_v58 }
 0x1fc   :  { %5344 = vmatprep.subr.bf16.mxu0 %v12143_v59  ;;  %5426 = vmatprep.subr.bf16.mxu1 %v12145_v63  ;;  %v12264_v59 = vcombine.low %v707_v37, %v719_v38  ;;  %v754_v63 = vld [vmem:[#allocation2 + $0x1230] sm:$0xff] }
 0x1fd   :  { %5374 = vmatprep.mubr.bf16.mxu0 %v14865_v42  ;;  %5456 = vmatprep.mubr.bf16.mxu1 %v14865_v42  ;;  %v12311_v5 = vcombine.high %v754_v63, %v766_v0 }
 0x1ff   :  { %5345 = vmatpush1.bf16.msra.mxu0 %v12142_v1  ;;  %5427 = vmatpush1.bf16.msra.mxu1 %v12144_v2  ;;  %v755_v1 = vld [vmem:[#allocation2 + $0x1238] sm:$0xff] }
 0x200   :  { %5346 = vmatprep.subr.bf16.mxu0 %v12167_v3  ;;  %5428 = vmatprep.subr.bf16.mxu1 %v12169_v7  ;;  %v767_v2 = vld [vmem:[#allocation2 + $0x1298] sm:$0xff]  ;;  %v12286_v3 = vcombine.low %v730_v48, %v742_v49  ;;  %v778_v7 = vld [vmem:[#allocation2 + $0x12f0] sm:$0xff] }
 0x201   :  { %v12313_v6 = vcombine.high %v755_v1, %v767_v2  ;;  %v12312_v13 = vcombine.low %v755_v1, %v767_v2  ;;  %v12335_v14 = vcombine.high %v778_v7, %v790_v8  ;;  %v827_v49 = vld [vmem:[#allocation2 + $0x1478] sm:$0xff] }
 0x203   :  { %5347 = vmatpush1.bf16.msra.mxu0 %v12166_v9  ;;  %5429 = vmatpush1.bf16.msra.mxu1 %v12168_v10  ;;  %v779_v9 = vld [vmem:[#allocation2 + $0x12f8] sm:$0xff] }
 0x204   :  { %5348 = vmatprep.subr.bf16.mxu0 %v12191_v11  ;;  %5430 = vmatprep.subr.bf16.mxu1 %v12193_v15  ;;  %v791_v10 = vld [vmem:[#allocation2 + $0x1358] sm:$0xff]  ;;  %v12310_v11 = vcombine.low %v754_v63, %v766_v0 }
 0x205   :  { %v12336_v34 = vcombine.low %v779_v9, %v791_v10  ;;  %v851_v63 = vld [vmem:[#allocation2 + $0x1538] sm:$0xff] }
 0x206   :  { %v863_v0 = vld [vmem:[#allocation2 + $0x1598] sm:$0xff] }
 0x207   :  { %5349 = vmatpush1.bf16.msra.mxu0 %v12190_v18  ;;  %5431 = vmatpush1.bf16.msra.mxu1 %v12192_v19  ;;  %v12337_v18 = vcombine.high %v779_v9, %v791_v10  ;;  %v802_v19 = vld [vmem:[#allocation2 + $0x13b0] sm:$0xff] }
 0x208   :  { %5350 = vmatprep.subr.bf16.mxu0 %v12215_v21  ;;  %5432 = vmatprep.subr.bf16.mxu1 %v12217_v22  ;;  %v814_v21 = vld [vmem:[#allocation2 + $0x1410] sm:$0xff] }
 0x209   :  { %v12359_v37 = vcombine.high %v802_v19, %v814_v21  ;;  %v12358_v53 = vcombine.low %v802_v19, %v814_v21  ;;  %v886_v9 = vld [vmem:[#allocation2 + $0x1650] sm:$0xff] }
 0x20a   :  { %v898_v19 = vld [vmem:[#allocation2 + $0x16b0] sm:$0xff] }
 0x20b   :  { %5351 = vmatpush1.bf16.msra.mxu0 %v12214_v26  ;;  %5433 = vmatpush1.bf16.msra.mxu1 %v12216_v28  ;;  %v910_v21 = vld [vmem:[#allocation2 + $0x1710] sm:$0xff] }
 0x20c   :  { %5352 = vmatprep.subr.bf16.mxu0 %v12239_v29  ;;  %5434 = vmatprep.subr.bf16.mxu1 %v12241_v32  ;;  %v12334_v29 = vcombine.low %v778_v7, %v790_v8  ;;  %v12409_v7 = vcombine.high %v851_v63, %v863_v0  ;;  %v874_v8 = vld [vmem:[#allocation2 + $0x15f0] sm:$0xff] }
 0x20d   :  { %v5048_v46 = vpop.f32.mrb[4].mxu0  ;;  %v5130_v50 = vpop.f32.mrb[4].mxu1 }
 0x20e   :  { %14566 = vtanh.f32 %v5048_v46  ;;  %v5050_v51 = vpop.f32.mrb[5].mxu0  ;;  %v5132_v54 = vpop.f32.mrb[5].mxu1  ;;  %v838_v46 = vld [vmem:[#allocation2 + $0x14d0] sm:$0xff] }
 0x20f   :  { %14568 = vtanh.f32 %v5130_v50  ;;  %v5052_v55 = vpop.f32.mrb[6].mxu0  ;;  %5353 = vmatpush1.bf16.msra.mxu0 %v12238_v39  ;;  %v5134_v57 = vpop.f32.mrb[6].mxu1  ;;  %5435 = vmatpush1.bf16.msra.mxu1 %v12240_v41  ;;  %v12361_v41 = vcombine.high %v803_v24, %v815_v25  ;;  %v839_v50 = vld [vmem:[#allocation2 + $0x14d8] sm:$0xff] }
 0x210   :  { %14570 = vtanh.f32 %v5050_v51  ;;  %v5053_v58 = vpop.f32.mrb[7].mxu0  ;;  %5354 = vmatprep.subr.bf16.mxu0 %v12263_v45  ;;  %v5135_v61 = vpop.f32.mrb[7].mxu1  ;;  %5436 = vmatprep.subr.bf16.mxu1 %v12265_v47  ;;  %v826_v45 = vld [vmem:[#allocation2 + $0x1470] sm:$0xff] }
 0x211   :  { %14572 = vtanh.f32 %v5132_v54  ;;  %v12383_v57 = vcombine.high %v826_v45, %v838_v46  ;;  %v862_v61 = vld [vmem:[#allocation2 + $0x1590] sm:$0xff]  ;;  %v12382_v2 = vcombine.low %v826_v45, %v838_v46  ;;  %v192_v45 = vld [vmem:[#allocation2 + $0xa0] sm:$0xff]  ;;  %v181_v46 = vld [vmem:[#allocation2 + $0x48] sm:$0xff] }
 0x213   :  { %5355 = vmatpush1.bf16.msra.mxu0 %v12262_v56  ;;  %5437 = vmatpush1.bf16.msra.mxu1 %v12264_v59  ;;  %v12360_v56 = vcombine.low %v803_v24, %v815_v25  ;;  %v12385_v59 = vcombine.high %v827_v49, %v839_v50  ;;  %v12430_v24 = vcombine.low %v874_v8, %v886_v9 }
 0x214   :  { %5356 = vmatprep.subr.bf16.mxu0 %v12287_v60  ;;  %5438 = vmatprep.subr.bf16.mxu1 %v12289_v62  ;;  %v850_v60 = vld [vmem:[#allocation2 + $0x1530] sm:$0xff] }
 0x217   :  { %5357 = vmatpush1.bf16.msra.mxu0 %v12286_v3  ;;  %5439 = vmatpush1.bf16.msra.mxu1 %v12288_v4  ;;  %v12384_v4 = vcombine.low %v827_v49, %v839_v50 }
 0x218   :  { %v14567_v12 = vpop.eup %14566  ;;  %5358 = vmatprep.subr.bf16.mxu0 %v12311_v5  ;;  %5440 = vmatprep.subr.bf16.mxu1 %v12313_v6  ;;  %v12407_v5 = vcombine.high %v850_v60, %v862_v61 }
 0x219   :  { %v14569_v15 = vpop.eup %14568  ;;  %v5821_v17 = vmul.f32 127.5, %v14567_v12  ;;  %v887_v12 = vld [vmem:[#allocation2 + $0x1658] sm:$0xff] }
 0x21a   :  { %v14571_v22 = vpop.eup %14570  ;;  %v5823_v23 = vmul.f32 127.5, %v14569_v15  ;;  %v12408_v15 = vcombine.low %v851_v63, %v863_v0  ;;  %v228_v0 = vld [vmem:[#allocation2 + $0x1c0] sm:$0xff] }
 0x21b   :  { %v14573_v43 = vpop.eup %14572  ;;  %v5845_v26 = vadd.f32 128.0, %v5821_v17  ;;  %v5822_v28 = vmul.f32 127.5, %v14571_v22  ;;  %5359 = vmatpush1.bf16.msra.mxu0 %v12310_v11  ;;  %5441 = vmatpush1.bf16.msra.mxu1 %v12312_v13  ;;  %v875_v11 = vld [vmem:[#allocation2 + $0x15f8] sm:$0xff]  ;;  %v12406_v13 = vcombine.low %v850_v60, %v862_v61  ;;  %v12431_v17 = vcombine.high %v874_v8, %v886_v9  ;;  %v252_v8 = vld [vmem:[#allocation2 + $0x280] sm:$0xff] }
 0x21c   :  { %v5847_v32 = vadd.f32 128.0, %v5823_v23  ;;  %v5824_v33 = vmul.f32 127.5, %v14573_v43  ;;  %5360 = vmatprep.subr.bf16.mxu0 %v12335_v14  ;;  %5442 = vmatprep.subr.bf16.mxu1 %v12337_v18  ;;  %v12433_v18 = vcombine.high %v875_v11, %v887_v12  ;;  %v899_v22 = vld [vmem:[#allocation2 + $0x16b8] sm:$0xff]  ;;  %v12432_v25 = vcombine.low %v875_v11, %v887_v12  ;;  %v264_v9 = vld [vmem:[#allocation2 + $0x2e0] sm:$0xff]  ;;  %v265_v11 = vld [vmem:[#allocation2 + $0x2e8] sm:$0xff] }
 0x21d   :  { %v5869_v38 = vmax.f32 %v5845_v26, 0.0  ;;  %v5846_v39 = vadd.f32 128.0, %v5822_v28  ;;  %v911_v23 = vld [vmem:[#allocation2 + $0x1718] sm:$0xff]  ;;  %v12455_v43 = vcombine.high %v898_v19, %v910_v21  ;;  %v922_v28 = vld [vmem:[#allocation2 + $0x1770] sm:$0xff] }
 0x21e   :  { %v5871_v47 = vmax.f32 %v5847_v32, 0.0  ;;  %v5848_v48 = vadd.f32 128.0, %v5824_v33  ;;  %v12457_v26 = vcombine.high %v899_v22, %v911_v23  ;;  %v923_v32 = vld [vmem:[#allocation2 + $0x1778] sm:$0xff] }
 0x21f   :  { %v14922_v51 = vmin.f32 %v5869_v38, 255.0  ;;  %v5870_v52 = vmax.f32 %v5846_v39, 0.0  ;;  %5361 = vmatpush1.bf16.msra.mxu0 %v12334_v29  ;;  %5443 = vmatpush1.bf16.msra.mxu1 %v12336_v34  ;;  %v934_v29 = vld [vmem:[#allocation2 + $0x17d0] sm:$0xff]  ;;  %v935_v33 = vld [vmem:[#allocation2 + $0x17d8] sm:$0xff]  ;;  %v12454_v34 = vcombine.low %v898_v19, %v910_v21  ;;  %v277_v19 = vld [vmem:[#allocation2 + $0x348] sm:$0xff] }
 0x220   :  { %v14924_v54 = vmin.f32 %v5871_v47, 255.0  ;;  %v5872_v55 = vmax.f32 %v5848_v48, 0.0  ;;  %5362 = vmatprep.subr.bf16.mxu0 %v12359_v37  ;;  %5444 = vmatprep.subr.bf16.mxu1 %v12361_v41  ;;  %v12456_v37 = vcombine.low %v899_v22, %v911_v23  ;;  %v12479_v38 = vcombine.high %v922_v28, %v934_v29  ;;  %v180_v41 = vld [vmem:[#allocation2 + $0x40] sm:$0xff]  ;;  %v193_v47 = vld [vmem:[#allocation2 + $0xa8] sm:$0xff] }
 0x221   :  { %v14926_v58 = vmin.f32 %v5870_v52, 255.0  ;;  %v12481_v39 = vcombine.high %v923_v32, %v935_v33  ;;  %v12478_v48 = vcombine.low %v922_v28, %v934_v29  ;;  %v12480_v49 = vcombine.low %v923_v32, %v935_v33  ;;  %v289_v21 = vld [vmem:[#allocation2 + $0x3a8] sm:$0xff] }
 0x222   :  { %v14928_v62 = vmin.f32 %v5872_v55, 255.0  ;;  %v11739_v50 = vcombine.high %v180_v41, %v192_v45  ;;  %v11741_v52 = vcombine.high %v181_v46, %v193_v47  ;;  %v216_v55 = vld [vmem:[#allocation2 + $0x160] sm:$0xff]  ;;  %v11740_v60 = vcombine.low %v181_v46, %v193_v47  ;;  %v301_v28 = vld [vmem:[#allocation2 + $0x408] sm:$0xff] }
 0x223   :  { %v5954_v1 = vcombine.low %v14922_v51, %v14926_v58  ;;  %5363 = vmatpush1.bf16.msra.mxu0 %v12358_v53  ;;  %5445 = vmatpush1.bf16.msra.mxu1 %v12360_v56  ;;  %v204_v53 = vld [vmem:[#allocation2 + $0x100] sm:$0xff]  ;;  %v205_v56 = vld [vmem:[#allocation2 + $0x108] sm:$0xff]  ;;  %v11810_v22 = vcombine.low %v252_v8, %v264_v9  ;;  %v11836_v33 = vcombine.low %v277_v19, %v289_v21 }
 0x224   :  { %v5955_v3 = vcombine.low %v14924_v54, %v14928_v62  ;;  %5364 = vmatprep.subr.bf16.mxu0 %v12383_v57  ;;  %5446 = vmatprep.subr.bf16.mxu1 %v12385_v59  ;;  %v217_v57 = vld [vmem:[#allocation2 + $0x168] sm:$0xff]  ;;  %v11738_v59 = vcombine.low %v180_v41, %v192_v45  ;;  %v11763_v61 = vcombine.high %v204_v53, %v216_v55 }
 0x225   :  { %v5962_v6 = vrot.slane %v5954_v1, %v14901_v36  ;;  %v11765_v63 = vcombine.high %v205_v56, %v217_v57  ;;  %v240_v1 = vld [vmem:[#allocation2 + $0x220] sm:$0xff]  ;;  %v313_v29 = vld [vmem:[#allocation2 + $0x468] sm:$0xff] }
 0x226   :  { %v5969_v10 = vrot.slane %v5955_v3, %v14901_v36  ;;  %v241_v3 = vld [vmem:[#allocation2 + $0x228] sm:$0xff]  ;;  %v11786_v12 = vcombine.low %v228_v0, %v240_v1  ;;  %v11860_v47 = vcombine.low %v301_v28, %v313_v29 }
 0x227   :  { %5365 = vmatpush1.bf16.msra.mxu0 %v12382_v2  ;;  %5447 = vmatpush1.bf16.msra.mxu1 %v12384_v4  ;;  %v229_v2 = vld [vmem:[#allocation2 + $0x1c8] sm:$0xff]  ;;  %v11762_v4 = vcombine.low %v204_v53, %v216_v55 }
 0x228   :  { %v5970_v14 = vcombine.low %v5962_v6, %v5969_v10  ;;  %5366 = vmatprep.subr.bf16.mxu0 %v12407_v5  ;;  %5448 = vmatprep.subr.bf16.mxu1 %v12409_v7  ;;  %v11764_v5 = vcombine.low %v205_v56, %v217_v57  ;;  %v11787_v6 = vcombine.high %v228_v0, %v240_v1  ;;  %v253_v10 = vld [vmem:[#allocation2 + $0x288] sm:$0xff] }
 0x229   :  { %v11789_v7 = vcombine.high %v229_v2, %v241_v3  ;;  %v11812_v23 = vcombine.low %v253_v10, %v265_v11  ;;  %v325_v41 = vld [vmem:[#allocation2 + $0x4c8] sm:$0xff] }
 0x22a   :  { %6046 = vst [vmem:[%s15086_s4 + $0x8] sm:$0xff] %v5970_v14  ;;  %v11811_v14 = vcombine.high %v252_v8, %v264_v9  ;;  %v337_v45 = vld [vmem:[#allocation2 + $0x528] sm:$0xff] }
 0x22b   :  { %5367 = vmatpush1.bf16.msra.mxu0 %v12406_v13  ;;  %5449 = vmatpush1.bf16.msra.mxu1 %v12408_v15  ;;  %v11788_v13 = vcombine.low %v229_v2, %v241_v3  ;;  %v11813_v15 = vcombine.high %v253_v10, %v265_v11  ;;  %v349_v53 = vld [vmem:[#allocation2 + $0x588] sm:$0xff]  ;;  %v11884_v57 = vcombine.low %v325_v41, %v337_v45 }
 0x22c   :  { %5368 = vmatprep.subr.bf16.mxu0 %v12431_v17  ;;  %5450 = vmatprep.subr.bf16.mxu1 %v12433_v18  ;;  %v276_v17 = vld [vmem:[#allocation2 + $0x340] sm:$0xff]  ;;  %v361_v55 = vld [vmem:[#allocation2 + $0x5e8] sm:$0xff] }
 0x22d   :  { %v288_v18 = vld [vmem:[#allocation2 + $0x3a0] sm:$0xff]  ;;  %v373_v0 = vld [vmem:[#allocation2 + $0x648] sm:$0xff]  ;;  %v11908_v3 = vcombine.low %v349_v53, %v361_v55 }
 0x22e   :  { %v11834_v32 = vcombine.low %v276_v17, %v288_v18  ;;  %v385_v1 = vld [vmem:[#allocation2 + $0x6a8] sm:$0xff] }
 0x22f   :  { %5369 = vmatpush1.bf16.msra.mxu0 %v12430_v24  ;;  %5451 = vmatpush1.bf16.msra.mxu1 %v12432_v25  ;;  %v11835_v24 = vcombine.high %v276_v17, %v288_v18  ;;  %v11837_v25 = vcombine.high %v277_v19, %v289_v21  ;;  %v397_v8 = vld [vmem:[#allocation2 + $0x708] sm:$0xff]  ;;  %v11932_v11 = vcombine.low %v373_v0, %v385_v1 }
 0x230   :  { %5370 = vmatprep.subr.bf16.mxu0 %v12455_v43  ;;  %5452 = vmatprep.subr.bf16.mxu1 %v12457_v26  ;;  %v300_v43 = vld [vmem:[#allocation2 + $0x400] sm:$0xff]  ;;  %v409_v9 = vld [vmem:[#allocation2 + $0x768] sm:$0xff] }
 0x231   :  { %v312_v26 = vld [vmem:[#allocation2 + $0x460] sm:$0xff]  ;;  %v421_v17 = vld [vmem:[#allocation2 + $0x7c8] sm:$0xff]  ;;  %v11956_v21 = vcombine.low %v397_v8, %v409_v9 }
 0x232   :  { %v11858_v46 = vcombine.low %v300_v43, %v312_v26  ;;  %v433_v18 = vld [vmem:[#allocation2 + $0x828] sm:$0xff] }
 0x233   :  { %5371 = vmatpush1.bf16.msra.mxu0 %v12454_v34  ;;  %5453 = vmatpush1.bf16.msra.mxu1 %v12456_v37  ;;  %v11859_v34 = vcombine.high %v300_v43, %v312_v26  ;;  %v11861_v37 = vcombine.high %v301_v28, %v313_v29  ;;  %v445_v43 = vld [vmem:[#allocation2 + $0x888] sm:$0xff]  ;;  %v11980_v29 = vcombine.low %v421_v17, %v433_v18 }
 0x234   :  { %5372 = vmatprep.subr.bf16.mxu0 %v12479_v38  ;;  %5454 = vmatprep.subr.bf16.mxu1 %v12481_v39  ;;  %v324_v38 = vld [vmem:[#allocation2 + $0x4c0] sm:$0xff]  ;;  %v457_v26 = vld [vmem:[#allocation2 + $0x8e8] sm:$0xff] }
 0x235   :  { %v336_v39 = vld [vmem:[#allocation2 + $0x520] sm:$0xff] }
 0x236   :  { %v11882_v56 = vcombine.low %v324_v38, %v336_v39 }
 0x237   :  { %5373 = vmatpush1.bf16.msra.mxu0 %v12478_v48  ;;  %5455 = vmatpush1.bf16.msra.mxu1 %v12480_v49  ;;  %v11883_v48 = vcombine.high %v324_v38, %v336_v39  ;;  %v11885_v49 = vcombine.high %v325_v41, %v337_v45  ;;  %v469_v38 = vld [vmem:[#allocation2 + $0x948] sm:$0xff]  ;;  %v12004_v45 = vcombine.low %v445_v43, %v457_v26 }
 0x238   :  { %5465 = vmatprep.subr.bf16.mxu0 %v11739_v50  ;;  %5547 = vmatprep.subr.bf16.mxu1 %v11741_v52  ;;  %v348_v50 = vld [vmem:[#allocation2 + $0x580] sm:$0xff]  ;;  %v481_v39 = vld [vmem:[#allocation2 + $0x9a8] sm:$0xff] }
 0x239   :  { %v360_v52 = vld [vmem:[#allocation2 + $0x5e0] sm:$0xff] }
 0x23a   :  { %5375 = vmatmul.mubr.bf16.vlgmr.msra.gmra.mrb[12].mxu0 %v14874_v16  ;;  %5457 = vmatmul.mubr.bf16.vlgmr.msra.gmra.mrb[12].mxu1 %v14874_v16  ;;  %v11906_v2 = vcombine.low %v348_v50, %v360_v52 }
 0x23b   :  { %5466 = vmatpush1.bf16.msra.mxu0 %v11738_v59  ;;  %5548 = vmatpush1.bf16.msra.mxu1 %v11740_v60  ;;  %v11907_v59 = vcombine.high %v348_v50, %v360_v52  ;;  %v11909_v60 = vcombine.high %v349_v53, %v361_v55  ;;  %v493_v50 = vld [vmem:[#allocation2 + $0xa08] sm:$0xff]  ;;  %v12028_v55 = vcombine.low %v469_v38, %v481_v39 }
 0x23c   :  { %5467 = vmatprep.subr.bf16.mxu0 %v11763_v61  ;;  %5549 = vmatprep.subr.bf16.mxu1 %v11765_v63  ;;  %v372_v61 = vld [vmem:[#allocation2 + $0x640] sm:$0xff]  ;;  %v505_v52 = vld [vmem:[#allocation2 + $0xa68] sm:$0xff] }
 0x23d   :  { %5497 = vmatprep.mubr.bf16.mxu0 %v14799_v31  ;;  %5579 = vmatprep.mubr.bf16.mxu1 %v14799_v31  ;;  %v384_v63 = vld [vmem:[#allocation2 + $0x6a0] sm:$0xff] }
 0x23e   :  { %v11930_v10 = vcombine.low %v372_v61, %v384_v63 }
 0x23f   :  { %5468 = vmatpush1.bf16.msra.mxu0 %v11762_v4  ;;  %5550 = vmatpush1.bf16.msra.mxu1 %v11764_v5  ;;  %v11931_v4 = vcombine.high %v372_v61, %v384_v63  ;;  %v11933_v5 = vcombine.high %v373_v0, %v385_v1  ;;  %v517_v61 = vld [vmem:[#allocation2 + $0xac8] sm:$0xff]  ;;  %v12052_v1 = vcombine.low %v493_v50, %v505_v52 }
 0x240   :  { %5469 = vmatprep.subr.bf16.mxu0 %v11787_v6  ;;  %5551 = vmatprep.subr.bf16.mxu1 %v11789_v7  ;;  %v396_v6 = vld [vmem:[#allocation2 + $0x700] sm:$0xff]  ;;  %v529_v63 = vld [vmem:[#allocation2 + $0xb28] sm:$0xff] }
 0x241   :  { %v408_v7 = vld [vmem:[#allocation2 + $0x760] sm:$0xff] }
 0x242   :  { %v11954_v19 = vcombine.low %v396_v6, %v408_v7 }
 0x243   :  { %5470 = vmatpush1.bf16.msra.mxu0 %v11786_v12  ;;  %5552 = vmatpush1.bf16.msra.mxu1 %v11788_v13  ;;  %v11955_v12 = vcombine.high %v396_v6, %v408_v7  ;;  %v11957_v13 = vcombine.high %v397_v8, %v409_v9  ;;  %v541_v6 = vld [vmem:[#allocation2 + $0xb88] sm:$0xff]  ;;  %v12076_v9 = vcombine.low %v517_v61, %v529_v63 }
 0x244   :  { %5471 = vmatprep.subr.bf16.mxu0 %v11811_v14  ;;  %5553 = vmatprep.subr.bf16.mxu1 %v11813_v15  ;;  %v420_v14 = vld [vmem:[#allocation2 + $0x7c0] sm:$0xff]  ;;  %v553_v7 = vld [vmem:[#allocation2 + $0xbe8] sm:$0xff] }
 0x245   :  { %v432_v15 = vld [vmem:[#allocation2 + $0x820] sm:$0xff] }
 0x246   :  { %v11978_v28 = vcombine.low %v420_v14, %v432_v15 }
 0x247   :  { %5472 = vmatpush1.bf16.msra.mxu0 %v11810_v22  ;;  %5554 = vmatpush1.bf16.msra.mxu1 %v11812_v23  ;;  %v11979_v22 = vcombine.high %v420_v14, %v432_v15  ;;  %v11981_v23 = vcombine.high %v421_v17, %v433_v18  ;;  %v565_v14 = vld [vmem:[#allocation2 + $0xc48] sm:$0xff]  ;;  %v12100_v18 = vcombine.low %v541_v6, %v553_v7 }
 0x248   :  { %5473 = vmatprep.subr.bf16.mxu0 %v11835_v24  ;;  %5555 = vmatprep.subr.bf16.mxu1 %v11837_v25  ;;  %v444_v24 = vld [vmem:[#allocation2 + $0x880] sm:$0xff]  ;;  %v577_v15 = vld [vmem:[#allocation2 + $0xca8] sm:$0xff] }
 0x249   :  { %v456_v25 = vld [vmem:[#allocation2 + $0x8e0] sm:$0xff] }
 0x24a   :  { %v12002_v41 = vcombine.low %v444_v24, %v456_v25 }
 0x24b   :  { %5474 = vmatpush1.bf16.msra.mxu0 %v11834_v32  ;;  %5556 = vmatpush1.bf16.msra.mxu1 %v11836_v33  ;;  %v12003_v32 = vcombine.high %v444_v24, %v456_v25  ;;  %v12005_v33 = vcombine.high %v445_v43, %v457_v26  ;;  %v589_v24 = vld [vmem:[#allocation2 + $0xd08] sm:$0xff]  ;;  %v12124_v26 = vcombine.low %v565_v14, %v577_v15 }
 0x24c   :  { %5475 = vmatprep.subr.bf16.mxu0 %v11859_v34  ;;  %5557 = vmatprep.subr.bf16.mxu1 %v11861_v37  ;;  %v468_v34 = vld [vmem:[#allocation2 + $0x940] sm:$0xff]  ;;  %v601_v25 = vld [vmem:[#allocation2 + $0xd68] sm:$0xff] }
 0x24d   :  { %v480_v37 = vld [vmem:[#allocation2 + $0x9a0] sm:$0xff] }
 0x24e   :  { %v12026_v53 = vcombine.low %v468_v34, %v480_v37 }
 0x24f   :  { %5476 = vmatpush1.bf16.msra.mxu0 %v11858_v46  ;;  %5558 = vmatpush1.bf16.msra.mxu1 %v11860_v47  ;;  %v12027_v46 = vcombine.high %v468_v34, %v480_v37  ;;  %v12029_v47 = vcombine.high %v469_v38, %v481_v39  ;;  %v613_v34 = vld [vmem:[#allocation2 + $0xdc8] sm:$0xff]  ;;  %v12148_v39 = vcombine.low %v589_v24, %v601_v25 }
 0x250   :  { %5477 = vmatprep.subr.bf16.mxu0 %v11883_v48  ;;  %5559 = vmatprep.subr.bf16.mxu1 %v11885_v49  ;;  %v492_v48 = vld [vmem:[#allocation2 + $0xa00] sm:$0xff]  ;;  %v625_v37 = vld [vmem:[#allocation2 + $0xe28] sm:$0xff] }
 0x251   :  { %v504_v49 = vld [vmem:[#allocation2 + $0xa60] sm:$0xff] }
 0x252   :  { %v12050_v0 = vcombine.low %v492_v48, %v504_v49 }
 0x253   :  { %5478 = vmatpush1.bf16.msra.mxu0 %v11882_v56  ;;  %5560 = vmatpush1.bf16.msra.mxu1 %v11884_v57  ;;  %v12051_v56 = vcombine.high %v492_v48, %v504_v49  ;;  %v12053_v57 = vcombine.high %v493_v50, %v505_v52  ;;  %v637_v48 = vld [vmem:[#allocation2 + $0xe88] sm:$0xff]  ;;  %v12172_v52 = vcombine.low %v613_v34, %v625_v37 }
 0x254   :  { %5479 = vmatprep.subr.bf16.mxu0 %v11907_v59  ;;  %5561 = vmatprep.subr.bf16.mxu1 %v11909_v60  ;;  %v516_v59 = vld [vmem:[#allocation2 + $0xac0] sm:$0xff]  ;;  %v649_v49 = vld [vmem:[#allocation2 + $0xee8] sm:$0xff] }
 0x255   :  { %v528_v60 = vld [vmem:[#allocation2 + $0xb20] sm:$0xff] }
 0x256   :  { %v12074_v8 = vcombine.low %v516_v59, %v528_v60 }
 0x257   :  { %5480 = vmatpush1.bf16.msra.mxu0 %v11906_v2  ;;  %5562 = vmatpush1.bf16.msra.mxu1 %v11908_v3  ;;  %v12075_v2 = vcombine.high %v516_v59, %v528_v60  ;;  %v12077_v3 = vcombine.high %v517_v61, %v529_v63  ;;  %v661_v59 = vld [vmem:[#allocation2 + $0xf48] sm:$0xff]  ;;  %v12196_v63 = vcombine.low %v637_v48, %v649_v49 }
 0x258   :  { %5481 = vmatprep.subr.bf16.mxu0 %v11931_v4  ;;  %5563 = vmatprep.subr.bf16.mxu1 %v11933_v5  ;;  %v540_v4 = vld [vmem:[#allocation2 + $0xb80] sm:$0xff]  ;;  %v673_v60 = vld [vmem:[#allocation2 + $0xfa8] sm:$0xff] }
 0x259   :  { %v552_v5 = vld [vmem:[#allocation2 + $0xbe0] sm:$0xff] }
 0x25a   :  { %v12098_v17 = vcombine.low %v540_v4, %v552_v5 }
 0x25b   :  { %5482 = vmatpush1.bf16.msra.mxu0 %v11930_v10  ;;  %5564 = vmatpush1.bf16.msra.mxu1 %v11932_v11  ;;  %v12099_v10 = vcombine.high %v540_v4, %v552_v5  ;;  %v12101_v11 = vcombine.high %v541_v6, %v553_v7  ;;  %v685_v4 = vld [vmem:[#allocation2 + $0x1008] sm:$0xff]  ;;  %v12220_v7 = vcombine.low %v661_v59, %v673_v60 }
 0x25c   :  { %5483 = vmatprep.subr.bf16.mxu0 %v11955_v12  ;;  %5565 = vmatprep.subr.bf16.mxu1 %v11957_v13  ;;  %v564_v12 = vld [vmem:[#allocation2 + $0xc40] sm:$0xff]  ;;  %v697_v5 = vld [vmem:[#allocation2 + $0x1068] sm:$0xff] }
 0x25d   :  { %v576_v13 = vld [vmem:[#allocation2 + $0xca0] sm:$0xff] }
 0x25e   :  { %v12122_v43 = vcombine.low %v564_v12, %v576_v13 }
 0x25f   :  { %5484 = vmatpush1.bf16.msra.mxu0 %v11954_v19  ;;  %5566 = vmatpush1.bf16.msra.mxu1 %v11956_v21  ;;  %v12123_v19 = vcombine.high %v564_v12, %v576_v13  ;;  %v12125_v21 = vcombine.high %v565_v14, %v577_v15  ;;  %v709_v12 = vld [vmem:[#allocation2 + $0x10c8] sm:$0xff]  ;;  %v12244_v15 = vcombine.low %v685_v4, %v697_v5 }
 0x260   :  { %5485 = vmatprep.subr.bf16.mxu0 %v11979_v22  ;;  %5567 = vmatprep.subr.bf16.mxu1 %v11981_v23  ;;  %v588_v22 = vld [vmem:[#allocation2 + $0xd00] sm:$0xff]  ;;  %v721_v13 = vld [vmem:[#allocation2 + $0x1128] sm:$0xff] }
 0x261   :  { %v600_v23 = vld [vmem:[#allocation2 + $0xd60] sm:$0xff] }
 0x262   :  { %v12146_v38 = vcombine.low %v588_v22, %v600_v23 }
 0x263   :  { %5486 = vmatpush1.bf16.msra.mxu0 %v11978_v28  ;;  %5568 = vmatpush1.bf16.msra.mxu1 %v11980_v29  ;;  %v12147_v28 = vcombine.high %v588_v22, %v600_v23  ;;  %v12149_v29 = vcombine.high %v589_v24, %v601_v25  ;;  %v744_v22 = vld [vmem:[#allocation2 + $0x11e0] sm:$0xff]  ;;  %v733_v25 = vld [vmem:[#allocation2 + $0x1188] sm:$0xff] }
 0x264   :  { %5487 = vmatprep.subr.bf16.mxu0 %v12003_v32  ;;  %5569 = vmatprep.subr.bf16.mxu1 %v12005_v33  ;;  %v612_v32 = vld [vmem:[#allocation2 + $0xdc0] sm:$0xff] }
 0x265   :  { %v624_v33 = vld [vmem:[#allocation2 + $0xe20] sm:$0xff] }
 0x266   :  { %v12170_v50 = vcombine.low %v612_v32, %v624_v33 }
 0x267   :  { %5488 = vmatpush1.bf16.msra.mxu0 %v12002_v41  ;;  %5570 = vmatpush1.bf16.msra.mxu1 %v12004_v45  ;;  %v12171_v41 = vcombine.high %v612_v32, %v624_v33  ;;  %v12173_v45 = vcombine.high %v613_v34, %v625_v37  ;;  %v12268_v34 = vcombine.low %v709_v12, %v721_v13 }
 0x268   :  { %5489 = vmatprep.subr.bf16.mxu0 %v12027_v46  ;;  %5571 = vmatprep.subr.bf16.mxu1 %v12029_v47  ;;  %v636_v46 = vld [vmem:[#allocation2 + $0xe80] sm:$0xff] }
 0x269   :  { %v648_v47 = vld [vmem:[#allocation2 + $0xee0] sm:$0xff] }
 0x26a   :  { %v12194_v61 = vcombine.low %v636_v46, %v648_v47 }
 0x26b   :  { %5490 = vmatpush1.bf16.msra.mxu0 %v12026_v53  ;;  %5572 = vmatpush1.bf16.msra.mxu1 %v12028_v55  ;;  %v12195_v53 = vcombine.high %v636_v46, %v648_v47  ;;  %v12197_v55 = vcombine.high %v637_v48, %v649_v49  ;;  %v757_v46 = vld [vmem:[#allocation2 + $0x1248] sm:$0xff] }
 0x26c   :  { %5491 = vmatprep.subr.bf16.mxu0 %v12051_v56  ;;  %5573 = vmatprep.subr.bf16.mxu1 %v12053_v57  ;;  %v660_v56 = vld [vmem:[#allocation2 + $0xf40] sm:$0xff]  ;;  %v769_v47 = vld [vmem:[#allocation2 + $0x12a8] sm:$0xff] }
 0x26d   :  { %v672_v57 = vld [vmem:[#allocation2 + $0xfa0] sm:$0xff] }
 0x26e   :  { %v12218_v6 = vcombine.low %v660_v56, %v672_v57 }
 0x26f   :  { %5492 = vmatpush1.bf16.msra.mxu0 %v12050_v0  ;;  %5574 = vmatpush1.bf16.msra.mxu1 %v12052_v1  ;;  %v12219_v0 = vcombine.high %v660_v56, %v672_v57  ;;  %v12221_v1 = vcombine.high %v661_v59, %v673_v60  ;;  %v781_v56 = vld [vmem:[#allocation2 + $0x1308] sm:$0xff] }
 0x270   :  { %5493 = vmatprep.subr.bf16.mxu0 %v12075_v2  ;;  %5575 = vmatprep.subr.bf16.mxu1 %v12077_v3  ;;  %v684_v2 = vld [vmem:[#allocation2 + $0x1000] sm:$0xff]  ;;  %v793_v57 = vld [vmem:[#allocation2 + $0x1368] sm:$0xff] }
 0x271   :  { %v696_v3 = vld [vmem:[#allocation2 + $0x1060] sm:$0xff] }
 0x272   :  { %v12242_v14 = vcombine.low %v684_v2, %v696_v3 }
 0x273   :  { %5494 = vmatpush1.bf16.msra.mxu0 %v12074_v8  ;;  %5576 = vmatpush1.bf16.msra.mxu1 %v12076_v9  ;;  %v12243_v8 = vcombine.high %v684_v2, %v696_v3  ;;  %v12245_v9 = vcombine.high %v685_v4, %v697_v5  ;;  %v12341_v2 = vcombine.high %v781_v56, %v793_v57  ;;  %v804_v3 = vld [vmem:[#allocation2 + $0x13c0] sm:$0xff] }
 0x274   :  { %5495 = vmatprep.subr.bf16.mxu0 %v12099_v10  ;;  %5577 = vmatprep.subr.bf16.mxu1 %v12101_v11  ;;  %v708_v10 = vld [vmem:[#allocation2 + $0x10c0] sm:$0xff] }
 0x275   :  { %v720_v11 = vld [vmem:[#allocation2 + $0x1120] sm:$0xff] }
 0x276   :  { %v816_v4 = vld [vmem:[#allocation2 + $0x1420] sm:$0xff] }
 0x277   :  { %5496 = vmatpush1.bf16.msra.mxu0 %v12098_v17  ;;  %5578 = vmatpush1.bf16.msra.mxu1 %v12100_v18  ;;  %v12267_v17 = vcombine.high %v708_v10, %v720_v11 }
 0x278   :  { %5506 = vmatprep.subr.bf16.mxu0 %v12123_v19  ;;  %5588 = vmatprep.subr.bf16.mxu1 %v12125_v21  ;;  %v12269_v19 = vcombine.high %v709_v12, %v721_v13  ;;  %v732_v21 = vld [vmem:[#allocation2 + $0x1180] sm:$0xff] }
 0x279   :  { %v12291_v37 = vcombine.high %v732_v21, %v744_v22  ;;  %v12290_v48 = vcombine.low %v732_v21, %v744_v22  ;;  %v828_v22 = vld [vmem:[#allocation2 + $0x1480] sm:$0xff] }
 0x27a   :  { %5498 = vmatmul.mubr.bf16.vlgmr.msra.gmra.mrb[16].mxu0 %v14860_v40  ;;  %5580 = vmatmul.mubr.bf16.vlgmr.msra.gmra.mrb[16].mxu1 %v14860_v40 }
 0x27b   :  { %5507 = vmatpush1.bf16.msra.mxu0 %v12122_v43  ;;  %5589 = vmatpush1.bf16.msra.mxu1 %v12124_v26  ;;  %v745_v43 = vld [vmem:[#allocation2 + $0x11e8] sm:$0xff] }
 0x27c   :  { %5508 = vmatprep.subr.bf16.mxu0 %v12147_v28  ;;  %5590 = vmatprep.subr.bf16.mxu1 %v12149_v29  ;;  %v12266_v29 = vcombine.low %v708_v10, %v720_v11  ;;  %v12292_v49 = vcombine.low %v733_v25, %v745_v43 }
 0x27d   :  { %5538 = vmatprep.mubr.bf16.mxu0 %v14865_v42  ;;  %5620 = vmatprep.mubr.bf16.mxu1 %v14865_v42 }
 0x27f   :  { %5509 = vmatpush1.bf16.msra.mxu0 %v12146_v38  ;;  %5591 = vmatpush1.bf16.msra.mxu1 %v12148_v39  ;;  %v12293_v39 = vcombine.high %v733_v25, %v745_v43  ;;  %v829_v43 = vld [vmem:[#allocation2 + $0x1488] sm:$0xff] }
 0x280   :  { %5510 = vmatprep.subr.bf16.mxu0 %v12171_v41  ;;  %5592 = vmatprep.subr.bf16.mxu1 %v12173_v45  ;;  %v756_v41 = vld [vmem:[#allocation2 + $0x1240] sm:$0xff] }
 0x281   :  { %v768_v45 = vld [vmem:[#allocation2 + $0x12a0] sm:$0xff] }
 0x282   :  { %v12314_v59 = vcombine.low %v756_v41, %v768_v45 }
 0x283   :  { %5511 = vmatpush1.bf16.msra.mxu0 %v12170_v50  ;;  %5593 = vmatpush1.bf16.msra.mxu1 %v12172_v52  ;;  %v12315_v50 = vcombine.high %v756_v41, %v768_v45  ;;  %v12317_v52 = vcombine.high %v757_v46, %v769_v47  ;;  %v852_v45 = vld [vmem:[#allocation2 + $0x1540] sm:$0xff] }
 0x284   :  { %5512 = vmatprep.subr.bf16.mxu0 %v12195_v53  ;;  %5594 = vmatprep.subr.bf16.mxu1 %v12197_v55  ;;  %v780_v53 = vld [vmem:[#allocation2 + $0x1300] sm:$0xff] }
 0x285   :  { %v792_v55 = vld [vmem:[#allocation2 + $0x1360] sm:$0xff] }
 0x286   :  { %v12338_v12 = vcombine.low %v780_v53, %v792_v55 }
 0x287   :  { %5513 = vmatpush1.bf16.msra.mxu0 %v12194_v61  ;;  %5595 = vmatpush1.bf16.msra.mxu1 %v12196_v63  ;;  %v12316_v61 = vcombine.low %v757_v46, %v769_v47  ;;  %v12339_v63 = vcombine.high %v780_v53, %v792_v55  ;;  %v864_v46 = vld [vmem:[#allocation2 + $0x15a0] sm:$0xff] }
 0x288   :  { %5514 = vmatprep.subr.bf16.mxu0 %v12219_v0  ;;  %5596 = vmatprep.subr.bf16.mxu1 %v12221_v1 }
 0x28b   :  { %5515 = vmatpush1.bf16.msra.mxu0 %v12218_v6  ;;  %5597 = vmatpush1.bf16.msra.mxu1 %v12220_v7  ;;  %v805_v7 = vld [vmem:[#allocation2 + $0x13c8] sm:$0xff] }
 0x28c   :  { %5516 = vmatprep.subr.bf16.mxu0 %v12243_v8  ;;  %5598 = vmatprep.subr.bf16.mxu1 %v12245_v9  ;;  %v817_v8 = vld [vmem:[#allocation2 + $0x1428] sm:$0xff] }
 0x28d   :  { %v5212_v18 = vpop.f32.mrb[8].mxu0  ;;  %v5294_v23 = vpop.f32.mrb[8].mxu1  ;;  %v12365_v21 = vcombine.high %v805_v7, %v817_v8 }
 0x28e   :  { %14574 = vtanh.f32 %v5212_v18  ;;  %v5214_v24 = vpop.f32.mrb[9].mxu0  ;;  %v5296_v26 = vpop.f32.mrb[9].mxu1 }
 0x28f   :  { %14576 = vtanh.f32 %v5294_v23  ;;  %v5216_v28 = vpop.f32.mrb[10].mxu0  ;;  %5517 = vmatpush1.bf16.msra.mxu0 %v12242_v14  ;;  %v5298_v32 = vpop.f32.mrb[10].mxu1  ;;  %5599 = vmatpush1.bf16.msra.mxu1 %v12244_v15  ;;  %v12340_v15 = vcombine.low %v781_v56, %v793_v57  ;;  %v840_v23 = vld [vmem:[#allocation2 + $0x14e0] sm:$0xff]  ;;  %v12411_v56 = vcombine.high %v852_v45, %v864_v46 }
 0x290   :  { %14578 = vtanh.f32 %v5214_v24  ;;  %v5217_v33 = vpop.f32.mrb[11].mxu0  ;;  %5518 = vmatprep.subr.bf16.mxu0 %v12267_v17  ;;  %v5299_v38 = vpop.f32.mrb[11].mxu1  ;;  %5600 = vmatprep.subr.bf16.mxu1 %v12269_v19  ;;  %v12363_v17 = vcombine.high %v804_v3, %v816_v4  ;;  %v12362_v32 = vcombine.low %v804_v3, %v816_v4 }
 0x291   :  { %14580 = vtanh.f32 %v5296_v26  ;;  %v841_v26 = vld [vmem:[#allocation2 + $0x14e8] sm:$0xff]  ;;  %v12387_v38 = vcombine.high %v828_v22, %v840_v23 }
 0x292   :  { %v12389_v41 = vcombine.high %v829_v43, %v841_v26  ;;  %v12388_v55 = vcombine.low %v829_v43, %v841_v26  ;;  %v194_v43 = vld [vmem:[#allocation2 + $0xb0] sm:$0xff]  ;;  %v183_v26 = vld [vmem:[#allocation2 + $0x58] sm:$0xff] }
 0x293   :  { %5519 = vmatpush1.bf16.msra.mxu0 %v12266_v29  ;;  %5601 = vmatpush1.bf16.msra.mxu1 %v12268_v34 }
 0x294   :  { %5520 = vmatprep.subr.bf16.mxu0 %v12291_v37  ;;  %5602 = vmatprep.subr.bf16.mxu1 %v12293_v39  ;;  %v12364_v37 = vcombine.low %v805_v7, %v817_v8  ;;  %v900_v7 = vld [vmem:[#allocation2 + $0x16c0] sm:$0xff] }
 0x295   :  { %v912_v8 = vld [vmem:[#allocation2 + $0x1720] sm:$0xff] }
 0x297   :  { %5521 = vmatpush1.bf16.msra.mxu0 %v12290_v48  ;;  %5603 = vmatpush1.bf16.msra.mxu1 %v12292_v49  ;;  %v853_v48 = vld [vmem:[#allocation2 + $0x1548] sm:$0xff] }
 0x298   :  { %v14575_v60 = vpop.eup %14574  ;;  %5522 = vmatprep.subr.bf16.mxu0 %v12315_v50  ;;  %5604 = vmatprep.subr.bf16.mxu1 %v12317_v52  ;;  %v865_v49 = vld [vmem:[#allocation2 + $0x15a8] sm:$0xff]  ;;  %v12386_v52 = vcombine.low %v828_v22, %v840_v23 }
 0x299   :  { %v14577_v0 = vpop.eup %14576  ;;  %v5825_v1 = vmul.f32 127.5, %v14575_v60  ;;  %v876_v60 = vld [vmem:[#allocation2 + $0x1600] sm:$0xff]  ;;  %v12412_v4 = vcombine.low %v853_v48, %v865_v49 }
 0x29a   :  { %v14579_v5 = vpop.eup %14578  ;;  %v5827_v6 = vmul.f32 127.5, %v14577_v0  ;;  %v877_v0 = vld [vmem:[#allocation2 + $0x1608] sm:$0xff] }
 0x29b   :  { %v14581_v9 = vpop.eup %14580  ;;  %v5849_v10 = vadd.f32 128.0, %v5825_v1  ;;  %v5826_v11 = vmul.f32 127.5, %v14579_v5  ;;  %5523 = vmatpush1.bf16.msra.mxu0 %v12314_v59  ;;  %5605 = vmatpush1.bf16.msra.mxu1 %v12316_v61  ;;  %v12413_v59 = vcombine.high %v853_v48, %v865_v49  ;;  %v888_v61 = vld [vmem:[#allocation2 + $0x1660] sm:$0xff]  ;;  %v889_v1 = vld [vmem:[#allocation2 + $0x1668] sm:$0xff]  ;;  %v219_v48 = vld [vmem:[#allocation2 + $0x178] sm:$0xff] }
 0x29c   :  { %v5851_v13 = vadd.f32 128.0, %v5827_v6  ;;  %v5828_v14 = vmul.f32 127.5, %v14581_v9  ;;  %5524 = vmatprep.subr.bf16.mxu0 %v12339_v63  ;;  %5606 = vmatprep.subr.bf16.mxu1 %v12341_v2  ;;  %v12410_v2 = vcombine.low %v852_v45, %v864_v46  ;;  %v12435_v5 = vcombine.high %v876_v60, %v888_v61  ;;  %v901_v9 = vld [vmem:[#allocation2 + $0x16c8] sm:$0xff]  ;;  %v218_v45 = vld [vmem:[#allocation2 + $0x170] sm:$0xff]  ;;  %v207_v46 = vld [vmem:[#allocation2 + $0x118] sm:$0xff] }
 0x29d   :  { %v5873_v18 = vmax.f32 %v5849_v10, 0.0  ;;  %v5850_v19 = vadd.f32 128.0, %v5826_v11  ;;  %v12437_v6 = vcombine.high %v877_v0, %v889_v1  ;;  %v913_v10 = vld [vmem:[#allocation2 + $0x1728] sm:$0xff]  ;;  %v12434_v11 = vcombine.low %v876_v60, %v888_v61 }
 0x29e   :  { %v5875_v24 = vmax.f32 %v5851_v13, 0.0  ;;  %v5852_v25 = vadd.f32 128.0, %v5828_v14  ;;  %v12459_v13 = vcombine.high %v900_v7, %v912_v8  ;;  %v12461_v14 = vcombine.high %v901_v9, %v913_v10 }
 0x29f   :  { %v14947_v28 = vmin.f32 %v5873_v18, 255.0  ;;  %v5874_v29 = vmax.f32 %v5850_v19, 0.0  ;;  %5525 = vmatpush1.bf16.msra.mxu0 %v12338_v12  ;;  %5607 = vmatpush1.bf16.msra.mxu1 %v12340_v15  ;;  %v12436_v12 = vcombine.low %v877_v0, %v889_v1  ;;  %v924_v15 = vld [vmem:[#allocation2 + $0x1780] sm:$0xff]  ;;  %v925_v18 = vld [vmem:[#allocation2 + $0x1788] sm:$0xff]  ;;  %v12460_v22 = vcombine.low %v901_v9, %v913_v10  ;;  %v254_v1 = vld [vmem:[#allocation2 + $0x290] sm:$0xff] }
 0x2a0   :  { %v14949_v33 = vmin.f32 %v5875_v24, 255.0  ;;  %v5876_v34 = vmax.f32 %v5852_v25, 0.0  ;;  %5526 = vmatprep.subr.bf16.mxu0 %v12363_v17  ;;  %5608 = vmatprep.subr.bf16.mxu1 %v12365_v21  ;;  %v936_v17 = vld [vmem:[#allocation2 + $0x17e0] sm:$0xff]  ;;  %v937_v19 = vld [vmem:[#allocation2 + $0x17e8] sm:$0xff]  ;;  %v12458_v21 = vcombine.low %v900_v7, %v912_v8  ;;  %v182_v25 = vld [vmem:[#allocation2 + $0x50] sm:$0xff]  ;;  %v11768_v61 = vcombine.low %v207_v46, %v219_v48 }
 0x2a1   :  { %v14951_v39 = vmin.f32 %v5874_v29, 255.0  ;;  %v12483_v23 = vcombine.high %v924_v15, %v936_v17  ;;  %v12485_v24 = vcombine.high %v925_v18, %v937_v19  ;;  %v195_v29 = vld [vmem:[#allocation2 + $0xb8] sm:$0xff]  ;;  %v11742_v49 = vcombine.low %v182_v25, %v194_v43  ;;  %v278_v9 = vld [vmem:[#allocation2 + $0x350] sm:$0xff] }
 0x2a2   :  { %v14953_v47 = vmin.f32 %v5876_v34, 255.0  ;;  %v12484_v34 = vcombine.low %v925_v18, %v937_v19  ;;  %v290_v10 = vld [vmem:[#allocation2 + $0x3b0] sm:$0xff]  ;;  %v303_v19 = vld [vmem:[#allocation2 + $0x418] sm:$0xff] }
 0x2a3   :  { %v5971_v50 = vcombine.low %v14947_v28, %v14951_v39  ;;  %5527 = vmatpush1.bf16.msra.mxu0 %v12362_v32  ;;  %5609 = vmatpush1.bf16.msra.mxu1 %v12364_v37  ;;  %v12482_v32 = vcombine.low %v924_v15, %v936_v17  ;;  %v11743_v37 = vcombine.high %v182_v25, %v194_v43  ;;  %v302_v17 = vld [vmem:[#allocation2 + $0x410] sm:$0xff] }
 0x2a4   :  { %v5972_v53 = vcombine.low %v14949_v33, %v14953_v47  ;;  %5528 = vmatprep.subr.bf16.mxu0 %v12387_v38  ;;  %5610 = vmatprep.subr.bf16.mxu1 %v12389_v41  ;;  %v11745_v38 = vcombine.high %v183_v26, %v195_v29  ;;  %v206_v41 = vld [vmem:[#allocation2 + $0x110] sm:$0xff]  ;;  %v11839_v15 = vcombine.high %v278_v9, %v290_v10 }
 0x2a5   :  { %v5979_v57 = vrot.slane %v5971_v50, %v14901_v36  ;;  %v11744_v50 = vcombine.low %v183_v26, %v195_v29  ;;  %v11766_v60 = vcombine.low %v206_v41, %v218_v45  ;;  %v314_v18 = vld [vmem:[#allocation2 + $0x470] sm:$0xff]  ;;  %v327_v29 = vld [vmem:[#allocation2 + $0x4d8] sm:$0xff] }
 0x2a6   :  { %v5986_v63 = vrot.slane %v5972_v53, %v14901_v36  ;;  %v11769_v53 = vcombine.high %v207_v46, %v219_v48  ;;  %v326_v43 = vld [vmem:[#allocation2 + $0x4d0] sm:$0xff]  ;;  %v351_v48 = vld [vmem:[#allocation2 + $0x598] sm:$0xff] }
 0x2a7   :  { %5529 = vmatpush1.bf16.msra.mxu0 %v12386_v52  ;;  %5611 = vmatpush1.bf16.msra.mxu1 %v12388_v55  ;;  %v11767_v52 = vcombine.high %v206_v41, %v218_v45  ;;  %v230_v55 = vld [vmem:[#allocation2 + $0x1d0] sm:$0xff] }
 0x2a8   :  { %v5987_v3 = vcombine.low %v5979_v57, %v5986_v63  ;;  %5530 = vmatprep.subr.bf16.mxu0 %v12411_v56  ;;  %5612 = vmatprep.subr.bf16.mxu1 %v12413_v59  ;;  %v242_v56 = vld [vmem:[#allocation2 + $0x230] sm:$0xff]  ;;  %v231_v57 = vld [vmem:[#allocation2 + $0x1d8] sm:$0xff] }
 0x2a9   :  { %v243_v59 = vld [vmem:[#allocation2 + $0x238] sm:$0xff]  ;;  %v11791_v63 = vcombine.high %v230_v55, %v242_v56  ;;  %v338_v26 = vld [vmem:[#allocation2 + $0x530] sm:$0xff] }
 0x2aa   :  { %6047 = vst [vmem:[%s15086_s4 + $0x10] sm:$0xff] %v5987_v3  ;;  %v11793_v0 = vcombine.high %v231_v57, %v243_v59  ;;  %v255_v3 = vld [vmem:[#allocation2 + $0x298] sm:$0xff]  ;;  %v350_v45 = vld [vmem:[#allocation2 + $0x590] sm:$0xff] }
 0x2ab   :  { %5531 = vmatpush1.bf16.msra.mxu0 %v12410_v2  ;;  %5613 = vmatpush1.bf16.msra.mxu1 %v12412_v4  ;;  %v266_v2 = vld [vmem:[#allocation2 + $0x2f0] sm:$0xff]  ;;  %v267_v4 = vld [vmem:[#allocation2 + $0x2f8] sm:$0xff] }
 0x2ac   :  { %5532 = vmatprep.subr.bf16.mxu0 %v12435_v5  ;;  %5614 = vmatprep.subr.bf16.mxu1 %v12437_v6  ;;  %v11790_v5 = vcombine.low %v230_v55, %v242_v56  ;;  %v11792_v6 = vcombine.low %v231_v57, %v243_v59  ;;  %v11815_v7 = vcombine.high %v254_v1, %v266_v2  ;;  %v362_v46 = vld [vmem:[#allocation2 + $0x5f0] sm:$0xff]  ;;  %v375_v59 = vld [vmem:[#allocation2 + $0x658] sm:$0xff] }
 0x2ad   :  { %v11817_v8 = vcombine.high %v255_v3, %v267_v4  ;;  %v374_v56 = vld [vmem:[#allocation2 + $0x650] sm:$0xff] }
 0x2ae   :  { %v386_v57 = vld [vmem:[#allocation2 + $0x6b0] sm:$0xff] }
 0x2af   :  { %5533 = vmatpush1.bf16.msra.mxu0 %v12434_v11  ;;  %5615 = vmatpush1.bf16.msra.mxu1 %v12436_v12  ;;  %v279_v11 = vld [vmem:[#allocation2 + $0x358] sm:$0xff] }
 0x2b0   :  { %5534 = vmatprep.subr.bf16.mxu0 %v12459_v13  ;;  %5616 = vmatprep.subr.bf16.mxu1 %v12461_v14  ;;  %v291_v12 = vld [vmem:[#allocation2 + $0x3b8] sm:$0xff]  ;;  %v11814_v13 = vcombine.low %v254_v1, %v266_v2  ;;  %v11816_v14 = vcombine.low %v255_v3, %v267_v4  ;;  %v398_v2 = vld [vmem:[#allocation2 + $0x710] sm:$0xff] }
 0x2b1   :  { %v410_v3 = vld [vmem:[#allocation2 + $0x770] sm:$0xff]  ;;  %v399_v4 = vld [vmem:[#allocation2 + $0x718] sm:$0xff] }
 0x2b3   :  { %5535 = vmatpush1.bf16.msra.mxu0 %v12458_v21  ;;  %5617 = vmatpush1.bf16.msra.mxu1 %v12460_v22  ;;  %v315_v21 = vld [vmem:[#allocation2 + $0x478] sm:$0xff]  ;;  %v11838_v22 = vcombine.low %v278_v9, %v290_v10  ;;  %v422_v10 = vld [vmem:[#allocation2 + $0x7d0] sm:$0xff] }
 0x2b4   :  { %5536 = vmatprep.subr.bf16.mxu0 %v12483_v23  ;;  %5618 = vmatprep.subr.bf16.mxu1 %v12485_v24  ;;  %v11840_v23 = vcombine.low %v279_v11, %v291_v12  ;;  %v11863_v24 = vcombine.high %v302_v17, %v314_v18  ;;  %v11865_v25 = vcombine.high %v303_v19, %v315_v21 }
 0x2b7   :  { %5537 = vmatpush1.bf16.msra.mxu0 %v12482_v32  ;;  %5619 = vmatpush1.bf16.msra.mxu1 %v12484_v34  ;;  %v339_v32 = vld [vmem:[#allocation2 + $0x538] sm:$0xff]  ;;  %v11862_v34 = vcombine.low %v302_v17, %v314_v18  ;;  %v446_v18 = vld [vmem:[#allocation2 + $0x890] sm:$0xff] }
 0x2b8   :  { %5629 = vmatprep.subr.bf16.mxu0 %v11743_v37  ;;  %5711 = vmatprep.subr.bf16.mxu1 %v11745_v38  ;;  %v11864_v37 = vcombine.low %v303_v19, %v315_v21  ;;  %v11887_v38 = vcombine.high %v326_v43, %v338_v26  ;;  %v11889_v41 = vcombine.high %v327_v29, %v339_v32  ;;  %v458_v19 = vld [vmem:[#allocation2 + $0x8f0] sm:$0xff]  ;;  %v447_v21 = vld [vmem:[#allocation2 + $0x898] sm:$0xff] }
 0x2ba   :  { %5539 = vmatmul.mubr.bf16.vlgmr.msra.gmra.mrb[16].mxu0 %v14874_v16  ;;  %5621 = vmatmul.mubr.bf16.vlgmr.msra.gmra.mrb[16].mxu1 %v14874_v16 }
 0x2bb   :  { %5630 = vmatpush1.bf16.msra.mxu0 %v11742_v49  ;;  %5712 = vmatpush1.bf16.msra.mxu1 %v11744_v50  ;;  %v363_v49 = vld [vmem:[#allocation2 + $0x5f8] sm:$0xff]  ;;  %v11886_v50 = vcombine.low %v326_v43, %v338_v26  ;;  %v470_v26 = vld [vmem:[#allocation2 + $0x950] sm:$0xff] }
 0x2bc   :  { %5631 = vmatprep.subr.bf16.mxu0 %v11767_v52  ;;  %5713 = vmatprep.subr.bf16.mxu1 %v11769_v53  ;;  %v11888_v52 = vcombine.low %v327_v29, %v339_v32  ;;  %v11911_v53 = vcombine.high %v350_v45, %v362_v46  ;;  %v11913_v55 = vcombine.high %v351_v48, %v363_v49  ;;  %v482_v29 = vld [vmem:[#allocation2 + $0x9b0] sm:$0xff]  ;;  %v471_v32 = vld [vmem:[#allocation2 + $0x958] sm:$0xff] }
 0x2bd   :  { %5661 = vmatprep.mubr.bf16.mxu0 %v14799_v31  ;;  %5743 = vmatprep.mubr.bf16.mxu1 %v14799_v31  ;;  %v11841_v31 = vcombine.high %v279_v11, %v291_v12  ;;  %v434_v11 = vld [vmem:[#allocation2 + $0x830] sm:$0xff]  ;;  %v423_v12 = vld [vmem:[#allocation2 + $0x7d8] sm:$0xff] }
 0x2bf   :  { %5632 = vmatpush1.bf16.msra.mxu0 %v11766_v60  ;;  %5714 = vmatpush1.bf16.msra.mxu1 %v11768_v61  ;;  %v387_v60 = vld [vmem:[#allocation2 + $0x6b8] sm:$0xff]  ;;  %v11910_v61 = vcombine.low %v350_v45, %v362_v46  ;;  %v494_v46 = vld [vmem:[#allocation2 + $0xa10] sm:$0xff] }
 0x2c0   :  { %5633 = vmatprep.subr.bf16.mxu0 %v11791_v63  ;;  %5715 = vmatprep.subr.bf16.mxu1 %v11793_v0  ;;  %v11912_v63 = vcombine.low %v351_v48, %v363_v49  ;;  %v11935_v0 = vcombine.high %v374_v56, %v386_v57  ;;  %v11937_v1 = vcombine.high %v375_v59, %v387_v60  ;;  %v506_v48 = vld [vmem:[#allocation2 + $0xa70] sm:$0xff]  ;;  %v495_v49 = vld [vmem:[#allocation2 + $0xa18] sm:$0xff] }
 0x2c3   :  { %5634 = vmatpush1.bf16.msra.mxu0 %v11790_v5  ;;  %5716 = vmatpush1.bf16.msra.mxu1 %v11792_v6  ;;  %v411_v5 = vld [vmem:[#allocation2 + $0x778] sm:$0xff]  ;;  %v11934_v6 = vcombine.low %v374_v56, %v386_v57  ;;  %v518_v57 = vld [vmem:[#allocation2 + $0xad0] sm:$0xff] }
 0x2c4   :  { %5635 = vmatprep.subr.bf16.mxu0 %v11815_v7  ;;  %5717 = vmatprep.subr.bf16.mxu1 %v11817_v8  ;;  %v11936_v7 = vcombine.low %v375_v59, %v387_v60  ;;  %v11959_v8 = vcombine.high %v398_v2, %v410_v3  ;;  %v11961_v9 = vcombine.high %v399_v4, %v411_v5  ;;  %v530_v59 = vld [vmem:[#allocation2 + $0xb30] sm:$0xff]  ;;  %v519_v60 = vld [vmem:[#allocation2 + $0xad8] sm:$0xff] }
 0x2c7   :  { %5636 = vmatpush1.bf16.msra.mxu0 %v11814_v13  ;;  %5718 = vmatpush1.bf16.msra.mxu1 %v11816_v14  ;;  %v435_v13 = vld [vmem:[#allocation2 + $0x838] sm:$0xff]  ;;  %v11958_v14 = vcombine.low %v398_v2, %v410_v3  ;;  %v542_v3 = vld [vmem:[#allocation2 + $0xb90] sm:$0xff] }
 0x2c8   :  { %5637 = vmatprep.subr.bf16.mxu0 %v11839_v15  ;;  %5719 = vmatprep.subr.bf16.mxu1 %v11841_v31  ;;  %v11960_v15 = vcombine.low %v399_v4, %v411_v5  ;;  %v11983_v31 = vcombine.high %v422_v10, %v434_v11  ;;  %v11985_v17 = vcombine.high %v423_v12, %v435_v13  ;;  %v554_v4 = vld [vmem:[#allocation2 + $0xbf0] sm:$0xff]  ;;  %v543_v5 = vld [vmem:[#allocation2 + $0xb98] sm:$0xff] }
 0x2cb   :  { %5638 = vmatpush1.bf16.msra.mxu0 %v11838_v22  ;;  %5720 = vmatpush1.bf16.msra.mxu1 %v11840_v23  ;;  %v459_v22 = vld [vmem:[#allocation2 + $0x8f8] sm:$0xff]  ;;  %v11982_v23 = vcombine.low %v422_v10, %v434_v11  ;;  %v566_v11 = vld [vmem:[#allocation2 + $0xc50] sm:$0xff] }
 0x2cc   :  { %5639 = vmatprep.subr.bf16.mxu0 %v11863_v24  ;;  %5721 = vmatprep.subr.bf16.mxu1 %v11865_v25  ;;  %v11984_v24 = vcombine.low %v423_v12, %v435_v13  ;;  %v12007_v25 = vcombine.high %v446_v18, %v458_v19  ;;  %v12009_v43 = vcombine.high %v447_v21, %v459_v22  ;;  %v578_v12 = vld [vmem:[#allocation2 + $0xcb0] sm:$0xff]  ;;  %v567_v13 = vld [vmem:[#allocation2 + $0xc58] sm:$0xff] }
 0x2cf   :  { %5640 = vmatpush1.bf16.msra.mxu0 %v11862_v34  ;;  %5722 = vmatpush1.bf16.msra.mxu1 %v11864_v37  ;;  %v483_v34 = vld [vmem:[#allocation2 + $0x9b8] sm:$0xff]  ;;  %v12006_v37 = vcombine.low %v446_v18, %v458_v19  ;;  %v590_v19 = vld [vmem:[#allocation2 + $0xd10] sm:$0xff] }
 0x2d0   :  { %5641 = vmatprep.subr.bf16.mxu0 %v11887_v38  ;;  %5723 = vmatprep.subr.bf16.mxu1 %v11889_v41  ;;  %v12008_v38 = vcombine.low %v447_v21, %v459_v22  ;;  %v12031_v41 = vcombine.high %v470_v26, %v482_v29  ;;  %v12033_v45 = vcombine.high %v471_v32, %v483_v34  ;;  %v602_v21 = vld [vmem:[#allocation2 + $0xd70] sm:$0xff]  ;;  %v591_v22 = vld [vmem:[#allocation2 + $0xd18] sm:$0xff] }
 0x2d3   :  { %5642 = vmatpush1.bf16.msra.mxu0 %v11886_v50  ;;  %5724 = vmatpush1.bf16.msra.mxu1 %v11888_v52  ;;  %v507_v50 = vld [vmem:[#allocation2 + $0xa78] sm:$0xff]  ;;  %v12030_v52 = vcombine.low %v470_v26, %v482_v29  ;;  %v614_v29 = vld [vmem:[#allocation2 + $0xdd0] sm:$0xff] }
 0x2d4   :  { %5643 = vmatprep.subr.bf16.mxu0 %v11911_v53  ;;  %5725 = vmatprep.subr.bf16.mxu1 %v11913_v55  ;;  %v12032_v53 = vcombine.low %v471_v32, %v483_v34  ;;  %v12055_v55 = vcombine.high %v494_v46, %v506_v48  ;;  %v12057_v56 = vcombine.high %v495_v49, %v507_v50  ;;  %v626_v32 = vld [vmem:[#allocation2 + $0xe30] sm:$0xff]  ;;  %v615_v34 = vld [vmem:[#allocation2 + $0xdd8] sm:$0xff] }
 0x2d7   :  { %5644 = vmatpush1.bf16.msra.mxu0 %v11910_v61  ;;  %5726 = vmatpush1.bf16.msra.mxu1 %v11912_v63  ;;  %v531_v61 = vld [vmem:[#allocation2 + $0xb38] sm:$0xff]  ;;  %v12054_v63 = vcombine.low %v494_v46, %v506_v48  ;;  %v638_v48 = vld [vmem:[#allocation2 + $0xe90] sm:$0xff] }
 0x2d8   :  { %5645 = vmatprep.subr.bf16.mxu0 %v11935_v0  ;;  %5727 = vmatprep.subr.bf16.mxu1 %v11937_v1  ;;  %v12056_v0 = vcombine.low %v495_v49, %v507_v50  ;;  %v12079_v1 = vcombine.high %v518_v57, %v530_v59  ;;  %v12081_v2 = vcombine.high %v519_v60, %v531_v61  ;;  %v650_v49 = vld [vmem:[#allocation2 + $0xef0] sm:$0xff]  ;;  %v639_v50 = vld [vmem:[#allocation2 + $0xe98] sm:$0xff] }
 0x2db   :  { %5646 = vmatpush1.bf16.msra.mxu0 %v11934_v6  ;;  %5728 = vmatpush1.bf16.msra.mxu1 %v11936_v7  ;;  %v555_v6 = vld [vmem:[#allocation2 + $0xbf8] sm:$0xff]  ;;  %v12078_v7 = vcombine.low %v518_v57, %v530_v59  ;;  %v662_v57 = vld [vmem:[#allocation2 + $0xf50] sm:$0xff] }
 0x2dc   :  { %5647 = vmatprep.subr.bf16.mxu0 %v11959_v8  ;;  %5729 = vmatprep.subr.bf16.mxu1 %v11961_v9  ;;  %v12080_v8 = vcombine.low %v519_v60, %v531_v61  ;;  %v12103_v9 = vcombine.high %v542_v3, %v554_v4  ;;  %v12105_v10 = vcombine.high %v543_v5, %v555_v6  ;;  %v674_v59 = vld [vmem:[#allocation2 + $0xfb0] sm:$0xff]  ;;  %v663_v60 = vld [vmem:[#allocation2 + $0xf58] sm:$0xff] }
 0x2dd   :  { %v675_v61 = vld [vmem:[#allocation2 + $0xfb8] sm:$0xff] }
 0x2df   :  { %5648 = vmatpush1.bf16.msra.mxu0 %v11958_v14  ;;  %5730 = vmatpush1.bf16.msra.mxu1 %v11960_v15  ;;  %v579_v14 = vld [vmem:[#allocation2 + $0xcb8] sm:$0xff]  ;;  %v12102_v15 = vcombine.low %v542_v3, %v554_v4  ;;  %v698_v3 = vld [vmem:[#allocation2 + $0x1070] sm:$0xff] }
 0x2e0   :  { %5649 = vmatprep.subr.bf16.mxu0 %v11983_v31  ;;  %5731 = vmatprep.subr.bf16.mxu1 %v11985_v17  ;;  %v12104_v31 = vcombine.low %v543_v5, %v555_v6  ;;  %v12127_v17 = vcombine.high %v566_v11, %v578_v12  ;;  %v12129_v18 = vcombine.high %v567_v13, %v579_v14  ;;  %v687_v4 = vld [vmem:[#allocation2 + $0x1018] sm:$0xff] }
 0x2e1   :  { %v699_v5 = vld [vmem:[#allocation2 + $0x1078] sm:$0xff]  ;;  %v12222_v6 = vcombine.low %v662_v57, %v674_v59 }
 0x2e3   :  { %5650 = vmatpush1.bf16.msra.mxu0 %v11982_v23  ;;  %5732 = vmatpush1.bf16.msra.mxu1 %v11984_v24  ;;  %v603_v23 = vld [vmem:[#allocation2 + $0xd78] sm:$0xff]  ;;  %v12126_v24 = vcombine.low %v566_v11, %v578_v12  ;;  %v722_v11 = vld [vmem:[#allocation2 + $0x1130] sm:$0xff] }
 0x2e4   :  { %5651 = vmatprep.subr.bf16.mxu0 %v12007_v25  ;;  %5733 = vmatprep.subr.bf16.mxu1 %v12009_v43  ;;  %v12128_v25 = vcombine.low %v567_v13, %v579_v14  ;;  %v12151_v43 = vcombine.high %v590_v19, %v602_v21  ;;  %v12153_v26 = vcombine.high %v591_v22, %v603_v23  ;;  %v711_v12 = vld [vmem:[#allocation2 + $0x10d8] sm:$0xff] }
 0x2e5   :  { %v723_v13 = vld [vmem:[#allocation2 + $0x1138] sm:$0xff] }
 0x2e7   :  { %5652 = vmatpush1.bf16.msra.mxu0 %v12006_v37  ;;  %5734 = vmatpush1.bf16.msra.mxu1 %v12008_v38  ;;  %v627_v37 = vld [vmem:[#allocation2 + $0xe38] sm:$0xff]  ;;  %v12150_v38 = vcombine.low %v590_v19, %v602_v21  ;;  %v734_v19 = vld [vmem:[#allocation2 + $0x1190] sm:$0xff] }
 0x2e8   :  { %5653 = vmatprep.subr.bf16.mxu0 %v12031_v41  ;;  %5735 = vmatprep.subr.bf16.mxu1 %v12033_v45  ;;  %v12152_v41 = vcombine.low %v591_v22, %v603_v23  ;;  %v12175_v45 = vcombine.high %v614_v29, %v626_v32  ;;  %v12177_v46 = vcombine.high %v615_v34, %v627_v37  ;;  %v746_v21 = vld [vmem:[#allocation2 + $0x11f0] sm:$0xff] }
 0x2eb   :  { %5654 = vmatpush1.bf16.msra.mxu0 %v12030_v52  ;;  %5736 = vmatpush1.bf16.msra.mxu1 %v12032_v53  ;;  %v651_v52 = vld [vmem:[#allocation2 + $0xef8] sm:$0xff]  ;;  %v12174_v53 = vcombine.low %v614_v29, %v626_v32 }
 0x2ec   :  { %5655 = vmatprep.subr.bf16.mxu0 %v12055_v55  ;;  %5737 = vmatprep.subr.bf16.mxu1 %v12057_v56  ;;  %v12199_v55 = vcombine.high %v638_v48, %v650_v49  ;;  %v12201_v56 = vcombine.high %v639_v50, %v651_v52 }
 0x2ef   :  { %5656 = vmatpush1.bf16.msra.mxu0 %v12054_v63  ;;  %5738 = vmatpush1.bf16.msra.mxu1 %v12056_v0  ;;  %v12198_v63 = vcombine.low %v638_v48, %v650_v49  ;;  %v12200_v0 = vcombine.low %v639_v50, %v651_v52  ;;  %v770_v48 = vld [vmem:[#allocation2 + $0x12b0] sm:$0xff]  ;;  %v759_v49 = vld [vmem:[#allocation2 + $0x1258] sm:$0xff]  ;;  %v12294_v52 = vcombine.low %v734_v19, %v746_v21 }
 0x2f0   :  { %5657 = vmatprep.subr.bf16.mxu0 %v12079_v1  ;;  %5739 = vmatprep.subr.bf16.mxu1 %v12081_v2  ;;  %v12223_v1 = vcombine.high %v662_v57, %v674_v59  ;;  %v686_v2 = vld [vmem:[#allocation2 + $0x1010] sm:$0xff]  ;;  %v771_v50 = vld [vmem:[#allocation2 + $0x12b8] sm:$0xff] }
 0x2f1   :  { %v12246_v14 = vcombine.low %v686_v2, %v698_v3  ;;  %v794_v57 = vld [vmem:[#allocation2 + $0x1370] sm:$0xff]  ;;  %v783_v59 = vld [vmem:[#allocation2 + $0x1318] sm:$0xff] }
 0x2f3   :  { %5658 = vmatpush1.bf16.msra.mxu0 %v12078_v7  ;;  %5740 = vmatpush1.bf16.msra.mxu1 %v12080_v8  ;;  %v12224_v7 = vcombine.low %v663_v60, %v675_v61  ;;  %v12247_v8 = vcombine.high %v686_v2, %v698_v3 }
 0x2f4   :  { %5659 = vmatprep.subr.bf16.mxu0 %v12103_v9  ;;  %5741 = vmatprep.subr.bf16.mxu1 %v12105_v10  ;;  %v12249_v9 = vcombine.high %v687_v4, %v699_v5  ;;  %v710_v10 = vld [vmem:[#allocation2 + $0x10d0] sm:$0xff] }
 0x2f5   :  { %v12270_v29 = vcombine.low %v710_v10, %v722_v11 }
 0x2f7   :  { %5660 = vmatpush1.bf16.msra.mxu0 %v12102_v15  ;;  %5742 = vmatpush1.bf16.msra.mxu1 %v12104_v31  ;;  %v12248_v15 = vcombine.low %v687_v4, %v699_v5  ;;  %v12271_v31 = vcombine.high %v710_v10, %v722_v11  ;;  %v806_v4 = vld [vmem:[#allocation2 + $0x13d0] sm:$0xff] }
 0x2f8   :  { %5670 = vmatprep.subr.bf16.mxu0 %v12127_v17  ;;  %5752 = vmatprep.subr.bf16.mxu1 %v12129_v18  ;;  %v12273_v18 = vcombine.high %v711_v12, %v723_v13  ;;  %v818_v5 = vld [vmem:[#allocation2 + $0x1430] sm:$0xff] }
 0x2fa   :  { %5662 = vmatmul.mubr.bf16.vlgmr.msra.gmra.mrb[20].mxu0 %v14860_v40  ;;  %5744 = vmatmul.mubr.bf16.vlgmr.msra.gmra.mrb[20].mxu1 %v14860_v40  ;;  %v12176_v40 = vcombine.low %v615_v34, %v627_v37  ;;  %v12272_v37 = vcombine.low %v711_v12, %v723_v13 }
 0x2fb   :  { %5671 = vmatpush1.bf16.msra.mxu0 %v12126_v24  ;;  %5753 = vmatpush1.bf16.msra.mxu1 %v12128_v25  ;;  %v735_v24 = vld [vmem:[#allocation2 + $0x1198] sm:$0xff] }
 0x2fc   :  { %5672 = vmatprep.subr.bf16.mxu0 %v12151_v43  ;;  %5754 = vmatprep.subr.bf16.mxu1 %v12153_v26  ;;  %v747_v25 = vld [vmem:[#allocation2 + $0x11f8] sm:$0xff] }
 0x2fd   :  { %5702 = vmatprep.mubr.bf16.mxu0 %v14865_v42  ;;  %5784 = vmatprep.mubr.bf16.mxu1 %v14865_v42  ;;  %v12225_v42 = vcombine.high %v663_v60, %v675_v61  ;;  %v795_v60 = vld [vmem:[#allocation2 + $0x1378] sm:$0xff] }
 0x2fe   :  { %v12345_v3 = vcombine.high %v783_v59, %v795_v60 }
 0x2ff   :  { %5673 = vmatpush1.bf16.msra.mxu0 %v12150_v38  ;;  %5755 = vmatpush1.bf16.msra.mxu1 %v12152_v41  ;;  %v12295_v38 = vcombine.high %v734_v19, %v746_v21 }
 0x300   :  { %5674 = vmatprep.subr.bf16.mxu0 %v12175_v45  ;;  %5756 = vmatprep.subr.bf16.mxu1 %v12177_v46  ;;  %v12297_v45 = vcombine.high %v735_v24, %v747_v25  ;;  %v758_v46 = vld [vmem:[#allocation2 + $0x1250] sm:$0xff] }
 0x301   :  { %v12318_v61 = vcombine.low %v758_v46, %v770_v48 }
 0x303   :  { %5675 = vmatpush1.bf16.msra.mxu0 %v12174_v53  ;;  %5757 = vmatpush1.bf16.msra.mxu1 %v12176_v40  ;;  %v12296_v53 = vcombine.low %v735_v24, %v747_v25  ;;  %v12319_v40 = vcombine.high %v758_v46, %v770_v48 }
 0x304   :  { %5676 = vmatprep.subr.bf16.mxu0 %v12199_v55  ;;  %5758 = vmatprep.subr.bf16.mxu1 %v12201_v56  ;;  %v12321_v55 = vcombine.high %v759_v49, %v771_v50  ;;  %v782_v56 = vld [vmem:[#allocation2 + $0x1310] sm:$0xff] }
 0x305   :  { %v12342_v13 = vcombine.low %v782_v56, %v794_v57 }
 0x307   :  { %5677 = vmatpush1.bf16.msra.mxu0 %v12198_v63  ;;  %5759 = vmatpush1.bf16.msra.mxu1 %v12200_v0  ;;  %v12320_v0 = vcombine.low %v759_v49, %v771_v50  ;;  %v854_v49 = vld [vmem:[#allocation2 + $0x1550] sm:$0xff] }
 0x308   :  { %5678 = vmatprep.subr.bf16.mxu0 %v12223_v1  ;;  %5760 = vmatprep.subr.bf16.mxu1 %v12225_v42  ;;  %v12343_v1 = vcombine.high %v782_v56, %v794_v57  ;;  %v866_v50 = vld [vmem:[#allocation2 + $0x15b0] sm:$0xff] }
 0x30b   :  { %5679 = vmatpush1.bf16.msra.mxu0 %v12222_v6  ;;  %5761 = vmatpush1.bf16.msra.mxu1 %v12224_v7 }
 0x30c   :  { %5680 = vmatprep.subr.bf16.mxu0 %v12247_v8  ;;  %5762 = vmatprep.subr.bf16.mxu1 %v12249_v9  ;;  %v807_v8 = vld [vmem:[#allocation2 + $0x13d8] sm:$0xff] }
 0x30d   :  { %v5376_v17 = vpop.f32.mrb[12].mxu0  ;;  %v5458_v22 = vpop.f32.mrb[12].mxu1  ;;  %v819_v9 = vld [vmem:[#allocation2 + $0x1438] sm:$0xff] }
 0x30e   :  { %14582 = vtanh.f32 %v5376_v17  ;;  %v5378_v23 = vpop.f32.mrb[13].mxu0  ;;  %v5460_v43 = vpop.f32.mrb[13].mxu1  ;;  %v12367_v17 = vcombine.high %v806_v4, %v818_v5  ;;  %v12369_v21 = vcombine.high %v807_v8, %v819_v9 }
 0x30f   :  { %14584 = vtanh.f32 %v5458_v22  ;;  %v5380_v26 = vpop.f32.mrb[14].mxu0  ;;  %5681 = vmatpush1.bf16.msra.mxu0 %v12246_v14  ;;  %v5462_v32 = vpop.f32.mrb[14].mxu1  ;;  %5763 = vmatpush1.bf16.msra.mxu1 %v12248_v15  ;;  %v830_v22 = vld [vmem:[#allocation2 + $0x1490] sm:$0xff] }
 0x310   :  { %14586 = vtanh.f32 %v5378_v23  ;;  %v5381_v34 = vpop.f32.mrb[15].mxu0  ;;  %5682 = vmatprep.subr.bf16.mxu0 %v12271_v31  ;;  %v5463_v41 = vpop.f32.mrb[15].mxu1  ;;  %5764 = vmatprep.subr.bf16.mxu1 %v12273_v18  ;;  %v12344_v31 = vcombine.low %v783_v59, %v795_v60  ;;  %v842_v23 = vld [vmem:[#allocation2 + $0x14f0] sm:$0xff]  ;;  %v843_v26 = vld [vmem:[#allocation2 + $0x14f8] sm:$0xff]  ;;  %v12415_v60 = vcombine.high %v854_v49, %v866_v50 }
 0x311   :  { %14588 = vtanh.f32 %v5460_v43  ;;  %v831_v43 = vld [vmem:[#allocation2 + $0x1498] sm:$0xff]  ;;  %v12366_v34 = vcombine.low %v806_v4, %v818_v5  ;;  %v12368_v41 = vcombine.low %v807_v8, %v819_v9  ;;  %v12390_v56 = vcombine.low %v830_v22, %v842_v23  ;;  %v902_v9 = vld [vmem:[#allocation2 + $0x16d0] sm:$0xff] }
 0x312   :  { %v12393_v48 = vcombine.high %v831_v43, %v843_v26  ;;  %v12392_v59 = vcombine.low %v831_v43, %v843_v26  ;;  %v12414_v4 = vcombine.low %v854_v49, %v866_v50  ;;  %v13417_v49 = vld [vmem:[#allocation4 + $0x2c] ss:$16 sps:$4 sm:$0xff]   ;;  %v13412_v50 = vld [vmem:[#allocation4 + $0x20] ss:$16 sps:$4 sm:$0xff]  }
 0x313   :  { %5683 = vmatpush1.bf16.msra.mxu0 %v12270_v29  ;;  %5765 = vmatpush1.bf16.msra.mxu1 %v12272_v37 }
 0x314   :  { %5684 = vmatprep.subr.bf16.mxu0 %v12295_v38  ;;  %5766 = vmatprep.subr.bf16.mxu1 %v12297_v45  ;;  %v12391_v45 = vcombine.high %v830_v22, %v842_v23 }
 0x317   :  { %5685 = vmatpush1.bf16.msra.mxu0 %v12294_v52  ;;  %5767 = vmatpush1.bf16.msra.mxu1 %v12296_v53  ;;  %v855_v53 = vld [vmem:[#allocation2 + $0x1558] sm:$0xff] }
 0x318   :  { %v14583_v63 = vpop.eup %14582  ;;  %5686 = vmatprep.subr.bf16.mxu0 %v12319_v40  ;;  %5768 = vmatprep.subr.bf16.mxu1 %v12321_v55  ;;  %v867_v40 = vld [vmem:[#allocation2 + $0x15b8] sm:$0xff] }
 0x319   :  { %v14585_v42 = vpop.eup %14584  ;;  %v5829_v2 = vmul.f32 127.5, %v14583_v63  ;;  %v12417_v63 = vcombine.high %v855_v53, %v867_v40 }
 0x31a   :  { %v14587_v6 = vpop.eup %14586  ;;  %v5831_v7 = vmul.f32 127.5, %v14585_v42 }
 0x31b   :  { %v14589_v10 = vpop.eup %14588  ;;  %v5853_v11 = vadd.f32 128.0, %v5829_v2  ;;  %v5830_v12 = vmul.f32 127.5, %v14587_v6  ;;  %5687 = vmatpush1.bf16.msra.mxu0 %v12318_v61  ;;  %5769 = vmatpush1.bf16.msra.mxu1 %v12320_v0  ;;  %v878_v0 = vld [vmem:[#allocation2 + $0x1610] sm:$0xff]  ;;  %v879_v2 = vld [vmem:[#allocation2 + $0x1618] sm:$0xff]  ;;  %v12416_v6 = vcombine.low %v855_v53, %v867_v40 }
 0x31c   :  { %v5855_v14 = vadd.f32 128.0, %v5831_v7  ;;  %v5832_v15 = vmul.f32 127.5, %v14589_v10  ;;  %5688 = vmatprep.subr.bf16.mxu0 %v12343_v1  ;;  %5770 = vmatprep.subr.bf16.mxu1 %v12345_v3  ;;  %v890_v1 = vld [vmem:[#allocation2 + $0x1670] sm:$0xff]  ;;  %v891_v3 = vld [vmem:[#allocation2 + $0x1678] sm:$0xff] }
 0x31d   :  { %v5877_v18 = vmax.f32 %v5853_v11, 0.0  ;;  %v5854_v19 = vadd.f32 128.0, %v5830_v12  ;;  %v12439_v7 = vcombine.high %v878_v0, %v890_v1  ;;  %v12441_v8 = vcombine.high %v879_v2, %v891_v3  ;;  %v914_v10 = vld [vmem:[#allocation2 + $0x1730] sm:$0xff]  ;;  %v903_v11 = vld [vmem:[#allocation2 + $0x16d8] sm:$0xff] }
 0x31e   :  { %v5879_v24 = vmax.f32 %v5855_v14, 0.0  ;;  %v5856_v25 = vadd.f32 128.0, %v5832_v15  ;;  %v915_v12 = vld [vmem:[#allocation2 + $0x1738] sm:$0xff]  ;;  %v12440_v14 = vcombine.low %v879_v2, %v891_v3  ;;  %v12463_v15 = vcombine.high %v902_v9, %v914_v10  ;;  %v13420_v40 = vld [vmem:[#allocation4 + $0x44] ss:$16 sps:$4 sm:$0xff]  }
 0x31f   :  { %v14972_v29 = vmin.f32 %v5877_v18, 255.0  ;;  %v5878_v32 = vmax.f32 %v5854_v19, 0.0  ;;  %5689 = vmatpush1.bf16.msra.mxu0 %v12342_v13  ;;  %5771 = vmatpush1.bf16.msra.mxu1 %v12344_v31  ;;  %v12438_v13 = vcombine.low %v878_v0, %v890_v1  ;;  %v12465_v31 = vcombine.high %v903_v11, %v915_v12  ;;  %v938_v18 = vld [vmem:[#allocation2 + $0x17f0] sm:$0xff]  ;;  %v927_v19 = vld [vmem:[#allocation2 + $0x1798] sm:$0xff] }
 0x320   :  { %v14974_v37 = vmin.f32 %v5879_v24, 255.0  ;;  %v5880_v38 = vmax.f32 %v5856_v25, 0.0  ;;  %5690 = vmatprep.subr.bf16.mxu0 %v12367_v17  ;;  %5772 = vmatprep.subr.bf16.mxu1 %v12369_v21  ;;  %v926_v17 = vld [vmem:[#allocation2 + $0x1790] sm:$0xff]  ;;  %v939_v21 = vld [vmem:[#allocation2 + $0x17f8] sm:$0xff]  ;;  %v12462_v22 = vcombine.low %v902_v9, %v914_v10  ;;  %v12464_v23 = vcombine.low %v903_v11, %v915_v12 }
 0x321   :  { %v14976_v46 = vmin.f32 %v5878_v32, 255.0  ;;  %v12487_v24 = vcombine.high %v926_v17, %v938_v18  ;;  %v12489_v25 = vcombine.high %v927_v19, %v939_v21  ;;  %v12486_v43 = vcombine.low %v926_v17, %v938_v18  ;;  %v13408_v32 = vld [vmem:[#allocation4 + $0x4] ss:$16 sps:$4 sm:$0xff]   ;;  %v13415_v53 = vld [vmem:[#allocation4 + $0x28] ss:$16 sps:$4 sm:$0xff]  }
 0x322   :  { %v14978_v52 = vmin.f32 %v5880_v38, 255.0  ;;  %v12488_v26 = vcombine.low %v927_v19, %v939_v21  ;;  %v13406_v38 = vld [vmem:[#allocation4] ss:$16 sps:$4 sm:$0xff]   ;;  %v13433_v1 = vld [vmem:[#allocation4 + $0x88] ss:$16 sps:$4 sm:$0xff]  }
 0x323   :  { %v5988_v55 = vcombine.low %v14972_v29, %v14976_v46  ;;  %5691 = vmatpush1.bf16.msra.mxu0 %v12366_v34  ;;  %5773 = vmatpush1.bf16.msra.mxu1 %v12368_v41  ;;  %v13411_v34 = vld [vmem:[#allocation4 + $0xc] ss:$16 sps:$4 sm:$0xff]   ;;  %v13409_v41 = vld [vmem:[#allocation4 + $0x8] ss:$16 sps:$4 sm:$0xff]   ;;  %v13430_v0 = vld [vmem:[#allocation4 + $0x80] ss:$16 sps:$4 sm:$0xff]  }
 0x324   :  { %v5989_v57 = vcombine.low %v14974_v37, %v14978_v52  ;;  %5692 = vmatprep.subr.bf16.mxu0 %v12391_v45  ;;  %5774 = vmatprep.subr.bf16.mxu1 %v12393_v48  ;;  %v13414_v45 = vld [vmem:[#allocation4 + $0x24] ss:$16 sps:$4 sm:$0xff]   ;;  %v6052_v48 = vpack.c.bf16 %v14898_v35, %v14898_v35  ;;  %v13429_v35 = vld [vmem:[#allocation4 + $0x6c] ss:$16 sps:$4 sm:$0xff]   ;;  %v13436_v3 = vld [vmem:[#allocation4 + $0xa0] ss:$16 sps:$4 sm:$0xff]  }
 0x325   :  { %v5996_v61 = vrot.slane %v5988_v55, %v14901_v36  ;;  %v13423_v55 = vld [vmem:[#allocation4 + $0x4c] ss:$16 sps:$4 sm:$0xff]   ;;  %v13450_v9 = vld [vmem:[#allocation4 + $0xe4] ss:$16 sps:$4 sm:$0xff]   ;;  %v13448_v11 = vld [vmem:[#allocation4 + $0xe0] ss:$16 sps:$4 sm:$0xff]  }
 0x326   :  { %v6003_v42 = vrot.slane %v5989_v57, %v14901_v36  ;;  %v13421_v57 = vld [vmem:[#allocation4 + $0x48] ss:$16 sps:$4 sm:$0xff]   ;;  %v13441_v2 = vld [vmem:[#allocation4 + $0xac] ss:$16 sps:$4 sm:$0xff]   ;;  %v13462_v17 = vld [vmem:[#allocation4 + $0x124] ss:$16 sps:$4 sm:$0xff]  }
 0x327   :  { %5693 = vmatpush1.bf16.msra.mxu0 %v12390_v56  ;;  %5775 = vmatpush1.bf16.msra.mxu1 %v12392_v59  ;;  %v13418_v56 = vld [vmem:[#allocation4 + $0x40] ss:$16 sps:$4 sm:$0xff]   ;;  %v13426_v59 = vld [vmem:[#allocation4 + $0x64] ss:$16 sps:$4 sm:$0xff]   ;;  %v13453_v10 = vld [vmem:[#allocation4 + $0xec] ss:$16 sps:$4 sm:$0xff]  }
 0x328   :  { %v6004_v5 = vcombine.low %v5996_v61, %v6003_v42  ;;  %5694 = vmatprep.subr.bf16.mxu0 %v12415_v60  ;;  %5776 = vmatprep.subr.bf16.mxu1 %v12417_v63  ;;  %v13427_v60 = vld [vmem:[#allocation4 + $0x68] ss:$16 sps:$4 sm:$0xff]   ;;  %v13432_v61 = vld [vmem:[#allocation4 + $0x84] ss:$16 sps:$4 sm:$0xff]   ;;  %v13435_v63 = vld [vmem:[#allocation4 + $0x8c] ss:$16 sps:$4 sm:$0xff]  }
 0x329   :  { %v13438_v42 = vld [vmem:[#allocation4 + $0xa4] ss:$16 sps:$4 sm:$0xff]   ;;  %v13451_v12 = vld [vmem:[#allocation4 + $0xe8] ss:$16 sps:$4 sm:$0xff]   ;;  %v13465_v18 = vld [vmem:[#allocation4 + $0x12c] ss:$16 sps:$4 sm:$0xff]  }
 0x32a   :  { %6048 = vst [vmem:[%s15086_s4 + $0x18] sm:$0xff] %v6004_v5  ;;  %v13444_v5 = vld [vmem:[#allocation4 + $0xc4] ss:$16 sps:$4 sm:$0xff]   ;;  %v13460_v19 = vld [vmem:[#allocation4 + $0x120] ss:$16 sps:$4 sm:$0xff]  }
 0x32b   :  { %5695 = vmatpush1.bf16.msra.mxu0 %v12414_v4  ;;  %5777 = vmatpush1.bf16.msra.mxu1 %v12416_v6  ;;  %v13439_v4 = vld [vmem:[#allocation4 + $0xa8] ss:$16 sps:$4 sm:$0xff]   ;;  %v13447_v6 = vld [vmem:[#allocation4 + $0xcc] ss:$16 sps:$4 sm:$0xff]  }
 0x32c   :  { %5696 = vmatprep.subr.bf16.mxu0 %v12439_v7  ;;  %5778 = vmatprep.subr.bf16.mxu1 %v12441_v8  ;;  %v13442_v7 = vld [vmem:[#allocation4 + $0xc0] ss:$16 sps:$4 sm:$0xff]   ;;  %v13445_v8 = vld [vmem:[#allocation4 + $0xc8] ss:$16 sps:$4 sm:$0xff]  }
 0x32d   :  { %v13463_v21 = vld [vmem:[#allocation4 + $0x128] ss:$16 sps:$4 sm:$0xff]  }
 0x32f   :  { %5697 = vmatpush1.bf16.msra.mxu0 %v12438_v13  ;;  %5779 = vmatpush1.bf16.msra.mxu1 %v12440_v14  ;;  %v13456_v13 = vld [vmem:[#allocation4 + $0x104] ss:$16 sps:$4 sm:$0xff]   ;;  %v13459_v14 = vld [vmem:[#allocation4 + $0x10c] ss:$16 sps:$4 sm:$0xff]  }
 0x330   :  { %5698 = vmatprep.subr.bf16.mxu0 %v12463_v15  ;;  %5780 = vmatprep.subr.bf16.mxu1 %v12465_v31  ;;  %v13454_v15 = vld [vmem:[#allocation4 + $0x100] ss:$16 sps:$4 sm:$0xff]   ;;  %v13457_v31 = vld [vmem:[#allocation4 + $0x108] ss:$16 sps:$4 sm:$0xff]  }
 0x333   :  { %5699 = vmatpush1.bf16.msra.mxu0 %v12462_v22  ;;  %5781 = vmatpush1.bf16.msra.mxu1 %v12464_v23  ;;  %v13468_v22 = vld [vmem:[#allocation4 + $0x144] ss:$16 sps:$4 sm:$0xff]   ;;  %v13471_v23 = vld [vmem:[#allocation4 + $0x14c] ss:$16 sps:$4 sm:$0xff]  }
 0x334   :  { %5700 = vmatprep.subr.bf16.mxu0 %v12487_v24  ;;  %5782 = vmatprep.subr.bf16.mxu1 %v12489_v25  ;;  %v13466_v24 = vld [vmem:[#allocation4 + $0x140] ss:$16 sps:$4 sm:$0xff]   ;;  %v13469_v25 = vld [vmem:[#allocation4 + $0x148] ss:$16 sps:$4 sm:$0xff]  }
 0x337   :  { %5701 = vmatpush1.bf16.msra.mxu0 %v12486_v43  ;;  %5783 = vmatpush1.bf16.msra.mxu1 %v12488_v26  ;;  %v13474_v43 = vld [vmem:[#allocation4 + $0x164] ss:$16 sps:$4 sm:$0xff]   ;;  %v13477_v26 = vld [vmem:[#allocation4 + $0x16c] ss:$16 sps:$4 sm:$0xff]  }
 0x338   :  { %10705 = vmatprep.subr.bf16.mxu0 %v13408_v32  ;;  %11197 = vmatprep.subr.bf16.mxu1 %v13411_v34  ;;  %v13472_v32 = vld [vmem:[#allocation4 + $0x160] ss:$16 sps:$4 sm:$0xff]   ;;  %v13475_v34 = vld [vmem:[#allocation4 + $0x168] ss:$16 sps:$4 sm:$0xff]  }
 0x33a   :  { %5703 = vmatmul.mubr.bf16.vlgmr.msra.gmra.mrb[20].mxu0 %v14874_v16  ;;  %5785 = vmatmul.mubr.bf16.vlgmr.msra.gmra.mrb[20].mxu1 %v14874_v16  ;;  %v13424_v16 = vld [vmem:[#allocation4 + $0x60] ss:$16 sps:$4 sm:$0xff]  }
 0x33b   :  { %10706 = vmatpush1.bf16.msra.mxu0 %v13406_v38  ;;  %10737 = vmatprep.mubr.bf16.mxu0 %v6052_v48  ;;  %v13480_v38 = vld [vmem:[#allocation4 + $0x184] ss:$16 sps:$4 sm:$0xff]  }
 0x33c   :  { %11198 = vmatpush1.bf16.msra.mxu1 %v13409_v41  ;;  %11229 = vmatprep.mubr.bf16.mxu1 %v6052_v48  ;;  %v13483_v41 = vld [vmem:[#allocation4 + $0x18c] ss:$16 sps:$4 sm:$0xff]   ;;  %v13481_v48 = vld [vmem:[#allocation4 + $0x188] ss:$16 sps:$4 sm:$0xff]  }
 0x33d   :  { %10707 = vmatprep.subr.bf16.mxu0 %v13414_v45  ;;  %11199 = vmatprep.subr.bf16.mxu1 %v13417_v49  ;;  %v13478_v45 = vld [vmem:[#allocation4 + $0x180] ss:$16 sps:$4 sm:$0xff]   ;;  %v13486_v49 = vld [vmem:[#allocation4 + $0x1a4] ss:$16 sps:$4 sm:$0xff]  }
 0x33f   :  { %10708 = vmatpush1.bf16.msra.mxu0 %v13412_v50  ;;  %v13489_v50 = vld [vmem:[#allocation4 + $0x1ac] ss:$16 sps:$4 sm:$0xff]  }
 0x340   :  { %11200 = vmatpush1.bf16.msra.mxu1 %v13415_v53  ;;  %10709 = vmatprep.subr.bf16.mxu0 %v13420_v40  ;;  %v13484_v53 = vld [vmem:[#allocation4 + $0x1a0] ss:$16 sps:$4 sm:$0xff]   ;;  %v13487_v40 = vld [vmem:[#allocation4 + $0x1a8] ss:$16 sps:$4 sm:$0xff]  }
 0x341   :  { %11201 = vmatprep.subr.bf16.mxu1 %v13423_v55  ;;  %v13492_v55 = vld [vmem:[#allocation4 + $0x1c4] ss:$16 sps:$4 sm:$0xff]  }
 0x343   :  { %10710 = vmatpush1.bf16.msra.mxu0 %v13418_v56  ;;  %v13495_v56 = vld [vmem:[#allocation4 + $0x1cc] ss:$16 sps:$4 sm:$0xff]  }
 0x344   :  { %11202 = vmatpush1.bf16.msra.mxu1 %v13421_v57  ;;  %10711 = vmatprep.subr.bf16.mxu0 %v13426_v59  ;;  %v13490_v57 = vld [vmem:[#allocation4 + $0x1c0] ss:$16 sps:$4 sm:$0xff]   ;;  %v13493_v59 = vld [vmem:[#allocation4 + $0x1c8] ss:$16 sps:$4 sm:$0xff]  }
 0x345   :  { %11203 = vmatprep.subr.bf16.mxu1 %v13429_v35  ;;  %v13498_v35 = vld [vmem:[#allocation4 + $0x1e4] ss:$16 sps:$4 sm:$0xff]  }
 0x347   :  { %10712 = vmatpush1.bf16.msra.mxu0 %v13424_v16  ;;  %v13501_v16 = vld [vmem:[#allocation4 + $0x1ec] ss:$16 sps:$4 sm:$0xff]  }
 0x348   :  { %11204 = vmatpush1.bf16.msra.mxu1 %v13427_v60  ;;  %10713 = vmatprep.subr.bf16.mxu0 %v13432_v61  ;;  %v13496_v60 = vld [vmem:[#allocation4 + $0x1e0] ss:$16 sps:$4 sm:$0xff]   ;;  %v13499_v61 = vld [vmem:[#allocation4 + $0x1e8] ss:$16 sps:$4 sm:$0xff]  }
 0x349   :  { %11205 = vmatprep.subr.bf16.mxu1 %v13435_v63  ;;  %v13504_v63 = vld [vmem:[#allocation4 + $0x204] ss:$16 sps:$4 sm:$0xff]  }
 0x34b   :  { %10714 = vmatpush1.bf16.msra.mxu0 %v13430_v0  ;;  %v13507_v0 = vld [vmem:[#allocation4 + $0x20c] ss:$16 sps:$4 sm:$0xff]  }
 0x34c   :  { %11206 = vmatpush1.bf16.msra.mxu1 %v13433_v1  ;;  %10715 = vmatprep.subr.bf16.mxu0 %v13438_v42  ;;  %v13502_v1 = vld [vmem:[#allocation4 + $0x200] ss:$16 sps:$4 sm:$0xff]   ;;  %v6051_v42 = vpack.c.bf16 %v14894_v27, %v14894_v27  ;;  %v13519_v27 = vld [vmem:[#allocation4 + $0x24c] ss:$16 sps:$4 sm:$0xff]  }
 0x34d   :  { %11207 = vmatprep.subr.bf16.mxu1 %v13441_v2  ;;  %v13505_v2 = vld [vmem:[#allocation4 + $0x208] ss:$16 sps:$4 sm:$0xff]  }
 0x34f   :  { %10716 = vmatpush1.bf16.msra.mxu0 %v13436_v3  ;;  %v13510_v3 = vld [vmem:[#allocation4 + $0x224] ss:$16 sps:$4 sm:$0xff]  }
 0x350   :  { %11208 = vmatpush1.bf16.msra.mxu1 %v13439_v4  ;;  %10717 = vmatprep.subr.bf16.mxu0 %v13444_v5  ;;  %v6054_v4 = vpack.c.bf16 %v14903_v44, %v14903_v44  ;;  %v13513_v5 = vld [vmem:[#allocation4 + $0x22c] ss:$16 sps:$4 sm:$0xff]  }
 0x351   :  { %11209 = vmatprep.subr.bf16.mxu1 %v13447_v6  ;;  %v13508_v6 = vld [vmem:[#allocation4 + $0x220] ss:$16 sps:$4 sm:$0xff]   ;;  %v13525_v44 = vld [vmem:[#allocation4 + $0x26c] ss:$16 sps:$4 sm:$0xff]  }
 0x353   :  { %10718 = vmatpush1.bf16.msra.mxu0 %v13442_v7  ;;  %v13511_v7 = vld [vmem:[#allocation4 + $0x228] ss:$16 sps:$4 sm:$0xff]  }
 0x354   :  { %11210 = vmatpush1.bf16.msra.mxu1 %v13445_v8  ;;  %10719 = vmatprep.subr.bf16.mxu0 %v13450_v9  ;;  %v13516_v8 = vld [vmem:[#allocation4 + $0x244] ss:$16 sps:$4 sm:$0xff]   ;;  %v13514_v9 = vld [vmem:[#allocation4 + $0x240] ss:$16 sps:$4 sm:$0xff]  }
 0x355   :  { %11211 = vmatprep.subr.bf16.mxu1 %v13453_v10  ;;  %v13517_v10 = vld [vmem:[#allocation4 + $0x248] ss:$16 sps:$4 sm:$0xff]  }
 0x357   :  { %10720 = vmatpush1.bf16.msra.mxu0 %v13448_v11  ;;  %v13522_v11 = vld [vmem:[#allocation4 + $0x264] ss:$16 sps:$4 sm:$0xff]  }
 0x358   :  { %11212 = vmatpush1.bf16.msra.mxu1 %v13451_v12  ;;  %10721 = vmatprep.subr.bf16.mxu0 %v13456_v13  ;;  %v13520_v12 = vld [vmem:[#allocation4 + $0x260] ss:$16 sps:$4 sm:$0xff]   ;;  %v13523_v13 = vld [vmem:[#allocation4 + $0x268] ss:$16 sps:$4 sm:$0xff]  }
 0x359   :  { %11213 = vmatprep.subr.bf16.mxu1 %v13459_v14  ;;  %v13528_v14 = vld [vmem:[#allocation4 + $0x284] ss:$16 sps:$4 sm:$0xff]  }
 0x35b   :  { %10722 = vmatpush1.bf16.msra.mxu0 %v13454_v15  ;;  %v13531_v15 = vld [vmem:[#allocation4 + $0x28c] ss:$16 sps:$4 sm:$0xff]  }
 0x35c   :  { %11214 = vmatpush1.bf16.msra.mxu1 %v13457_v31  ;;  %10723 = vmatprep.subr.bf16.mxu0 %v13462_v17  ;;  %v13526_v31 = vld [vmem:[#allocation4 + $0x280] ss:$16 sps:$4 sm:$0xff]   ;;  %v13529_v17 = vld [vmem:[#allocation4 + $0x288] ss:$16 sps:$4 sm:$0xff]  }
 0x35d   :  { %11215 = vmatprep.subr.bf16.mxu1 %v13465_v18  ;;  %v13534_v18 = vld [vmem:[#allocation4 + $0x2a4] ss:$16 sps:$4 sm:$0xff]  }
 0x35f   :  { %10724 = vmatpush1.bf16.msra.mxu0 %v13460_v19  ;;  %v13537_v19 = vld [vmem:[#allocation4 + $0x2ac] ss:$16 sps:$4 sm:$0xff]  }
 0x360   :  { %11216 = vmatpush1.bf16.msra.mxu1 %v13463_v21  ;;  %10725 = vmatprep.subr.bf16.mxu0 %v13468_v22  ;;  %v13532_v21 = vld [vmem:[#allocation4 + $0x2a0] ss:$16 sps:$4 sm:$0xff]   ;;  %v13535_v22 = vld [vmem:[#allocation4 + $0x2a8] ss:$16 sps:$4 sm:$0xff]  }
 0x361   :  { %11217 = vmatprep.subr.bf16.mxu1 %v13471_v23  ;;  %v13540_v23 = vld [vmem:[#allocation4 + $0x2c4] ss:$16 sps:$4 sm:$0xff]  }
 0x363   :  { %10726 = vmatpush1.bf16.msra.mxu0 %v13466_v24 }
 0x364   :  { %11218 = vmatpush1.bf16.msra.mxu1 %v13469_v25  ;;  %10727 = vmatprep.subr.bf16.mxu0 %v13474_v43  ;;  %v13543_v25 = vld [vmem:[#allocation4 + $0x2cc] ss:$16 sps:$4 sm:$0xff]  }
 0x365   :  { %11219 = vmatprep.subr.bf16.mxu1 %v13477_v26 }
 0x367   :  { %10728 = vmatpush1.bf16.msra.mxu0 %v13472_v32 }
 0x368   :  { %11220 = vmatpush1.bf16.msra.mxu1 %v13475_v34  ;;  %10729 = vmatprep.subr.bf16.mxu0 %v13480_v38  ;;  %v13538_v38 = vld [vmem:[#allocation4 + $0x2c0] ss:$16 sps:$4 sm:$0xff]  }
 0x369   :  { %11221 = vmatprep.subr.bf16.mxu1 %v13483_v41 }
 0x36b   :  { %10730 = vmatpush1.bf16.msra.mxu0 %v13478_v45 }
 0x36c   :  { %11222 = vmatpush1.bf16.msra.mxu1 %v13481_v48  ;;  %10731 = vmatprep.subr.bf16.mxu0 %v13486_v49  ;;  %v13541_v48 = vld [vmem:[#allocation4 + $0x2c8] ss:$16 sps:$4 sm:$0xff]   ;;  %v13546_v49 = vld [vmem:[#allocation4 + $0x2e4] ss:$16 sps:$4 sm:$0xff]  }
 0x36d   :  { %11223 = vmatprep.subr.bf16.mxu1 %v13489_v50 }
 0x36f   :  { %10732 = vmatpush1.bf16.msra.mxu0 %v13484_v53  ;;  %v13549_v53 = vld [vmem:[#allocation4 + $0x2ec] ss:$16 sps:$4 sm:$0xff]  }
 0x370   :  { %11224 = vmatpush1.bf16.msra.mxu1 %v13487_v40  ;;  %10733 = vmatprep.subr.bf16.mxu0 %v13492_v55  ;;  %v13544_v40 = vld [vmem:[#allocation4 + $0x2e0] ss:$16 sps:$4 sm:$0xff]   ;;  %v13547_v55 = vld [vmem:[#allocation4 + $0x2e8] ss:$16 sps:$4 sm:$0xff]  }
 0x371   :  { %11225 = vmatprep.subr.bf16.mxu1 %v13495_v56  ;;  %v13552_v56 = vld [vmem:[#allocation4 + $0x304] ss:$16 sps:$4 sm:$0xff]  }
 0x373   :  { %10734 = vmatpush1.bf16.msra.mxu0 %v13490_v57  ;;  %v13555_v57 = vld [vmem:[#allocation4 + $0x30c] ss:$16 sps:$4 sm:$0xff]  }
 0x374   :  { %11226 = vmatpush1.bf16.msra.mxu1 %v13493_v59  ;;  %10735 = vmatprep.subr.bf16.mxu0 %v13498_v35  ;;  %v13550_v59 = vld [vmem:[#allocation4 + $0x300] ss:$16 sps:$4 sm:$0xff]  }
 0x375   :  { %11227 = vmatprep.subr.bf16.mxu1 %v13501_v16  ;;  %v13553_v16 = vld [vmem:[#allocation4 + $0x308] ss:$16 sps:$4 sm:$0xff]  }
 0x377   :  { %10736 = vmatpush1.bf16.msra.mxu0 %v13496_v60  ;;  %v13558_v60 = vld [vmem:[#allocation4 + $0x324] ss:$16 sps:$4 sm:$0xff]  }
 0x378   :  { %11228 = vmatpush1.bf16.msra.mxu1 %v13499_v61  ;;  %10746 = vmatprep.subr.bf16.mxu0 %v13504_v63 }
 0x379   :  { %11238 = vmatprep.subr.bf16.mxu1 %v13507_v0  ;;  %v13561_v0 = vld [vmem:[#allocation4 + $0x32c] ss:$16 sps:$4 sm:$0xff]  }
 0x37a   :  { %10738 = vmatmul.mubr.bf16.vlgmr.msra.gmra.mrb[24].mxu0 %v6051_v42 }
 0x37b   :  { %11230 = vmatmul.mubr.bf16.vlgmr.msra.gmra.mrb[24].mxu1 %v6051_v42  ;;  %10747 = vmatpush1.bf16.msra.mxu0 %v13502_v1 }
 0x37c   :  { %10778 = vmatprep.mubr.bf16.mxu0 %v6054_v4  ;;  %11239 = vmatpush1.bf16.msra.mxu1 %v13505_v2 }
 0x37d   :  { %11270 = vmatprep.mubr.bf16.mxu1 %v6054_v4  ;;  %10748 = vmatprep.subr.bf16.mxu0 %v13510_v3 }
 0x37e   :  { %11240 = vmatprep.subr.bf16.mxu1 %v13513_v5  ;;  %v13556_v5 = vld [vmem:[#allocation4 + $0x320] ss:$16 sps:$4 sm:$0xff]  }
 0x37f   :  { %10749 = vmatpush1.bf16.msra.mxu0 %v13508_v6 }
 0x380   :  { %11241 = vmatpush1.bf16.msra.mxu1 %v13511_v7  ;;  %10750 = vmatprep.subr.bf16.mxu0 %v13516_v8  ;;  %v13559_v8 = vld [vmem:[#allocation4 + $0x328] ss:$16 sps:$4 sm:$0xff]  }
 0x381   :  { %11242 = vmatprep.subr.bf16.mxu1 %v13519_v27  ;;  %v13564_v27 = vld [vmem:[#allocation4 + $0x344] ss:$16 sps:$4 sm:$0xff]  }
 0x383   :  { %10751 = vmatpush1.bf16.msra.mxu0 %v13514_v9 }
 0x384   :  { %11243 = vmatpush1.bf16.msra.mxu1 %v13517_v10  ;;  %10752 = vmatprep.subr.bf16.mxu0 %v13522_v11  ;;  %v13567_v11 = vld [vmem:[#allocation4 + $0x34c] ss:$16 sps:$4 sm:$0xff]  }
 0x385   :  { %11244 = vmatprep.subr.bf16.mxu1 %v13525_v44 }
 0x387   :  { %10753 = vmatpush1.bf16.msra.mxu0 %v13520_v12 }
 0x388   :  { %11245 = vmatpush1.bf16.msra.mxu1 %v13523_v13  ;;  %10754 = vmatprep.subr.bf16.mxu0 %v13528_v14 }
 0x389   :  { %11246 = vmatprep.subr.bf16.mxu1 %v13531_v15  ;;  %v13562_v15 = vld [vmem:[#allocation4 + $0x340] ss:$16 sps:$4 sm:$0xff]  }
 0x38b   :  { %10755 = vmatpush1.bf16.msra.mxu0 %v13526_v31 }
 0x38c   :  { %11247 = vmatpush1.bf16.msra.mxu1 %v13529_v17  ;;  %10756 = vmatprep.subr.bf16.mxu0 %v13534_v18  ;;  %v13565_v18 = vld [vmem:[#allocation4 + $0x348] ss:$16 sps:$4 sm:$0xff]  }
 0x38d   :  { %v5540_v24 = vpop.f32.mrb[16].mxu0  ;;  %11248 = vmatprep.subr.bf16.mxu1 %v13537_v19  ;;  %v5622_v43 = vpop.f32.mrb[16].mxu1  ;;  %v13570_v19 = vld [vmem:[#allocation4 + $0x364] ss:$16 sps:$4 sm:$0xff]  }
 0x38e   :  { %14590 = vtanh.f32 %v5540_v24  ;;  %v5542_v26 = vpop.f32.mrb[17].mxu0  ;;  %v5624_v32 = vpop.f32.mrb[17].mxu1 }
 0x38f   :  { %14592 = vtanh.f32 %v5622_v43  ;;  %v5544_v34 = vpop.f32.mrb[18].mxu0  ;;  %10757 = vmatpush1.bf16.msra.mxu0 %v13532_v21  ;;  %v5626_v41 = vpop.f32.mrb[18].mxu1 }
 0x390   :  { %14594 = vtanh.f32 %v5542_v26  ;;  %11249 = vmatpush1.bf16.msra.mxu1 %v13535_v22  ;;  %v5545_v45 = vpop.f32.mrb[19].mxu0  ;;  %10758 = vmatprep.subr.bf16.mxu0 %v13540_v23  ;;  %v5627_v50 = vpop.f32.mrb[19].mxu1  ;;  %v13573_v22 = vld [vmem:[#allocation4 + $0x36c] ss:$16 sps:$4 sm:$0xff]   ;;  %v13571_v26 = vld [vmem:[#allocation4 + $0x368] ss:$16 sps:$4 sm:$0xff]  }
 0x391   :  { %14596 = vtanh.f32 %v5624_v32  ;;  %11250 = vmatprep.subr.bf16.mxu1 %v13543_v25  ;;  %v13568_v25 = vld [vmem:[#allocation4 + $0x360] ss:$16 sps:$4 sm:$0xff]   ;;  %v13576_v32 = vld [vmem:[#allocation4 + $0x384] ss:$16 sps:$4 sm:$0xff]  }
 0x392   :  { %v13574_v45 = vld [vmem:[#allocation4 + $0x380] ss:$16 sps:$4 sm:$0xff]   ;;  %v13582_v50 = vld [vmem:[#allocation4 + $0x3a4] ss:$16 sps:$4 sm:$0xff]  }
 0x393   :  { %10759 = vmatpush1.bf16.msra.mxu0 %v13538_v38  ;;  %v13579_v38 = vld [vmem:[#allocation4 + $0x38c] ss:$16 sps:$4 sm:$0xff]  }
 0x394   :  { %11251 = vmatpush1.bf16.msra.mxu1 %v13541_v48  ;;  %10760 = vmatprep.subr.bf16.mxu0 %v13546_v49  ;;  %v13577_v49 = vld [vmem:[#allocation4 + $0x388] ss:$16 sps:$4 sm:$0xff]  }
 0x395   :  { %11252 = vmatprep.subr.bf16.mxu1 %v13549_v53  ;;  %v13585_v53 = vld [vmem:[#allocation4 + $0x3ac] ss:$16 sps:$4 sm:$0xff]  }
 0x397   :  { %10761 = vmatpush1.bf16.msra.mxu0 %v13544_v40  ;;  %v13580_v40 = vld [vmem:[#allocation4 + $0x3a0] ss:$16 sps:$4 sm:$0xff]  }
 0x398   :  { %v14591_v35 = vpop.eup %14590  ;;  %11253 = vmatpush1.bf16.msra.mxu1 %v13547_v55  ;;  %10762 = vmatprep.subr.bf16.mxu0 %v13552_v56  ;;  %v13583_v55 = vld [vmem:[#allocation4 + $0x3a8] ss:$16 sps:$4 sm:$0xff]   ;;  %v13588_v56 = vld [vmem:[#allocation4 + $0x3c4] ss:$16 sps:$4 sm:$0xff]  }
 0x399   :  { %v14593_v61 = vpop.eup %14592  ;;  %v5833_v63 = vmul.f32 127.5, %v14591_v35  ;;  %11254 = vmatprep.subr.bf16.mxu1 %v13555_v57  ;;  %v13591_v57 = vld [vmem:[#allocation4 + $0x3cc] ss:$16 sps:$4 sm:$0xff]   ;;  %v13589_v35 = vld [vmem:[#allocation4 + $0x3c8] ss:$16 sps:$4 sm:$0xff]  }
 0x39a   :  { %v14595_v1 = vpop.eup %14594  ;;  %v5835_v42 = vmul.f32 127.5, %v14593_v61  ;;  %v13592_v61 = vld [vmem:[#allocation4 + $0x3e0] ss:$16 sps:$4 sm:$0xff]  }
 0x39b   :  { %v14597_v2 = vpop.eup %14596  ;;  %v5857_v3 = vadd.f32 128.0, %v5833_v63  ;;  %v5834_v4 = vmul.f32 127.5, %v14595_v1  ;;  %10763 = vmatpush1.bf16.msra.mxu0 %v13550_v59  ;;  %v13586_v59 = vld [vmem:[#allocation4 + $0x3c0] ss:$16 sps:$4 sm:$0xff]   ;;  %v13595_v63 = vld [vmem:[#allocation4 + $0x3e8] ss:$16 sps:$4 sm:$0xff]  }
 0x39c   :  { %v5859_v6 = vadd.f32 128.0, %v5835_v42  ;;  %v5836_v7 = vmul.f32 127.5, %v14597_v2  ;;  %11255 = vmatpush1.bf16.msra.mxu1 %v13553_v16  ;;  %10764 = vmatprep.subr.bf16.mxu0 %v13558_v60  ;;  %v13594_v16 = vld [vmem:[#allocation4 + $0x3e4] ss:$16 sps:$4 sm:$0xff]   ;;  %v13597_v60 = vld [vmem:[#allocation4 + $0x3ec] ss:$16 sps:$4 sm:$0xff]   ;;  %v6053_v2 = vpack.c.bf16 %v14896_v30, %v14896_v30 }
 0x39d   :  { %v5881_v9 = vmax.f32 %v5857_v3, 0.0  ;;  %v5858_v10 = vadd.f32 128.0, %v5834_v4  ;;  %11256 = vmatprep.subr.bf16.mxu1 %v13561_v0  ;;  %v13600_v0 = vld [vmem:[#allocation4 + $0x404] ss:$16 sps:$4 sm:$0xff]   ;;  %v13603_v1 = vld [vmem:[#allocation4 + $0x40c] ss:$16 sps:$4 sm:$0xff]  }
 0x39e   :  { %v5883_v44 = vmax.f32 %v5859_v6, 0.0  ;;  %v5860_v12 = vadd.f32 128.0, %v5836_v7  ;;  %v13598_v42 = vld [vmem:[#allocation4 + $0x400] ss:$16 sps:$4 sm:$0xff]   ;;  %v13601_v3 = vld [vmem:[#allocation4 + $0x408] ss:$16 sps:$4 sm:$0xff]  }
 0x39f   :  { %v14997_v13 = vmin.f32 %v5881_v9, 255.0  ;;  %v5882_v14 = vmax.f32 %v5858_v10, 0.0  ;;  %10765 = vmatpush1.bf16.msra.mxu0 %v13556_v5  ;;  %v13606_v4 = vld [vmem:[#allocation4 + $0x424] ss:$16 sps:$4 sm:$0xff]   ;;  %v6056_v5 = vpack.c.bf16 %v14926_v58, %v14926_v58  ;;  %v13609_v6 = vld [vmem:[#allocation4 + $0x42c] ss:$16 sps:$4 sm:$0xff]  }
 0x3a0   :  { %v14999_v31 = vmin.f32 %v5883_v44, 255.0  ;;  %v5884_v17 = vmax.f32 %v5860_v12, 0.0  ;;  %11257 = vmatpush1.bf16.msra.mxu1 %v13559_v8  ;;  %10766 = vmatprep.subr.bf16.mxu0 %v13564_v27  ;;  %v13604_v7 = vld [vmem:[#allocation4 + $0x420] ss:$16 sps:$4 sm:$0xff]   ;;  %v13607_v8 = vld [vmem:[#allocation4 + $0x428] ss:$16 sps:$4 sm:$0xff]  }
 0x3a1   :  { %v15001_v21 = vmin.f32 %v5882_v14, 255.0  ;;  %11258 = vmatprep.subr.bf16.mxu1 %v13567_v11  ;;  %v13612_v27 = vld [vmem:[#allocation4 + $0x444] ss:$16 sps:$4 sm:$0xff]   ;;  %v13615_v30 = vld [vmem:[#allocation4 + $0x44c] ss:$16 sps:$4 sm:$0xff]  }
 0x3a2   :  { %v15003_v23 = vmin.f32 %v5884_v17, 255.0  ;;  %v13610_v9 = vld [vmem:[#allocation4 + $0x440] ss:$16 sps:$4 sm:$0xff]   ;;  %v13613_v10 = vld [vmem:[#allocation4 + $0x448] ss:$16 sps:$4 sm:$0xff]  }
 0x3a3   :  { %v6005_v24 = vcombine.low %v14997_v13, %v15001_v21  ;;  %10767 = vmatpush1.bf16.msra.mxu0 %v13562_v15  ;;  %v13618_v11 = vld [vmem:[#allocation4 + $0x464] ss:$16 sps:$4 sm:$0xff]   ;;  %v13621_v58 = vld [vmem:[#allocation4 + $0x46c] ss:$16 sps:$4 sm:$0xff]   ;;  %v13616_v44 = vld [vmem:[#allocation4 + $0x460] ss:$16 sps:$4 sm:$0xff]  }
 0x3a4   :  { %v6006_v43 = vcombine.low %v14999_v31, %v15003_v23  ;;  %11259 = vmatpush1.bf16.msra.mxu1 %v13565_v18  ;;  %10768 = vmatprep.subr.bf16.mxu0 %v13570_v19  ;;  %v13619_v12 = vld [vmem:[#allocation4 + $0x468] ss:$16 sps:$4 sm:$0xff]   ;;  %v13624_v14 = vld [vmem:[#allocation4 + $0x484] ss:$16 sps:$4 sm:$0xff]   ;;  %v13627_v15 = vld [vmem:[#allocation4 + $0x48c] ss:$16 sps:$4 sm:$0xff]  }
 0x3a5   :  { %v6013_v34 = vrot.slane %v6005_v24, %v14901_v36  ;;  %11260 = vmatprep.subr.bf16.mxu1 %v13573_v22  ;;  %v13622_v17 = vld [vmem:[#allocation4 + $0x480] ss:$16 sps:$4 sm:$0xff]   ;;  %v13625_v18 = vld [vmem:[#allocation4 + $0x488] ss:$16 sps:$4 sm:$0xff]   ;;  %v13630_v19 = vld [vmem:[#allocation4 + $0x4a4] ss:$16 sps:$4 sm:$0xff]  }
 0x3a6   :  { %v6020_v41 = vrot.slane %v6006_v43, %v14901_v36  ;;  %v13633_v22 = vld [vmem:[#allocation4 + $0x4ac] ss:$16 sps:$4 sm:$0xff]   ;;  %v13628_v24 = vld [vmem:[#allocation4 + $0x4a0] ss:$16 sps:$4 sm:$0xff]   ;;  %v13636_v43 = vld [vmem:[#allocation4 + $0x4c4] ss:$16 sps:$4 sm:$0xff]  }
 0x3a7   :  { %10769 = vmatpush1.bf16.msra.mxu0 %v13568_v25  ;;  %v13631_v25 = vld [vmem:[#allocation4 + $0x4a8] ss:$16 sps:$4 sm:$0xff]  }
 0x3a8   :  { %v6021_v48 = vcombine.low %v6013_v34, %v6020_v41  ;;  %11261 = vmatpush1.bf16.msra.mxu1 %v13571_v26  ;;  %10770 = vmatprep.subr.bf16.mxu0 %v13576_v32  ;;  %v13639_v26 = vld [vmem:[#allocation4 + $0x4cc] ss:$16 sps:$4 sm:$0xff]   ;;  %v13634_v32 = vld [vmem:[#allocation4 + $0x4c0] ss:$16 sps:$4 sm:$0xff]   ;;  %v13637_v34 = vld [vmem:[#allocation4 + $0x4c8] ss:$16 sps:$4 sm:$0xff]  }
 0x3a9   :  { %11262 = vmatprep.subr.bf16.mxu1 %v13579_v38  ;;  %v13642_v38 = vld [vmem:[#allocation4 + $0x4e4] ss:$16 sps:$4 sm:$0xff]   ;;  %v13645_v41 = vld [vmem:[#allocation4 + $0x4ec] ss:$16 sps:$4 sm:$0xff]  }
 0x3aa   :  { %6049 = vst [vmem:[%s15086_s4 + $0x20] sm:$0xff] %v6021_v48  ;;  %v13643_v48 = vld [vmem:[#allocation4 + $0x4e8] ss:$16 sps:$4 sm:$0xff]  }
 0x3ab   :  { %10771 = vmatpush1.bf16.msra.mxu0 %v13574_v45  ;;  %v13640_v45 = vld [vmem:[#allocation4 + $0x4e0] ss:$16 sps:$4 sm:$0xff]  }
 0x3ac   :  { %11263 = vmatpush1.bf16.msra.mxu1 %v13577_v49  ;;  %10772 = vmatprep.subr.bf16.mxu0 %v13582_v50  ;;  %v13648_v49 = vld [vmem:[#allocation4 + $0x504] ss:$16 sps:$4 sm:$0xff]   ;;  %v13651_v50 = vld [vmem:[#allocation4 + $0x50c] ss:$16 sps:$4 sm:$0xff]  }
 0x3ad   :  { %11264 = vmatprep.subr.bf16.mxu1 %v13585_v53  ;;  %v13646_v53 = vld [vmem:[#allocation4 + $0x500] ss:$16 sps:$4 sm:$0xff]  }
 0x3af   :  { %10773 = vmatpush1.bf16.msra.mxu0 %v13580_v40  ;;  %v13649_v40 = vld [vmem:[#allocation4 + $0x508] ss:$16 sps:$4 sm:$0xff]  }
 0x3b0   :  { %11265 = vmatpush1.bf16.msra.mxu1 %v13583_v55  ;;  %10774 = vmatprep.subr.bf16.mxu0 %v13588_v56  ;;  %v13654_v55 = vld [vmem:[#allocation4 + $0x524] ss:$16 sps:$4 sm:$0xff]   ;;  %v13657_v56 = vld [vmem:[#allocation4 + $0x52c] ss:$16 sps:$4 sm:$0xff]  }
 0x3b1   :  { %11266 = vmatprep.subr.bf16.mxu1 %v13591_v57  ;;  %v13652_v57 = vld [vmem:[#allocation4 + $0x520] ss:$16 sps:$4 sm:$0xff]  }
 0x3b3   :  { %10775 = vmatpush1.bf16.msra.mxu0 %v13586_v59  ;;  %v13655_v59 = vld [vmem:[#allocation4 + $0x528] ss:$16 sps:$4 sm:$0xff]  }
 0x3b4   :  { %11267 = vmatpush1.bf16.msra.mxu1 %v13589_v35  ;;  %10776 = vmatprep.subr.bf16.mxu0 %v13594_v16  ;;  %v13660_v35 = vld [vmem:[#allocation4 + $0x544] ss:$16 sps:$4 sm:$0xff]   ;;  %v13663_v16 = vld [vmem:[#allocation4 + $0x54c] ss:$16 sps:$4 sm:$0xff]  }
 0x3b5   :  { %11268 = vmatprep.subr.bf16.mxu1 %v13597_v60  ;;  %v13658_v60 = vld [vmem:[#allocation4 + $0x540] ss:$16 sps:$4 sm:$0xff]  }
 0x3b7   :  { %10777 = vmatpush1.bf16.msra.mxu0 %v13592_v61  ;;  %v13661_v61 = vld [vmem:[#allocation4 + $0x548] ss:$16 sps:$4 sm:$0xff]  }
 0x3b8   :  { %11269 = vmatpush1.bf16.msra.mxu1 %v13595_v63  ;;  %10787 = vmatprep.subr.bf16.mxu0 %v13600_v0  ;;  %v13666_v63 = vld [vmem:[#allocation4 + $0x564] ss:$16 sps:$4 sm:$0xff]   ;;  %v13669_v0 = vld [vmem:[#allocation4 + $0x56c] ss:$16 sps:$4 sm:$0xff]  }
 0x3b9   :  { %11279 = vmatprep.subr.bf16.mxu1 %v13603_v1  ;;  %v13664_v1 = vld [vmem:[#allocation4 + $0x560] ss:$16 sps:$4 sm:$0xff]  }
 0x3ba   :  { %10779 = vmatmul.mubr.bf16.vlgmr.msra.gmra.mrb[24].mxu0 %v6053_v2 }
 0x3bb   :  { %11271 = vmatmul.mubr.bf16.vlgmr.msra.gmra.mrb[24].mxu1 %v6053_v2  ;;  %10788 = vmatpush1.bf16.msra.mxu0 %v13598_v42  ;;  %v13667_v42 = vld [vmem:[#allocation4 + $0x568] ss:$16 sps:$4 sm:$0xff]   ;;  %v13672_v2 = vld [vmem:[#allocation4 + $0x584] ss:$16 sps:$4 sm:$0xff]  }
 0x3bc   :  { %10819 = vmatprep.mubr.bf16.mxu0 %v6056_v5  ;;  %11280 = vmatpush1.bf16.msra.mxu1 %v13601_v3  ;;  %v13675_v3 = vld [vmem:[#allocation4 + $0x58c] ss:$16 sps:$4 sm:$0xff]  }
 0x3bd   :  { %11311 = vmatprep.mubr.bf16.mxu1 %v6056_v5  ;;  %10789 = vmatprep.subr.bf16.mxu0 %v13606_v4  ;;  %v13670_v4 = vld [vmem:[#allocation4 + $0x580] ss:$16 sps:$4 sm:$0xff]   ;;  %v13673_v5 = vld [vmem:[#allocation4 + $0x588] ss:$16 sps:$4 sm:$0xff]  }
 0x3be   :  { %11281 = vmatprep.subr.bf16.mxu1 %v13609_v6  ;;  %v13678_v6 = vld [vmem:[#allocation4 + $0x5a4] ss:$16 sps:$4 sm:$0xff]  }
 0x3bf   :  { %10790 = vmatpush1.bf16.msra.mxu0 %v13604_v7  ;;  %v13681_v7 = vld [vmem:[#allocation4 + $0x5ac] ss:$16 sps:$4 sm:$0xff]  }
 0x3c0   :  { %11282 = vmatpush1.bf16.msra.mxu1 %v13607_v8  ;;  %10791 = vmatprep.subr.bf16.mxu0 %v13612_v27  ;;  %v13676_v8 = vld [vmem:[#allocation4 + $0x5a0] ss:$16 sps:$4 sm:$0xff]   ;;  %v13679_v27 = vld [vmem:[#allocation4 + $0x5a8] ss:$16 sps:$4 sm:$0xff]  }
 0x3c1   :  { %11283 = vmatprep.subr.bf16.mxu1 %v13615_v30  ;;  %v13684_v30 = vld [vmem:[#allocation4 + $0x5c4] ss:$16 sps:$4 sm:$0xff]  }
 0x3c3   :  { %10792 = vmatpush1.bf16.msra.mxu0 %v13610_v9  ;;  %v13687_v9 = vld [vmem:[#allocation4 + $0x5cc] ss:$16 sps:$4 sm:$0xff]  }
 0x3c4   :  { %11284 = vmatpush1.bf16.msra.mxu1 %v13613_v10  ;;  %10793 = vmatprep.subr.bf16.mxu0 %v13618_v11  ;;  %v13682_v10 = vld [vmem:[#allocation4 + $0x5c0] ss:$16 sps:$4 sm:$0xff]   ;;  %v13685_v11 = vld [vmem:[#allocation4 + $0x5c8] ss:$16 sps:$4 sm:$0xff]  }
 0x3c5   :  { %11285 = vmatprep.subr.bf16.mxu1 %v13621_v58  ;;  %v13690_v58 = vld [vmem:[#allocation4 + $0x5e4] ss:$16 sps:$4 sm:$0xff]  }
 0x3c7   :  { %10794 = vmatpush1.bf16.msra.mxu0 %v13616_v44  ;;  %v13693_v44 = vld [vmem:[#allocation4 + $0x5ec] ss:$16 sps:$4 sm:$0xff]  }
 0x3c8   :  { %11286 = vmatpush1.bf16.msra.mxu1 %v13619_v12  ;;  %10795 = vmatprep.subr.bf16.mxu0 %v13624_v14  ;;  %v13688_v12 = vld [vmem:[#allocation4 + $0x5e0] ss:$16 sps:$4 sm:$0xff]   ;;  %v13691_v14 = vld [vmem:[#allocation4 + $0x5e8] ss:$16 sps:$4 sm:$0xff]  }
 0x3c9   :  { %11287 = vmatprep.subr.bf16.mxu1 %v13627_v15  ;;  %v13696_v15 = vld [vmem:[#allocation4 + $0x604] ss:$16 sps:$4 sm:$0xff]  }
 0x3cb   :  { %10796 = vmatpush1.bf16.msra.mxu0 %v13622_v17  ;;  %v13699_v17 = vld [vmem:[#allocation4 + $0x60c] ss:$16 sps:$4 sm:$0xff]  }
 0x3cc   :  { %11288 = vmatpush1.bf16.msra.mxu1 %v13625_v18  ;;  %10797 = vmatprep.subr.bf16.mxu0 %v13630_v19  ;;  %v13694_v18 = vld [vmem:[#allocation4 + $0x600] ss:$16 sps:$4 sm:$0xff]   ;;  %v6055_v19 = vpack.c.bf16 %v14922_v51, %v14922_v51  ;;  %v13711_v51 = vld [vmem:[#allocation4 + $0x64c] ss:$16 sps:$4 sm:$0xff]  }
 0x3cd   :  { %11289 = vmatprep.subr.bf16.mxu1 %v13633_v22  ;;  %v13697_v22 = vld [vmem:[#allocation4 + $0x608] ss:$16 sps:$4 sm:$0xff]  }
 0x3cf   :  { %10798 = vmatpush1.bf16.msra.mxu0 %v13628_v24  ;;  %v13702_v24 = vld [vmem:[#allocation4 + $0x624] ss:$16 sps:$4 sm:$0xff]  }
 0x3d0   :  { %11290 = vmatpush1.bf16.msra.mxu1 %v13631_v25  ;;  %10799 = vmatprep.subr.bf16.mxu0 %v13636_v43  ;;  %v6058_v25 = vpack.c.bf16 %v14928_v62, %v14928_v62  ;;  %v13705_v43 = vld [vmem:[#allocation4 + $0x62c] ss:$16 sps:$4 sm:$0xff]  }
 0x3d1   :  { %11291 = vmatprep.subr.bf16.mxu1 %v13639_v26  ;;  %v13700_v26 = vld [vmem:[#allocation4 + $0x620] ss:$16 sps:$4 sm:$0xff]   ;;  %v13717_v62 = vld [vmem:[#allocation4 + $0x66c] ss:$16 sps:$4 sm:$0xff]  }
 0x3d3   :  { %10800 = vmatpush1.bf16.msra.mxu0 %v13634_v32  ;;  %v13703_v32 = vld [vmem:[#allocation4 + $0x628] ss:$16 sps:$4 sm:$0xff]  }
 0x3d4   :  { %11292 = vmatpush1.bf16.msra.mxu1 %v13637_v34  ;;  %10801 = vmatprep.subr.bf16.mxu0 %v13642_v38  ;;  %v13708_v34 = vld [vmem:[#allocation4 + $0x644] ss:$16 sps:$4 sm:$0xff]   ;;  %v13706_v38 = vld [vmem:[#allocation4 + $0x640] ss:$16 sps:$4 sm:$0xff]  }
 0x3d5   :  { %11293 = vmatprep.subr.bf16.mxu1 %v13645_v41  ;;  %v13709_v41 = vld [vmem:[#allocation4 + $0x648] ss:$16 sps:$4 sm:$0xff]  }
 0x3d7   :  { %10802 = vmatpush1.bf16.msra.mxu0 %v13640_v45  ;;  %v13714_v45 = vld [vmem:[#allocation4 + $0x664] ss:$16 sps:$4 sm:$0xff]  }
 0x3d8   :  { %11294 = vmatpush1.bf16.msra.mxu1 %v13643_v48  ;;  %10803 = vmatprep.subr.bf16.mxu0 %v13648_v49  ;;  %v13712_v48 = vld [vmem:[#allocation4 + $0x660] ss:$16 sps:$4 sm:$0xff]   ;;  %v13715_v49 = vld [vmem:[#allocation4 + $0x668] ss:$16 sps:$4 sm:$0xff]  }
 0x3d9   :  { %11295 = vmatprep.subr.bf16.mxu1 %v13651_v50  ;;  %v13720_v50 = vld [vmem:[#allocation4 + $0x684] ss:$16 sps:$4 sm:$0xff]  }
 0x3db   :  { %10804 = vmatpush1.bf16.msra.mxu0 %v13646_v53  ;;  %v13723_v53 = vld [vmem:[#allocation4 + $0x68c] ss:$16 sps:$4 sm:$0xff]  }
 0x3dc   :  { %11296 = vmatpush1.bf16.msra.mxu1 %v13649_v40  ;;  %10805 = vmatprep.subr.bf16.mxu0 %v13654_v55  ;;  %v13718_v40 = vld [vmem:[#allocation4 + $0x680] ss:$16 sps:$4 sm:$0xff]   ;;  %v13721_v55 = vld [vmem:[#allocation4 + $0x688] ss:$16 sps:$4 sm:$0xff]  }
 0x3dd   :  { %11297 = vmatprep.subr.bf16.mxu1 %v13657_v56  ;;  %v13726_v56 = vld [vmem:[#allocation4 + $0x6a4] ss:$16 sps:$4 sm:$0xff]  }
 0x3df   :  { %10806 = vmatpush1.bf16.msra.mxu0 %v13652_v57  ;;  %v13729_v57 = vld [vmem:[#allocation4 + $0x6ac] ss:$16 sps:$4 sm:$0xff]  }
 0x3e0   :  { %11298 = vmatpush1.bf16.msra.mxu1 %v13655_v59  ;;  %10807 = vmatprep.subr.bf16.mxu0 %v13660_v35  ;;  %v13724_v59 = vld [vmem:[#allocation4 + $0x6a0] ss:$16 sps:$4 sm:$0xff]   ;;  %v13727_v35 = vld [vmem:[#allocation4 + $0x6a8] ss:$16 sps:$4 sm:$0xff]  }
 0x3e1   :  { %11299 = vmatprep.subr.bf16.mxu1 %v13663_v16  ;;  %v13732_v16 = vld [vmem:[#allocation4 + $0x6c4] ss:$16 sps:$4 sm:$0xff]  }
 0x3e3   :  { %10808 = vmatpush1.bf16.msra.mxu0 %v13658_v60 }
 0x3e4   :  { %11300 = vmatpush1.bf16.msra.mxu1 %v13661_v61  ;;  %10809 = vmatprep.subr.bf16.mxu0 %v13666_v63  ;;  %v13735_v61 = vld [vmem:[#allocation4 + $0x6cc] ss:$16 sps:$4 sm:$0xff]  }
 0x3e5   :  { %11301 = vmatprep.subr.bf16.mxu1 %v13669_v0 }
 0x3e7   :  { %10810 = vmatpush1.bf16.msra.mxu0 %v13664_v1 }
 0x3e8   :  { %11302 = vmatpush1.bf16.msra.mxu1 %v13667_v42  ;;  %10811 = vmatprep.subr.bf16.mxu0 %v13672_v2  ;;  %v13730_v2 = vld [vmem:[#allocation4 + $0x6c0] ss:$16 sps:$4 sm:$0xff]  }
 0x3e9   :  { %11303 = vmatprep.subr.bf16.mxu1 %v13675_v3 }
 0x3eb   :  { %10812 = vmatpush1.bf16.msra.mxu0 %v13670_v4 }
 0x3ec   :  { %11304 = vmatpush1.bf16.msra.mxu1 %v13673_v5  ;;  %10813 = vmatprep.subr.bf16.mxu0 %v13678_v6  ;;  %v13733_v5 = vld [vmem:[#allocation4 + $0x6c8] ss:$16 sps:$4 sm:$0xff]   ;;  %v13738_v6 = vld [vmem:[#allocation4 + $0x6e4] ss:$16 sps:$4 sm:$0xff]  }
 0x3ed   :  { %11305 = vmatprep.subr.bf16.mxu1 %v13681_v7 }
 0x3ef   :  { %10814 = vmatpush1.bf16.msra.mxu0 %v13676_v8  ;;  %v13741_v8 = vld [vmem:[#allocation4 + $0x6ec] ss:$16 sps:$4 sm:$0xff]  }
 0x3f0   :  { %11306 = vmatpush1.bf16.msra.mxu1 %v13679_v27  ;;  %10815 = vmatprep.subr.bf16.mxu0 %v13684_v30  ;;  %v13736_v27 = vld [vmem:[#allocation4 + $0x6e0] ss:$16 sps:$4 sm:$0xff]   ;;  %v13739_v30 = vld [vmem:[#allocation4 + $0x6e8] ss:$16 sps:$4 sm:$0xff]  }
 0x3f1   :  { %11307 = vmatprep.subr.bf16.mxu1 %v13687_v9  ;;  %v13744_v9 = vld [vmem:[#allocation4 + $0x704] ss:$16 sps:$4 sm:$0xff]  }
 0x3f3   :  { %10816 = vmatpush1.bf16.msra.mxu0 %v13682_v10  ;;  %v13747_v10 = vld [vmem:[#allocation4 + $0x70c] ss:$16 sps:$4 sm:$0xff]  }
 0x3f4   :  { %11308 = vmatpush1.bf16.msra.mxu1 %v13685_v11  ;;  %10817 = vmatprep.subr.bf16.mxu0 %v13690_v58  ;;  %v13742_v11 = vld [vmem:[#allocation4 + $0x700] ss:$16 sps:$4 sm:$0xff]  }
 0x3f5   :  { %11309 = vmatprep.subr.bf16.mxu1 %v13693_v44  ;;  %v13745_v44 = vld [vmem:[#allocation4 + $0x708] ss:$16 sps:$4 sm:$0xff]  }
 0x3f7   :  { %10818 = vmatpush1.bf16.msra.mxu0 %v13688_v12  ;;  %v13750_v12 = vld [vmem:[#allocation4 + $0x724] ss:$16 sps:$4 sm:$0xff]  }
 0x3f8   :  { %11310 = vmatpush1.bf16.msra.mxu1 %v13691_v14  ;;  %10828 = vmatprep.subr.bf16.mxu0 %v13696_v15 }
 0x3f9   :  { %11320 = vmatprep.subr.bf16.mxu1 %v13699_v17  ;;  %v13753_v17 = vld [vmem:[#allocation4 + $0x72c] ss:$16 sps:$4 sm:$0xff]  }
 0x3fa   :  { %10820 = vmatmul.mubr.bf16.vlgmr.msra.gmra.mrb[24].mxu0 %v6055_v19 }
 0x3fb   :  { %11312 = vmatmul.mubr.bf16.vlgmr.msra.gmra.mrb[24].mxu1 %v6055_v19  ;;  %10829 = vmatpush1.bf16.msra.mxu0 %v13694_v18 }
 0x3fc   :  { %10860 = vmatprep.mubr.bf16.mxu0 %v6058_v25  ;;  %11321 = vmatpush1.bf16.msra.mxu1 %v13697_v22 }
 0x3fd   :  { %11352 = vmatprep.mubr.bf16.mxu1 %v6058_v25  ;;  %10830 = vmatprep.subr.bf16.mxu0 %v13702_v24 }
 0x3fe   :  { %11322 = vmatprep.subr.bf16.mxu1 %v13705_v43  ;;  %v13748_v43 = vld [vmem:[#allocation4 + $0x720] ss:$16 sps:$4 sm:$0xff]  }
 0x3ff   :  { %10831 = vmatpush1.bf16.msra.mxu0 %v13700_v26 }
 0x400   :  { %11323 = vmatpush1.bf16.msra.mxu1 %v13703_v32  ;;  %10832 = vmatprep.subr.bf16.mxu0 %v13708_v34  ;;  %v13751_v34 = vld [vmem:[#allocation4 + $0x728] ss:$16 sps:$4 sm:$0xff]  }
 0x401   :  { %11324 = vmatprep.subr.bf16.mxu1 %v13711_v51  ;;  %v13756_v51 = vld [vmem:[#allocation4 + $0x744] ss:$16 sps:$4 sm:$0xff]  }
 0x403   :  { %10833 = vmatpush1.bf16.msra.mxu0 %v13706_v38 }
 0x404   :  { %11325 = vmatpush1.bf16.msra.mxu1 %v13709_v41  ;;  %10834 = vmatprep.subr.bf16.mxu0 %v13714_v45  ;;  %v13759_v45 = vld [vmem:[#allocation4 + $0x74c] ss:$16 sps:$4 sm:$0xff]  }
 0x405   :  { %11326 = vmatprep.subr.bf16.mxu1 %v13717_v62 }
 0x407   :  { %10835 = vmatpush1.bf16.msra.mxu0 %v13712_v48 }
 0x408   :  { %11327 = vmatpush1.bf16.msra.mxu1 %v13715_v49  ;;  %10836 = vmatprep.subr.bf16.mxu0 %v13720_v50 }
 0x409   :  { %11328 = vmatprep.subr.bf16.mxu1 %v13723_v53  ;;  %v13754_v53 = vld [vmem:[#allocation4 + $0x740] ss:$16 sps:$4 sm:$0xff]  }
 0x40b   :  { %10837 = vmatpush1.bf16.msra.mxu0 %v13718_v40 }
 0x40c   :  { %11329 = vmatpush1.bf16.msra.mxu1 %v13721_v55  ;;  %10838 = vmatprep.subr.bf16.mxu0 %v13726_v56  ;;  %v13757_v56 = vld [vmem:[#allocation4 + $0x748] ss:$16 sps:$4 sm:$0xff]  }
 0x40d   :  { %v5704_v60 = vpop.f32.mrb[20].mxu0  ;;  %11330 = vmatprep.subr.bf16.mxu1 %v13729_v57  ;;  %v5786_v63 = vpop.f32.mrb[20].mxu1  ;;  %v13762_v57 = vld [vmem:[#allocation4 + $0x764] ss:$16 sps:$4 sm:$0xff]  }
 0x40e   :  { %14598 = vtanh.f32 %v5704_v60  ;;  %v5706_v0 = vpop.f32.mrb[21].mxu0  ;;  %v5788_v1 = vpop.f32.mrb[21].mxu1 }
 0x40f   :  { %14600 = vtanh.f32 %v5786_v63  ;;  %v5708_v42 = vpop.f32.mrb[22].mxu0  ;;  %10839 = vmatpush1.bf16.msra.mxu0 %v13724_v59  ;;  %v5790_v3 = vpop.f32.mrb[22].mxu1 }
 0x410   :  { %14602 = vtanh.f32 %v5706_v0  ;;  %11331 = vmatpush1.bf16.msra.mxu1 %v13727_v35  ;;  %v5709_v4 = vpop.f32.mrb[23].mxu0  ;;  %10840 = vmatprep.subr.bf16.mxu0 %v13732_v16  ;;  %v5791_v7 = vpop.f32.mrb[23].mxu1  ;;  %v13765_v35 = vld [vmem:[#allocation4 + $0x76c] ss:$16 sps:$4 sm:$0xff]   ;;  %v13763_v0 = vld [vmem:[#allocation4 + $0x768] ss:$16 sps:$4 sm:$0xff]  }
 0x411   :  { %14604 = vtanh.f32 %v5788_v1  ;;  %11332 = vmatprep.subr.bf16.mxu1 %v13735_v61  ;;  %v13760_v61 = vld [vmem:[#allocation4 + $0x760] ss:$16 sps:$4 sm:$0xff]   ;;  %v13768_v1 = vld [vmem:[#allocation4 + $0x784] ss:$16 sps:$4 sm:$0xff]  }
 0x412   :  { %v13766_v4 = vld [vmem:[#allocation4 + $0x780] ss:$16 sps:$4 sm:$0xff]   ;;  %v13774_v7 = vld [vmem:[#allocation4 + $0x7a4] ss:$16 sps:$4 sm:$0xff]  }
 0x413   :  { %10841 = vmatpush1.bf16.msra.mxu0 %v13730_v2  ;;  %v13771_v2 = vld [vmem:[#allocation4 + $0x78c] ss:$16 sps:$4 sm:$0xff]  }
 0x414   :  { %11333 = vmatpush1.bf16.msra.mxu1 %v13733_v5  ;;  %10842 = vmatprep.subr.bf16.mxu0 %v13738_v6  ;;  %v13769_v6 = vld [vmem:[#allocation4 + $0x788] ss:$16 sps:$4 sm:$0xff]  }
 0x415   :  { %11334 = vmatprep.subr.bf16.mxu1 %v13741_v8  ;;  %v13777_v8 = vld [vmem:[#allocation4 + $0x7ac] ss:$16 sps:$4 sm:$0xff]  }
 0x417   :  { %10843 = vmatpush1.bf16.msra.mxu0 %v13736_v27  ;;  %v13772_v27 = vld [vmem:[#allocation4 + $0x7a0] ss:$16 sps:$4 sm:$0xff]  }
 0x418   :  { %v14599_v58 = vpop.eup %14598  ;;  %11335 = vmatpush1.bf16.msra.mxu1 %v13739_v30  ;;  %10844 = vmatprep.subr.bf16.mxu0 %v13744_v9  ;;  %v13775_v30 = vld [vmem:[#allocation4 + $0x7a8] ss:$16 sps:$4 sm:$0xff]   ;;  %v13780_v9 = vld [vmem:[#allocation4 + $0x7c4] ss:$16 sps:$4 sm:$0xff]  }
 0x419   :  { %v14601_v14 = vpop.eup %14600  ;;  %v5837_v15 = vmul.f32 127.5, %v14599_v58  ;;  %11336 = vmatprep.subr.bf16.mxu1 %v13747_v10  ;;  %v13783_v10 = vld [vmem:[#allocation4 + $0x7cc] ss:$16 sps:$4 sm:$0xff]   ;;  %v13781_v58 = vld [vmem:[#allocation4 + $0x7c8] ss:$16 sps:$4 sm:$0xff]  }
 0x41a   :  { %v14603_v18 = vpop.eup %14602  ;;  %v5839_v19 = vmul.f32 127.5, %v14601_v14  ;;  %v13784_v14 = vld [vmem:[#allocation4 + $0x7e0] ss:$16 sps:$4 sm:$0xff]  }
 0x41b   :  { %v14605_v22 = vpop.eup %14604  ;;  %v5861_v24 = vadd.f32 128.0, %v5837_v15  ;;  %v5838_v25 = vmul.f32 127.5, %v14603_v18  ;;  %10845 = vmatpush1.bf16.msra.mxu0 %v13742_v11  ;;  %v13778_v11 = vld [vmem:[#allocation4 + $0x7c0] ss:$16 sps:$4 sm:$0xff]   ;;  %v13787_v15 = vld [vmem:[#allocation4 + $0x7e8] ss:$16 sps:$4 sm:$0xff]  }
 0x41c   :  { %v5863_v26 = vadd.f32 128.0, %v5839_v19  ;;  %v5840_v32 = vmul.f32 127.5, %v14605_v22  ;;  %11337 = vmatpush1.bf16.msra.mxu1 %v13745_v44  ;;  %10846 = vmatprep.subr.bf16.mxu0 %v13750_v12  ;;  %v13786_v44 = vld [vmem:[#allocation4 + $0x7e4] ss:$16 sps:$4 sm:$0xff]   ;;  %v13789_v12 = vld [vmem:[#allocation4 + $0x7ec] ss:$16 sps:$4 sm:$0xff]   ;;  %v6057_v22 = vpack.c.bf16 %v14924_v54, %v14924_v54 }
 0x41d   :  { %v5885_v38 = vmax.f32 %v5861_v24, 0.0  ;;  %v5862_v41 = vadd.f32 128.0, %v5838_v25  ;;  %11338 = vmatprep.subr.bf16.mxu1 %v13753_v17  ;;  %v13792_v17 = vld [vmem:[#allocation4 + $0x804] ss:$16 sps:$4 sm:$0xff]   ;;  %v13795_v18 = vld [vmem:[#allocation4 + $0x80c] ss:$16 sps:$4 sm:$0xff]  }
 0x41e   :  { %v5887_v62 = vmax.f32 %v5863_v26, 0.0  ;;  %v5864_v48 = vadd.f32 128.0, %v5840_v32  ;;  %v13790_v19 = vld [vmem:[#allocation4 + $0x800] ss:$16 sps:$4 sm:$0xff]   ;;  %v13793_v24 = vld [vmem:[#allocation4 + $0x808] ss:$16 sps:$4 sm:$0xff]  }
 0x41f   :  { %v15022_v49 = vmin.f32 %v5885_v38, 255.0  ;;  %v5886_v50 = vmax.f32 %v5862_v41, 0.0  ;;  %10847 = vmatpush1.bf16.msra.mxu0 %v13748_v43  ;;  %v13798_v25 = vld [vmem:[#allocation4 + $0x824] ss:$16 sps:$4 sm:$0xff]   ;;  %v6060_v43 = vpack.c.bf16 %v14951_v39, %v14951_v39  ;;  %v13801_v26 = vld [vmem:[#allocation4 + $0x82c] ss:$16 sps:$4 sm:$0xff]  }
 0x420   :  { %v15024_v40 = vmin.f32 %v5887_v62, 255.0  ;;  %v5888_v55 = vmax.f32 %v5864_v48, 0.0  ;;  %11339 = vmatpush1.bf16.msra.mxu1 %v13751_v34  ;;  %10848 = vmatprep.subr.bf16.mxu0 %v13756_v51  ;;  %v13796_v32 = vld [vmem:[#allocation4 + $0x820] ss:$16 sps:$4 sm:$0xff]   ;;  %v13799_v34 = vld [vmem:[#allocation4 + $0x828] ss:$16 sps:$4 sm:$0xff]  }
 0x421   :  { %v15026_v59 = vmin.f32 %v5886_v50, 255.0  ;;  %11340 = vmatprep.subr.bf16.mxu1 %v13759_v45  ;;  %v13804_v51 = vld [vmem:[#allocation4 + $0x844] ss:$16 sps:$4 sm:$0xff]   ;;  %v13807_v54 = vld [vmem:[#allocation4 + $0x84c] ss:$16 sps:$4 sm:$0xff]  }
 0x422   :  { %v15028_v16 = vmin.f32 %v5888_v55, 255.0  ;;  %v13802_v38 = vld [vmem:[#allocation4 + $0x840] ss:$16 sps:$4 sm:$0xff]   ;;  %v13805_v41 = vld [vmem:[#allocation4 + $0x848] ss:$16 sps:$4 sm:$0xff]  }
 0x423   :  { %v6022_v60 = vcombine.low %v15022_v49, %v15026_v59  ;;  %10849 = vmatpush1.bf16.msra.mxu0 %v13754_v53  ;;  %v13810_v45 = vld [vmem:[#allocation4 + $0x864] ss:$16 sps:$4 sm:$0xff]   ;;  %v13813_v39 = vld [vmem:[#allocation4 + $0x86c] ss:$16 sps:$4 sm:$0xff]   ;;  %v13808_v62 = vld [vmem:[#allocation4 + $0x860] ss:$16 sps:$4 sm:$0xff]  }
 0x424   :  { %v6023_v63 = vcombine.low %v15024_v40, %v15028_v16  ;;  %11341 = vmatpush1.bf16.msra.mxu1 %v13757_v56  ;;  %10850 = vmatprep.subr.bf16.mxu0 %v13762_v57  ;;  %v13811_v48 = vld [vmem:[#allocation4 + $0x868] ss:$16 sps:$4 sm:$0xff]   ;;  %v13816_v50 = vld [vmem:[#allocation4 + $0x884] ss:$16 sps:$4 sm:$0xff]   ;;  %v13819_v53 = vld [vmem:[#allocation4 + $0x88c] ss:$16 sps:$4 sm:$0xff]  }
 0x425   :  { %v6030_v42 = vrot.slane %v6022_v60, %v14901_v36  ;;  %11342 = vmatprep.subr.bf16.mxu1 %v13765_v35  ;;  %v13814_v55 = vld [vmem:[#allocation4 + $0x880] ss:$16 sps:$4 sm:$0xff]   ;;  %v13817_v56 = vld [vmem:[#allocation4 + $0x888] ss:$16 sps:$4 sm:$0xff]   ;;  %v13822_v57 = vld [vmem:[#allocation4 + $0x8a4] ss:$16 sps:$4 sm:$0xff]  }
 0x426   :  { %v6037_v3 = vrot.slane %v6023_v63, %v14901_v36  ;;  %v13825_v35 = vld [vmem:[#allocation4 + $0x8ac] ss:$16 sps:$4 sm:$0xff]   ;;  %v13820_v60 = vld [vmem:[#allocation4 + $0x8a0] ss:$16 sps:$4 sm:$0xff]   ;;  %v13828_v63 = vld [vmem:[#allocation4 + $0x8c4] ss:$16 sps:$4 sm:$0xff]  }
 0x427   :  { %10851 = vmatpush1.bf16.msra.mxu0 %v13760_v61  ;;  %v13823_v61 = vld [vmem:[#allocation4 + $0x8a8] ss:$16 sps:$4 sm:$0xff]  }
 0x428   :  { %v6038_v5 = vcombine.low %v6030_v42, %v6037_v3  ;;  %11343 = vmatpush1.bf16.msra.mxu1 %v13763_v0  ;;  %10852 = vmatprep.subr.bf16.mxu0 %v13768_v1  ;;  %v13831_v0 = vld [vmem:[#allocation4 + $0x8cc] ss:$16 sps:$4 sm:$0xff]   ;;  %v13826_v1 = vld [vmem:[#allocation4 + $0x8c0] ss:$16 sps:$4 sm:$0xff]   ;;  %v13829_v42 = vld [vmem:[#allocation4 + $0x8c8] ss:$16 sps:$4 sm:$0xff]  }
 0x429   :  { %11344 = vmatprep.subr.bf16.mxu1 %v13771_v2  ;;  %v13834_v2 = vld [vmem:[#allocation4 + $0x8e4] ss:$16 sps:$4 sm:$0xff]   ;;  %v13837_v3 = vld [vmem:[#allocation4 + $0x8ec] ss:$16 sps:$4 sm:$0xff]  }
 0x42a   :  { %6050 = vst [vmem:[%s15086_s4 + $0x28] sm:$0xff] %v6038_v5  ;;  %v13835_v5 = vld [vmem:[#allocation4 + $0x8e8] ss:$16 sps:$4 sm:$0xff]  }
 0x42b   :  { %10853 = vmatpush1.bf16.msra.mxu0 %v13766_v4  ;;  %v13832_v4 = vld [vmem:[#allocation4 + $0x8e0] ss:$16 sps:$4 sm:$0xff]  }
 0x42c   :  { %11345 = vmatpush1.bf16.msra.mxu1 %v13769_v6  ;;  %10854 = vmatprep.subr.bf16.mxu0 %v13774_v7  ;;  %v13840_v6 = vld [vmem:[#allocation4 + $0x904] ss:$16 sps:$4 sm:$0xff]   ;;  %v13843_v7 = vld [vmem:[#allocation4 + $0x90c] ss:$16 sps:$4 sm:$0xff]  }
 0x42d   :  { %11346 = vmatprep.subr.bf16.mxu1 %v13777_v8  ;;  %v13838_v8 = vld [vmem:[#allocation4 + $0x900] ss:$16 sps:$4 sm:$0xff]  }
 0x42f   :  { %10855 = vmatpush1.bf16.msra.mxu0 %v13772_v27  ;;  %v13841_v27 = vld [vmem:[#allocation4 + $0x908] ss:$16 sps:$4 sm:$0xff]  }
 0x430   :  { %11347 = vmatpush1.bf16.msra.mxu1 %v13775_v30  ;;  %10856 = vmatprep.subr.bf16.mxu0 %v13780_v9  ;;  %v13846_v30 = vld [vmem:[#allocation4 + $0x924] ss:$16 sps:$4 sm:$0xff]   ;;  %v13849_v9 = vld [vmem:[#allocation4 + $0x92c] ss:$16 sps:$4 sm:$0xff]  }
 0x431   :  { %11348 = vmatprep.subr.bf16.mxu1 %v13783_v10  ;;  %v13844_v10 = vld [vmem:[#allocation4 + $0x920] ss:$16 sps:$4 sm:$0xff]  }
 0x433   :  { %10857 = vmatpush1.bf16.msra.mxu0 %v13778_v11  ;;  %v13847_v11 = vld [vmem:[#allocation4 + $0x928] ss:$16 sps:$4 sm:$0xff]  }
 0x434   :  { %11349 = vmatpush1.bf16.msra.mxu1 %v13781_v58  ;;  %10858 = vmatprep.subr.bf16.mxu0 %v13786_v44  ;;  %v13852_v58 = vld [vmem:[#allocation4 + $0x944] ss:$16 sps:$4 sm:$0xff]   ;;  %v13855_v44 = vld [vmem:[#allocation4 + $0x94c] ss:$16 sps:$4 sm:$0xff]  }
 0x435   :  { %11350 = vmatprep.subr.bf16.mxu1 %v13789_v12  ;;  %v13850_v12 = vld [vmem:[#allocation4 + $0x940] ss:$16 sps:$4 sm:$0xff]  }
 0x437   :  { %10859 = vmatpush1.bf16.msra.mxu0 %v13784_v14  ;;  %v13853_v14 = vld [vmem:[#allocation4 + $0x948] ss:$16 sps:$4 sm:$0xff]  }
 0x438   :  { %11351 = vmatpush1.bf16.msra.mxu1 %v13787_v15  ;;  %10869 = vmatprep.subr.bf16.mxu0 %v13792_v17  ;;  %v13858_v15 = vld [vmem:[#allocation4 + $0x964] ss:$16 sps:$4 sm:$0xff]   ;;  %v13861_v17 = vld [vmem:[#allocation4 + $0x96c] ss:$16 sps:$4 sm:$0xff]  }
 0x439   :  { %11361 = vmatprep.subr.bf16.mxu1 %v13795_v18  ;;  %v13856_v18 = vld [vmem:[#allocation4 + $0x960] ss:$16 sps:$4 sm:$0xff]  }
 0x43a   :  { %10861 = vmatmul.mubr.bf16.vlgmr.msra.gmra.mrb[24].mxu0 %v6057_v22 }
 0x43b   :  { %11353 = vmatmul.mubr.bf16.vlgmr.msra.gmra.mrb[24].mxu1 %v6057_v22  ;;  %10870 = vmatpush1.bf16.msra.mxu0 %v13790_v19  ;;  %v13859_v19 = vld [vmem:[#allocation4 + $0x968] ss:$16 sps:$4 sm:$0xff]   ;;  %v13864_v22 = vld [vmem:[#allocation4 + $0x984] ss:$16 sps:$4 sm:$0xff]  }
 0x43c   :  { %10901 = vmatprep.mubr.bf16.mxu0 %v6060_v43  ;;  %11362 = vmatpush1.bf16.msra.mxu1 %v13793_v24  ;;  %v13867_v24 = vld [vmem:[#allocation4 + $0x98c] ss:$16 sps:$4 sm:$0xff]  }
 0x43d   :  { %11393 = vmatprep.mubr.bf16.mxu1 %v6060_v43  ;;  %10871 = vmatprep.subr.bf16.mxu0 %v13798_v25  ;;  %v13862_v25 = vld [vmem:[#allocation4 + $0x980] ss:$16 sps:$4 sm:$0xff]   ;;  %v13865_v43 = vld [vmem:[#allocation4 + $0x988] ss:$16 sps:$4 sm:$0xff]  }
 0x43e   :  { %11363 = vmatprep.subr.bf16.mxu1 %v13801_v26  ;;  %v13870_v26 = vld [vmem:[#allocation4 + $0x9a4] ss:$16 sps:$4 sm:$0xff]  }
 0x43f   :  { %10872 = vmatpush1.bf16.msra.mxu0 %v13796_v32  ;;  %v13873_v32 = vld [vmem:[#allocation4 + $0x9ac] ss:$16 sps:$4 sm:$0xff]  }
 0x440   :  { %11364 = vmatpush1.bf16.msra.mxu1 %v13799_v34  ;;  %10873 = vmatprep.subr.bf16.mxu0 %v13804_v51  ;;  %v13868_v34 = vld [vmem:[#allocation4 + $0x9a0] ss:$16 sps:$4 sm:$0xff]   ;;  %v13871_v51 = vld [vmem:[#allocation4 + $0x9a8] ss:$16 sps:$4 sm:$0xff]  }
 0x441   :  { %11365 = vmatprep.subr.bf16.mxu1 %v13807_v54  ;;  %v13876_v54 = vld [vmem:[#allocation4 + $0x9c4] ss:$16 sps:$4 sm:$0xff]  }
 0x443   :  { %10874 = vmatpush1.bf16.msra.mxu0 %v13802_v38  ;;  %v13879_v38 = vld [vmem:[#allocation4 + $0x9cc] ss:$16 sps:$4 sm:$0xff]  }
 0x444   :  { %11366 = vmatpush1.bf16.msra.mxu1 %v13805_v41  ;;  %10875 = vmatprep.subr.bf16.mxu0 %v13810_v45  ;;  %v13874_v41 = vld [vmem:[#allocation4 + $0x9c0] ss:$16 sps:$4 sm:$0xff]   ;;  %v13877_v45 = vld [vmem:[#allocation4 + $0x9c8] ss:$16 sps:$4 sm:$0xff]  }
 0x445   :  { %11367 = vmatprep.subr.bf16.mxu1 %v13813_v39  ;;  %v13882_v39 = vld [vmem:[#allocation4 + $0x9e4] ss:$16 sps:$4 sm:$0xff]  }
 0x447   :  { %10876 = vmatpush1.bf16.msra.mxu0 %v13808_v62  ;;  %v13885_v62 = vld [vmem:[#allocation4 + $0x9ec] ss:$16 sps:$4 sm:$0xff]  }
 0x448   :  { %11368 = vmatpush1.bf16.msra.mxu1 %v13811_v48  ;;  %10877 = vmatprep.subr.bf16.mxu0 %v13816_v50  ;;  %v13880_v48 = vld [vmem:[#allocation4 + $0x9e0] ss:$16 sps:$4 sm:$0xff]   ;;  %v13883_v50 = vld [vmem:[#allocation4 + $0x9e8] ss:$16 sps:$4 sm:$0xff]  }
 0x449   :  { %11369 = vmatprep.subr.bf16.mxu1 %v13819_v53  ;;  %v13888_v53 = vld [vmem:[#allocation4 + $0xa04] ss:$16 sps:$4 sm:$0xff]  }
 0x44b   :  { %10878 = vmatpush1.bf16.msra.mxu0 %v13814_v55  ;;  %v13891_v55 = vld [vmem:[#allocation4 + $0xa0c] ss:$16 sps:$4 sm:$0xff]  }
 0x44c   :  { %11370 = vmatpush1.bf16.msra.mxu1 %v13817_v56  ;;  %10879 = vmatprep.subr.bf16.mxu0 %v13822_v57  ;;  %v13886_v56 = vld [vmem:[#allocation4 + $0xa00] ss:$16 sps:$4 sm:$0xff]   ;;  %v6059_v57 = vpack.c.bf16 %v14947_v28, %v14947_v28  ;;  %v13903_v28 = vld [vmem:[#allocation4 + $0xa4c] ss:$16 sps:$4 sm:$0xff]  }
 0x44d   :  { %11371 = vmatprep.subr.bf16.mxu1 %v13825_v35  ;;  %v13889_v35 = vld [vmem:[#allocation4 + $0xa08] ss:$16 sps:$4 sm:$0xff]  }
 0x44f   :  { %10880 = vmatpush1.bf16.msra.mxu0 %v13820_v60  ;;  %v13894_v60 = vld [vmem:[#allocation4 + $0xa24] ss:$16 sps:$4 sm:$0xff]  }
 0x450   :  { %11372 = vmatpush1.bf16.msra.mxu1 %v13823_v61  ;;  %10881 = vmatprep.subr.bf16.mxu0 %v13828_v63  ;;  %v6062_v61 = vpack.c.bf16 %v14953_v47, %v14953_v47  ;;  %v13897_v63 = vld [vmem:[#allocation4 + $0xa2c] ss:$16 sps:$4 sm:$0xff]  }
 0x451   :  { %11373 = vmatprep.subr.bf16.mxu1 %v13831_v0  ;;  %v13892_v0 = vld [vmem:[#allocation4 + $0xa20] ss:$16 sps:$4 sm:$0xff]   ;;  %v13909_v47 = vld [vmem:[#allocation4 + $0xa6c] ss:$16 sps:$4 sm:$0xff]  }
 0x453   :  { %10882 = vmatpush1.bf16.msra.mxu0 %v13826_v1  ;;  %v13895_v1 = vld [vmem:[#allocation4 + $0xa28] ss:$16 sps:$4 sm:$0xff]  }
 0x454   :  { %11374 = vmatpush1.bf16.msra.mxu1 %v13829_v42  ;;  %10883 = vmatprep.subr.bf16.mxu0 %v13834_v2  ;;  %v13900_v42 = vld [vmem:[#allocation4 + $0xa44] ss:$16 sps:$4 sm:$0xff]   ;;  %v13898_v2 = vld [vmem:[#allocation4 + $0xa40] ss:$16 sps:$4 sm:$0xff]  }
 0x455   :  { %11375 = vmatprep.subr.bf16.mxu1 %v13837_v3  ;;  %v13901_v3 = vld [vmem:[#allocation4 + $0xa48] ss:$16 sps:$4 sm:$0xff]  }
 0x457   :  { %10884 = vmatpush1.bf16.msra.mxu0 %v13832_v4  ;;  %v13906_v4 = vld [vmem:[#allocation4 + $0xa64] ss:$16 sps:$4 sm:$0xff]  }
 0x458   :  { %11376 = vmatpush1.bf16.msra.mxu1 %v13835_v5  ;;  %10885 = vmatprep.subr.bf16.mxu0 %v13840_v6  ;;  %v13904_v5 = vld [vmem:[#allocation4 + $0xa60] ss:$16 sps:$4 sm:$0xff]   ;;  %v13907_v6 = vld [vmem:[#allocation4 + $0xa68] ss:$16 sps:$4 sm:$0xff]  }
 0x459   :  { %11377 = vmatprep.subr.bf16.mxu1 %v13843_v7  ;;  %v13912_v7 = vld [vmem:[#allocation4 + $0xa84] ss:$16 sps:$4 sm:$0xff]  }
 0x45b   :  { %10886 = vmatpush1.bf16.msra.mxu0 %v13838_v8  ;;  %v13915_v8 = vld [vmem:[#allocation4 + $0xa8c] ss:$16 sps:$4 sm:$0xff]  }
 0x45c   :  { %11378 = vmatpush1.bf16.msra.mxu1 %v13841_v27  ;;  %10887 = vmatprep.subr.bf16.mxu0 %v13846_v30  ;;  %v13910_v27 = vld [vmem:[#allocation4 + $0xa80] ss:$16 sps:$4 sm:$0xff]   ;;  %v13913_v30 = vld [vmem:[#allocation4 + $0xa88] ss:$16 sps:$4 sm:$0xff]  }
 0x45d   :  { %11379 = vmatprep.subr.bf16.mxu1 %v13849_v9  ;;  %v13918_v9 = vld [vmem:[#allocation4 + $0xaa4] ss:$16 sps:$4 sm:$0xff]  }
 0x45f   :  { %10888 = vmatpush1.bf16.msra.mxu0 %v13844_v10  ;;  %v13921_v10 = vld [vmem:[#allocation4 + $0xaac] ss:$16 sps:$4 sm:$0xff]  }
 0x460   :  { %11380 = vmatpush1.bf16.msra.mxu1 %v13847_v11  ;;  %10889 = vmatprep.subr.bf16.mxu0 %v13852_v58  ;;  %v13916_v11 = vld [vmem:[#allocation4 + $0xaa0] ss:$16 sps:$4 sm:$0xff]   ;;  %v13919_v58 = vld [vmem:[#allocation4 + $0xaa8] ss:$16 sps:$4 sm:$0xff]  }
 0x461   :  { %11381 = vmatprep.subr.bf16.mxu1 %v13855_v44  ;;  %v13924_v44 = vld [vmem:[#allocation4 + $0xac4] ss:$16 sps:$4 sm:$0xff]  }
 0x463   :  { %10890 = vmatpush1.bf16.msra.mxu0 %v13850_v12  ;;  %v13927_v12 = vld [vmem:[#allocation4 + $0xacc] ss:$16 sps:$4 sm:$0xff]  }
 0x464   :  { %11382 = vmatpush1.bf16.msra.mxu1 %v13853_v14  ;;  %10891 = vmatprep.subr.bf16.mxu0 %v13858_v15  ;;  %v13922_v14 = vld [vmem:[#allocation4 + $0xac0] ss:$16 sps:$4 sm:$0xff]   ;;  %v13925_v15 = vld [vmem:[#allocation4 + $0xac8] ss:$16 sps:$4 sm:$0xff]  }
 0x465   :  { %11383 = vmatprep.subr.bf16.mxu1 %v13861_v17  ;;  %v13930_v17 = vld [vmem:[#allocation4 + $0xae4] ss:$16 sps:$4 sm:$0xff]  }
 0x467   :  { %10892 = vmatpush1.bf16.msra.mxu0 %v13856_v18  ;;  %v13933_v18 = vld [vmem:[#allocation4 + $0xaec] ss:$16 sps:$4 sm:$0xff]  }
 0x468   :  { %11384 = vmatpush1.bf16.msra.mxu1 %v13859_v19  ;;  %10893 = vmatprep.subr.bf16.mxu0 %v13864_v22  ;;  %v13928_v19 = vld [vmem:[#allocation4 + $0xae0] ss:$16 sps:$4 sm:$0xff]   ;;  %v13931_v22 = vld [vmem:[#allocation4 + $0xae8] ss:$16 sps:$4 sm:$0xff]  }
 0x469   :  { %11385 = vmatprep.subr.bf16.mxu1 %v13867_v24  ;;  %v13936_v24 = vld [vmem:[#allocation4 + $0xb04] ss:$16 sps:$4 sm:$0xff]  }
 0x46b   :  { %10894 = vmatpush1.bf16.msra.mxu0 %v13862_v25  ;;  %v13939_v25 = vld [vmem:[#allocation4 + $0xb0c] ss:$16 sps:$4 sm:$0xff]  }
 0x46c   :  { %11386 = vmatpush1.bf16.msra.mxu1 %v13865_v43  ;;  %10895 = vmatprep.subr.bf16.mxu0 %v13870_v26  ;;  %v13934_v43 = vld [vmem:[#allocation4 + $0xb00] ss:$16 sps:$4 sm:$0xff]   ;;  %v13937_v26 = vld [vmem:[#allocation4 + $0xb08] ss:$16 sps:$4 sm:$0xff]  }
 0x46d   :  { %11387 = vmatprep.subr.bf16.mxu1 %v13873_v32  ;;  %v13942_v32 = vld [vmem:[#allocation4 + $0xb24] ss:$16 sps:$4 sm:$0xff]  }
 0x46f   :  { %10896 = vmatpush1.bf16.msra.mxu0 %v13868_v34  ;;  %v13945_v34 = vld [vmem:[#allocation4 + $0xb2c] ss:$16 sps:$4 sm:$0xff]  }
 0x470   :  { %11388 = vmatpush1.bf16.msra.mxu1 %v13871_v51  ;;  %10897 = vmatprep.subr.bf16.mxu0 %v13876_v54  ;;  %v13940_v51 = vld [vmem:[#allocation4 + $0xb20] ss:$16 sps:$4 sm:$0xff]   ;;  %v13943_v54 = vld [vmem:[#allocation4 + $0xb28] ss:$16 sps:$4 sm:$0xff]  }
 0x471   :  { %11389 = vmatprep.subr.bf16.mxu1 %v13879_v38  ;;  %v13948_v38 = vld [vmem:[#allocation4 + $0xb44] ss:$16 sps:$4 sm:$0xff]  }
 0x473   :  { %10898 = vmatpush1.bf16.msra.mxu0 %v13874_v41  ;;  %v13951_v41 = vld [vmem:[#allocation4 + $0xb4c] ss:$16 sps:$4 sm:$0xff]  }
 0x474   :  { %11390 = vmatpush1.bf16.msra.mxu1 %v13877_v45  ;;  %10899 = vmatprep.subr.bf16.mxu0 %v13882_v39  ;;  %v13946_v45 = vld [vmem:[#allocation4 + $0xb40] ss:$16 sps:$4 sm:$0xff]   ;;  %v13949_v39 = vld [vmem:[#allocation4 + $0xb48] ss:$16 sps:$4 sm:$0xff]  }
 0x475   :  { %11391 = vmatprep.subr.bf16.mxu1 %v13885_v62  ;;  %v13954_v62 = vld [vmem:[#allocation4 + $0xb64] ss:$16 sps:$4 sm:$0xff]  }
 0x477   :  { %10900 = vmatpush1.bf16.msra.mxu0 %v13880_v48  ;;  %v13957_v48 = vld [vmem:[#allocation4 + $0xb6c] ss:$16 sps:$4 sm:$0xff]  }
 0x478   :  { %11392 = vmatpush1.bf16.msra.mxu1 %v13883_v50  ;;  %10910 = vmatprep.subr.bf16.mxu0 %v13888_v53  ;;  %v13952_v50 = vld [vmem:[#allocation4 + $0xb60] ss:$16 sps:$4 sm:$0xff]   ;;  %v13955_v53 = vld [vmem:[#allocation4 + $0xb68] ss:$16 sps:$4 sm:$0xff]  }
 0x479   :  { %11402 = vmatprep.subr.bf16.mxu1 %v13891_v55  ;;  %v13960_v55 = vld [vmem:[#allocation4 + $0xb84] ss:$16 sps:$4 sm:$0xff]  }
 0x47a   :  { %10902 = vmatmul.mubr.bf16.vlgmr.msra.gmra.mrb[24].mxu0 %v6059_v57 }
 0x47b   :  { %11394 = vmatmul.mubr.bf16.vlgmr.msra.gmra.mrb[24].mxu1 %v6059_v57  ;;  %10911 = vmatpush1.bf16.msra.mxu0 %v13886_v56  ;;  %v13963_v56 = vld [vmem:[#allocation4 + $0xb8c] ss:$16 sps:$4 sm:$0xff]   ;;  %v13958_v57 = vld [vmem:[#allocation4 + $0xb80] ss:$16 sps:$4 sm:$0xff]  }
 0x47c   :  { %10942 = vmatprep.mubr.bf16.mxu0 %v6062_v61  ;;  %11403 = vmatpush1.bf16.msra.mxu1 %v13889_v35  ;;  %v13961_v35 = vld [vmem:[#allocation4 + $0xb88] ss:$16 sps:$4 sm:$0xff]  }
 0x47d   :  { %11434 = vmatprep.mubr.bf16.mxu1 %v6062_v61  ;;  %10912 = vmatprep.subr.bf16.mxu0 %v13894_v60  ;;  %v13966_v60 = vld [vmem:[#allocation4 + $0xba4] ss:$16 sps:$4 sm:$0xff]   ;;  %v13969_v61 = vld [vmem:[#allocation4 + $0xbac] ss:$16 sps:$4 sm:$0xff]  }
 0x47e   :  { %11404 = vmatprep.subr.bf16.mxu1 %v13897_v63  ;;  %v13964_v63 = vld [vmem:[#allocation4 + $0xba0] ss:$16 sps:$4 sm:$0xff]  }
 0x47f   :  { %10913 = vmatpush1.bf16.msra.mxu0 %v13892_v0  ;;  %v13967_v0 = vld [vmem:[#allocation4 + $0xba8] ss:$16 sps:$4 sm:$0xff]  }
 0x480   :  { %11405 = vmatpush1.bf16.msra.mxu1 %v13895_v1  ;;  %10914 = vmatprep.subr.bf16.mxu0 %v13900_v42  ;;  %v13972_v1 = vld [vmem:[#allocation4 + $0xbc4] ss:$16 sps:$4 sm:$0xff]   ;;  %v13975_v42 = vld [vmem:[#allocation4 + $0xbcc] ss:$16 sps:$4 sm:$0xff]  }
 0x481   :  { %11406 = vmatprep.subr.bf16.mxu1 %v13903_v28  ;;  %v13970_v28 = vld [vmem:[#allocation4 + $0xbc0] ss:$16 sps:$4 sm:$0xff]  }
 0x483   :  { %10915 = vmatpush1.bf16.msra.mxu0 %v13898_v2  ;;  %v13973_v2 = vld [vmem:[#allocation4 + $0xbc8] ss:$16 sps:$4 sm:$0xff]  }
 0x484   :  { %11407 = vmatpush1.bf16.msra.mxu1 %v13901_v3  ;;  %10916 = vmatprep.subr.bf16.mxu0 %v13906_v4  ;;  %v13978_v3 = vld [vmem:[#allocation4 + $0xbe4] ss:$16 sps:$4 sm:$0xff]   ;;  %v13981_v4 = vld [vmem:[#allocation4 + $0xbec] ss:$16 sps:$4 sm:$0xff]  }
 0x485   :  { %11408 = vmatprep.subr.bf16.mxu1 %v13909_v47  ;;  %v13976_v47 = vld [vmem:[#allocation4 + $0xbe0] ss:$16 sps:$4 sm:$0xff]  }
 0x487   :  { %10917 = vmatpush1.bf16.msra.mxu0 %v13904_v5  ;;  %v13979_v5 = vld [vmem:[#allocation4 + $0xbe8] ss:$16 sps:$4 sm:$0xff]  }
 0x488   :  { %11409 = vmatpush1.bf16.msra.mxu1 %v13907_v6  ;;  %10918 = vmatprep.subr.bf16.mxu0 %v13912_v7  ;;  %v13984_v6 = vld [vmem:[#allocation4 + $0xc04] ss:$16 sps:$4 sm:$0xff]   ;;  %v13987_v7 = vld [vmem:[#allocation4 + $0xc0c] ss:$16 sps:$4 sm:$0xff]  }
 0x489   :  { %11410 = vmatprep.subr.bf16.mxu1 %v13915_v8  ;;  %v13982_v8 = vld [vmem:[#allocation4 + $0xc00] ss:$16 sps:$4 sm:$0xff]  }
 0x48b   :  { %10919 = vmatpush1.bf16.msra.mxu0 %v13910_v27  ;;  %v6061_v27 = vpack.c.bf16 %v14949_v33, %v14949_v33  ;;  %v13999_v33 = vld [vmem:[#allocation4 + $0xc4c] ss:$16 sps:$4 sm:$0xff]  }
 0x48c   :  { %11411 = vmatpush1.bf16.msra.mxu1 %v13913_v30  ;;  %10920 = vmatprep.subr.bf16.mxu0 %v13918_v9  ;;  %v13985_v30 = vld [vmem:[#allocation4 + $0xc08] ss:$16 sps:$4 sm:$0xff]   ;;  %v13990_v9 = vld [vmem:[#allocation4 + $0xc24] ss:$16 sps:$4 sm:$0xff]  }
 0x48d   :  { %11412 = vmatprep.subr.bf16.mxu1 %v13921_v10  ;;  %v6064_v10 = vpack.c.bf16 %v14976_v46, %v14976_v46  ;;  %v14005_v46 = vld [vmem:[#allocation4 + $0xc6c] ss:$16 sps:$4 sm:$0xff]  }
 0x48f   :  { %10921 = vmatpush1.bf16.msra.mxu0 %v13916_v11  ;;  %v13993_v11 = vld [vmem:[#allocation4 + $0xc2c] ss:$16 sps:$4 sm:$0xff]  }
 0x490   :  { %11413 = vmatpush1.bf16.msra.mxu1 %v13919_v58  ;;  %10922 = vmatprep.subr.bf16.mxu0 %v13924_v44  ;;  %v13988_v58 = vld [vmem:[#allocation4 + $0xc20] ss:$16 sps:$4 sm:$0xff]   ;;  %v13991_v44 = vld [vmem:[#allocation4 + $0xc28] ss:$16 sps:$4 sm:$0xff]  }
 0x491   :  { %11414 = vmatprep.subr.bf16.mxu1 %v13927_v12  ;;  %v13996_v12 = vld [vmem:[#allocation4 + $0xc44] ss:$16 sps:$4 sm:$0xff]  }
 0x493   :  { %10923 = vmatpush1.bf16.msra.mxu0 %v13922_v14  ;;  %v13994_v14 = vld [vmem:[#allocation4 + $0xc40] ss:$16 sps:$4 sm:$0xff]  }
 0x494   :  { %11415 = vmatpush1.bf16.msra.mxu1 %v13925_v15  ;;  %10924 = vmatprep.subr.bf16.mxu0 %v13930_v17  ;;  %v13997_v15 = vld [vmem:[#allocation4 + $0xc48] ss:$16 sps:$4 sm:$0xff]   ;;  %v14002_v17 = vld [vmem:[#allocation4 + $0xc64] ss:$16 sps:$4 sm:$0xff]  }
 0x495   :  { %11416 = vmatprep.subr.bf16.mxu1 %v13933_v18  ;;  %v14000_v18 = vld [vmem:[#allocation4 + $0xc60] ss:$16 sps:$4 sm:$0xff]  }
 0x497   :  { %10925 = vmatpush1.bf16.msra.mxu0 %v13928_v19  ;;  %v14003_v19 = vld [vmem:[#allocation4 + $0xc68] ss:$16 sps:$4 sm:$0xff]  }
 0x498   :  { %11417 = vmatpush1.bf16.msra.mxu1 %v13931_v22  ;;  %10926 = vmatprep.subr.bf16.mxu0 %v13936_v24  ;;  %v14008_v22 = vld [vmem:[#allocation4 + $0xc84] ss:$16 sps:$4 sm:$0xff]   ;;  %v14011_v24 = vld [vmem:[#allocation4 + $0xc8c] ss:$16 sps:$4 sm:$0xff]  }
 0x499   :  { %11418 = vmatprep.subr.bf16.mxu1 %v13939_v25  ;;  %v14006_v25 = vld [vmem:[#allocation4 + $0xc80] ss:$16 sps:$4 sm:$0xff]  }
 0x49b   :  { %10927 = vmatpush1.bf16.msra.mxu0 %v13934_v43  ;;  %v14009_v43 = vld [vmem:[#allocation4 + $0xc88] ss:$16 sps:$4 sm:$0xff]  }
 0x49c   :  { %11419 = vmatpush1.bf16.msra.mxu1 %v13937_v26  ;;  %10928 = vmatprep.subr.bf16.mxu0 %v13942_v32  ;;  %v14014_v26 = vld [vmem:[#allocation4 + $0xca4] ss:$16 sps:$4 sm:$0xff]   ;;  %v14017_v32 = vld [vmem:[#allocation4 + $0xcac] ss:$16 sps:$4 sm:$0xff]  }
 0x49d   :  { %11420 = vmatprep.subr.bf16.mxu1 %v13945_v34  ;;  %v14012_v34 = vld [vmem:[#allocation4 + $0xca0] ss:$16 sps:$4 sm:$0xff]  }
 0x49f   :  { %10929 = vmatpush1.bf16.msra.mxu0 %v13940_v51  ;;  %v14015_v51 = vld [vmem:[#allocation4 + $0xca8] ss:$16 sps:$4 sm:$0xff]  }
 0x4a0   :  { %11421 = vmatpush1.bf16.msra.mxu1 %v13943_v54  ;;  %10930 = vmatprep.subr.bf16.mxu0 %v13948_v38  ;;  %v14020_v54 = vld [vmem:[#allocation4 + $0xcc4] ss:$16 sps:$4 sm:$0xff]   ;;  %v14023_v38 = vld [vmem:[#allocation4 + $0xccc] ss:$16 sps:$4 sm:$0xff]  }
 0x4a1   :  { %11422 = vmatprep.subr.bf16.mxu1 %v13951_v41  ;;  %v14018_v41 = vld [vmem:[#allocation4 + $0xcc0] ss:$16 sps:$4 sm:$0xff]  }
 0x4a3   :  { %10931 = vmatpush1.bf16.msra.mxu0 %v13946_v45  ;;  %v14021_v45 = vld [vmem:[#allocation4 + $0xcc8] ss:$16 sps:$4 sm:$0xff]  }
 0x4a4   :  { %11423 = vmatpush1.bf16.msra.mxu1 %v13949_v39  ;;  %10932 = vmatprep.subr.bf16.mxu0 %v13954_v62  ;;  %v14026_v39 = vld [vmem:[#allocation4 + $0xce4] ss:$16 sps:$4 sm:$0xff]   ;;  %v14029_v62 = vld [vmem:[#allocation4 + $0xcec] ss:$16 sps:$4 sm:$0xff]  }
 0x4a5   :  { %11424 = vmatprep.subr.bf16.mxu1 %v13957_v48  ;;  %v14024_v48 = vld [vmem:[#allocation4 + $0xce0] ss:$16 sps:$4 sm:$0xff]  }
 0x4a7   :  { %10933 = vmatpush1.bf16.msra.mxu0 %v13952_v50  ;;  %v14027_v50 = vld [vmem:[#allocation4 + $0xce8] ss:$16 sps:$4 sm:$0xff]  }
 0x4a8   :  { %11425 = vmatpush1.bf16.msra.mxu1 %v13955_v53  ;;  %10934 = vmatprep.subr.bf16.mxu0 %v13960_v55  ;;  %v14032_v53 = vld [vmem:[#allocation4 + $0xd04] ss:$16 sps:$4 sm:$0xff]   ;;  %v14035_v55 = vld [vmem:[#allocation4 + $0xd0c] ss:$16 sps:$4 sm:$0xff]  }
 0x4a9   :  { %11426 = vmatprep.subr.bf16.mxu1 %v13963_v56  ;;  %v14030_v56 = vld [vmem:[#allocation4 + $0xd00] ss:$16 sps:$4 sm:$0xff]  }
 0x4ab   :  { %10935 = vmatpush1.bf16.msra.mxu0 %v13958_v57  ;;  %v14033_v57 = vld [vmem:[#allocation4 + $0xd08] ss:$16 sps:$4 sm:$0xff]  }
 0x4ac   :  { %11427 = vmatpush1.bf16.msra.mxu1 %v13961_v35  ;;  %10936 = vmatprep.subr.bf16.mxu0 %v13966_v60  ;;  %v14038_v35 = vld [vmem:[#allocation4 + $0xd24] ss:$16 sps:$4 sm:$0xff]   ;;  %v14041_v60 = vld [vmem:[#allocation4 + $0xd2c] ss:$16 sps:$4 sm:$0xff]  }
 0x4ad   :  { %11428 = vmatprep.subr.bf16.mxu1 %v13969_v61  ;;  %v14036_v61 = vld [vmem:[#allocation4 + $0xd20] ss:$16 sps:$4 sm:$0xff]  }
 0x4af   :  { %10937 = vmatpush1.bf16.msra.mxu0 %v13964_v63  ;;  %v14039_v63 = vld [vmem:[#allocation4 + $0xd28] ss:$16 sps:$4 sm:$0xff]  }
 0x4b0   :  { %11429 = vmatpush1.bf16.msra.mxu1 %v13967_v0  ;;  %10938 = vmatprep.subr.bf16.mxu0 %v13972_v1  ;;  %v14044_v0 = vld [vmem:[#allocation4 + $0xd44] ss:$16 sps:$4 sm:$0xff]   ;;  %v14047_v1 = vld [vmem:[#allocation4 + $0xd4c] ss:$16 sps:$4 sm:$0xff]  }
 0x4b1   :  { %11430 = vmatprep.subr.bf16.mxu1 %v13975_v42  ;;  %v14042_v42 = vld [vmem:[#allocation4 + $0xd40] ss:$16 sps:$4 sm:$0xff]  }
 0x4b3   :  { %10939 = vmatpush1.bf16.msra.mxu0 %v13970_v28  ;;  %v14045_v28 = vld [vmem:[#allocation4 + $0xd48] ss:$16 sps:$4 sm:$0xff]  }
 0x4b4   :  { %11431 = vmatpush1.bf16.msra.mxu1 %v13973_v2  ;;  %10940 = vmatprep.subr.bf16.mxu0 %v13978_v3  ;;  %v14050_v2 = vld [vmem:[#allocation4 + $0xd64] ss:$16 sps:$4 sm:$0xff]   ;;  %v14053_v3 = vld [vmem:[#allocation4 + $0xd6c] ss:$16 sps:$4 sm:$0xff]  }
 0x4b5   :  { %11432 = vmatprep.subr.bf16.mxu1 %v13981_v4  ;;  %v14048_v4 = vld [vmem:[#allocation4 + $0xd60] ss:$16 sps:$4 sm:$0xff]  }
 0x4b7   :  { %10941 = vmatpush1.bf16.msra.mxu0 %v13976_v47  ;;  %v14051_v47 = vld [vmem:[#allocation4 + $0xd68] ss:$16 sps:$4 sm:$0xff]  }
 0x4b8   :  { %11433 = vmatpush1.bf16.msra.mxu1 %v13979_v5  ;;  %10951 = vmatprep.subr.bf16.mxu0 %v13984_v6  ;;  %v14056_v5 = vld [vmem:[#allocation4 + $0xd84] ss:$16 sps:$4 sm:$0xff]   ;;  %v14059_v6 = vld [vmem:[#allocation4 + $0xd8c] ss:$16 sps:$4 sm:$0xff]  }
 0x4b9   :  { %11443 = vmatprep.subr.bf16.mxu1 %v13987_v7  ;;  %v14054_v7 = vld [vmem:[#allocation4 + $0xd80] ss:$16 sps:$4 sm:$0xff]  }
 0x4ba   :  { %10943 = vmatmul.mubr.bf16.vlgmr.msra.gmra.mrb[24].mxu0 %v6061_v27 }
 0x4bb   :  { %11435 = vmatmul.mubr.bf16.vlgmr.msra.gmra.mrb[24].mxu1 %v6061_v27  ;;  %10952 = vmatpush1.bf16.msra.mxu0 %v13982_v8  ;;  %v14057_v8 = vld [vmem:[#allocation4 + $0xd88] ss:$16 sps:$4 sm:$0xff]   ;;  %v14062_v27 = vld [vmem:[#allocation4 + $0xda4] ss:$16 sps:$4 sm:$0xff]  }
 0x4bc   :  { %10983 = vmatprep.mubr.bf16.mxu0 %v6064_v10  ;;  %11444 = vmatpush1.bf16.msra.mxu1 %v13985_v30  ;;  %v14065_v30 = vld [vmem:[#allocation4 + $0xdac] ss:$16 sps:$4 sm:$0xff]  }
 0x4bd   :  { %11475 = vmatprep.mubr.bf16.mxu1 %v6064_v10  ;;  %10953 = vmatprep.subr.bf16.mxu0 %v13990_v9  ;;  %v14060_v9 = vld [vmem:[#allocation4 + $0xda0] ss:$16 sps:$4 sm:$0xff]   ;;  %v14063_v10 = vld [vmem:[#allocation4 + $0xda8] ss:$16 sps:$4 sm:$0xff]  }
 0x4be   :  { %11445 = vmatprep.subr.bf16.mxu1 %v13993_v11  ;;  %v14068_v11 = vld [vmem:[#allocation4 + $0xdc4] ss:$16 sps:$4 sm:$0xff]  }
 0x4bf   :  { %10954 = vmatpush1.bf16.msra.mxu0 %v13988_v58  ;;  %v14071_v58 = vld [vmem:[#allocation4 + $0xdcc] ss:$16 sps:$4 sm:$0xff]  }
 0x4c0   :  { %11446 = vmatpush1.bf16.msra.mxu1 %v13991_v44  ;;  %10955 = vmatprep.subr.bf16.mxu0 %v13996_v12  ;;  %v14066_v44 = vld [vmem:[#allocation4 + $0xdc0] ss:$16 sps:$4 sm:$0xff]   ;;  %v14069_v12 = vld [vmem:[#allocation4 + $0xdc8] ss:$16 sps:$4 sm:$0xff]  }
 0x4c1   :  { %11447 = vmatprep.subr.bf16.mxu1 %v13999_v33  ;;  %v14074_v33 = vld [vmem:[#allocation4 + $0xde4] ss:$16 sps:$4 sm:$0xff]  }
 0x4c3   :  { %10956 = vmatpush1.bf16.msra.mxu0 %v13994_v14  ;;  %v14077_v14 = vld [vmem:[#allocation4 + $0xdec] ss:$16 sps:$4 sm:$0xff]  }
 0x4c4   :  { %11448 = vmatpush1.bf16.msra.mxu1 %v13997_v15  ;;  %10957 = vmatprep.subr.bf16.mxu0 %v14002_v17  ;;  %v14072_v15 = vld [vmem:[#allocation4 + $0xde0] ss:$16 sps:$4 sm:$0xff]   ;;  %v14075_v17 = vld [vmem:[#allocation4 + $0xde8] ss:$16 sps:$4 sm:$0xff]  }
 0x4c5   :  { %11449 = vmatprep.subr.bf16.mxu1 %v14005_v46  ;;  %v14080_v46 = vld [vmem:[#allocation4 + $0xe04] ss:$16 sps:$4 sm:$0xff]  }
 0x4c7   :  { %10958 = vmatpush1.bf16.msra.mxu0 %v14000_v18  ;;  %v14083_v18 = vld [vmem:[#allocation4 + $0xe0c] ss:$16 sps:$4 sm:$0xff]  }
 0x4c8   :  { %11450 = vmatpush1.bf16.msra.mxu1 %v14003_v19  ;;  %10959 = vmatprep.subr.bf16.mxu0 %v14008_v22  ;;  %v14078_v19 = vld [vmem:[#allocation4 + $0xe00] ss:$16 sps:$4 sm:$0xff]   ;;  %v6063_v22 = vpack.c.bf16 %v14972_v29, %v14972_v29  ;;  %v14095_v29 = vld [vmem:[#allocation4 + $0xe4c] ss:$16 sps:$4 sm:$0xff]  }
 0x4c9   :  { %11451 = vmatprep.subr.bf16.mxu1 %v14011_v24  ;;  %v14081_v24 = vld [vmem:[#allocation4 + $0xe08] ss:$16 sps:$4 sm:$0xff]  }
 0x4cb   :  { %10960 = vmatpush1.bf16.msra.mxu0 %v14006_v25  ;;  %v14086_v25 = vld [vmem:[#allocation4 + $0xe24] ss:$16 sps:$4 sm:$0xff]  }
 0x4cc   :  { %11452 = vmatpush1.bf16.msra.mxu1 %v14009_v43  ;;  %10961 = vmatprep.subr.bf16.mxu0 %v14014_v26  ;;  %v6066_v43 = vpack.c.bf16 %v14978_v52, %v14978_v52  ;;  %v14089_v26 = vld [vmem:[#allocation4 + $0xe2c] ss:$16 sps:$4 sm:$0xff]  }
 0x4cd   :  { %11453 = vmatprep.subr.bf16.mxu1 %v14017_v32  ;;  %v14084_v32 = vld [vmem:[#allocation4 + $0xe20] ss:$16 sps:$4 sm:$0xff]   ;;  %v14101_v52 = vld [vmem:[#allocation4 + $0xe6c] ss:$16 sps:$4 sm:$0xff]  }
 0x4cf   :  { %10962 = vmatpush1.bf16.msra.mxu0 %v14012_v34  ;;  %v14087_v34 = vld [vmem:[#allocation4 + $0xe28] ss:$16 sps:$4 sm:$0xff]  }
 0x4d0   :  { %11454 = vmatpush1.bf16.msra.mxu1 %v14015_v51  ;;  %10963 = vmatprep.subr.bf16.mxu0 %v14020_v54  ;;  %v14092_v51 = vld [vmem:[#allocation4 + $0xe44] ss:$16 sps:$4 sm:$0xff]   ;;  %v14090_v54 = vld [vmem:[#allocation4 + $0xe40] ss:$16 sps:$4 sm:$0xff]  }
 0x4d1   :  { %11455 = vmatprep.subr.bf16.mxu1 %v14023_v38  ;;  %v14093_v38 = vld [vmem:[#allocation4 + $0xe48] ss:$16 sps:$4 sm:$0xff]  }
 0x4d3   :  { %10964 = vmatpush1.bf16.msra.mxu0 %v14018_v41  ;;  %v14098_v41 = vld [vmem:[#allocation4 + $0xe64] ss:$16 sps:$4 sm:$0xff]  }
 0x4d4   :  { %11456 = vmatpush1.bf16.msra.mxu1 %v14021_v45  ;;  %10965 = vmatprep.subr.bf16.mxu0 %v14026_v39  ;;  %v14096_v45 = vld [vmem:[#allocation4 + $0xe60] ss:$16 sps:$4 sm:$0xff]   ;;  %v14099_v39 = vld [vmem:[#allocation4 + $0xe68] ss:$16 sps:$4 sm:$0xff]  }
 0x4d5   :  { %11457 = vmatprep.subr.bf16.mxu1 %v14029_v62  ;;  %v14104_v62 = vld [vmem:[#allocation4 + $0xe84] ss:$16 sps:$4 sm:$0xff]  }
 0x4d7   :  { %10966 = vmatpush1.bf16.msra.mxu0 %v14024_v48  ;;  %v14107_v48 = vld [vmem:[#allocation4 + $0xe8c] ss:$16 sps:$4 sm:$0xff]  }
 0x4d8   :  { %11458 = vmatpush1.bf16.msra.mxu1 %v14027_v50  ;;  %10967 = vmatprep.subr.bf16.mxu0 %v14032_v53  ;;  %v14102_v50 = vld [vmem:[#allocation4 + $0xe80] ss:$16 sps:$4 sm:$0xff]   ;;  %v14105_v53 = vld [vmem:[#allocation4 + $0xe88] ss:$16 sps:$4 sm:$0xff]  }
 0x4d9   :  { %11459 = vmatprep.subr.bf16.mxu1 %v14035_v55  ;;  %v14110_v55 = vld [vmem:[#allocation4 + $0xea4] ss:$16 sps:$4 sm:$0xff]  }
 0x4db   :  { %10968 = vmatpush1.bf16.msra.mxu0 %v14030_v56  ;;  %v14113_v56 = vld [vmem:[#allocation4 + $0xeac] ss:$16 sps:$4 sm:$0xff]  }
 0x4dc   :  { %11460 = vmatpush1.bf16.msra.mxu1 %v14033_v57  ;;  %10969 = vmatprep.subr.bf16.mxu0 %v14038_v35  ;;  %v14108_v57 = vld [vmem:[#allocation4 + $0xea0] ss:$16 sps:$4 sm:$0xff]   ;;  %v14111_v35 = vld [vmem:[#allocation4 + $0xea8] ss:$16 sps:$4 sm:$0xff]  }
 0x4dd   :  { %11461 = vmatprep.subr.bf16.mxu1 %v14041_v60  ;;  %v14116_v60 = vld [vmem:[#allocation4 + $0xec4] ss:$16 sps:$4 sm:$0xff]  }
 0x4df   :  { %10970 = vmatpush1.bf16.msra.mxu0 %v14036_v61  ;;  %v14119_v61 = vld [vmem:[#allocation4 + $0xecc] ss:$16 sps:$4 sm:$0xff]  }
 0x4e0   :  { %11462 = vmatpush1.bf16.msra.mxu1 %v14039_v63  ;;  %10971 = vmatprep.subr.bf16.mxu0 %v14044_v0  ;;  %v14114_v63 = vld [vmem:[#allocation4 + $0xec0] ss:$16 sps:$4 sm:$0xff]   ;;  %v14117_v0 = vld [vmem:[#allocation4 + $0xec8] ss:$16 sps:$4 sm:$0xff]  }
 0x4e1   :  { %11463 = vmatprep.subr.bf16.mxu1 %v14047_v1  ;;  %v14122_v1 = vld [vmem:[#allocation4 + $0xee4] ss:$16 sps:$4 sm:$0xff]  }
 0x4e3   :  { %10972 = vmatpush1.bf16.msra.mxu0 %v14042_v42  ;;  %v14125_v42 = vld [vmem:[#allocation4 + $0xeec] ss:$16 sps:$4 sm:$0xff]  }
 0x4e4   :  { %11464 = vmatpush1.bf16.msra.mxu1 %v14045_v28  ;;  %10973 = vmatprep.subr.bf16.mxu0 %v14050_v2  ;;  %v14120_v28 = vld [vmem:[#allocation4 + $0xee0] ss:$16 sps:$4 sm:$0xff]   ;;  %v14123_v2 = vld [vmem:[#allocation4 + $0xee8] ss:$16 sps:$4 sm:$0xff]  }
 0x4e5   :  { %11465 = vmatprep.subr.bf16.mxu1 %v14053_v3  ;;  %v14128_v3 = vld [vmem:[#allocation4 + $0xf04] ss:$16 sps:$4 sm:$0xff]  }
 0x4e7   :  { %10974 = vmatpush1.bf16.msra.mxu0 %v14048_v4  ;;  %v14131_v4 = vld [vmem:[#allocation4 + $0xf0c] ss:$16 sps:$4 sm:$0xff]  }
 0x4e8   :  { %11466 = vmatpush1.bf16.msra.mxu1 %v14051_v47  ;;  %10975 = vmatprep.subr.bf16.mxu0 %v14056_v5  ;;  %v14126_v47 = vld [vmem:[#allocation4 + $0xf00] ss:$16 sps:$4 sm:$0xff]   ;;  %v14129_v5 = vld [vmem:[#allocation4 + $0xf08] ss:$16 sps:$4 sm:$0xff]  }
 0x4e9   :  { %11467 = vmatprep.subr.bf16.mxu1 %v14059_v6  ;;  %v14134_v6 = vld [vmem:[#allocation4 + $0xf24] ss:$16 sps:$4 sm:$0xff]  }
 0x4eb   :  { %10976 = vmatpush1.bf16.msra.mxu0 %v14054_v7  ;;  %v14137_v7 = vld [vmem:[#allocation4 + $0xf2c] ss:$16 sps:$4 sm:$0xff]  }
 0x4ec   :  { %11468 = vmatpush1.bf16.msra.mxu1 %v14057_v8  ;;  %10977 = vmatprep.subr.bf16.mxu0 %v14062_v27  ;;  %v14132_v8 = vld [vmem:[#allocation4 + $0xf20] ss:$16 sps:$4 sm:$0xff]   ;;  %v14135_v27 = vld [vmem:[#allocation4 + $0xf28] ss:$16 sps:$4 sm:$0xff]  }
 0x4ed   :  { %11469 = vmatprep.subr.bf16.mxu1 %v14065_v30  ;;  %v14140_v30 = vld [vmem:[#allocation4 + $0xf44] ss:$16 sps:$4 sm:$0xff]  }
 0x4ef   :  { %10978 = vmatpush1.bf16.msra.mxu0 %v14060_v9  ;;  %v14143_v9 = vld [vmem:[#allocation4 + $0xf4c] ss:$16 sps:$4 sm:$0xff]  }
 0x4f0   :  { %11470 = vmatpush1.bf16.msra.mxu1 %v14063_v10  ;;  %10979 = vmatprep.subr.bf16.mxu0 %v14068_v11  ;;  %v14138_v10 = vld [vmem:[#allocation4 + $0xf40] ss:$16 sps:$4 sm:$0xff]   ;;  %v14141_v11 = vld [vmem:[#allocation4 + $0xf48] ss:$16 sps:$4 sm:$0xff]  }
 0x4f1   :  { %11471 = vmatprep.subr.bf16.mxu1 %v14071_v58  ;;  %v14146_v58 = vld [vmem:[#allocation4 + $0xf64] ss:$16 sps:$4 sm:$0xff]  }
 0x4f3   :  { %10980 = vmatpush1.bf16.msra.mxu0 %v14066_v44  ;;  %v14149_v44 = vld [vmem:[#allocation4 + $0xf6c] ss:$16 sps:$4 sm:$0xff]  }
 0x4f4   :  { %11472 = vmatpush1.bf16.msra.mxu1 %v14069_v12  ;;  %10981 = vmatprep.subr.bf16.mxu0 %v14074_v33  ;;  %v14144_v12 = vld [vmem:[#allocation4 + $0xf60] ss:$16 sps:$4 sm:$0xff]   ;;  %v14147_v33 = vld [vmem:[#allocation4 + $0xf68] ss:$16 sps:$4 sm:$0xff]  }
 0x4f5   :  { %11473 = vmatprep.subr.bf16.mxu1 %v14077_v14  ;;  %v14152_v14 = vld [vmem:[#allocation4 + $0xf84] ss:$16 sps:$4 sm:$0xff]  }
 0x4f7   :  { %10982 = vmatpush1.bf16.msra.mxu0 %v14072_v15  ;;  %v14155_v15 = vld [vmem:[#allocation4 + $0xf8c] ss:$16 sps:$4 sm:$0xff]  }
 0x4f8   :  { %11474 = vmatpush1.bf16.msra.mxu1 %v14075_v17  ;;  %10992 = vmatprep.subr.bf16.mxu0 %v14080_v46  ;;  %v14150_v17 = vld [vmem:[#allocation4 + $0xf80] ss:$16 sps:$4 sm:$0xff]   ;;  %v14153_v46 = vld [vmem:[#allocation4 + $0xf88] ss:$16 sps:$4 sm:$0xff]  }
 0x4f9   :  { %11484 = vmatprep.subr.bf16.mxu1 %v14083_v18  ;;  %v14158_v18 = vld [vmem:[#allocation4 + $0xfa4] ss:$16 sps:$4 sm:$0xff]  }
 0x4fa   :  { %10984 = vmatmul.mubr.bf16.vlgmr.msra.gmra.mrb[24].mxu0 %v6063_v22 }
 0x4fb   :  { %11476 = vmatmul.mubr.bf16.vlgmr.msra.gmra.mrb[24].mxu1 %v6063_v22  ;;  %10993 = vmatpush1.bf16.msra.mxu0 %v14078_v19  ;;  %v14161_v19 = vld [vmem:[#allocation4 + $0xfac] ss:$16 sps:$4 sm:$0xff]   ;;  %v14156_v22 = vld [vmem:[#allocation4 + $0xfa0] ss:$16 sps:$4 sm:$0xff]  }
 0x4fc   :  { %11024 = vmatprep.mubr.bf16.mxu0 %v6066_v43  ;;  %11485 = vmatpush1.bf16.msra.mxu1 %v14081_v24  ;;  %v14159_v24 = vld [vmem:[#allocation4 + $0xfa8] ss:$16 sps:$4 sm:$0xff]  }
 0x4fd   :  { %11516 = vmatprep.mubr.bf16.mxu1 %v6066_v43  ;;  %10994 = vmatprep.subr.bf16.mxu0 %v14086_v25  ;;  %v14164_v25 = vld [vmem:[#allocation4 + $0xfc4] ss:$16 sps:$4 sm:$0xff]   ;;  %v14167_v43 = vld [vmem:[#allocation4 + $0xfcc] ss:$16 sps:$4 sm:$0xff]  }
 0x4fe   :  { %11486 = vmatprep.subr.bf16.mxu1 %v14089_v26  ;;  %v14162_v26 = vld [vmem:[#allocation4 + $0xfc0] ss:$16 sps:$4 sm:$0xff]  }
 0x4ff   :  { %10995 = vmatpush1.bf16.msra.mxu0 %v14084_v32  ;;  %v14165_v32 = vld [vmem:[#allocation4 + $0xfc8] ss:$16 sps:$4 sm:$0xff]  }
 0x500   :  { %11487 = vmatpush1.bf16.msra.mxu1 %v14087_v34  ;;  %10996 = vmatprep.subr.bf16.mxu0 %v14092_v51  ;;  %v14170_v34 = vld [vmem:[#allocation4 + $0xfe4] ss:$16 sps:$4 sm:$0xff]   ;;  %v14173_v51 = vld [vmem:[#allocation4 + $0xfec] ss:$16 sps:$4 sm:$0xff]  }
 0x501   :  { %11488 = vmatprep.subr.bf16.mxu1 %v14095_v29  ;;  %v14168_v29 = vld [vmem:[#allocation4 + $0xfe0] ss:$16 sps:$4 sm:$0xff]  }
 0x503   :  { %10997 = vmatpush1.bf16.msra.mxu0 %v14090_v54  ;;  %v14171_v54 = vld [vmem:[#allocation4 + $0xfe8] ss:$16 sps:$4 sm:$0xff]  }
 0x504   :  { %11489 = vmatpush1.bf16.msra.mxu1 %v14093_v38  ;;  %10998 = vmatprep.subr.bf16.mxu0 %v14098_v41  ;;  %v14176_v38 = vld [vmem:[#allocation4 + $0x1004] ss:$16 sps:$4 sm:$0xff]   ;;  %v14179_v41 = vld [vmem:[#allocation4 + $0x100c] ss:$16 sps:$4 sm:$0xff]  }
 0x505   :  { %11490 = vmatprep.subr.bf16.mxu1 %v14101_v52  ;;  %v14174_v52 = vld [vmem:[#allocation4 + $0x1000] ss:$16 sps:$4 sm:$0xff]  }
 0x507   :  { %10999 = vmatpush1.bf16.msra.mxu0 %v14096_v45  ;;  %v6065_v45 = vpack.c.bf16 %v14974_v37, %v14974_v37  ;;  %v14191_v37 = vld [vmem:[#allocation4 + $0x104c] ss:$16 sps:$4 sm:$0xff]  }
 0x508   :  { %11491 = vmatpush1.bf16.msra.mxu1 %v14099_v39  ;;  %11000 = vmatprep.subr.bf16.mxu0 %v14104_v62  ;;  %v14177_v39 = vld [vmem:[#allocation4 + $0x1008] ss:$16 sps:$4 sm:$0xff]   ;;  %v14182_v62 = vld [vmem:[#allocation4 + $0x1024] ss:$16 sps:$4 sm:$0xff]  }
 0x509   :  { %11492 = vmatprep.subr.bf16.mxu1 %v14107_v48  ;;  %v6068_v48 = vpack.c.bf16 %v15001_v21, %v15001_v21  ;;  %v14197_v21 = vld [vmem:[#allocation4 + $0x106c] ss:$16 sps:$4 sm:$0xff]  }
 0x50b   :  { %11001 = vmatpush1.bf16.msra.mxu0 %v14102_v50  ;;  %v14185_v50 = vld [vmem:[#allocation4 + $0x102c] ss:$16 sps:$4 sm:$0xff]  }
 0x50c   :  { %11493 = vmatpush1.bf16.msra.mxu1 %v14105_v53  ;;  %11002 = vmatprep.subr.bf16.mxu0 %v14110_v55  ;;  %v14180_v53 = vld [vmem:[#allocation4 + $0x1020] ss:$16 sps:$4 sm:$0xff]   ;;  %v14183_v55 = vld [vmem:[#allocation4 + $0x1028] ss:$16 sps:$4 sm:$0xff]  }
 0x50d   :  { %11494 = vmatprep.subr.bf16.mxu1 %v14113_v56  ;;  %v14188_v56 = vld [vmem:[#allocation4 + $0x1044] ss:$16 sps:$4 sm:$0xff]  }
 0x50f   :  { %11003 = vmatpush1.bf16.msra.mxu0 %v14108_v57  ;;  %v14186_v57 = vld [vmem:[#allocation4 + $0x1040] ss:$16 sps:$4 sm:$0xff]  }
 0x510   :  { %11495 = vmatpush1.bf16.msra.mxu1 %v14111_v35  ;;  %11004 = vmatprep.subr.bf16.mxu0 %v14116_v60  ;;  %v14189_v35 = vld [vmem:[#allocation4 + $0x1048] ss:$16 sps:$4 sm:$0xff]   ;;  %v14194_v60 = vld [vmem:[#allocation4 + $0x1064] ss:$16 sps:$4 sm:$0xff]  }
 0x511   :  { %11496 = vmatprep.subr.bf16.mxu1 %v14119_v61  ;;  %v14192_v61 = vld [vmem:[#allocation4 + $0x1060] ss:$16 sps:$4 sm:$0xff]  }
 0x513   :  { %11005 = vmatpush1.bf16.msra.mxu0 %v14114_v63  ;;  %v14195_v63 = vld [vmem:[#allocation4 + $0x1068] ss:$16 sps:$4 sm:$0xff]  }
 0x514   :  { %11497 = vmatpush1.bf16.msra.mxu1 %v14117_v0  ;;  %11006 = vmatprep.subr.bf16.mxu0 %v14122_v1  ;;  %v14200_v0 = vld [vmem:[#allocation4 + $0x1084] ss:$16 sps:$4 sm:$0xff]   ;;  %v14203_v1 = vld [vmem:[#allocation4 + $0x108c] ss:$16 sps:$4 sm:$0xff]  }
 0x515   :  { %11498 = vmatprep.subr.bf16.mxu1 %v14125_v42  ;;  %v14198_v42 = vld [vmem:[#allocation4 + $0x1080] ss:$16 sps:$4 sm:$0xff]  }
 0x517   :  { %11007 = vmatpush1.bf16.msra.mxu0 %v14120_v28  ;;  %v14201_v28 = vld [vmem:[#allocation4 + $0x1088] ss:$16 sps:$4 sm:$0xff]  }
 0x518   :  { %11499 = vmatpush1.bf16.msra.mxu1 %v14123_v2  ;;  %11008 = vmatprep.subr.bf16.mxu0 %v14128_v3  ;;  %v14206_v2 = vld [vmem:[#allocation4 + $0x10a4] ss:$16 sps:$4 sm:$0xff]   ;;  %v14209_v3 = vld [vmem:[#allocation4 + $0x10ac] ss:$16 sps:$4 sm:$0xff]  }
 0x519   :  { %11500 = vmatprep.subr.bf16.mxu1 %v14131_v4  ;;  %v14204_v4 = vld [vmem:[#allocation4 + $0x10a0] ss:$16 sps:$4 sm:$0xff]  }
 0x51b   :  { %11009 = vmatpush1.bf16.msra.mxu0 %v14126_v47  ;;  %v14207_v47 = vld [vmem:[#allocation4 + $0x10a8] ss:$16 sps:$4 sm:$0xff]  }
 0x51c   :  { %11501 = vmatpush1.bf16.msra.mxu1 %v14129_v5  ;;  %11010 = vmatprep.subr.bf16.mxu0 %v14134_v6  ;;  %v14212_v5 = vld [vmem:[#allocation4 + $0x10c4] ss:$16 sps:$4 sm:$0xff]   ;;  %v14215_v6 = vld [vmem:[#allocation4 + $0x10cc] ss:$16 sps:$4 sm:$0xff]  }
 0x51d   :  { %11502 = vmatprep.subr.bf16.mxu1 %v14137_v7  ;;  %v14210_v7 = vld [vmem:[#allocation4 + $0x10c0] ss:$16 sps:$4 sm:$0xff]  }
 0x51f   :  { %11011 = vmatpush1.bf16.msra.mxu0 %v14132_v8  ;;  %v14213_v8 = vld [vmem:[#allocation4 + $0x10c8] ss:$16 sps:$4 sm:$0xff]  }
 0x520   :  { %11503 = vmatpush1.bf16.msra.mxu1 %v14135_v27  ;;  %11012 = vmatprep.subr.bf16.mxu0 %v14140_v30  ;;  %v14218_v27 = vld [vmem:[#allocation4 + $0x10e4] ss:$16 sps:$4 sm:$0xff]   ;;  %v14221_v30 = vld [vmem:[#allocation4 + $0x10ec] ss:$16 sps:$4 sm:$0xff]  }
 0x521   :  { %11504 = vmatprep.subr.bf16.mxu1 %v14143_v9  ;;  %v14216_v9 = vld [vmem:[#allocation4 + $0x10e0] ss:$16 sps:$4 sm:$0xff]  }
 0x523   :  { %11013 = vmatpush1.bf16.msra.mxu0 %v14138_v10  ;;  %v14219_v10 = vld [vmem:[#allocation4 + $0x10e8] ss:$16 sps:$4 sm:$0xff]  }
 0x524   :  { %11505 = vmatpush1.bf16.msra.mxu1 %v14141_v11  ;;  %11014 = vmatprep.subr.bf16.mxu0 %v14146_v58  ;;  %v14224_v11 = vld [vmem:[#allocation4 + $0x1104] ss:$16 sps:$4 sm:$0xff]   ;;  %v14227_v58 = vld [vmem:[#allocation4 + $0x110c] ss:$16 sps:$4 sm:$0xff]  }
 0x525   :  { %11506 = vmatprep.subr.bf16.mxu1 %v14149_v44  ;;  %v14222_v44 = vld [vmem:[#allocation4 + $0x1100] ss:$16 sps:$4 sm:$0xff]  }
 0x527   :  { %11015 = vmatpush1.bf16.msra.mxu0 %v14144_v12  ;;  %v14225_v12 = vld [vmem:[#allocation4 + $0x1108] ss:$16 sps:$4 sm:$0xff]  }
 0x528   :  { %11507 = vmatpush1.bf16.msra.mxu1 %v14147_v33  ;;  %11016 = vmatprep.subr.bf16.mxu0 %v14152_v14  ;;  %v14230_v33 = vld [vmem:[#allocation4 + $0x1124] ss:$16 sps:$4 sm:$0xff]   ;;  %v14233_v14 = vld [vmem:[#allocation4 + $0x112c] ss:$16 sps:$4 sm:$0xff]  }
 0x529   :  { %11508 = vmatprep.subr.bf16.mxu1 %v14155_v15  ;;  %v14228_v15 = vld [vmem:[#allocation4 + $0x1120] ss:$16 sps:$4 sm:$0xff]  }
 0x52b   :  { %11017 = vmatpush1.bf16.msra.mxu0 %v14150_v17  ;;  %v14231_v17 = vld [vmem:[#allocation4 + $0x1128] ss:$16 sps:$4 sm:$0xff]  }
 0x52c   :  { %11509 = vmatpush1.bf16.msra.mxu1 %v14153_v46  ;;  %11018 = vmatprep.subr.bf16.mxu0 %v14158_v18  ;;  %v14236_v46 = vld [vmem:[#allocation4 + $0x1144] ss:$16 sps:$4 sm:$0xff]   ;;  %v14239_v18 = vld [vmem:[#allocation4 + $0x114c] ss:$16 sps:$4 sm:$0xff]  }
 0x52d   :  { %11510 = vmatprep.subr.bf16.mxu1 %v14161_v19  ;;  %v14234_v19 = vld [vmem:[#allocation4 + $0x1140] ss:$16 sps:$4 sm:$0xff]  }
 0x52f   :  { %11019 = vmatpush1.bf16.msra.mxu0 %v14156_v22  ;;  %v14237_v22 = vld [vmem:[#allocation4 + $0x1148] ss:$16 sps:$4 sm:$0xff]  }
 0x530   :  { %11511 = vmatpush1.bf16.msra.mxu1 %v14159_v24  ;;  %11020 = vmatprep.subr.bf16.mxu0 %v14164_v25  ;;  %v14242_v24 = vld [vmem:[#allocation4 + $0x1164] ss:$16 sps:$4 sm:$0xff]   ;;  %v14245_v25 = vld [vmem:[#allocation4 + $0x116c] ss:$16 sps:$4 sm:$0xff]  }
 0x531   :  { %11512 = vmatprep.subr.bf16.mxu1 %v14167_v43  ;;  %v14240_v43 = vld [vmem:[#allocation4 + $0x1160] ss:$16 sps:$4 sm:$0xff]  }
 0x533   :  { %11021 = vmatpush1.bf16.msra.mxu0 %v14162_v26  ;;  %v14243_v26 = vld [vmem:[#allocation4 + $0x1168] ss:$16 sps:$4 sm:$0xff]  }
 0x534   :  { %11513 = vmatpush1.bf16.msra.mxu1 %v14165_v32  ;;  %11022 = vmatprep.subr.bf16.mxu0 %v14170_v34  ;;  %v14248_v32 = vld [vmem:[#allocation4 + $0x1184] ss:$16 sps:$4 sm:$0xff]   ;;  %v14251_v34 = vld [vmem:[#allocation4 + $0x118c] ss:$16 sps:$4 sm:$0xff]  }
 0x535   :  { %11514 = vmatprep.subr.bf16.mxu1 %v14173_v51  ;;  %v14246_v51 = vld [vmem:[#allocation4 + $0x1180] ss:$16 sps:$4 sm:$0xff]  }
 0x537   :  { %11023 = vmatpush1.bf16.msra.mxu0 %v14168_v29  ;;  %v14249_v29 = vld [vmem:[#allocation4 + $0x1188] ss:$16 sps:$4 sm:$0xff]  }
 0x538   :  { %11515 = vmatpush1.bf16.msra.mxu1 %v14171_v54  ;;  %11033 = vmatprep.subr.bf16.mxu0 %v14176_v38  ;;  %v14254_v54 = vld [vmem:[#allocation4 + $0x11a4] ss:$16 sps:$4 sm:$0xff]   ;;  %v14257_v38 = vld [vmem:[#allocation4 + $0x11ac] ss:$16 sps:$4 sm:$0xff]  }
 0x539   :  { %11525 = vmatprep.subr.bf16.mxu1 %v14179_v41  ;;  %v14252_v41 = vld [vmem:[#allocation4 + $0x11a0] ss:$16 sps:$4 sm:$0xff]  }
 0x53a   :  { %11025 = vmatmul.mubr.bf16.vlgmr.msra.gmra.mrb[24].mxu0 %v6065_v45 }
 0x53b   :  { %11517 = vmatmul.mubr.bf16.vlgmr.msra.gmra.mrb[24].mxu1 %v6065_v45  ;;  %11034 = vmatpush1.bf16.msra.mxu0 %v14174_v52  ;;  %v14255_v52 = vld [vmem:[#allocation4 + $0x11a8] ss:$16 sps:$4 sm:$0xff]   ;;  %v14260_v45 = vld [vmem:[#allocation4 + $0x11c4] ss:$16 sps:$4 sm:$0xff]  }
 0x53c   :  { %11065 = vmatprep.mubr.bf16.mxu0 %v6068_v48  ;;  %11526 = vmatpush1.bf16.msra.mxu1 %v14177_v39  ;;  %v14263_v39 = vld [vmem:[#allocation4 + $0x11cc] ss:$16 sps:$4 sm:$0xff]  }
 0x53d   :  { %11557 = vmatprep.mubr.bf16.mxu1 %v6068_v48  ;;  %11035 = vmatprep.subr.bf16.mxu0 %v14182_v62  ;;  %v14258_v62 = vld [vmem:[#allocation4 + $0x11c0] ss:$16 sps:$4 sm:$0xff]   ;;  %v14261_v48 = vld [vmem:[#allocation4 + $0x11c8] ss:$16 sps:$4 sm:$0xff]  }
 0x53e   :  { %11527 = vmatprep.subr.bf16.mxu1 %v14185_v50  ;;  %v14266_v50 = vld [vmem:[#allocation4 + $0x11e4] ss:$16 sps:$4 sm:$0xff]  }
 0x53f   :  { %11036 = vmatpush1.bf16.msra.mxu0 %v14180_v53  ;;  %v14269_v53 = vld [vmem:[#allocation4 + $0x11ec] ss:$16 sps:$4 sm:$0xff]  }
 0x540   :  { %11528 = vmatpush1.bf16.msra.mxu1 %v14183_v55  ;;  %11037 = vmatprep.subr.bf16.mxu0 %v14188_v56  ;;  %v14264_v55 = vld [vmem:[#allocation4 + $0x11e0] ss:$16 sps:$4 sm:$0xff]   ;;  %v14267_v56 = vld [vmem:[#allocation4 + $0x11e8] ss:$16 sps:$4 sm:$0xff]  }
 0x541   :  { %11529 = vmatprep.subr.bf16.mxu1 %v14191_v37  ;;  %v14272_v37 = vld [vmem:[#allocation4 + $0x1204] ss:$16 sps:$4 sm:$0xff]  }
 0x543   :  { %11038 = vmatpush1.bf16.msra.mxu0 %v14186_v57  ;;  %v14275_v57 = vld [vmem:[#allocation4 + $0x120c] ss:$16 sps:$4 sm:$0xff]  }
 0x544   :  { %11530 = vmatpush1.bf16.msra.mxu1 %v14189_v35  ;;  %11039 = vmatprep.subr.bf16.mxu0 %v14194_v60  ;;  %v14270_v35 = vld [vmem:[#allocation4 + $0x1200] ss:$16 sps:$4 sm:$0xff]   ;;  %v6067_v60 = vpack.c.bf16 %v14997_v13, %v14997_v13  ;;  %v14287_v13 = vld [vmem:[#allocation4 + $0x124c] ss:$16 sps:$4 sm:$0xff]  }
 0x545   :  { %11531 = vmatprep.subr.bf16.mxu1 %v14197_v21  ;;  %v14273_v21 = vld [vmem:[#allocation4 + $0x1208] ss:$16 sps:$4 sm:$0xff]  }
 0x547   :  { %11040 = vmatpush1.bf16.msra.mxu0 %v14192_v61  ;;  %v14278_v61 = vld [vmem:[#allocation4 + $0x1224] ss:$16 sps:$4 sm:$0xff]  }
 0x548   :  { %11532 = vmatpush1.bf16.msra.mxu1 %v14195_v63  ;;  %11041 = vmatprep.subr.bf16.mxu0 %v14200_v0  ;;  %v6070_v63 = vpack.c.bf16 %v15003_v23, %v15003_v23  ;;  %v14281_v0 = vld [vmem:[#allocation4 + $0x122c] ss:$16 sps:$4 sm:$0xff]  }
 0x549   :  { %11533 = vmatprep.subr.bf16.mxu1 %v14203_v1  ;;  %v14276_v1 = vld [vmem:[#allocation4 + $0x1220] ss:$16 sps:$4 sm:$0xff]   ;;  %v14293_v23 = vld [vmem:[#allocation4 + $0x126c] ss:$16 sps:$4 sm:$0xff]  }
 0x54b   :  { %11042 = vmatpush1.bf16.msra.mxu0 %v14198_v42  ;;  %v14279_v42 = vld [vmem:[#allocation4 + $0x1228] ss:$16 sps:$4 sm:$0xff]  }
 0x54c   :  { %11534 = vmatpush1.bf16.msra.mxu1 %v14201_v28  ;;  %11043 = vmatprep.subr.bf16.mxu0 %v14206_v2  ;;  %v14284_v28 = vld [vmem:[#allocation4 + $0x1244] ss:$16 sps:$4 sm:$0xff]   ;;  %v14282_v2 = vld [vmem:[#allocation4 + $0x1240] ss:$16 sps:$4 sm:$0xff]  }
 0x54d   :  { %11535 = vmatprep.subr.bf16.mxu1 %v14209_v3  ;;  %v14285_v3 = vld [vmem:[#allocation4 + $0x1248] ss:$16 sps:$4 sm:$0xff]  }
 0x54f   :  { %11044 = vmatpush1.bf16.msra.mxu0 %v14204_v4  ;;  %v14290_v4 = vld [vmem:[#allocation4 + $0x1264] ss:$16 sps:$4 sm:$0xff]  }
 0x550   :  { %11536 = vmatpush1.bf16.msra.mxu1 %v14207_v47  ;;  %11045 = vmatprep.subr.bf16.mxu0 %v14212_v5  ;;  %v14288_v47 = vld [vmem:[#allocation4 + $0x1260] ss:$16 sps:$4 sm:$0xff]   ;;  %v14291_v5 = vld [vmem:[#allocation4 + $0x1268] ss:$16 sps:$4 sm:$0xff]  }
 0x551   :  { %11537 = vmatprep.subr.bf16.mxu1 %v14215_v6  ;;  %v14296_v6 = vld [vmem:[#allocation4 + $0x1284] ss:$16 sps:$4 sm:$0xff]  }
 0x553   :  { %11046 = vmatpush1.bf16.msra.mxu0 %v14210_v7  ;;  %v14299_v7 = vld [vmem:[#allocation4 + $0x128c] ss:$16 sps:$4 sm:$0xff]  }
 0x554   :  { %11538 = vmatpush1.bf16.msra.mxu1 %v14213_v8  ;;  %11047 = vmatprep.subr.bf16.mxu0 %v14218_v27  ;;  %v14294_v8 = vld [vmem:[#allocation4 + $0x1280] ss:$16 sps:$4 sm:$0xff]   ;;  %v14297_v27 = vld [vmem:[#allocation4 + $0x1288] ss:$16 sps:$4 sm:$0xff]  }
 0x555   :  { %11539 = vmatprep.subr.bf16.mxu1 %v14221_v30  ;;  %v14302_v30 = vld [vmem:[#allocation4 + $0x12a4] ss:$16 sps:$4 sm:$0xff]  }
 0x557   :  { %11048 = vmatpush1.bf16.msra.mxu0 %v14216_v9  ;;  %v14305_v9 = vld [vmem:[#allocation4 + $0x12ac] ss:$16 sps:$4 sm:$0xff]  }
 0x558   :  { %11540 = vmatpush1.bf16.msra.mxu1 %v14219_v10  ;;  %11049 = vmatprep.subr.bf16.mxu0 %v14224_v11  ;;  %v14300_v10 = vld [vmem:[#allocation4 + $0x12a0] ss:$16 sps:$4 sm:$0xff]   ;;  %v14303_v11 = vld [vmem:[#allocation4 + $0x12a8] ss:$16 sps:$4 sm:$0xff]  }
 0x559   :  { %11541 = vmatprep.subr.bf16.mxu1 %v14227_v58  ;;  %v14308_v58 = vld [vmem:[#allocation4 + $0x12c4] ss:$16 sps:$4 sm:$0xff]  }
 0x55b   :  { %11050 = vmatpush1.bf16.msra.mxu0 %v14222_v44  ;;  %v14311_v44 = vld [vmem:[#allocation4 + $0x12cc] ss:$16 sps:$4 sm:$0xff]  }
 0x55c   :  { %11542 = vmatpush1.bf16.msra.mxu1 %v14225_v12  ;;  %11051 = vmatprep.subr.bf16.mxu0 %v14230_v33  ;;  %v14306_v12 = vld [vmem:[#allocation4 + $0x12c0] ss:$16 sps:$4 sm:$0xff]   ;;  %v14309_v33 = vld [vmem:[#allocation4 + $0x12c8] ss:$16 sps:$4 sm:$0xff]  }
 0x55d   :  { %11543 = vmatprep.subr.bf16.mxu1 %v14233_v14  ;;  %v14314_v14 = vld [vmem:[#allocation4 + $0x12e4] ss:$16 sps:$4 sm:$0xff]  }
 0x55f   :  { %11052 = vmatpush1.bf16.msra.mxu0 %v14228_v15  ;;  %v14317_v15 = vld [vmem:[#allocation4 + $0x12ec] ss:$16 sps:$4 sm:$0xff]  }
 0x560   :  { %11544 = vmatpush1.bf16.msra.mxu1 %v14231_v17  ;;  %11053 = vmatprep.subr.bf16.mxu0 %v14236_v46  ;;  %v14312_v17 = vld [vmem:[#allocation4 + $0x12e0] ss:$16 sps:$4 sm:$0xff]   ;;  %v14315_v46 = vld [vmem:[#allocation4 + $0x12e8] ss:$16 sps:$4 sm:$0xff]  }
 0x561   :  { %11545 = vmatprep.subr.bf16.mxu1 %v14239_v18  ;;  %v14320_v18 = vld [vmem:[#allocation4 + $0x1304] ss:$16 sps:$4 sm:$0xff]  }
 0x563   :  { %11054 = vmatpush1.bf16.msra.mxu0 %v14234_v19  ;;  %v14323_v19 = vld [vmem:[#allocation4 + $0x130c] ss:$16 sps:$4 sm:$0xff]  }
 0x564   :  { %11546 = vmatpush1.bf16.msra.mxu1 %v14237_v22  ;;  %11055 = vmatprep.subr.bf16.mxu0 %v14242_v24  ;;  %v14318_v22 = vld [vmem:[#allocation4 + $0x1300] ss:$16 sps:$4 sm:$0xff]   ;;  %v14321_v24 = vld [vmem:[#allocation4 + $0x1308] ss:$16 sps:$4 sm:$0xff]  }
 0x565   :  { %11547 = vmatprep.subr.bf16.mxu1 %v14245_v25  ;;  %v14326_v25 = vld [vmem:[#allocation4 + $0x1324] ss:$16 sps:$4 sm:$0xff]  }
 0x567   :  { %11056 = vmatpush1.bf16.msra.mxu0 %v14240_v43  ;;  %v14329_v43 = vld [vmem:[#allocation4 + $0x132c] ss:$16 sps:$4 sm:$0xff]  }
 0x568   :  { %11548 = vmatpush1.bf16.msra.mxu1 %v14243_v26  ;;  %11057 = vmatprep.subr.bf16.mxu0 %v14248_v32  ;;  %v14324_v26 = vld [vmem:[#allocation4 + $0x1320] ss:$16 sps:$4 sm:$0xff]   ;;  %v14327_v32 = vld [vmem:[#allocation4 + $0x1328] ss:$16 sps:$4 sm:$0xff]  }
 0x569   :  { %11549 = vmatprep.subr.bf16.mxu1 %v14251_v34  ;;  %v14332_v34 = vld [vmem:[#allocation4 + $0x1344] ss:$16 sps:$4 sm:$0xff]  }
 0x56b   :  { %11058 = vmatpush1.bf16.msra.mxu0 %v14246_v51  ;;  %v14335_v51 = vld [vmem:[#allocation4 + $0x134c] ss:$16 sps:$4 sm:$0xff]  }
 0x56c   :  { %11550 = vmatpush1.bf16.msra.mxu1 %v14249_v29  ;;  %11059 = vmatprep.subr.bf16.mxu0 %v14254_v54  ;;  %v14330_v29 = vld [vmem:[#allocation4 + $0x1340] ss:$16 sps:$4 sm:$0xff]   ;;  %v14333_v54 = vld [vmem:[#allocation4 + $0x1348] ss:$16 sps:$4 sm:$0xff]  }
 0x56d   :  { %11551 = vmatprep.subr.bf16.mxu1 %v14257_v38  ;;  %v14338_v38 = vld [vmem:[#allocation4 + $0x1364] ss:$16 sps:$4 sm:$0xff]  }
 0x56f   :  { %11060 = vmatpush1.bf16.msra.mxu0 %v14252_v41  ;;  %v14341_v41 = vld [vmem:[#allocation4 + $0x136c] ss:$16 sps:$4 sm:$0xff]  }
 0x570   :  { %11552 = vmatpush1.bf16.msra.mxu1 %v14255_v52  ;;  %11061 = vmatprep.subr.bf16.mxu0 %v14260_v45  ;;  %v14336_v52 = vld [vmem:[#allocation4 + $0x1360] ss:$16 sps:$4 sm:$0xff]   ;;  %v14339_v45 = vld [vmem:[#allocation4 + $0x1368] ss:$16 sps:$4 sm:$0xff]  }
 0x571   :  { %11553 = vmatprep.subr.bf16.mxu1 %v14263_v39  ;;  %v14344_v39 = vld [vmem:[#allocation4 + $0x1384] ss:$16 sps:$4 sm:$0xff]  }
 0x573   :  { %11062 = vmatpush1.bf16.msra.mxu0 %v14258_v62  ;;  %v14347_v62 = vld [vmem:[#allocation4 + $0x138c] ss:$16 sps:$4 sm:$0xff]  }
 0x574   :  { %11554 = vmatpush1.bf16.msra.mxu1 %v14261_v48  ;;  %11063 = vmatprep.subr.bf16.mxu0 %v14266_v50  ;;  %v14342_v48 = vld [vmem:[#allocation4 + $0x1380] ss:$16 sps:$4 sm:$0xff]   ;;  %v14345_v50 = vld [vmem:[#allocation4 + $0x1388] ss:$16 sps:$4 sm:$0xff]  }
 0x575   :  { %11555 = vmatprep.subr.bf16.mxu1 %v14269_v53  ;;  %v14350_v53 = vld [vmem:[#allocation4 + $0x13a4] ss:$16 sps:$4 sm:$0xff]  }
 0x577   :  { %11064 = vmatpush1.bf16.msra.mxu0 %v14264_v55  ;;  %v14353_v55 = vld [vmem:[#allocation4 + $0x13ac] ss:$16 sps:$4 sm:$0xff]  }
 0x578   :  { %11556 = vmatpush1.bf16.msra.mxu1 %v14267_v56  ;;  %11074 = vmatprep.subr.bf16.mxu0 %v14272_v37  ;;  %v14348_v56 = vld [vmem:[#allocation4 + $0x13a0] ss:$16 sps:$4 sm:$0xff]   ;;  %v14351_v37 = vld [vmem:[#allocation4 + $0x13a8] ss:$16 sps:$4 sm:$0xff]  }
 0x579   :  { %11566 = vmatprep.subr.bf16.mxu1 %v14275_v57  ;;  %v14356_v57 = vld [vmem:[#allocation4 + $0x13c4] ss:$16 sps:$4 sm:$0xff]  }
 0x57a   :  { %11066 = vmatmul.mubr.bf16.vlgmr.msra.gmra.mrb[24].mxu0 %v6067_v60 }
 0x57b   :  { %11558 = vmatmul.mubr.bf16.vlgmr.msra.gmra.mrb[24].mxu1 %v6067_v60  ;;  %11075 = vmatpush1.bf16.msra.mxu0 %v14270_v35  ;;  %v14359_v35 = vld [vmem:[#allocation4 + $0x13cc] ss:$16 sps:$4 sm:$0xff]   ;;  %v14354_v60 = vld [vmem:[#allocation4 + $0x13c0] ss:$16 sps:$4 sm:$0xff]  }
 0x57c   :  { %11106 = vmatprep.mubr.bf16.mxu0 %v6070_v63  ;;  %11567 = vmatpush1.bf16.msra.mxu1 %v14273_v21  ;;  %v14357_v21 = vld [vmem:[#allocation4 + $0x13c8] ss:$16 sps:$4 sm:$0xff]  }
 0x57d   :  { %11598 = vmatprep.mubr.bf16.mxu1 %v6070_v63  ;;  %11076 = vmatprep.subr.bf16.mxu0 %v14278_v61  ;;  %v14362_v61 = vld [vmem:[#allocation4 + $0x13e4] ss:$16 sps:$4 sm:$0xff]   ;;  %v14365_v63 = vld [vmem:[#allocation4 + $0x13ec] ss:$16 sps:$4 sm:$0xff]  }
 0x57e   :  { %11568 = vmatprep.subr.bf16.mxu1 %v14281_v0  ;;  %v14360_v0 = vld [vmem:[#allocation4 + $0x13e0] ss:$16 sps:$4 sm:$0xff]  }
 0x57f   :  { %11077 = vmatpush1.bf16.msra.mxu0 %v14276_v1  ;;  %v14363_v1 = vld [vmem:[#allocation4 + $0x13e8] ss:$16 sps:$4 sm:$0xff]  }
 0x580   :  { %11569 = vmatpush1.bf16.msra.mxu1 %v14279_v42  ;;  %11078 = vmatprep.subr.bf16.mxu0 %v14284_v28  ;;  %v14368_v42 = vld [vmem:[#allocation4 + $0x1404] ss:$16 sps:$4 sm:$0xff]   ;;  %v14371_v28 = vld [vmem:[#allocation4 + $0x140c] ss:$16 sps:$4 sm:$0xff]  }
 0x581   :  { %11570 = vmatprep.subr.bf16.mxu1 %v14287_v13  ;;  %v14366_v13 = vld [vmem:[#allocation4 + $0x1400] ss:$16 sps:$4 sm:$0xff]  }
 0x583   :  { %11079 = vmatpush1.bf16.msra.mxu0 %v14282_v2  ;;  %v6069_v2 = vpack.c.bf16 %v14999_v31, %v14999_v31  ;;  %v14383_v31 = vld [vmem:[#allocation4 + $0x144c] ss:$16 sps:$4 sm:$0xff]  }
 0x584   :  { %11571 = vmatpush1.bf16.msra.mxu1 %v14285_v3  ;;  %11080 = vmatprep.subr.bf16.mxu0 %v14290_v4  ;;  %v14369_v3 = vld [vmem:[#allocation4 + $0x1408] ss:$16 sps:$4 sm:$0xff]   ;;  %v14374_v4 = vld [vmem:[#allocation4 + $0x1424] ss:$16 sps:$4 sm:$0xff]  }
 0x585   :  { %11572 = vmatprep.subr.bf16.mxu1 %v14293_v23  ;;  %v6072_v23 = vpack.c.bf16 %v15026_v59, %v15026_v59  ;;  %v14389_v59 = vld [vmem:[#allocation4 + $0x146c] ss:$16 sps:$4 sm:$0xff]  }
 0x587   :  { %11081 = vmatpush1.bf16.msra.mxu0 %v14288_v47  ;;  %v14377_v47 = vld [vmem:[#allocation4 + $0x142c] ss:$16 sps:$4 sm:$0xff]  }
 0x588   :  { %11573 = vmatpush1.bf16.msra.mxu1 %v14291_v5  ;;  %11082 = vmatprep.subr.bf16.mxu0 %v14296_v6  ;;  %v14372_v5 = vld [vmem:[#allocation4 + $0x1420] ss:$16 sps:$4 sm:$0xff]   ;;  %v14375_v6 = vld [vmem:[#allocation4 + $0x1428] ss:$16 sps:$4 sm:$0xff]  }
 0x589   :  { %11574 = vmatprep.subr.bf16.mxu1 %v14299_v7  ;;  %v14380_v7 = vld [vmem:[#allocation4 + $0x1444] ss:$16 sps:$4 sm:$0xff]  }
 0x58b   :  { %11083 = vmatpush1.bf16.msra.mxu0 %v14294_v8  ;;  %v14378_v8 = vld [vmem:[#allocation4 + $0x1440] ss:$16 sps:$4 sm:$0xff]  }
 0x58c   :  { %11575 = vmatpush1.bf16.msra.mxu1 %v14297_v27  ;;  %11084 = vmatprep.subr.bf16.mxu0 %v14302_v30  ;;  %v14381_v27 = vld [vmem:[#allocation4 + $0x1448] ss:$16 sps:$4 sm:$0xff]   ;;  %v14386_v30 = vld [vmem:[#allocation4 + $0x1464] ss:$16 sps:$4 sm:$0xff]  }
 0x58d   :  { %11576 = vmatprep.subr.bf16.mxu1 %v14305_v9  ;;  %v14384_v9 = vld [vmem:[#allocation4 + $0x1460] ss:$16 sps:$4 sm:$0xff]  }
 0x58f   :  { %11085 = vmatpush1.bf16.msra.mxu0 %v14300_v10  ;;  %v14387_v10 = vld [vmem:[#allocation4 + $0x1468] ss:$16 sps:$4 sm:$0xff]  }
 0x590   :  { %11577 = vmatpush1.bf16.msra.mxu1 %v14303_v11  ;;  %11086 = vmatprep.subr.bf16.mxu0 %v14308_v58  ;;  %v14392_v11 = vld [vmem:[#allocation4 + $0x1484] ss:$16 sps:$4 sm:$0xff]   ;;  %v14395_v58 = vld [vmem:[#allocation4 + $0x148c] ss:$16 sps:$4 sm:$0xff]  }
 0x591   :  { %11578 = vmatprep.subr.bf16.mxu1 %v14311_v44  ;;  %v14390_v44 = vld [vmem:[#allocation4 + $0x1480] ss:$16 sps:$4 sm:$0xff]  }
 0x593   :  { %11087 = vmatpush1.bf16.msra.mxu0 %v14306_v12  ;;  %v14393_v12 = vld [vmem:[#allocation4 + $0x1488] ss:$16 sps:$4 sm:$0xff]  }
 0x594   :  { %11579 = vmatpush1.bf16.msra.mxu1 %v14309_v33  ;;  %11088 = vmatprep.subr.bf16.mxu0 %v14314_v14  ;;  %v14398_v33 = vld [vmem:[#allocation4 + $0x14a4] ss:$16 sps:$4 sm:$0xff]   ;;  %v14401_v14 = vld [vmem:[#allocation4 + $0x14ac] ss:$16 sps:$4 sm:$0xff]  }
 0x595   :  { %11580 = vmatprep.subr.bf16.mxu1 %v14317_v15  ;;  %v14396_v15 = vld [vmem:[#allocation4 + $0x14a0] ss:$16 sps:$4 sm:$0xff]  }
 0x597   :  { %11089 = vmatpush1.bf16.msra.mxu0 %v14312_v17  ;;  %v14399_v17 = vld [vmem:[#allocation4 + $0x14a8] ss:$16 sps:$4 sm:$0xff]  }
 0x598   :  { %11581 = vmatpush1.bf16.msra.mxu1 %v14315_v46  ;;  %11090 = vmatprep.subr.bf16.mxu0 %v14320_v18  ;;  %v14404_v46 = vld [vmem:[#allocation4 + $0x14c4] ss:$16 sps:$4 sm:$0xff]   ;;  %v14407_v18 = vld [vmem:[#allocation4 + $0x14cc] ss:$16 sps:$4 sm:$0xff]  }
 0x599   :  { %11582 = vmatprep.subr.bf16.mxu1 %v14323_v19  ;;  %v14402_v19 = vld [vmem:[#allocation4 + $0x14c0] ss:$16 sps:$4 sm:$0xff]  }
 0x59b   :  { %11091 = vmatpush1.bf16.msra.mxu0 %v14318_v22  ;;  %v14405_v22 = vld [vmem:[#allocation4 + $0x14c8] ss:$16 sps:$4 sm:$0xff]  }
 0x59c   :  { %11583 = vmatpush1.bf16.msra.mxu1 %v14321_v24  ;;  %11092 = vmatprep.subr.bf16.mxu0 %v14326_v25  ;;  %v14410_v24 = vld [vmem:[#allocation4 + $0x14e4] ss:$16 sps:$4 sm:$0xff]   ;;  %v14413_v25 = vld [vmem:[#allocation4 + $0x14ec] ss:$16 sps:$4 sm:$0xff]  }
 0x59d   :  { %11584 = vmatprep.subr.bf16.mxu1 %v14329_v43  ;;  %v14408_v43 = vld [vmem:[#allocation4 + $0x14e0] ss:$16 sps:$4 sm:$0xff]  }
 0x59f   :  { %11093 = vmatpush1.bf16.msra.mxu0 %v14324_v26  ;;  %v14411_v26 = vld [vmem:[#allocation4 + $0x14e8] ss:$16 sps:$4 sm:$0xff]  }
 0x5a0   :  { %11585 = vmatpush1.bf16.msra.mxu1 %v14327_v32  ;;  %11094 = vmatprep.subr.bf16.mxu0 %v14332_v34  ;;  %v14416_v32 = vld [vmem:[#allocation4 + $0x1504] ss:$16 sps:$4 sm:$0xff]   ;;  %v14419_v34 = vld [vmem:[#allocation4 + $0x150c] ss:$16 sps:$4 sm:$0xff]  }
 0x5a1   :  { %11586 = vmatprep.subr.bf16.mxu1 %v14335_v51  ;;  %v14414_v51 = vld [vmem:[#allocation4 + $0x1500] ss:$16 sps:$4 sm:$0xff]  }
 0x5a3   :  { %11095 = vmatpush1.bf16.msra.mxu0 %v14330_v29  ;;  %v14417_v29 = vld [vmem:[#allocation4 + $0x1508] ss:$16 sps:$4 sm:$0xff]  }
 0x5a4   :  { %11587 = vmatpush1.bf16.msra.mxu1 %v14333_v54  ;;  %11096 = vmatprep.subr.bf16.mxu0 %v14338_v38  ;;  %v14422_v54 = vld [vmem:[#allocation4 + $0x1524] ss:$16 sps:$4 sm:$0xff]   ;;  %v14425_v38 = vld [vmem:[#allocation4 + $0x152c] ss:$16 sps:$4 sm:$0xff]  }
 0x5a5   :  { %11588 = vmatprep.subr.bf16.mxu1 %v14341_v41  ;;  %v14420_v41 = vld [vmem:[#allocation4 + $0x1520] ss:$16 sps:$4 sm:$0xff]  }
 0x5a7   :  { %11097 = vmatpush1.bf16.msra.mxu0 %v14336_v52  ;;  %v14423_v52 = vld [vmem:[#allocation4 + $0x1528] ss:$16 sps:$4 sm:$0xff]  }
 0x5a8   :  { %11589 = vmatpush1.bf16.msra.mxu1 %v14339_v45  ;;  %11098 = vmatprep.subr.bf16.mxu0 %v14344_v39  ;;  %v14428_v45 = vld [vmem:[#allocation4 + $0x1544] ss:$16 sps:$4 sm:$0xff]   ;;  %v14431_v39 = vld [vmem:[#allocation4 + $0x154c] ss:$16 sps:$4 sm:$0xff]  }
 0x5a9   :  { %11590 = vmatprep.subr.bf16.mxu1 %v14347_v62  ;;  %v14426_v62 = vld [vmem:[#allocation4 + $0x1540] ss:$16 sps:$4 sm:$0xff]  }
 0x5ab   :  { %11099 = vmatpush1.bf16.msra.mxu0 %v14342_v48  ;;  %v14429_v48 = vld [vmem:[#allocation4 + $0x1548] ss:$16 sps:$4 sm:$0xff]  }
 0x5ac   :  { %11591 = vmatpush1.bf16.msra.mxu1 %v14345_v50  ;;  %11100 = vmatprep.subr.bf16.mxu0 %v14350_v53  ;;  %v14434_v50 = vld [vmem:[#allocation4 + $0x1564] ss:$16 sps:$4 sm:$0xff]   ;;  %v14437_v53 = vld [vmem:[#allocation4 + $0x156c] ss:$16 sps:$4 sm:$0xff]  }
 0x5ad   :  { %11592 = vmatprep.subr.bf16.mxu1 %v14353_v55  ;;  %v14432_v55 = vld [vmem:[#allocation4 + $0x1560] ss:$16 sps:$4 sm:$0xff]  }
 0x5af   :  { %11101 = vmatpush1.bf16.msra.mxu0 %v14348_v56  ;;  %v14435_v56 = vld [vmem:[#allocation4 + $0x1568] ss:$16 sps:$4 sm:$0xff]  }
 0x5b0   :  { %11593 = vmatpush1.bf16.msra.mxu1 %v14351_v37  ;;  %11102 = vmatprep.subr.bf16.mxu0 %v14356_v57  ;;  %v14440_v37 = vld [vmem:[#allocation4 + $0x1584] ss:$16 sps:$4 sm:$0xff]   ;;  %v14443_v57 = vld [vmem:[#allocation4 + $0x158c] ss:$16 sps:$4 sm:$0xff]  }
 0x5b1   :  { %11594 = vmatprep.subr.bf16.mxu1 %v14359_v35  ;;  %v14438_v35 = vld [vmem:[#allocation4 + $0x1580] ss:$16 sps:$4 sm:$0xff]  }
 0x5b3   :  { %11103 = vmatpush1.bf16.msra.mxu0 %v14354_v60  ;;  %v14441_v60 = vld [vmem:[#allocation4 + $0x1588] ss:$16 sps:$4 sm:$0xff]  }
 0x5b4   :  { %11595 = vmatpush1.bf16.msra.mxu1 %v14357_v21  ;;  %11104 = vmatprep.subr.bf16.mxu0 %v14362_v61  ;;  %v14446_v21 = vld [vmem:[#allocation4 + $0x15a4] ss:$16 sps:$4 sm:$0xff]   ;;  %v14449_v61 = vld [vmem:[#allocation4 + $0x15ac] ss:$16 sps:$4 sm:$0xff]  }
 0x5b5   :  { %11596 = vmatprep.subr.bf16.mxu1 %v14365_v63  ;;  %v14444_v63 = vld [vmem:[#allocation4 + $0x15a0] ss:$16 sps:$4 sm:$0xff]  }
 0x5b7   :  { %11105 = vmatpush1.bf16.msra.mxu0 %v14360_v0  ;;  %v14447_v0 = vld [vmem:[#allocation4 + $0x15a8] ss:$16 sps:$4 sm:$0xff]  }
 0x5b8   :  { %11597 = vmatpush1.bf16.msra.mxu1 %v14363_v1  ;;  %11115 = vmatprep.subr.bf16.mxu0 %v14368_v42  ;;  %v14452_v1 = vld [vmem:[#allocation4 + $0x15c4] ss:$16 sps:$4 sm:$0xff]   ;;  %v14455_v42 = vld [vmem:[#allocation4 + $0x15cc] ss:$16 sps:$4 sm:$0xff]  }
 0x5b9   :  { %11607 = vmatprep.subr.bf16.mxu1 %v14371_v28  ;;  %v14450_v28 = vld [vmem:[#allocation4 + $0x15c0] ss:$16 sps:$4 sm:$0xff]  }
 0x5ba   :  { %11107 = vmatmul.mubr.bf16.vlgmr.msra.gmra.mrb[24].mxu0 %v6069_v2 }
 0x5bb   :  { %11599 = vmatmul.mubr.bf16.vlgmr.msra.gmra.mrb[24].mxu1 %v6069_v2  ;;  %11116 = vmatpush1.bf16.msra.mxu0 %v14366_v13  ;;  %v14453_v13 = vld [vmem:[#allocation4 + $0x15c8] ss:$16 sps:$4 sm:$0xff]   ;;  %v14458_v2 = vld [vmem:[#allocation4 + $0x15e4] ss:$16 sps:$4 sm:$0xff]  }
 0x5bc   :  { %11147 = vmatprep.mubr.bf16.mxu0 %v6072_v23  ;;  %11608 = vmatpush1.bf16.msra.mxu1 %v14369_v3  ;;  %v14461_v3 = vld [vmem:[#allocation4 + $0x15ec] ss:$16 sps:$4 sm:$0xff]  }
 0x5bd   :  { %11639 = vmatprep.mubr.bf16.mxu1 %v6072_v23  ;;  %11117 = vmatprep.subr.bf16.mxu0 %v14374_v4  ;;  %v14456_v4 = vld [vmem:[#allocation4 + $0x15e0] ss:$16 sps:$4 sm:$0xff]   ;;  %v14459_v23 = vld [vmem:[#allocation4 + $0x15e8] ss:$16 sps:$4 sm:$0xff]  }
 0x5be   :  { %11609 = vmatprep.subr.bf16.mxu1 %v14377_v47  ;;  %v14464_v47 = vld [vmem:[#allocation4 + $0x1604] ss:$16 sps:$4 sm:$0xff]  }
 0x5bf   :  { %11118 = vmatpush1.bf16.msra.mxu0 %v14372_v5  ;;  %v14467_v5 = vld [vmem:[#allocation4 + $0x160c] ss:$16 sps:$4 sm:$0xff]  }
 0x5c0   :  { %11610 = vmatpush1.bf16.msra.mxu1 %v14375_v6  ;;  %11119 = vmatprep.subr.bf16.mxu0 %v14380_v7  ;;  %v14462_v6 = vld [vmem:[#allocation4 + $0x1600] ss:$16 sps:$4 sm:$0xff]   ;;  %v6071_v7 = vpack.c.bf16 %v15022_v49, %v15022_v49  ;;  %v14479_v49 = vld [vmem:[#allocation4 + $0x164c] ss:$16 sps:$4 sm:$0xff]  }
 0x5c1   :  { %11611 = vmatprep.subr.bf16.mxu1 %v14383_v31  ;;  %v14465_v31 = vld [vmem:[#allocation4 + $0x1608] ss:$16 sps:$4 sm:$0xff]  }
 0x5c3   :  { %11120 = vmatpush1.bf16.msra.mxu0 %v14378_v8  ;;  %v14470_v8 = vld [vmem:[#allocation4 + $0x1624] ss:$16 sps:$4 sm:$0xff]  }
 0x5c4   :  { %11612 = vmatpush1.bf16.msra.mxu1 %v14381_v27  ;;  %11121 = vmatprep.subr.bf16.mxu0 %v14386_v30  ;;  %v6074_v27 = vpack.c.bf16 %v15028_v16, %v15028_v16  ;;  %v14473_v30 = vld [vmem:[#allocation4 + $0x162c] ss:$16 sps:$4 sm:$0xff]  }
 0x5c5   :  { %11613 = vmatprep.subr.bf16.mxu1 %v14389_v59  ;;  %v14468_v59 = vld [vmem:[#allocation4 + $0x1620] ss:$16 sps:$4 sm:$0xff]   ;;  %v14485_v16 = vld [vmem:[#allocation4 + $0x166c] ss:$16 sps:$4 sm:$0xff]  }
 0x5c7   :  { %11122 = vmatpush1.bf16.msra.mxu0 %v14384_v9  ;;  %v14471_v9 = vld [vmem:[#allocation4 + $0x1628] ss:$16 sps:$4 sm:$0xff]  }
 0x5c8   :  { %11614 = vmatpush1.bf16.msra.mxu1 %v14387_v10  ;;  %11123 = vmatprep.subr.bf16.mxu0 %v14392_v11  ;;  %v14476_v10 = vld [vmem:[#allocation4 + $0x1644] ss:$16 sps:$4 sm:$0xff]   ;;  %v14474_v11 = vld [vmem:[#allocation4 + $0x1640] ss:$16 sps:$4 sm:$0xff]  }
 0x5c9   :  { %11615 = vmatprep.subr.bf16.mxu1 %v14395_v58  ;;  %v14477_v58 = vld [vmem:[#allocation4 + $0x1648] ss:$16 sps:$4 sm:$0xff]  }
 0x5cb   :  { %11124 = vmatpush1.bf16.msra.mxu0 %v14390_v44  ;;  %v14482_v44 = vld [vmem:[#allocation4 + $0x1664] ss:$16 sps:$4 sm:$0xff]  }
 0x5cc   :  { %11616 = vmatpush1.bf16.msra.mxu1 %v14393_v12  ;;  %11125 = vmatprep.subr.bf16.mxu0 %v14398_v33  ;;  %v14480_v12 = vld [vmem:[#allocation4 + $0x1660] ss:$16 sps:$4 sm:$0xff]   ;;  %v14483_v33 = vld [vmem:[#allocation4 + $0x1668] ss:$16 sps:$4 sm:$0xff]  }
 0x5cd   :  { %11617 = vmatprep.subr.bf16.mxu1 %v14401_v14  ;;  %v14488_v14 = vld [vmem:[#allocation4 + $0x1684] ss:$16 sps:$4 sm:$0xff]  }
 0x5cf   :  { %11126 = vmatpush1.bf16.msra.mxu0 %v14396_v15  ;;  %v14491_v15 = vld [vmem:[#allocation4 + $0x168c] ss:$16 sps:$4 sm:$0xff]  }
 0x5d0   :  { %11618 = vmatpush1.bf16.msra.mxu1 %v14399_v17  ;;  %11127 = vmatprep.subr.bf16.mxu0 %v14404_v46  ;;  %v14486_v17 = vld [vmem:[#allocation4 + $0x1680] ss:$16 sps:$4 sm:$0xff]   ;;  %v14489_v46 = vld [vmem:[#allocation4 + $0x1688] ss:$16 sps:$4 sm:$0xff]  }
 0x5d1   :  { %11619 = vmatprep.subr.bf16.mxu1 %v14407_v18  ;;  %v14494_v18 = vld [vmem:[#allocation4 + $0x16a4] ss:$16 sps:$4 sm:$0xff]  }
 0x5d3   :  { %11128 = vmatpush1.bf16.msra.mxu0 %v14402_v19  ;;  %v14497_v19 = vld [vmem:[#allocation4 + $0x16ac] ss:$16 sps:$4 sm:$0xff]  }
 0x5d4   :  { %11620 = vmatpush1.bf16.msra.mxu1 %v14405_v22  ;;  %11129 = vmatprep.subr.bf16.mxu0 %v14410_v24  ;;  %v14492_v22 = vld [vmem:[#allocation4 + $0x16a0] ss:$16 sps:$4 sm:$0xff]   ;;  %v14495_v24 = vld [vmem:[#allocation4 + $0x16a8] ss:$16 sps:$4 sm:$0xff]  }
 0x5d5   :  { %11621 = vmatprep.subr.bf16.mxu1 %v14413_v25  ;;  %v14500_v25 = vld [vmem:[#allocation4 + $0x16c4] ss:$16 sps:$4 sm:$0xff]  }
 0x5d7   :  { %11130 = vmatpush1.bf16.msra.mxu0 %v14408_v43  ;;  %v14503_v43 = vld [vmem:[#allocation4 + $0x16cc] ss:$16 sps:$4 sm:$0xff]  }
 0x5d8   :  { %11622 = vmatpush1.bf16.msra.mxu1 %v14411_v26  ;;  %11131 = vmatprep.subr.bf16.mxu0 %v14416_v32  ;;  %v14498_v26 = vld [vmem:[#allocation4 + $0x16c0] ss:$16 sps:$4 sm:$0xff]   ;;  %v14501_v32 = vld [vmem:[#allocation4 + $0x16c8] ss:$16 sps:$4 sm:$0xff]  }
 0x5d9   :  { %11623 = vmatprep.subr.bf16.mxu1 %v14419_v34  ;;  %v14506_v34 = vld [vmem:[#allocation4 + $0x16e4] ss:$16 sps:$4 sm:$0xff]  }
 0x5db   :  { %11132 = vmatpush1.bf16.msra.mxu0 %v14414_v51  ;;  %v14509_v51 = vld [vmem:[#allocation4 + $0x16ec] ss:$16 sps:$4 sm:$0xff]  }
 0x5dc   :  { %11624 = vmatpush1.bf16.msra.mxu1 %v14417_v29  ;;  %11133 = vmatprep.subr.bf16.mxu0 %v14422_v54  ;;  %v14504_v29 = vld [vmem:[#allocation4 + $0x16e0] ss:$16 sps:$4 sm:$0xff]   ;;  %v14507_v54 = vld [vmem:[#allocation4 + $0x16e8] ss:$16 sps:$4 sm:$0xff]  }
 0x5dd   :  { %11625 = vmatprep.subr.bf16.mxu1 %v14425_v38  ;;  %v14512_v38 = vld [vmem:[#allocation4 + $0x1704] ss:$16 sps:$4 sm:$0xff]  }
 0x5df   :  { %11134 = vmatpush1.bf16.msra.mxu0 %v14420_v41  ;;  %v14515_v41 = vld [vmem:[#allocation4 + $0x170c] ss:$16 sps:$4 sm:$0xff]  }
 0x5e0   :  { %11626 = vmatpush1.bf16.msra.mxu1 %v14423_v52  ;;  %11135 = vmatprep.subr.bf16.mxu0 %v14428_v45  ;;  %v14510_v52 = vld [vmem:[#allocation4 + $0x1700] ss:$16 sps:$4 sm:$0xff]   ;;  %v14513_v45 = vld [vmem:[#allocation4 + $0x1708] ss:$16 sps:$4 sm:$0xff]  }
 0x5e1   :  { %11627 = vmatprep.subr.bf16.mxu1 %v14431_v39  ;;  %v14518_v39 = vld [vmem:[#allocation4 + $0x1724] ss:$16 sps:$4 sm:$0xff]  }
 0x5e3   :  { %11136 = vmatpush1.bf16.msra.mxu0 %v14426_v62  ;;  %v14521_v62 = vld [vmem:[#allocation4 + $0x172c] ss:$16 sps:$4 sm:$0xff]  }
 0x5e4   :  { %11628 = vmatpush1.bf16.msra.mxu1 %v14429_v48  ;;  %11137 = vmatprep.subr.bf16.mxu0 %v14434_v50  ;;  %v14516_v48 = vld [vmem:[#allocation4 + $0x1720] ss:$16 sps:$4 sm:$0xff]   ;;  %v14519_v50 = vld [vmem:[#allocation4 + $0x1728] ss:$16 sps:$4 sm:$0xff]  }
 0x5e5   :  { %11629 = vmatprep.subr.bf16.mxu1 %v14437_v53  ;;  %v14524_v53 = vld [vmem:[#allocation4 + $0x1744] ss:$16 sps:$4 sm:$0xff]  }
 0x5e7   :  { %11138 = vmatpush1.bf16.msra.mxu0 %v14432_v55  ;;  %v14527_v55 = vld [vmem:[#allocation4 + $0x174c] ss:$16 sps:$4 sm:$0xff]  }
 0x5e8   :  { %11630 = vmatpush1.bf16.msra.mxu1 %v14435_v56  ;;  %11139 = vmatprep.subr.bf16.mxu0 %v14440_v37  ;;  %v14522_v56 = vld [vmem:[#allocation4 + $0x1740] ss:$16 sps:$4 sm:$0xff]   ;;  %v14525_v37 = vld [vmem:[#allocation4 + $0x1748] ss:$16 sps:$4 sm:$0xff]  }
 0x5e9   :  { %11631 = vmatprep.subr.bf16.mxu1 %v14443_v57  ;;  %v14530_v57 = vld [vmem:[#allocation4 + $0x1764] ss:$16 sps:$4 sm:$0xff]  }
 0x5eb   :  { %11140 = vmatpush1.bf16.msra.mxu0 %v14438_v35  ;;  %v14533_v35 = vld [vmem:[#allocation4 + $0x176c] ss:$16 sps:$4 sm:$0xff]  }
 0x5ec   :  { %11632 = vmatpush1.bf16.msra.mxu1 %v14441_v60  ;;  %11141 = vmatprep.subr.bf16.mxu0 %v14446_v21  ;;  %v14528_v60 = vld [vmem:[#allocation4 + $0x1760] ss:$16 sps:$4 sm:$0xff]   ;;  %v14531_v21 = vld [vmem:[#allocation4 + $0x1768] ss:$16 sps:$4 sm:$0xff]  }
 0x5ed   :  { %11633 = vmatprep.subr.bf16.mxu1 %v14449_v61  ;;  %v14536_v61 = vld [vmem:[#allocation4 + $0x1784] ss:$16 sps:$4 sm:$0xff]  }
 0x5ef   :  { %11142 = vmatpush1.bf16.msra.mxu0 %v14444_v63  ;;  %v14539_v63 = vld [vmem:[#allocation4 + $0x178c] ss:$16 sps:$4 sm:$0xff]  }
 0x5f0   :  { %11634 = vmatpush1.bf16.msra.mxu1 %v14447_v0  ;;  %11143 = vmatprep.subr.bf16.mxu0 %v14452_v1  ;;  %v14534_v0 = vld [vmem:[#allocation4 + $0x1780] ss:$16 sps:$4 sm:$0xff]   ;;  %v14537_v1 = vld [vmem:[#allocation4 + $0x1788] ss:$16 sps:$4 sm:$0xff]  }
 0x5f1   :  { %11635 = vmatprep.subr.bf16.mxu1 %v14455_v42  ;;  %v14542_v42 = vld [vmem:[#allocation4 + $0x17a4] ss:$16 sps:$4 sm:$0xff]  }
 0x5f3   :  { %11144 = vmatpush1.bf16.msra.mxu0 %v14450_v28  ;;  %v14545_v28 = vld [vmem:[#allocation4 + $0x17ac] ss:$16 sps:$4 sm:$0xff]  }
 0x5f4   :  { %11636 = vmatpush1.bf16.msra.mxu1 %v14453_v13  ;;  %11145 = vmatprep.subr.bf16.mxu0 %v14458_v2  ;;  %v14540_v13 = vld [vmem:[#allocation4 + $0x17a0] ss:$16 sps:$4 sm:$0xff]   ;;  %v14543_v2 = vld [vmem:[#allocation4 + $0x17a8] ss:$16 sps:$4 sm:$0xff]  }
 0x5f5   :  { %11637 = vmatprep.subr.bf16.mxu1 %v14461_v3  ;;  %v14548_v3 = vld [vmem:[#allocation4 + $0x17c4] ss:$16 sps:$4 sm:$0xff]  }
 0x5f7   :  { %11146 = vmatpush1.bf16.msra.mxu0 %v14456_v4  ;;  %v14551_v4 = vld [vmem:[#allocation4 + $0x17cc] ss:$16 sps:$4 sm:$0xff]  }
 0x5f8   :  { %11638 = vmatpush1.bf16.msra.mxu1 %v14459_v23  ;;  %11156 = vmatprep.subr.bf16.mxu0 %v14464_v47  ;;  %v14546_v23 = vld [vmem:[#allocation4 + $0x17c0] ss:$16 sps:$4 sm:$0xff]   ;;  %v14549_v47 = vld [vmem:[#allocation4 + $0x17c8] ss:$16 sps:$4 sm:$0xff]  }
 0x5f9   :  { %11648 = vmatprep.subr.bf16.mxu1 %v14467_v5  ;;  %v14554_v5 = vld [vmem:[#allocation4 + $0x17e4] ss:$16 sps:$4 sm:$0xff]  }
 0x5fa   :  { %11148 = vmatmul.mubr.bf16.vlgmr.msra.gmra.mrb[24].mxu0 %v6071_v7 }
 0x5fb   :  { %11640 = vmatmul.mubr.bf16.vlgmr.msra.gmra.mrb[24].mxu1 %v6071_v7  ;;  %11157 = vmatpush1.bf16.msra.mxu0 %v14462_v6  ;;  %v14557_v6 = vld [vmem:[#allocation4 + $0x17ec] ss:$16 sps:$4 sm:$0xff]   ;;  %v14552_v7 = vld [vmem:[#allocation4 + $0x17e0] ss:$16 sps:$4 sm:$0xff]  }
 0x5fc   :  { %11188 = vmatprep.mubr.bf16.mxu0 %v6074_v27  ;;  %11649 = vmatpush1.bf16.msra.mxu1 %v14465_v31  ;;  %v14555_v31 = vld [vmem:[#allocation4 + $0x17e8] ss:$16 sps:$4 sm:$0xff]  }
 0x5fd   :  { %11680 = vmatprep.mubr.bf16.mxu1 %v6074_v27  ;;  %11158 = vmatprep.subr.bf16.mxu0 %v14470_v8  ;;  %v6073_v8 = vpack.c.bf16 %v15024_v40, %v15024_v40  ;;  %v6847_v27 = vsub.s32 0, %v14892_v20 }
 0x5fe   :  { %11650 = vmatprep.subr.bf16.mxu1 %v14473_v30  ;;  %v6843_v30 = vld [vmem:[#allocation6] sm:$0xf] }
 0x5ff   :  { %11159 = vmatpush1.bf16.msra.mxu0 %v14468_v59  ;;  %v6855_v59 = vsub.s32 2, %v14892_v20 }
 0x600   :  { %11651 = vmatpush1.bf16.msra.mxu1 %v14471_v9  ;;  %11160 = vmatprep.subr.bf16.mxu0 %v14476_v10  ;;  %v6851_v9 = vsub.s32 1, %v14892_v20  ;;  %v6859_v10 = vsub.s32 3, %v14892_v20 }
 0x601   :  { %11652 = vmatprep.subr.bf16.mxu1 %v14479_v49  ;;  %v6848_v49 = vrot.slane %v6843_v30, %v6847_v27 }
 0x603   :  { %11161 = vmatpush1.bf16.msra.mxu0 %v14474_v11  ;;  %v6856_v11 = vrot.slane %v6843_v30, %v6855_v59 }
 0x604   :  { %11653 = vmatpush1.bf16.msra.mxu1 %v14477_v58  ;;  %11162 = vmatprep.subr.bf16.mxu0 %v14482_v44  ;;  %v6852_v58 = vrot.slane %v6843_v30, %v6851_v9  ;;  %v6860_v44 = vrot.slane %v6843_v30, %v6859_v10 }
 0x605   :  { %11654 = vmatprep.subr.bf16.mxu1 %v14485_v16 }
 0x607   :  { %11163 = vmatpush1.bf16.msra.mxu0 %v14480_v12 }
 0x608   :  { %11655 = vmatpush1.bf16.msra.mxu1 %v14483_v33  ;;  %11164 = vmatprep.subr.bf16.mxu0 %v14488_v14 }
 0x609   :  { %11656 = vmatprep.subr.bf16.mxu1 %v14491_v15 }
 0x60b   :  { %11165 = vmatpush1.bf16.msra.mxu0 %v14486_v17 }
 0x60c   :  { %11657 = vmatpush1.bf16.msra.mxu1 %v14489_v46  ;;  %11166 = vmatprep.subr.bf16.mxu0 %v14494_v18 }
 0x60d   :  { %11658 = vmatprep.subr.bf16.mxu1 %v14497_v19 }
 0x60f   :  { %11167 = vmatpush1.bf16.msra.mxu0 %v14492_v22 }
 0x610   :  { %11659 = vmatpush1.bf16.msra.mxu1 %v14495_v24  ;;  %11168 = vmatprep.subr.bf16.mxu0 %v14500_v25 }
 0x611   :  { %11660 = vmatprep.subr.bf16.mxu1 %v14503_v43 }
 0x613   :  { %11169 = vmatpush1.bf16.msra.mxu0 %v14498_v26 }
 0x614   :  { %11661 = vmatpush1.bf16.msra.mxu1 %v14501_v32  ;;  %11170 = vmatprep.subr.bf16.mxu0 %v14506_v34 }
 0x615   :  { %11662 = vmatprep.subr.bf16.mxu1 %v14509_v51 }
 0x617   :  { %11171 = vmatpush1.bf16.msra.mxu0 %v14504_v29 }
 0x618   :  { %11663 = vmatpush1.bf16.msra.mxu1 %v14507_v54  ;;  %11172 = vmatprep.subr.bf16.mxu0 %v14512_v38 }
 0x619   :  { %11664 = vmatprep.subr.bf16.mxu1 %v14515_v41 }
 0x61b   :  { %11173 = vmatpush1.bf16.msra.mxu0 %v14510_v52 }
 0x61c   :  { %11665 = vmatpush1.bf16.msra.mxu1 %v14513_v45  ;;  %11174 = vmatprep.subr.bf16.mxu0 %v14518_v39 }
 0x61d   :  { %11666 = vmatprep.subr.bf16.mxu1 %v14521_v62 }
 0x61f   :  { %11175 = vmatpush1.bf16.msra.mxu0 %v14516_v48 }
 0x620   :  { %11667 = vmatpush1.bf16.msra.mxu1 %v14519_v50  ;;  %11176 = vmatprep.subr.bf16.mxu0 %v14524_v53 }
 0x621   :  { %11668 = vmatprep.subr.bf16.mxu1 %v14527_v55 }
 0x623   :  { %11177 = vmatpush1.bf16.msra.mxu0 %v14522_v56 }
 0x624   :  { %11669 = vmatpush1.bf16.msra.mxu1 %v14525_v37  ;;  %11178 = vmatprep.subr.bf16.mxu0 %v14530_v57 }
 0x625   :  { %11670 = vmatprep.subr.bf16.mxu1 %v14533_v35 }
 0x627   :  { %11179 = vmatpush1.bf16.msra.mxu0 %v14528_v60 }
 0x628   :  { %11671 = vmatpush1.bf16.msra.mxu1 %v14531_v21  ;;  %11180 = vmatprep.subr.bf16.mxu0 %v14536_v61 }
 0x629   :  { %11672 = vmatprep.subr.bf16.mxu1 %v14539_v63 }
 0x62b   :  { %11181 = vmatpush1.bf16.msra.mxu0 %v14534_v0 }
 0x62c   :  { %11673 = vmatpush1.bf16.msra.mxu1 %v14537_v1  ;;  %11182 = vmatprep.subr.bf16.mxu0 %v14542_v42 }
 0x62d   :  { %11674 = vmatprep.subr.bf16.mxu1 %v14545_v28 }
 0x62f   :  { %11183 = vmatpush1.bf16.msra.mxu0 %v14540_v13 }
 0x630   :  { %11675 = vmatpush1.bf16.msra.mxu1 %v14543_v2  ;;  %11184 = vmatprep.subr.bf16.mxu0 %v14548_v3 }
 0x631   :  { %11676 = vmatprep.subr.bf16.mxu1 %v14551_v4 }
 0x633   :  { %11185 = vmatpush1.bf16.msra.mxu0 %v14546_v23 }
 0x634   :  { %11677 = vmatpush1.bf16.msra.mxu1 %v14549_v47  ;;  %11186 = vmatprep.subr.bf16.mxu0 %v14554_v5 }
 0x635   :  { %11678 = vmatprep.subr.bf16.mxu1 %v14557_v6 }
 0x637   :  { %11187 = vmatpush1.bf16.msra.mxu0 %v14552_v7 }
 0x638   :  { %11679 = vmatpush1.bf16.msra.mxu1 %v14555_v31 }
 0x63a   :  { %11189 = vmatmul.mubr.bf16.vlgmr.msra.gmra.mrb[24].mxu0 %v6073_v8 }
 0x63b   :  { %11681 = vmatmul.mubr.bf16.vlgmr.msra.gmra.mrb[24].mxu1 %v6073_v8 }
 0x70d   :  { %v11190_v16 = vpop.f32.mrb[24].mxu0 }
 0x70e   :  { %v13258_v12 = vadd.f32 %v11190_v16, %v6848_v49  ;;  %v11682_v33 = vpop.f32.mrb[24].mxu1  ;;  %v11192_v40 = vpop.f32.mrb[25].mxu0 }
 0x70f   :  { %v13260_v14 = vadd.f32 %v11682_v33, %v6856_v11  ;;  %v13259_v15 = vadd.f32 %v11192_v40, %v6852_v58  ;;  %v11684_v17 = vpop.f32.mrb[25].mxu1  ;;  %v11194_v46 = vpop.f32.mrb[26].mxu0 }
 0x710   :  { %v13261_v18 = vadd.f32 %v11684_v17, %v6860_v44  ;;  %v11686_v19 = vpop.f32.mrb[26].mxu1  ;;  %v11195_v22 = vpop.f32.mrb[27].mxu0 }
 0x711   :  { %v11693_v24 = vcombine.low %v13258_v12, %v13259_v15  ;;  %v11687_v25 = vpop.f32.mrb[27].mxu1 }
 0x712   :  { %v11694_v43 = vcombine.low %v13260_v14, %v13261_v18 }
 0x713   :  { %v11701_v20 = vrot.slane %v11693_v24, %v14901_v36 }
 0x714   :  { %v11708_v26 = vrot.slane %v11694_v43, %v14901_v36 }
 0x716   :  { %v11709_v32 = vcombine.low %v11701_v20, %v11708_v26 }
 0x718   :  { %11711 = vst [vmem:[%s15087_s5] sm:$0xff] %v11709_v32 }
 0x719   :  { %11720 = vsyncpa [#allocation3], 1 }
 0x71a   :  { %11721 = vsyncpa [#allocation5], 1 }

</bundles_post_ra>
